<compile_context>
chip_gen: v5e
topology: v5e:2x2
jax: 0.10.0
libtpu: 0.0.40
codegen_flags: <defaults>
</compile_context>

<pallas_src>
import math

import jax
import jax.numpy as jnp
from jax.experimental import pallas as pl
from jax.experimental.pallas import tpu as pltpu

# ---------------------------------------------------------------------------
# Canvas geometry (per image)
# ---------------------------------------------------------------------------
HC, WC = 20, 18          # canvas height / width; activation placed at (1, 1)
MI = HC * WC             # 360 core rows per image  (multiple of 8)
G = 24                   # guard rows above the core (>= WC+1, multiple of 8)
GB = 24                  # guard rows below the core
ROWS = G + MI + GB       # 408 canvas rows per image (multiple of 8)
CIN0 = 16                # input channels padded 3 -> 16 (bf16-tile aligned K)
EPS = 1e-5


# ---------------------------------------------------------------------------
# Fused forward-pass kernel (one invocation per image)
# ---------------------------------------------------------------------------
def _autoencoder_kernel(x_ref, m_ref,
                        w1_ref, b1_ref,
                        w2_ref, s2_ref, t2_ref,
                        wd_ref, sd_ref, td_ref,
                        w3_ref, b3_ref,
                        lat_ref, rec_ref,
                        c1, c2, rcv, d1):
    f32 = jnp.float32
    masks = m_ref[...]                       # (MI, 8)
    mask15 = masks[:, 0:1]                   # valid 15x15 region (enc conv1)
    mask16 = masks[:, 1:2]                   # valid 16x16 region

    def taps_matmul(src_ref, offsets, w_ref, cin, pmask_cols=None):
        """sum_t (pmask_t *) src[rows + off_t, :] @ W_t  -- MXU matmuls."""
        acc = None
        for t, off in enumerate(offsets):
            lhs = src_ref[off:off + MI, :].astype(jnp.bfloat16)
            y = jnp.dot(lhs, w_ref[t * cin:(t + 1) * cin, :],
                        preferred_element_type=f32)
            if pmask_cols is not None:
                c = pmask_cols[t]
                y = y * masks[:, c:c + 1]
            acc = y if acc is None else acc + y
        return acc

    def to_canvas(ref, core):
        """Store `core` into a canvas scratch ref, zeroing the guard rows."""
        cols = core.shape[1]
        ref[0:G, :] = jnp.zeros((G, cols), f32)
        ref[G + MI:, :] = jnp.zeros((GB, cols), f32)
        ref[G:G + MI, :] = core

    # ---- encoder: Conv2d(3,16,k=2,p=0) + bias, ReLU ------------------------
    offs = [G + i * WC + j for i in (0, 1) for j in (0, 1)]
    a1 = taps_matmul(x_ref, offs, w1_ref, CIN0) + b1_ref[...]
    to_canvas(c1, jnp.maximum(a1, 0.0) * mask15)

    # ---- encoder: Conv2d(16,16,k=2,p=1) + folded bias/BatchNorm affine -----
    offs = [G + (i - 1) * WC + (j - 1) for i in (0, 1) for j in (0, 1)]
    a2 = taps_matmul(c1, offs, w2_ref, 16) * s2_ref[...] + t2_ref[...]
    to_canvas(c2, a2 * mask16)

    # ---- encoder: MaxPool2d(2) + ReLU  (-> latent code) --------------------
    p = c2[G:G + MI, :]
    for off in (G + 1, G + WC, G + WC + 1):
        p = jnp.maximum(p, c2[off:off + MI, :])
    r = jnp.maximum(p, 0.0)
    to_canvas(rcv, r)
    lat_ref[...] = r            # wrapper extracts the stride-2 8x8 latent grid

    # ---- decoder: ConvTranspose2d(16,16,2,s=2) + folded bias/BN, ReLU ------
    # parity masks (columns 2..5 of `masks`) select which of the 4 sub-pixel
    # taps feeds each output position -> pixel interleave fused in-kernel.
    offs = [G - (a * WC + b) for a in (0, 1) for b in (0, 1)]
    a3 = taps_matmul(rcv, offs, wd_ref, 16, pmask_cols=(2, 3, 4, 5))
    a3 = a3 * sd_ref[...] + td_ref[...]
    to_canvas(d1, jnp.maximum(a3, 0.0) * mask16)

    # ---- decoder: Conv2d(16,3,k=3,p=1) + bias, Sigmoid ---------------------
    offs = [G + (i - 1) * WC + (j - 1) for i in (0, 1, 2) for j in (0, 1, 2)]
    y = taps_matmul(d1, offs, w3_ref, 16) + b3_ref[...]
    ez = jnp.exp(-y)                                    # EUP
    rec = pl.reciprocal(1.0 + ez, approx=True)          # EUP (approx recip)
    rec_ref[...] = jnp.minimum(rec, 1.0)                # guard approx > 1


# ---------------------------------------------------------------------------
# Wrapper-side helpers (pure XLA glue on tiny arrays)
# ---------------------------------------------------------------------------
def _build_masks():
    hc = jnp.arange(HC, dtype=jnp.int32).reshape(HC, 1)
    wc = jnp.arange(WC, dtype=jnp.int32).reshape(1, WC)

    def box(lo, hi):
        return (hc >= lo) & (hc <= hi) & (wc >= lo) & (wc <= hi)

    v15 = box(1, 15)
    v16 = box(1, 16)
    cols = [v15, v16]
    for a in range(2):
        for b in range(2):
            cols.append(v16 & ((hc - 1) % 2 == a) & ((wc - 1) % 2 == b))
    cols += [jnp.zeros_like(v15), jnp.zeros_like(v15)]
    return jnp.stack(cols, axis=-1).astype(jnp.float32).reshape(MI, 8)


def _pack(p):
    """Fold conv bias + BN into per-channel affine; pack weights for the kernel."""
    def fold(bn, bias):
        s = bn["gamma"] / jnp.sqrt(bn["var"] + EPS)
        t = bn["beta"] + (bias - bn["mean"]) * s
        return s.reshape(1, -1).astype(jnp.float32), t.reshape(1, -1).astype(jnp.float32)

    s2, t2 = fold(p["bn_e"], p["b2"])
    sd, td = fold(p["bn_d"], p["bd"])

    # first conv: pad Cin 3 -> 16 with zeros so every tap slice is 16-row aligned
    w1_full = jnp.zeros((2, 2, CIN0, 16), jnp.float32).at[:, :, 0:3, :].set(p["w1"])
    return dict(
        w1=w1_full.reshape(4 * CIN0, 16).astype(jnp.bfloat16),
        b1=p["b1"].reshape(1, 16).astype(jnp.float32),
        w2=p["w2"].reshape(64, 16).astype(jnp.bfloat16), s2=s2, t2=t2,
        wd=p["wd"].reshape(64, 16).astype(jnp.bfloat16), sd=sd, td=td,
        w3=p["w3"].reshape(144, 3).astype(jnp.bfloat16),
        b3=p["b3"].reshape(1, 3).astype(jnp.float32),
    )


def forward(params, x_nchw):
    """Returns (reconstruction (N,3,16,16), latent_code (N,16,8,8)) like torch."""
    n = x_nchw.shape[0]
    x = jnp.transpose(x_nchw, (0, 2, 3, 1)).astype(jnp.float32)       # NHWC

    # build the per-image flattened canvas (zero border + guard rows)
    cv = jnp.zeros((n, HC, WC, CIN0), jnp.float32).at[:, 1:17, 1:17, 0:3].set(x)
    cv = jnp.pad(cv.reshape(n, MI, CIN0), ((0, 0), (G, GB), (0, 0)))
    cv = cv.reshape(n * ROWS, CIN0)

    masks = _build_masks()
    q = _pack(params)

    vmem = pltpu.MemorySpace.VMEM

    def rep(shape):
        return pl.BlockSpec(shape, lambda i: (0, 0), memory_space=vmem)

    lat_full, rec_full = pl.pallas_call(
        _autoencoder_kernel,
        grid=(n,),
        in_specs=[
            pl.BlockSpec((ROWS, CIN0), lambda i: (i, 0), memory_space=vmem),  # x canvas
            rep((MI, 8)),                                                     # masks
            rep((4 * CIN0, 16)), rep((1, 16)),                                # w1, b1
            rep((64, 16)), rep((1, 16)), rep((1, 16)),                        # w2, s2, t2
            rep((64, 16)), rep((1, 16)), rep((1, 16)),                        # wd, sd, td
            rep((144, 3)), rep((1, 3)),                                       # w3, b3
        ],
        out_specs=[
            pl.BlockSpec((MI, 16), lambda i: (i, 0), memory_space=vmem),      # latent canvas
            pl.BlockSpec((MI, 3), lambda i: (i, 0), memory_space=vmem),       # recon canvas
        ],
        out_shape=[
            jax.ShapeDtypeStruct((n * MI, 16), jnp.float32),
            jax.ShapeDtypeStruct((n * MI, 3), jnp.float32),
        ],
        scratch_shapes=[pltpu.VMEM((ROWS, 16), jnp.float32) for _ in range(4)],
        compiler_params=pltpu.CompilerParams(
            dimension_semantics=("parallel",)),
    )(cv, masks, q["w1"], q["b1"], q["w2"], q["s2"], q["t2"],
      q["wd"], q["sd"], q["td"], q["w3"], q["b3"])

    lat = lat_full.reshape(n, HC, WC, 16)[:, 1:17:2, 1:17:2, :]       # (N,8,8,16)
    rec = rec_full.reshape(n, HC, WC, 3)[:, 1:17, 1:17, :]            # (N,16,16,3)
    return jnp.transpose(rec, (0, 3, 1, 2)), jnp.transpose(lat, (0, 3, 1, 2))


# ---------------------------------------------------------------------------
# Parameters (deterministic synthetic init; shapes/semantics match the module)
# ---------------------------------------------------------------------------
def init_params(key):
    ks = iter(jax.random.split(key, 24))

    def conv_init(kh, kw, cin, cout):
        fan_in = kh * kw * cin
        w = jax.random.normal(next(ks), (kh, kw, cin, cout), jnp.float32) / math.sqrt(fan_in)
        b = 0.02 * jax.random.normal(next(ks), (cout,), jnp.float32)
        return w, b

    def bn_init(c):
        return dict(
            gamma=1.0 + 0.1 * jax.random.normal(next(ks), (c,), jnp.float32),
            beta=0.1 * jax.random.normal(next(ks), (c,), jnp.float32),
            mean=0.1 * jax.random.normal(next(ks), (c,), jnp.float32),
            var=0.8 + 0.4 * jax.random.uniform(next(ks), (c,), jnp.float32),
        )

    p = {}
    p["w1"], p["b1"] = conv_init(2, 2, 3, 16)        # Conv2d(3,16,2,p=0)
    p["w2"], p["b2"] = conv_init(2, 2, 16, 16)       # Conv2d(16,16,2,p=1)
    p["bn_e"] = bn_init(16)                          # BatchNorm2d(16)
    p["wd"] = jax.random.normal(next(ks), (2, 2, 16, 16), jnp.float32) / math.sqrt(64.0)
    p["bd"] = 0.02 * jax.random.normal(next(ks), (16,), jnp.float32)  # ConvTranspose2d
    p["bn_d"] = bn_init(16)                          # BatchNorm2d(16)
    p["w3"], p["b3"] = conv_init(3, 3, 16, 3)        # Conv2d(16,3,3,p=1)
    return p


# ---------------------------------------------------------------------------
# Plain-JAX reference (f32, HIGHEST precision) for a numerical sanity check
# ---------------------------------------------------------------------------
def reference_forward(p, x_nchw):
    hp = jax.lax.Precision.HIGHEST
    x = jnp.transpose(x_nchw, (0, 2, 3, 1)).astype(jnp.float32)

    def conv(v, w, b, pad):
        return jax.lax.conv_general_dilated(
            v, w, (1, 1), [(pad, pad), (pad, pad)],
            dimension_numbers=("NHWC", "HWIO", "NHWC"), precision=hp) + b

    def bn(v, s):
        return (v - s["mean"]) / jnp.sqrt(s["var"] + EPS) * s["gamma"] + s["beta"]

    h = jax.nn.relu(conv(x, p["w1"], p["b1"], 0))            # (N,15,15,16)
    h = bn(conv(h, p["w2"], p["b2"], 1), p["bn_e"])          # (N,16,16,16)
    nb, hh, ww, cc = h.shape
    h = h.reshape(nb, hh // 2, 2, ww // 2, 2, cc).max(axis=(2, 4))
    lat = jax.nn.relu(h)                                     # (N,8,8,16)

    y = jnp.einsum("nijc,abcd->nijabd", lat, p["wd"], precision=hp)
    y = y.transpose(0, 1, 3, 2, 4, 5).reshape(nb, 16, 16, 16) + p["bd"]
    y = jax.nn.relu(bn(y, p["bn_d"]))
    y = conv(y, p["w3"], p["b3"], 1)
    rec = jax.nn.sigmoid(y)
    return jnp.transpose(rec, (0, 3, 1, 2)), jnp.transpose(lat, (0, 3, 1, 2))


# ---------------------------------------------------------------------------
if __name__ == "__main__":
    key = jax.random.PRNGKey(0)
    kp, kx = jax.random.split(key)
    params = init_params(kp)
    x = jax.random.normal(kx, (2, 3, 16, 16), jnp.float32)

    rec, lat = jax.jit(forward)(params, x)
    rec, lat = jax.block_until_ready((rec, lat))

    assert rec.shape == (2, 3, 16, 16), rec.shape
    assert lat.shape == (2, 16, 8, 8), lat.shape
    assert bool(jnp.all(jnp.isfinite(rec))) and bool(jnp.all(jnp.isfinite(lat)))
    assert bool(jnp.all((rec >= 0.0) & (rec <= 1.0)))        # sigmoid output

    rec_r, lat_r = jax.jit(reference_forward)(params, x)
    assert float(jnp.max(jnp.abs(rec - rec_r))) < 5e-2, "reconstruction mismatch"
    assert float(jnp.max(jnp.abs(lat - lat_r))) < 1e-1, "latent mismatch"

    print("KERNEL_OK")
</pallas_src>

<mosaic_0001>
module attributes {stable_mosaic.version = 11 : i64} {
  func.func @_autoencoder_kernel(%arg0: i32, %arg1: memref<408x16xf32, #tpu.memory_space<vmem>>, %arg2: memref<360x8xf32, #tpu.memory_space<vmem>>, %arg3: memref<64x16xbf16, #tpu.memory_space<vmem>>, %arg4: memref<1x16xf32, #tpu.memory_space<vmem>>, %arg5: memref<64x16xbf16, #tpu.memory_space<vmem>>, %arg6: memref<1x16xf32, #tpu.memory_space<vmem>>, %arg7: memref<1x16xf32, #tpu.memory_space<vmem>>, %arg8: memref<64x16xbf16, #tpu.memory_space<vmem>>, %arg9: memref<1x16xf32, #tpu.memory_space<vmem>>, %arg10: memref<1x16xf32, #tpu.memory_space<vmem>>, %arg11: memref<144x3xbf16, #tpu.memory_space<vmem>>, %arg12: memref<1x3xf32, #tpu.memory_space<vmem>>, %arg13: memref<360x16xf32, #tpu.memory_space<vmem>>, %arg14: memref<360x3xf32, #tpu.memory_space<vmem>>, %arg15: memref<408x16xf32, #tpu.memory_space<vmem>>, %arg16: memref<408x16xf32, #tpu.memory_space<vmem>>, %arg17: memref<408x16xf32, #tpu.memory_space<vmem>>, %arg18: memref<408x16xf32, #tpu.memory_space<vmem>>) attributes {dimension_semantics = [#tpu.dimension_semantics<parallel>], iteration_bounds = array<i64: 2>, scalar_prefetch = 0 : i64, scratch_operands = 4 : i64, tpu.core_type = #tpu.core_type<tc>, window_params = [{transform_indices = @transform_0, window_bounds = array<i64: 408, 16>}, {pipeline_mode = #tpu.pipeline_mode<synchronous>, transform_indices = @transform_1, window_bounds = array<i64: 360, 8>}, {pipeline_mode = #tpu.pipeline_mode<synchronous>, transform_indices = @transform_2, window_bounds = array<i64: 64, 16>}, {pipeline_mode = #tpu.pipeline_mode<synchronous>, transform_indices = @transform_3, window_bounds = array<i64: 1, 16>}, {pipeline_mode = #tpu.pipeline_mode<synchronous>, transform_indices = @transform_4, window_bounds = array<i64: 64, 16>}, {pipeline_mode = #tpu.pipeline_mode<synchronous>, transform_indices = @transform_5, window_bounds = array<i64: 1, 16>}, {pipeline_mode = #tpu.pipeline_mode<synchronous>, transform_indices = @transform_6, window_bounds = array<i64: 1, 16>}, {pipeline_mode = #tpu.pipeline_mode<synchronous>, transform_indices = @transform_7, window_bounds = array<i64: 64, 16>}, {pipeline_mode = #tpu.pipeline_mode<synchronous>, transform_indices = @transform_8, window_bounds = array<i64: 1, 16>}, {pipeline_mode = #tpu.pipeline_mode<synchronous>, transform_indices = @transform_9, window_bounds = array<i64: 1, 16>}, {pipeline_mode = #tpu.pipeline_mode<synchronous>, transform_indices = @transform_10, window_bounds = array<i64: 144, 3>}, {pipeline_mode = #tpu.pipeline_mode<synchronous>, transform_indices = @transform_11, window_bounds = array<i64: 1, 3>}, {transform_indices = @transform_12, window_bounds = array<i64: 360, 16>}, {transform_indices = @transform_13, window_bounds = array<i64: 360, 3>}]} {
    %c0 = arith.constant 0 : index
    %c0_0 = arith.constant 0 : index
    %0 = vector.load %arg2[%c0, %c0_0] : memref<360x8xf32, #tpu.memory_space<vmem>>, vector<360x8xf32>
    %1 = vector.extract_strided_slice %0 {offsets = [0, 0], sizes = [360, 1], strides = [1, 1]} : vector<360x8xf32> to vector<360x1xf32>
    %2 = vector.extract_strided_slice %0 {offsets = [0, 1], sizes = [360, 1], strides = [1, 1]} : vector<360x8xf32> to vector<360x1xf32>
    %c24 = arith.constant 24 : index
    %c0_1 = arith.constant 0 : index
    %3 = vector.load %arg1[%c24, %c0_1] : memref<408x16xf32, #tpu.memory_space<vmem>>, vector<360x16xf32>
    %4 = arith.truncf %3 : vector<360x16xf32> to vector<360x16xbf16>
    %c0_2 = arith.constant 0 : index
    %c0_3 = arith.constant 0 : index
    %5 = vector.load %arg3[%c0_2, %c0_3] : memref<64x16xbf16, #tpu.memory_space<vmem>>, vector<16x16xbf16>
    %cst = arith.constant dense<0.000000e+00> : vector<360x16xf32>
    %6 = tpu.matmul %4, %5, %cst {dimension_numbers = #tpu.dot_dimension_numbers<[1], [0], [0], [1], [0, 0, 1, 1], [], []>} : vector<360x16xbf16>, vector<16x16xbf16>, vector<360x16xf32> -> vector<360x16xf32>
    %c25 = arith.constant 25 : index
    %c0_4 = arith.constant 0 : index
    %7 = vector.load %arg1[%c25, %c0_4] : memref<408x16xf32, #tpu.memory_space<vmem>>, vector<360x16xf32>
    %8 = arith.truncf %7 : vector<360x16xf32> to vector<360x16xbf16>
    %c16 = arith.constant 16 : index
    %c0_5 = arith.constant 0 : index
    %9 = vector.load %arg3[%c16, %c0_5] : memref<64x16xbf16, #tpu.memory_space<vmem>>, vector<16x16xbf16>
    %cst_6 = arith.constant dense<0.000000e+00> : vector<360x16xf32>
    %10 = tpu.matmul %8, %9, %cst_6 {dimension_numbers = #tpu.dot_dimension_numbers<[1], [0], [0], [1], [0, 0, 1, 1], [], []>} : vector<360x16xbf16>, vector<16x16xbf16>, vector<360x16xf32> -> vector<360x16xf32>
    %11 = arith.addf %6, %10 : vector<360x16xf32>
    %c42 = arith.constant 42 : index
    %c0_7 = arith.constant 0 : index
    %12 = vector.load %arg1[%c42, %c0_7] : memref<408x16xf32, #tpu.memory_space<vmem>>, vector<360x16xf32>
    %13 = arith.truncf %12 : vector<360x16xf32> to vector<360x16xbf16>
    %c32 = arith.constant 32 : index
    %c0_8 = arith.constant 0 : index
    %14 = vector.load %arg3[%c32, %c0_8] : memref<64x16xbf16, #tpu.memory_space<vmem>>, vector<16x16xbf16>
    %cst_9 = arith.constant dense<0.000000e+00> : vector<360x16xf32>
    %15 = tpu.matmul %13, %14, %cst_9 {dimension_numbers = #tpu.dot_dimension_numbers<[1], [0], [0], [1], [0, 0, 1, 1], [], []>} : vector<360x16xbf16>, vector<16x16xbf16>, vector<360x16xf32> -> vector<360x16xf32>
    %16 = arith.addf %11, %15 : vector<360x16xf32>
    %c43 = arith.constant 43 : index
    %c0_10 = arith.constant 0 : index
    %17 = vector.load %arg1[%c43, %c0_10] : memref<408x16xf32, #tpu.memory_space<vmem>>, vector<360x16xf32>
    %18 = arith.truncf %17 : vector<360x16xf32> to vector<360x16xbf16>
    %c48 = arith.constant 48 : index
    %c0_11 = arith.constant 0 : index
    %19 = vector.load %arg3[%c48, %c0_11] : memref<64x16xbf16, #tpu.memory_space<vmem>>, vector<16x16xbf16>
    %cst_12 = arith.constant dense<0.000000e+00> : vector<360x16xf32>
    %20 = tpu.matmul %18, %19, %cst_12 {dimension_numbers = #tpu.dot_dimension_numbers<[1], [0], [0], [1], [0, 0, 1, 1], [], []>} : vector<360x16xbf16>, vector<16x16xbf16>, vector<360x16xf32> -> vector<360x16xf32>
    %21 = arith.addf %16, %20 : vector<360x16xf32>
    %c0_13 = arith.constant 0 : index
    %c0_14 = arith.constant 0 : index
    %22 = vector.load %arg4[%c0_13, %c0_14] : memref<1x16xf32, #tpu.memory_space<vmem>>, vector<1x16xf32>
    %23 = vector.broadcast %22 : vector<1x16xf32> to vector<360x16xf32>
    %24 = arith.addf %21, %23 : vector<360x16xf32>
    %cst_15 = arith.constant 0.000000e+00 : f32
    %25 = vector.broadcast %cst_15 : f32 to vector<360x16xf32>
    %26 = arith.maximumf %24, %25 : vector<360x16xf32>
    %27 = vector.broadcast %1 : vector<360x1xf32> to vector<360x16xf32>
    %28 = arith.mulf %26, %27 : vector<360x16xf32>
    %cst_16 = arith.constant 0.000000e+00 : f32
    %29 = vector.broadcast %cst_16 : f32 to vector<24x16xf32>
    %c0_17 = arith.constant 0 : index
    %c0_18 = arith.constant 0 : index
    %30 = vector.load %arg15[%c0_17, %c0_18] : memref<408x16xf32, #tpu.memory_space<vmem>>, vector<24x16xf32>
    tpu.vector_store %arg15[%c0_17, %c0_18], %29 {strides = array<i32>} : memref<408x16xf32, #tpu.memory_space<vmem>>, vector<24x16xf32>,
    %cst_19 = arith.constant 0.000000e+00 : f32
    %31 = vector.broadcast %cst_19 : f32 to vector<24x16xf32>
    %c384 = arith.constant 384 : index
    %c0_20 = arith.constant 0 : index
    %32 = vector.load %arg15[%c384, %c0_20] : memref<408x16xf32, #tpu.memory_space<vmem>>, vector<24x16xf32>
    tpu.vector_store %arg15[%c384, %c0_20], %31 {strides = array<i32>} : memref<408x16xf32, #tpu.memory_space<vmem>>, vector<24x16xf32>,
    %c24_21 = arith.constant 24 : index
    %c0_22 = arith.constant 0 : index
    %33 = vector.load %arg15[%c24_21, %c0_22] : memref<408x16xf32, #tpu.memory_space<vmem>>, vector<360x16xf32>
    tpu.vector_store %arg15[%c24_21, %c0_22], %28 {strides = array<i32>} : memref<408x16xf32, #tpu.memory_space<vmem>>, vector<360x16xf32>,
    %c5 = arith.constant 5 : index
    %c0_23 = arith.constant 0 : index
    %34 = vector.load %arg15[%c5, %c0_23] : memref<408x16xf32, #tpu.memory_space<vmem>>, vector<360x16xf32>
    %35 = arith.truncf %34 : vector<360x16xf32> to vector<360x16xbf16>
    %c0_24 = arith.constant 0 : index
    %c0_25 = arith.constant 0 : index
    %36 = vector.load %arg5[%c0_24, %c0_25] : memref<64x16xbf16, #tpu.memory_space<vmem>>, vector<16x16xbf16>
    %cst_26 = arith.constant dense<0.000000e+00> : vector<360x16xf32>
    %37 = tpu.matmul %35, %36, %cst_26 {dimension_numbers = #tpu.dot_dimension_numbers<[1], [0], [0], [1], [0, 0, 1, 1], [], []>} : vector<360x16xbf16>, vector<16x16xbf16>, vector<360x16xf32> -> vector<360x16xf32>
    %c6 = arith.constant 6 : index
    %c0_27 = arith.constant 0 : index
    %38 = vector.load %arg15[%c6, %c0_27] : memref<408x16xf32, #tpu.memory_space<vmem>>, vector<360x16xf32>
    %39 = arith.truncf %38 : vector<360x16xf32> to vector<360x16xbf16>
    %c16_28 = arith.constant 16 : index
    %c0_29 = arith.constant 0 : index
    %40 = vector.load %arg5[%c16_28, %c0_29] : memref<64x16xbf16, #tpu.memory_space<vmem>>, vector<16x16xbf16>
    %cst_30 = arith.constant dense<0.000000e+00> : vector<360x16xf32>
    %41 = tpu.matmul %39, %40, %cst_30 {dimension_numbers = #tpu.dot_dimension_numbers<[1], [0], [0], [1], [0, 0, 1, 1], [], []>} : vector<360x16xbf16>, vector<16x16xbf16>, vector<360x16xf32> -> vector<360x16xf32>
    %42 = arith.addf %37, %41 : vector<360x16xf32>
    %c23 = arith.constant 23 : index
    %c0_31 = arith.constant 0 : index
    %43 = vector.load %arg15[%c23, %c0_31] : memref<408x16xf32, #tpu.memory_space<vmem>>, vector<360x16xf32>
    %44 = arith.truncf %43 : vector<360x16xf32> to vector<360x16xbf16>
    %c32_32 = arith.constant 32 : index
    %c0_33 = arith.constant 0 : index
    %45 = vector.load %arg5[%c32_32, %c0_33] : memref<64x16xbf16, #tpu.memory_space<vmem>>, vector<16x16xbf16>
    %cst_34 = arith.constant dense<0.000000e+00> : vector<360x16xf32>
    %46 = tpu.matmul %44, %45, %cst_34 {dimension_numbers = #tpu.dot_dimension_numbers<[1], [0], [0], [1], [0, 0, 1, 1], [], []>} : vector<360x16xbf16>, vector<16x16xbf16>, vector<360x16xf32> -> vector<360x16xf32>
    %47 = arith.addf %42, %46 : vector<360x16xf32>
    %c24_35 = arith.constant 24 : index
    %c0_36 = arith.constant 0 : index
    %48 = vector.load %arg15[%c24_35, %c0_36] : memref<408x16xf32, #tpu.memory_space<vmem>>, vector<360x16xf32>
    %49 = arith.truncf %48 : vector<360x16xf32> to vector<360x16xbf16>
    %c48_37 = arith.constant 48 : index
    %c0_38 = arith.constant 0 : index
    %50 = vector.load %arg5[%c48_37, %c0_38] : memref<64x16xbf16, #tpu.memory_space<vmem>>, vector<16x16xbf16>
    %cst_39 = arith.constant dense<0.000000e+00> : vector<360x16xf32>
    %51 = tpu.matmul %49, %50, %cst_39 {dimension_numbers = #tpu.dot_dimension_numbers<[1], [0], [0], [1], [0, 0, 1, 1], [], []>} : vector<360x16xbf16>, vector<16x16xbf16>, vector<360x16xf32> -> vector<360x16xf32>
    %52 = arith.addf %47, %51 : vector<360x16xf32>
    %c0_40 = arith.constant 0 : index
    %c0_41 = arith.constant 0 : index
    %53 = vector.load %arg6[%c0_40, %c0_41] : memref<1x16xf32, #tpu.memory_space<vmem>>, vector<1x16xf32>
    %54 = vector.broadcast %53 : vector<1x16xf32> to vector<360x16xf32>
    %55 = arith.mulf %52, %54 : vector<360x16xf32>
    %c0_42 = arith.constant 0 : index
    %c0_43 = arith.constant 0 : index
    %56 = vector.load %arg7[%c0_42, %c0_43] : memref<1x16xf32, #tpu.memory_space<vmem>>, vector<1x16xf32>
    %57 = vector.broadcast %56 : vector<1x16xf32> to vector<360x16xf32>
    %58 = arith.addf %55, %57 : vector<360x16xf32>
    %59 = vector.broadcast %2 : vector<360x1xf32> to vector<360x16xf32>
    %60 = arith.mulf %58, %59 : vector<360x16xf32>
    %cst_44 = arith.constant 0.000000e+00 : f32
    %61 = vector.broadcast %cst_44 : f32 to vector<24x16xf32>
    %c0_45 = arith.constant 0 : index
    %c0_46 = arith.constant 0 : index
    %62 = vector.load %arg16[%c0_45, %c0_46] : memref<408x16xf32, #tpu.memory_space<vmem>>, vector<24x16xf32>
    tpu.vector_store %arg16[%c0_45, %c0_46], %61 {strides = array<i32>} : memref<408x16xf32, #tpu.memory_space<vmem>>, vector<24x16xf32>,
    %cst_47 = arith.constant 0.000000e+00 : f32
    %63 = vector.broadcast %cst_47 : f32 to vector<24x16xf32>
    %c384_48 = arith.constant 384 : index
    %c0_49 = arith.constant 0 : index
    %64 = vector.load %arg16[%c384_48, %c0_49] : memref<408x16xf32, #tpu.memory_space<vmem>>, vector<24x16xf32>
    tpu.vector_store %arg16[%c384_48, %c0_49], %63 {strides = array<i32>} : memref<408x16xf32, #tpu.memory_space<vmem>>, vector<24x16xf32>,
    %c24_50 = arith.constant 24 : index
    %c0_51 = arith.constant 0 : index
    %65 = vector.load %arg16[%c24_50, %c0_51] : memref<408x16xf32, #tpu.memory_space<vmem>>, vector<360x16xf32>
    tpu.vector_store %arg16[%c24_50, %c0_51], %60 {strides = array<i32>} : memref<408x16xf32, #tpu.memory_space<vmem>>, vector<360x16xf32>,
    %c24_52 = arith.constant 24 : index
    %c0_53 = arith.constant 0 : index
    %66 = vector.load %arg16[%c24_52, %c0_53] : memref<408x16xf32, #tpu.memory_space<vmem>>, vector<360x16xf32>
    %c25_54 = arith.constant 25 : index
    %c0_55 = arith.constant 0 : index
    %67 = vector.load %arg16[%c25_54, %c0_55] : memref<408x16xf32, #tpu.memory_space<vmem>>, vector<360x16xf32>
    %68 = arith.maximumf %66, %67 : vector<360x16xf32>
    %c42_56 = arith.constant 42 : index
    %c0_57 = arith.constant 0 : index
    %69 = vector.load %arg16[%c42_56, %c0_57] : memref<408x16xf32, #tpu.memory_space<vmem>>, vector<360x16xf32>
    %70 = arith.maximumf %68, %69 : vector<360x16xf32>
    %c43_58 = arith.constant 43 : index
    %c0_59 = arith.constant 0 : index
    %71 = vector.load %arg16[%c43_58, %c0_59] : memref<408x16xf32, #tpu.memory_space<vmem>>, vector<360x16xf32>
    %72 = arith.maximumf %70, %71 : vector<360x16xf32>
    %cst_60 = arith.constant 0.000000e+00 : f32
    %73 = vector.broadcast %cst_60 : f32 to vector<360x16xf32>
    %74 = arith.maximumf %72, %73 : vector<360x16xf32>
    %cst_61 = arith.constant 0.000000e+00 : f32
    %75 = vector.broadcast %cst_61 : f32 to vector<24x16xf32>
    %c0_62 = arith.constant 0 : index
    %c0_63 = arith.constant 0 : index
    %76 = vector.load %arg17[%c0_62, %c0_63] : memref<408x16xf32, #tpu.memory_space<vmem>>, vector<24x16xf32>
    tpu.vector_store %arg17[%c0_62, %c0_63], %75 {strides = array<i32>} : memref<408x16xf32, #tpu.memory_space<vmem>>, vector<24x16xf32>,
    %cst_64 = arith.constant 0.000000e+00 : f32
    %77 = vector.broadcast %cst_64 : f32 to vector<24x16xf32>
    %c384_65 = arith.constant 384 : index
    %c0_66 = arith.constant 0 : index
    %78 = vector.load %arg17[%c384_65, %c0_66] : memref<408x16xf32, #tpu.memory_space<vmem>>, vector<24x16xf32>
    tpu.vector_store %arg17[%c384_65, %c0_66], %77 {strides = array<i32>} : memref<408x16xf32, #tpu.memory_space<vmem>>, vector<24x16xf32>,
    %c24_67 = arith.constant 24 : index
    %c0_68 = arith.constant 0 : index
    %79 = vector.load %arg17[%c24_67, %c0_68] : memref<408x16xf32, #tpu.memory_space<vmem>>, vector<360x16xf32>
    tpu.vector_store %arg17[%c24_67, %c0_68], %74 {strides = array<i32>} : memref<408x16xf32, #tpu.memory_space<vmem>>, vector<360x16xf32>,
    %c0_69 = arith.constant 0 : index
    %c0_70 = arith.constant 0 : index
    %80 = vector.load %arg13[%c0_69, %c0_70] : memref<360x16xf32, #tpu.memory_space<vmem>>, vector<360x16xf32>
    tpu.vector_store %arg13[%c0_69, %c0_70], %74 {strides = array<i32>} : memref<360x16xf32, #tpu.memory_space<vmem>>, vector<360x16xf32>,
    %c24_71 = arith.constant 24 : index
    %c0_72 = arith.constant 0 : index
    %81 = vector.load %arg17[%c24_71, %c0_72] : memref<408x16xf32, #tpu.memory_space<vmem>>, vector<360x16xf32>
    %82 = arith.truncf %81 : vector<360x16xf32> to vector<360x16xbf16>
    %c0_73 = arith.constant 0 : index
    %c0_74 = arith.constant 0 : index
    %83 = vector.load %arg8[%c0_73, %c0_74] : memref<64x16xbf16, #tpu.memory_space<vmem>>, vector<16x16xbf16>
    %cst_75 = arith.constant dense<0.000000e+00> : vector<360x16xf32>
    %84 = tpu.matmul %82, %83, %cst_75 {dimension_numbers = #tpu.dot_dimension_numbers<[1], [0], [0], [1], [0, 0, 1, 1], [], []>} : vector<360x16xbf16>, vector<16x16xbf16>, vector<360x16xf32> -> vector<360x16xf32>
    %85 = vector.extract_strided_slice %0 {offsets = [0, 2], sizes = [360, 1], strides = [1, 1]} : vector<360x8xf32> to vector<360x1xf32>
    %86 = vector.broadcast %85 : vector<360x1xf32> to vector<360x16xf32>
    %87 = arith.mulf %84, %86 : vector<360x16xf32>
    %c23_76 = arith.constant 23 : index
    %c0_77 = arith.constant 0 : index
    %88 = vector.load %arg17[%c23_76, %c0_77] : memref<408x16xf32, #tpu.memory_space<vmem>>, vector<360x16xf32>
    %89 = arith.truncf %88 : vector<360x16xf32> to vector<360x16xbf16>
    %c16_78 = arith.constant 16 : index
    %c0_79 = arith.constant 0 : index
    %90 = vector.load %arg8[%c16_78, %c0_79] : memref<64x16xbf16, #tpu.memory_space<vmem>>, vector<16x16xbf16>
    %cst_80 = arith.constant dense<0.000000e+00> : vector<360x16xf32>
    %91 = tpu.matmul %89, %90, %cst_80 {dimension_numbers = #tpu.dot_dimension_numbers<[1], [0], [0], [1], [0, 0, 1, 1], [], []>} : vector<360x16xbf16>, vector<16x16xbf16>, vector<360x16xf32> -> vector<360x16xf32>
    %92 = vector.extract_strided_slice %0 {offsets = [0, 3], sizes = [360, 1], strides = [1, 1]} : vector<360x8xf32> to vector<360x1xf32>
    %93 = vector.broadcast %92 : vector<360x1xf32> to vector<360x16xf32>
    %94 = arith.mulf %91, %93 : vector<360x16xf32>
    %95 = arith.addf %87, %94 : vector<360x16xf32>
    %c6_81 = arith.constant 6 : index
    %c0_82 = arith.constant 0 : index
    %96 = vector.load %arg17[%c6_81, %c0_82] : memref<408x16xf32, #tpu.memory_space<vmem>>, vector<360x16xf32>
    %97 = arith.truncf %96 : vector<360x16xf32> to vector<360x16xbf16>
    %c32_83 = arith.constant 32 : index
    %c0_84 = arith.constant 0 : index
    %98 = vector.load %arg8[%c32_83, %c0_84] : memref<64x16xbf16, #tpu.memory_space<vmem>>, vector<16x16xbf16>
    %cst_85 = arith.constant dense<0.000000e+00> : vector<360x16xf32>
    %99 = tpu.matmul %97, %98, %cst_85 {dimension_numbers = #tpu.dot_dimension_numbers<[1], [0], [0], [1], [0, 0, 1, 1], [], []>} : vector<360x16xbf16>, vector<16x16xbf16>, vector<360x16xf32> -> vector<360x16xf32>
    %100 = vector.extract_strided_slice %0 {offsets = [0, 4], sizes = [360, 1], strides = [1, 1]} : vector<360x8xf32> to vector<360x1xf32>
    %101 = vector.broadcast %100 : vector<360x1xf32> to vector<360x16xf32>
    %102 = arith.mulf %99, %101 : vector<360x16xf32>
    %103 = arith.addf %95, %102 : vector<360x16xf32>
    %c5_86 = arith.constant 5 : index
    %c0_87 = arith.constant 0 : index
    %104 = vector.load %arg17[%c5_86, %c0_87] : memref<408x16xf32, #tpu.memory_space<vmem>>, vector<360x16xf32>
    %105 = arith.truncf %104 : vector<360x16xf32> to vector<360x16xbf16>
    %c48_88 = arith.constant 48 : index
    %c0_89 = arith.constant 0 : index
    %106 = vector.load %arg8[%c48_88, %c0_89] : memref<64x16xbf16, #tpu.memory_space<vmem>>, vector<16x16xbf16>
    %cst_90 = arith.constant dense<0.000000e+00> : vector<360x16xf32>
    %107 = tpu.matmul %105, %106, %cst_90 {dimension_numbers = #tpu.dot_dimension_numbers<[1], [0], [0], [1], [0, 0, 1, 1], [], []>} : vector<360x16xbf16>, vector<16x16xbf16>, vector<360x16xf32> -> vector<360x16xf32>
    %108 = vector.extract_strided_slice %0 {offsets = [0, 5], sizes = [360, 1], strides = [1, 1]} : vector<360x8xf32> to vector<360x1xf32>
    %109 = vector.broadcast %108 : vector<360x1xf32> to vector<360x16xf32>
    %110 = arith.mulf %107, %109 : vector<360x16xf32>
    %111 = arith.addf %103, %110 : vector<360x16xf32>
    %c0_91 = arith.constant 0 : index
    %c0_92 = arith.constant 0 : index
    %112 = vector.load %arg9[%c0_91, %c0_92] : memref<1x16xf32, #tpu.memory_space<vmem>>, vector<1x16xf32>
    %113 = vector.broadcast %112 : vector<1x16xf32> to vector<360x16xf32>
    %114 = arith.mulf %111, %113 : vector<360x16xf32>
    %c0_93 = arith.constant 0 : index
    %c0_94 = arith.constant 0 : index
    %115 = vector.load %arg10[%c0_93, %c0_94] : memref<1x16xf32, #tpu.memory_space<vmem>>, vector<1x16xf32>
    %116 = vector.broadcast %115 : vector<1x16xf32> to vector<360x16xf32>
    %117 = arith.addf %114, %116 : vector<360x16xf32>
    %cst_95 = arith.constant 0.000000e+00 : f32
    %118 = vector.broadcast %cst_95 : f32 to vector<360x16xf32>
    %119 = arith.maximumf %117, %118 : vector<360x16xf32>
    %120 = vector.broadcast %2 : vector<360x1xf32> to vector<360x16xf32>
    %121 = arith.mulf %119, %120 : vector<360x16xf32>
    %cst_96 = arith.constant 0.000000e+00 : f32
    %122 = vector.broadcast %cst_96 : f32 to vector<24x16xf32>
    %c0_97 = arith.constant 0 : index
    %c0_98 = arith.constant 0 : index
    %123 = vector.load %arg18[%c0_97, %c0_98] : memref<408x16xf32, #tpu.memory_space<vmem>>, vector<24x16xf32>
    tpu.vector_store %arg18[%c0_97, %c0_98], %122 {strides = array<i32>} : memref<408x16xf32, #tpu.memory_space<vmem>>, vector<24x16xf32>,
    %cst_99 = arith.constant 0.000000e+00 : f32
    %124 = vector.broadcast %cst_99 : f32 to vector<24x16xf32>
    %c384_100 = arith.constant 384 : index
    %c0_101 = arith.constant 0 : index
    %125 = vector.load %arg18[%c384_100, %c0_101] : memref<408x16xf32, #tpu.memory_space<vmem>>, vector<24x16xf32>
    tpu.vector_store %arg18[%c384_100, %c0_101], %124 {strides = array<i32>} : memref<408x16xf32, #tpu.memory_space<vmem>>, vector<24x16xf32>,
    %c24_102 = arith.constant 24 : index
    %c0_103 = arith.constant 0 : index
    %126 = vector.load %arg18[%c24_102, %c0_103] : memref<408x16xf32, #tpu.memory_space<vmem>>, vector<360x16xf32>
    tpu.vector_store %arg18[%c24_102, %c0_103], %121 {strides = array<i32>} : memref<408x16xf32, #tpu.memory_space<vmem>>, vector<360x16xf32>,
    %c5_104 = arith.constant 5 : index
    %c0_105 = arith.constant 0 : index
    %127 = vector.load %arg18[%c5_104, %c0_105] : memref<408x16xf32, #tpu.memory_space<vmem>>, vector<360x16xf32>
    %128 = arith.truncf %127 : vector<360x16xf32> to vector<360x16xbf16>
    %c0_106 = arith.constant 0 : index
    %c0_107 = arith.constant 0 : index
    %129 = vector.load %arg11[%c0_106, %c0_107] : memref<144x3xbf16, #tpu.memory_space<vmem>>, vector<16x3xbf16>
    %cst_108 = arith.constant dense<0.000000e+00> : vector<360x3xf32>
    %130 = tpu.matmul %128, %129, %cst_108 {dimension_numbers = #tpu.dot_dimension_numbers<[1], [0], [0], [1], [0, 0, 1, 1], [], []>} : vector<360x16xbf16>, vector<16x3xbf16>, vector<360x3xf32> -> vector<360x3xf32>
    %c6_109 = arith.constant 6 : index
    %c0_110 = arith.constant 0 : index
    %131 = vector.load %arg18[%c6_109, %c0_110] : memref<408x16xf32, #tpu.memory_space<vmem>>, vector<360x16xf32>
    %132 = arith.truncf %131 : vector<360x16xf32> to vector<360x16xbf16>
    %c16_111 = arith.constant 16 : index
    %c0_112 = arith.constant 0 : index
    %133 = vector.load %arg11[%c16_111, %c0_112] : memref<144x3xbf16, #tpu.memory_space<vmem>>, vector<16x3xbf16>
    %cst_113 = arith.constant dense<0.000000e+00> : vector<360x3xf32>
    %134 = tpu.matmul %132, %133, %cst_113 {dimension_numbers = #tpu.dot_dimension_numbers<[1], [0], [0], [1], [0, 0, 1, 1], [], []>} : vector<360x16xbf16>, vector<16x3xbf16>, vector<360x3xf32> -> vector<360x3xf32>
    %135 = arith.addf %130, %134 : vector<360x3xf32>
    %c7 = arith.constant 7 : index
    %c0_114 = arith.constant 0 : index
    %136 = vector.load %arg18[%c7, %c0_114] : memref<408x16xf32, #tpu.memory_space<vmem>>, vector<360x16xf32>
    %137 = arith.truncf %136 : vector<360x16xf32> to vector<360x16xbf16>
    %c32_115 = arith.constant 32 : index
    %c0_116 = arith.constant 0 : index
    %138 = vector.load %arg11[%c32_115, %c0_116] : memref<144x3xbf16, #tpu.memory_space<vmem>>, vector<16x3xbf16>
    %cst_117 = arith.constant dense<0.000000e+00> : vector<360x3xf32>
    %139 = tpu.matmul %137, %138, %cst_117 {dimension_numbers = #tpu.dot_dimension_numbers<[1], [0], [0], [1], [0, 0, 1, 1], [], []>} : vector<360x16xbf16>, vector<16x3xbf16>, vector<360x3xf32> -> vector<360x3xf32>
    %140 = arith.addf %135, %139 : vector<360x3xf32>
    %c23_118 = arith.constant 23 : index
    %c0_119 = arith.constant 0 : index
    %141 = vector.load %arg18[%c23_118, %c0_119] : memref<408x16xf32, #tpu.memory_space<vmem>>, vector<360x16xf32>
    %142 = arith.truncf %141 : vector<360x16xf32> to vector<360x16xbf16>
    %c48_120 = arith.constant 48 : index
    %c0_121 = arith.constant 0 : index
    %143 = vector.load %arg11[%c48_120, %c0_121] : memref<144x3xbf16, #tpu.memory_space<vmem>>, vector<16x3xbf16>
    %cst_122 = arith.constant dense<0.000000e+00> : vector<360x3xf32>
    %144 = tpu.matmul %142, %143, %cst_122 {dimension_numbers = #tpu.dot_dimension_numbers<[1], [0], [0], [1], [0, 0, 1, 1], [], []>} : vector<360x16xbf16>, vector<16x3xbf16>, vector<360x3xf32> -> vector<360x3xf32>
    %145 = arith.addf %140, %144 : vector<360x3xf32>
    %c24_123 = arith.constant 24 : index
    %c0_124 = arith.constant 0 : index
    %146 = vector.load %arg18[%c24_123, %c0_124] : memref<408x16xf32, #tpu.memory_space<vmem>>, vector<360x16xf32>
    %147 = arith.truncf %146 : vector<360x16xf32> to vector<360x16xbf16>
    %c64 = arith.constant 64 : index
    %c0_125 = arith.constant 0 : index
    %148 = vector.load %arg11[%c64, %c0_125] : memref<144x3xbf16, #tpu.memory_space<vmem>>, vector<16x3xbf16>
    %cst_126 = arith.constant dense<0.000000e+00> : vector<360x3xf32>
    %149 = tpu.matmul %147, %148, %cst_126 {dimension_numbers = #tpu.dot_dimension_numbers<[1], [0], [0], [1], [0, 0, 1, 1], [], []>} : vector<360x16xbf16>, vector<16x3xbf16>, vector<360x3xf32> -> vector<360x3xf32>
    %150 = arith.addf %145, %149 : vector<360x3xf32>
    %c25_127 = arith.constant 25 : index
    %c0_128 = arith.constant 0 : index
    %151 = vector.load %arg18[%c25_127, %c0_128] : memref<408x16xf32, #tpu.memory_space<vmem>>, vector<360x16xf32>
    %152 = arith.truncf %151 : vector<360x16xf32> to vector<360x16xbf16>
    %c80 = arith.constant 80 : index
    %c0_129 = arith.constant 0 : index
    %153 = vector.load %arg11[%c80, %c0_129] : memref<144x3xbf16, #tpu.memory_space<vmem>>, vector<16x3xbf16>
    %cst_130 = arith.constant dense<0.000000e+00> : vector<360x3xf32>
    %154 = tpu.matmul %152, %153, %cst_130 {dimension_numbers = #tpu.dot_dimension_numbers<[1], [0], [0], [1], [0, 0, 1, 1], [], []>} : vector<360x16xbf16>, vector<16x3xbf16>, vector<360x3xf32> -> vector<360x3xf32>
    %155 = arith.addf %150, %154 : vector<360x3xf32>
    %c41 = arith.constant 41 : index
    %c0_131 = arith.constant 0 : index
    %156 = vector.load %arg18[%c41, %c0_131] : memref<408x16xf32, #tpu.memory_space<vmem>>, vector<360x16xf32>
    %157 = arith.truncf %156 : vector<360x16xf32> to vector<360x16xbf16>
    %c96 = arith.constant 96 : index
    %c0_132 = arith.constant 0 : index
    %158 = vector.load %arg11[%c96, %c0_132] : memref<144x3xbf16, #tpu.memory_space<vmem>>, vector<16x3xbf16>
    %cst_133 = arith.constant dense<0.000000e+00> : vector<360x3xf32>
    %159 = tpu.matmul %157, %158, %cst_133 {dimension_numbers = #tpu.dot_dimension_numbers<[1], [0], [0], [1], [0, 0, 1, 1], [], []>} : vector<360x16xbf16>, vector<16x3xbf16>, vector<360x3xf32> -> vector<360x3xf32>
    %160 = arith.addf %155, %159 : vector<360x3xf32>
    %c42_134 = arith.constant 42 : index
    %c0_135 = arith.constant 0 : index
    %161 = vector.load %arg18[%c42_134, %c0_135] : memref<408x16xf32, #tpu.memory_space<vmem>>, vector<360x16xf32>
    %162 = arith.truncf %161 : vector<360x16xf32> to vector<360x16xbf16>
    %c112 = arith.constant 112 : index
    %c0_136 = arith.constant 0 : index
    %163 = vector.load %arg11[%c112, %c0_136] : memref<144x3xbf16, #tpu.memory_space<vmem>>, vector<16x3xbf16>
    %cst_137 = arith.constant dense<0.000000e+00> : vector<360x3xf32>
    %164 = tpu.matmul %162, %163, %cst_137 {dimension_numbers = #tpu.dot_dimension_numbers<[1], [0], [0], [1], [0, 0, 1, 1], [], []>} : vector<360x16xbf16>, vector<16x3xbf16>, vector<360x3xf32> -> vector<360x3xf32>
    %165 = arith.addf %160, %164 : vector<360x3xf32>
    %c43_138 = arith.constant 43 : index
    %c0_139 = arith.constant 0 : index
    %166 = vector.load %arg18[%c43_138, %c0_139] : memref<408x16xf32, #tpu.memory_space<vmem>>, vector<360x16xf32>
    %167 = arith.truncf %166 : vector<360x16xf32> to vector<360x16xbf16>
    %c128 = arith.constant 128 : index
    %c0_140 = arith.constant 0 : index
    %168 = vector.load %arg11[%c128, %c0_140] : memref<144x3xbf16, #tpu.memory_space<vmem>>, vector<16x3xbf16>
    %cst_141 = arith.constant dense<0.000000e+00> : vector<360x3xf32>
    %169 = tpu.matmul %167, %168, %cst_141 {dimension_numbers = #tpu.dot_dimension_numbers<[1], [0], [0], [1], [0, 0, 1, 1], [], []>} : vector<360x16xbf16>, vector<16x3xbf16>, vector<360x3xf32> -> vector<360x3xf32>
    %170 = arith.addf %165, %169 : vector<360x3xf32>
    %c0_142 = arith.constant 0 : index
    %c0_143 = arith.constant 0 : index
    %171 = vector.load %arg12[%c0_142, %c0_143] : memref<1x3xf32, #tpu.memory_space<vmem>>, vector<1x3xf32>
    %172 = vector.broadcast %171 : vector<1x3xf32> to vector<360x3xf32>
    %173 = arith.addf %170, %172 : vector<360x3xf32>
    %cst_144 = arith.constant 0.000000e+00 : f32
    %174 = vector.broadcast %cst_144 : f32 to vector<360x3xf32>
    %175 = arith.subf %174, %173 : vector<360x3xf32>
    %176 = math.exp %175 : vector<360x3xf32>
    %cst_145 = arith.constant 1.000000e+00 : f32
    %177 = vector.broadcast %cst_145 : f32 to vector<360x3xf32>
    %178 = arith.addf %177, %176 : vector<360x3xf32>
    %179 = tpu.reciprocal %178 {approx = true} : vector<360x3xf32> -> vector<360x3xf32>
    %cst_146 = arith.constant 1.000000e+00 : f32
    %180 = vector.broadcast %cst_146 : f32 to vector<360x3xf32>
    %181 = arith.minimumf %179, %180 : vector<360x3xf32>
    %c0_147 = arith.constant 0 : index
    %c0_148 = arith.constant 0 : index
    %182 = vector.load %arg14[%c0_147, %c0_148] : memref<360x3xf32, #tpu.memory_space<vmem>>, vector<360x3xf32>
    tpu.vector_store %arg14[%c0_147, %c0_148], %181 {strides = array<i32>} : memref<360x3xf32, #tpu.memory_space<vmem>>, vector<360x3xf32>,
    return
  }
  func.func @transform_0(%arg0: i32) -> (i32, i32) {
    %c0_i32 = arith.constant 0 : i32
    %c0_i32_0 = arith.constant 0 : i32
    return %arg0, %c0_i32 : i32, i32
  }
  func.func @transform_1(%arg0: i32) -> (i32, i32) {
    %c0_i32 = arith.constant 0 : i32
    %c0_i32_0 = arith.constant 0 : i32
    %c0_i32_1 = arith.constant 0 : i32
    return %c0_i32, %c0_i32_0 : i32, i32
  }
  func.func @transform_2(%arg0: i32) -> (i32, i32) {
    %c0_i32 = arith.constant 0 : i32
    %c0_i32_0 = arith.constant 0 : i32
    %c0_i32_1 = arith.constant 0 : i32
    return %c0_i32, %c0_i32_0 : i32, i32
  }
  func.func @transform_3(%arg0: i32) -> (i32, i32) {
    %c0_i32 = arith.constant 0 : i32
    %c0_i32_0 = arith.constant 0 : i32
    %c0_i32_1 = arith.constant 0 : i32
    return %c0_i32, %c0_i32_0 : i32, i32
  }
  func.func @transform_4(%arg0: i32) -> (i32, i32) {
    %c0_i32 = arith.constant 0 : i32
    %c0_i32_0 = arith.constant 0 : i32
    %c0_i32_1 = arith.constant 0 : i32
    return %c0_i32, %c0_i32_0 : i32, i32
  }
  func.func @transform_5(%arg0: i32) -> (i32, i32) {
    %c0_i32 = arith.constant 0 : i32
    %c0_i32_0 = arith.constant 0 : i32
    %c0_i32_1 = arith.constant 0 : i32
    return %c0_i32, %c0_i32_0 : i32, i32
  }
  func.func @transform_6(%arg0: i32) -> (i32, i32) {
    %c0_i32 = arith.constant 0 : i32
    %c0_i32_0 = arith.constant 0 : i32
    %c0_i32_1 = arith.constant 0 : i32
    return %c0_i32, %c0_i32_0 : i32, i32
  }
  func.func @transform_7(%arg0: i32) -> (i32, i32) {
    %c0_i32 = arith.constant 0 : i32
    %c0_i32_0 = arith.constant 0 : i32
    %c0_i32_1 = arith.constant 0 : i32
    return %c0_i32, %c0_i32_0 : i32, i32
  }
  func.func @transform_8(%arg0: i32) -> (i32, i32) {
    %c0_i32 = arith.constant 0 : i32
    %c0_i32_0 = arith.constant 0 : i32
    %c0_i32_1 = arith.constant 0 : i32
    return %c0_i32, %c0_i32_0 : i32, i32
  }
  func.func @transform_9(%arg0: i32) -> (i32, i32) {
    %c0_i32 = arith.constant 0 : i32
    %c0_i32_0 = arith.constant 0 : i32
    %c0_i32_1 = arith.constant 0 : i32
    return %c0_i32, %c0_i32_0 : i32, i32
  }
  func.func @transform_10(%arg0: i32) -> (i32, i32) {
    %c0_i32 = arith.constant 0 : i32
    %c0_i32_0 = arith.constant 0 : i32
    %c0_i32_1 = arith.constant 0 : i32
    return %c0_i32, %c0_i32_0 : i32, i32
  }
  func.func @transform_11(%arg0: i32) -> (i32, i32) {
    %c0_i32 = arith.constant 0 : i32
    %c0_i32_0 = arith.constant 0 : i32
    %c0_i32_1 = arith.constant 0 : i32
    return %c0_i32, %c0_i32_0 : i32, i32
  }
  func.func @transform_12(%arg0: i32) -> (i32, i32) {
    %c0_i32 = arith.constant 0 : i32
    %c0_i32_0 = arith.constant 0 : i32
    return %arg0, %c0_i32 : i32, i32
  }
  func.func @transform_13(%arg0: i32) -> (i32, i32) {
    %c0_i32 = arith.constant 0 : i32
    %c0_i32_0 = arith.constant 0 : i32
    return %arg0, %c0_i32 : i32, i32
  }
}

</mosaic_0001>

<bundles_post_ra>
// kernel: forward.1
= control target key start
LH: loop header
LB: loop body
LE: loop exit
PB: predicated region body
PF: predicated region fallthrough
CT: control target
= control target key end

     0   :  { %s10746_s25 = smov 0   ;;  %s14958_s0 = inlined_call_operand.vmem [shape: f32[816,16], index: 0, kind: input, shape index: {}]   ;;  %s14959_s1 = inlined_call_operand.vmem [shape: f32[360,8], index: 1, kind: input, shape index: {}]   ;;  %s14960_s2 = inlined_call_operand.vmem [shape: bf16[64,16], index: 2, kind: input, shape index: {}]   ;;  %s14961_s3 = inlined_call_operand.vmem [shape: f32[1,16], index: 3, kind: input, shape index: {}]   ;;  %s14962_s4 = inlined_call_operand.vmem [shape: bf16[64,16], index: 4, kind: input, shape index: {}]   ;;  %s14963_s5 = inlined_call_operand.vmem [shape: f32[1,16], index: 5, kind: input, shape index: {}]   ;;  %s14964_s6 = inlined_call_operand.vmem [shape: f32[1,16], index: 6, kind: input, shape index: {}]   ;;  %s14965_s7 = inlined_call_operand.vmem [shape: bf16[64,16], index: 7, kind: input, shape index: {}]   ;;  %s14966_s8 = inlined_call_operand.vmem [shape: f32[1,16], index: 8, kind: input, shape index: {}]   ;;  %s14967_s9 = inlined_call_operand.vmem [shape: f32[1,16], index: 9, kind: input, shape index: {}]   ;;  %s14968_s10 = inlined_call_operand.vmem [shape: bf16[144,3], index: 10, kind: input, shape index: {}]   ;;  %s14969_s11 = inlined_call_operand.vmem [shape: f32[1,3], index: 11, kind: input, shape index: {}]   ;;  %s14970_s12 = inlined_call_operand.vmem [shape: f32[720,16], index: 12, kind: output, shape index: {0}]   ;;  %s14971_s13 = inlined_call_operand.vmem [shape: f32[720,3], index: 13, kind: output, shape index: {1}]  }
   0x1 LB: > { %s9602_s26 = sadd.s32 4294967295, %s10667_s25   ;;  %p9606_p0 = scmp.ge.s32.totalorder %s10667_s25, 1  ;;  %s10667_s25 = sphi %s10746_s25, %s24_s25  }
   0x2   : > { %p391_p1 = scmp.lt.s32.totalorder %s10667_s25, 3 }
   0x4   : > { %p392_p2 = pnand %p9606_p0, %p391_p1 }
   0x6   : > { %395 = sbr.rel (%p392_p2) target bundleno = 2296 (0x8f8), region = 68 }
   0xb   : > { %v10180_v0 = vld [vmem:[%s14960_s2 + $0x8] sm:$0xff]  ;;  %s440_s29 = smul.u32 51, %s9602_s26  ;;  %v10181_v1 = vld [vmem:[%s14960_s2 + $0x10] sm:$0xff]  ;;  %v10179_v2 = vld [vmem:[%s14960_s2] sm:$0xff]  ;;  %vm650_vm0 = vcmask 130048   ;;  %v14972_v23 = vmov 0  }
   0xc   : > { %v10182_v3 = vld [vmem:[%s14960_s2 + $0x18] sm:$0xff]  ;;  %10200 = vmatpush.bf16.msra.mxu1 %v10180_v0  ;;  %10201 = vmatpush.bf16.msra.mxu2 %v10180_v0  ;;  %v10794_v22 = vld [vmem:[%s14959_s1] sm:$0xff]  ;;  %v10812_v33 = vld [vmem:[%s14959_s1 + $0x8] sm:$0xff]  ;;  %s446_s17 = smul.u32 45, %s9602_s26  ;;  %vm9466_vm1 = vcmask 23552  }
   0xd   : > { %p441_p3 = scmp.lt.s32.totalorder %s440_s29, 101  ;;  %10202 = vmatpush.bf16.msra.mxu3 %v10180_v0  ;;  %727 = vmatpush.bf16.msra.mxu0 %v10180_v0  ;;  %v10818_v34 = vld [vmem:[%s14959_s1 + $0x30] sm:$0xff]  ;;  %v10838_v45 = vld [vmem:[%s14959_s1 + $0x48] sm:$0xff]  ;;  %v10848_v49 = vld [vmem:[%s14959_s1 + $0x18] sm:$0xff] }
   0xe   : > { %10218 = vset.pattern.permute.xlu0 %v14972_v23  ;;  %10219 = vset.pattern.permute.xlu1 %v14972_v23  ;;  %v10833_v44 = vld [vmem:[%s14959_s1 + $0x10] sm:$0xff]  ;;  %v10853_v50 = vld [vmem:[%s14959_s1 + $0x60] sm:$0xff]  ;;  %v10186_v60 = vld [vmem:[%s14962_s4 + $0x18] sm:$0xff]  ;;  %p447_p4 = scmp.lt.s32.totalorder %s446_s17, 89 }
   0xf   : > { %s15451_s29 = smov (!%p441_p3, %s440_s29), 101  ;;  %1763 = vperm.xlu0 %10218, %v10794_v22   ;;  %10220 = vset.pattern.permute.xlu2 %v14972_v23  ;;  %v10185_v59 = vld [vmem:[%s14962_s4 + $0x10] sm:$0xff]  ;;  %v10183_v61 = vld [vmem:[%s14962_s4] sm:$0xff]  ;;  %v10877_v62 = vld [vmem:[%s14959_s1 + $0x38] sm:$0xff] }
  0x10   : > { %1193 = vmatpush.bf16.msrb.mxu2 %v10181_v1  ;;  %925 = vmatpush.bf16.msrb.mxu1 %v10179_v2  ;;  %s9607_s19 = sshll.u32 %s15451_s29, 3  ;;  %v10882_v63 = vld [vmem:[%s14959_s1 + $0x78] sm:$0xff]  ;;  %s15453_s17 = smov (!%p447_p4, %s446_s17), 89 }
  0x11   : > { %1506 = vmatpush.bf16.msrb.mxu3 %v10182_v3  ;;  %s10771_s22 = scalar_lea.vmem %s14958_s0, %s9607_s19  ;;  %1773 = vperm.xlu1 %10219, %v10833_v44   ;;  %s9608_s21 = sshll.u32 %s15453_s17, 3 }
  0x12   : > { %v586_v4 = vld [vmem:[%s10771_s22 + $0x79] sm:$0xff]  ;;  %v587_v5 = vld [vmem:[%s10771_s22 + $0x81] sm:$0xff]  ;;  %v588_v13 = vld [vmem:[%s10771_s22 + $0x89] sm:$0xff]  ;;  %s12284_s27 = scalar_lea.vmem %s14970_s12, %s9608_s21  ;;  %s14706_s24 = scalar_lea.vmem %s14971_s13, %s9608_s21 }
  0x13   : > { %v598_v6 = vld [vmem:[%s10771_s22 + $0xd9] sm:$0xff]  ;;  %v625_v7 = vpack.c.bf16 %v587_v5, %v586_v4  ;;  %v599_v8 = vld [vmem:[%s10771_s22 + $0xe1] sm:$0xff]  ;;  %v589_v14 = vld [vmem:[%s10771_s22 + $0x91] sm:$0xff] }
  0x14   : > { %v610_v9 = vld [vmem:[%s10771_s22 + $0x139] sm:$0xff]  ;;  %v611_v10 = vld [vmem:[%s10771_s22 + $0x141] sm:$0xff]  ;;  %v631_v11 = vpack.c.bf16 %v599_v8, %v598_v6  ;;  %v600_v15 = vld [vmem:[%s10771_s22 + $0xe9] sm:$0xff]  ;;  %v626_v19 = vpack.c.bf16 %v589_v14, %v588_v13 }
  0x15   : > { %v637_v12 = vpack.c.bf16 %v611_v10, %v610_v9  ;;  %9620 = vmatmul.msk.bf16.vlgmr.msra.gmra.mxu1 %vm650_vm0, %v625_v7  ;;  %v601_v16 = vld [vmem:[%s10771_s22 + $0xf1] sm:$0xff]  ;;  %v612_v17 = vld [vmem:[%s10771_s22 + $0x149] sm:$0xff]  ;;  %v590_v24 = vld [vmem:[%s10771_s22 + $0x99] sm:$0xff] }
  0x16   : > { %9626 = vmatmul.msk.bf16.vlgmr.msra.gmra.mxu2 %vm650_vm0, %v631_v11  ;;  %v613_v18 = vld [vmem:[%s10771_s22 + $0x151] sm:$0xff]  ;;  %v632_v20 = vpack.c.bf16 %v601_v16, %v600_v15  ;;  %v591_v25 = vld [vmem:[%s10771_s22 + $0xa1] sm:$0xff]  ;;  %v602_v26 = vld [vmem:[%s10771_s22 + $0xf9] sm:$0xff]  ;;  %2502 = vmatpush.bf16.msra.mxu1 %v10183_v61 }
  0x17   : > { %9632 = vmatmul.msk.bf16.vlgmr.msra.gmra.mxu3 %vm650_vm0, %v637_v12  ;;  %v638_v21 = vpack.c.bf16 %v613_v18, %v612_v17  ;;  %v603_v27 = vld [vmem:[%s10771_s22 + $0x101] sm:$0xff]  ;;  %v614_v28 = vld [vmem:[%s10771_s22 + $0x159] sm:$0xff]  ;;  %v627_v30 = vpack.c.bf16 %v591_v25, %v590_v24  ;;  %1768 = vperm.xlu0 %10218, %v10812_v33   ;;  %v592_v35 = vld [vmem:[%s10771_s22 + $0xa9] sm:$0xff] }
  0x18   : > { %v615_v29 = vld [vmem:[%s10771_s22 + $0x161] sm:$0xff]  ;;  %v633_v31 = vpack.c.bf16 %v603_v27, %v602_v26  ;;  %v593_v36 = vld [vmem:[%s10771_s22 + $0xb1] sm:$0xff]  ;;  %v604_v37 = vld [vmem:[%s10771_s22 + $0x109] sm:$0xff]  ;;  %2770 = vmatpush.bf16.msra.mxu2 %v10185_v59  ;;  %3083 = vmatpush.bf16.msra.mxu3 %v10186_v60 }
  0x19   : > { %v639_v32 = vpack.c.bf16 %v615_v29, %v614_v28  ;;  %v605_v38 = vld [vmem:[%s10771_s22 + $0x111] sm:$0xff]  ;;  %v616_v39 = vld [vmem:[%s10771_s22 + $0x169] sm:$0xff]  ;;  %v628_v41 = vpack.c.bf16 %v593_v36, %v592_v35  ;;  %v574_v46 = vld [vmem:[%s10771_s22 + $0x19] sm:$0xff]  ;;  %1778 = vperm.xlu1 %10219, %v10848_v49  }
  0x1a   : > { %v617_v40 = vld [vmem:[%s10771_s22 + $0x171] sm:$0xff]  ;;  %v634_v42 = vpack.c.bf16 %v605_v38, %v604_v37  ;;  %v575_v47 = vld [vmem:[%s10771_s22 + $0x21] sm:$0xff]  ;;  %v594_v51 = vld [vmem:[%s10771_s22 + $0xb9] sm:$0xff] }
  0x1b   : > { %v640_v43 = vpack.c.bf16 %v617_v40, %v616_v39  ;;  %v619_v48 = vpack.c.bf16 %v575_v47, %v574_v46  ;;  %v595_v52 = vld [vmem:[%s10771_s22 + $0xc1] sm:$0xff]  ;;  %v606_v53 = vld [vmem:[%s10771_s22 + $0x119] sm:$0xff]  ;;  %v576_v0 = vld [vmem:[%s10771_s22 + $0x29] sm:$0xff] }
  0x1c   : > { %v607_v54 = vld [vmem:[%s10771_s22 + $0x121] sm:$0xff]  ;;  %v618_v55 = vld [vmem:[%s10771_s22 + $0x179] sm:$0xff]  ;;  %v629_v56 = vpack.c.bf16 %v595_v52, %v594_v51  ;;  %v577_v1 = vld [vmem:[%s10771_s22 + $0x31] sm:$0xff] }
  0x1d   : > { %9614 = vmatmul.msk.bf16.vlgmr.msra.gmra.mxu0 %vm650_vm0, %v619_v48  ;;  %v635_v57 = vpack.c.bf16 %v607_v54, %v606_v53  ;;  %v641_v58 = vpack.c.bf16 %v618_v55, %v618_v55  ;;  %v620_v2 = vpack.c.bf16 %v577_v1, %v576_v0  ;;  %v596_v3 = vld [vmem:[%s10771_s22 + $0xc9] sm:$0xff]  ;;  %v597_v4 = vld [vmem:[%s10771_s22 + $0xd1] sm:$0xff]  ;;  %v505_v17 = vld [vmem:[%s10771_s22 + $0x20] sm:$0xff] }
  0x1e   : > { %v608_v5 = vld [vmem:[%s10771_s22 + $0x129] sm:$0xff]  ;;  %v609_v6 = vld [vmem:[%s10771_s22 + $0x131] sm:$0xff]  ;;  %v630_v11 = vpack.c.bf16 %v597_v4, %v596_v3  ;;  %v10931_v27 = vld [vmem:[%s14959_s1 + $0x20] sm:$0xff] }
  0x1f   : > { %1793 = vperm.xlu0 %10218, %v10818_v34   ;;  %v10896_v7 = vld [vmem:[%s14959_s1 + $0x50] sm:$0xff]  ;;  %v636_v12 = vpack.c.bf16 %v609_v6, %v608_v5  ;;  %v10913_v14 = vld [vmem:[%s14959_s1 + $0x68] sm:$0xff]  ;;  %v504_v16 = vld [vmem:[%s10771_s22 + $0x18] sm:$0xff]  ;;  %1783 = vperm.xlu2 %10220, %v10931_v27  }
  0x20   : > { %v1354_v8 = vld [vmem:[%s10771_s22 + $0x2b] sm:$0xff]  ;;  %v1355_v9 = vld [vmem:[%s10771_s22 + $0x33] sm:$0xff]  ;;  %v549_v24 = vpack.c.bf16 %v505_v17, %v504_v16  ;;  %v10936_v28 = vld [vmem:[%s14959_s1 + $0x80] sm:$0xff] }
  0x21   : > { %1798 = vperm.xlu1 %10219, %v10877_v62   ;;  %v10903_v10 = vld [vmem:[%s14959_s1 + $0x90] sm:$0xff]  ;;  %v1399_v13 = vpack.c.bf16 %v1355_v9, %v1354_v8  ;;  %v10918_v15 = vld [vmem:[%s14959_s1 + $0xa8] sm:$0xff]  ;;  %v10941_v29 = vld [vmem:[%s14959_s1 + $0xc0] sm:$0xff] }
  0x22   : > { %v1041_v18 = vld [vmem:[%s10771_s22 + $0x2a] sm:$0xff]  ;;  %v10960_v36 = vld [vmem:[%s14959_s1 + $0x98] sm:$0xff]  ;;  %v10976_v51 = vld [vmem:[%s14959_s1 + $0x40] sm:$0xff] }
  0x23   : > { %v10955_v35 = vld [vmem:[%s14959_s1 + $0x28] sm:$0xff]  ;;  %v486_v37 = vld [vmem:[%s14959_s1 + $0xd8] sm:$0xff]  ;;  %v507_v39 = vld [vmem:[%s10771_s22 + $0x30] sm:$0xff] }
  0x24   : > { %v506_v38 = vld [vmem:[%s10771_s22 + $0x28] sm:$0xff]  ;;  %v1043_v40 = vld [vmem:[%s10771_s22 + $0x3a] sm:$0xff]  ;;  %v10981_v52 = vld [vmem:[%s14959_s1 + $0xb0] sm:$0xff] }
  0x25   : > { %9621 = vmatmul.msk.bf16.gmra.mxu1 %vm650_vm0, %v626_v19  ;;  %v1042_v19 = vld [vmem:[%s10771_s22 + $0x32] sm:$0xff]  ;;  %v550_v46 = vpack.c.bf16 %v507_v39, %v506_v38  ;;  %v580_v54 = vld [vmem:[%s10771_s22 + $0x49] sm:$0xff]  ;;  %v509_v61 = vld [vmem:[%s10771_s22 + $0x40] sm:$0xff] }
  0x26   : > { %9627 = vmatmul.msk.bf16.gmra.mxu2 %vm650_vm0, %v632_v20  ;;  %v1356_v20 = vld [vmem:[%s10771_s22 + $0x3b] sm:$0xff]  ;;  %v1086_v25 = vpack.c.bf16 %v1042_v19, %v1041_v18  ;;  %v489_v53 = vld [vmem:[%s14959_s1 + $0xf0] sm:$0xff]  ;;  %v492_v59 = vld [vmem:[%s14959_s1 + $0x108] sm:$0xff] }
  0x27   : > { %9633 = vmatmul.msk.bf16.gmra.mxu3 %vm650_vm0, %v638_v21  ;;  %1808 = vperm.xlu0 %10218, %v10838_v45   ;;  %v1357_v21 = vld [vmem:[%s10771_s22 + $0x43] sm:$0xff]  ;;  %v581_v55 = vld [vmem:[%s10771_s22 + $0x51] sm:$0xff] }
  0x28   : > { %v1400_v26 = vpack.c.bf16 %v1357_v21, %v1356_v20  ;;  %1788 = vperm.xlu2 %10220, %v10955_v35   ;;  %v508_v60 = vld [vmem:[%s10771_s22 + $0x38] sm:$0xff]  ;;  %v1045_v0 = vld [vmem:[%s10771_s22 + $0x4a] sm:$0xff]  ;;  %v583_v16 = vld [vmem:[%s10771_s22 + $0x61] sm:$0xff] }
  0x29   : > { %1813 = vperm.xlu1 %10219, %v10896_v7   ;;  %v1046_v1 = vld [vmem:[%s10771_s22 + $0x52] sm:$0xff]  ;;  %v1361_v3 = vld [vmem:[%s10771_s22 + $0x63] sm:$0xff]  ;;  %v551_v4 = vpack.c.bf16 %v509_v61, %v508_v60 }
  0x2a   : > { %v1088_v6 = vpack.c.bf16 %v1046_v1, %v1045_v0  ;;  %v11020_v9 = vld [vmem:[%s14959_s1 + $0x70] sm:$0xff]  ;;  %v11047_v21 = vld [vmem:[%s14959_s1 + $0x88] sm:$0xff]  ;;  %v11101_v0 = vld [vmem:[%s14959_s1 + $0xb8] sm:$0xff] }
  0x2b   : > { %v1363_v38 = vld [vmem:[%s10771_s22 + $0x73] sm:$0xff]  ;;  %v11106_v1 = vld [vmem:[%s14959_s1 + $0x128] sm:$0xff] }
  0x2c   : > { %15036 = vst [vmem:[#allocation13_spill] sm:$0xff] %v11106_v1  ;;  %v1369_v23 = vld [vmem:[%s10771_s22 + $0xa3] sm:$0xff] }
  0x2d   : > { %9615 = vmatmul.msk.bf16.gmra.mxu0 %vm650_vm0, %v620_v2  ;;  %v1360_v2 = vld [vmem:[%s10771_s22 + $0x5b] sm:$0xff] }
  0x2e   : > { %v1402_v8 = vpack.c.bf16 %v1361_v3, %v1360_v2  ;;  %v512_v2 = vld [vmem:[%s10771_s22 + $0x58] sm:$0xff]  ;;  %v513_v3 = vld [vmem:[%s10771_s22 + $0x60] sm:$0xff] }
  0x2f   : > { %1823 = vperm.xlu0 %10218, %v10853_v50  }
  0x30   : > { %1803 = vperm.xlu2 %10220, %v10976_v51  }
  0x31   : > { %1828 = vperm.xlu1 %10219, %v10913_v14  }
  0x35   : > { %9622 = vmatmul.msk.bf16.gmra.mxu1 %vm650_vm0, %v627_v30  ;;  %v578_v30 = vld [vmem:[%s10771_s22 + $0x39] sm:$0xff] }
  0x36   : > { %9628 = vmatmul.msk.bf16.gmra.mxu2 %vm650_vm0, %v633_v31  ;;  %v579_v31 = vld [vmem:[%s10771_s22 + $0x41] sm:$0xff] }
  0x37   : > { %9634 = vmatmul.msk.bf16.gmra.mxu3 %vm650_vm0, %v639_v32  ;;  %1838 = vperm.xlu0 %10218, %v10882_v63   ;;  %v621_v32 = vpack.c.bf16 %v579_v31, %v578_v30  ;;  %v511_v30 = vld [vmem:[%s10771_s22 + $0x50] sm:$0xff]  ;;  %v1047_v31 = vld [vmem:[%s10771_s22 + $0x5a] sm:$0xff] }
  0x39   : > { %1843 = vperm.xlu1 %10219, %v10936_v28  }
  0x3d   : > { %9616 = vmatmul.msk.bf16.gmra.mxu0 %vm650_vm0, %v621_v32  ;;  %v1048_v32 = vld [vmem:[%s10771_s22 + $0x62] sm:$0xff] }
  0x3f   : > { %1853 = vperm.xlu0 %10218, %v10903_v10  }
  0x41   : > { %1858 = vperm.xlu1 %10219, %v10960_v36  }
  0x45   : > { %9623 = vmatmul.msk.bf16.gmra.mxu1 %vm650_vm0, %v628_v41  ;;  %v1044_v41 = vld [vmem:[%s10771_s22 + $0x42] sm:$0xff] }
  0x46   : > { %9629 = vmatmul.msk.bf16.gmra.mxu2 %vm650_vm0, %v634_v42  ;;  %v1358_v42 = vld [vmem:[%s10771_s22 + $0x4b] sm:$0xff]  ;;  %v1087_v47 = vpack.c.bf16 %v1044_v41, %v1043_v40 }
  0x47   : > { %9635 = vmatmul.msk.bf16.gmra.mxu3 %vm650_vm0, %v640_v43  ;;  %1868 = vperm.xlu0 %10218, %v10918_v15   ;;  %v1359_v43 = vld [vmem:[%s10771_s22 + $0x53] sm:$0xff] }
  0x48   : > { %v1401_v48 = vpack.c.bf16 %v1359_v43, %v1358_v42  ;;  %v1089_v43 = vpack.c.bf16 %v1048_v32, %v1047_v31  ;;  %v11125_v31 = vld [vmem:[%s14959_s1 + $0xd0] sm:$0xff]  ;;  %v11130_v32 = vld [vmem:[%s14959_s1 + $0x140] sm:$0xff] }
  0x49   : > { %1873 = vperm.xlu1 %10219, %v10981_v52   ;;  %15040 = vst [vmem:[#allocation17_spill] sm:$0xff] %v11130_v32 }
  0x4f   : > { %1883 = vperm.xlu0 %10218, %v10941_v29  }
  0x55   : > { %9624 = vmatmul.msk.bf16.gmra.mxu1 %vm650_vm0, %v629_v56  ;;  %v622_v56 = vpack.c.bf16 %v581_v55, %v580_v54  ;;  %v584_v54 = vld [vmem:[%s10771_s22 + $0x69] sm:$0xff]  ;;  %v585_v55 = vld [vmem:[%s10771_s22 + $0x71] sm:$0xff] }
  0x56   : > { %9630 = vmatmul.msk.bf16.gmra.mxu2 %vm650_vm0, %v635_v57  ;;  %v10997_v57 = vld [vmem:[%s14959_s1 + $0x58] sm:$0xff] }
  0x57   : > { %9636 = vmatmul.msk.bf16.gmra.mxu3 %vm650_vm0, %v641_v58  ;;  %1898 = vperm.xlu0 %10218, %v486_v37   ;;  %v11002_v58 = vld [vmem:[%s14959_s1 + $0xc8] sm:$0xff] }
  0x58   : > { %9617 = vmatmul.msk.bf16.gmra.mxu0 %vm650_vm0, %v622_v56  ;;  %1818 = vperm.xlu2 %10220, %v10997_v57   ;;  %v1362_v37 = vld [vmem:[%s10771_s22 + $0x6b] sm:$0xff]  ;;  %v624_v56 = vpack.c.bf16 %v585_v55, %v584_v54  ;;  %v1051_v55 = vld [vmem:[%s10771_s22 + $0x7a] sm:$0xff] }
  0x59   : > { %1888 = vperm.xlu1 %10219, %v11002_v58   ;;  %v515_v54 = vld [vmem:[%s10771_s22 + $0x70] sm:$0xff] }
  0x5f   : > { %1913 = vperm.xlu0 %10218, %v489_v53   ;;  %v501_v53 = vld [vmem:[%s14959_s1 + $0x150] sm:$0xff] }
  0x60   : > { %1833 = vperm.xlu2 %10220, %v11020_v9  }
  0x65   : > { %9625 = vmatmul.msk.bf16.gmra.mxu1 %vm650_vm0, %v630_v11  ;;  %v11025_v11 = vld [vmem:[%s14959_s1 + $0xe0] sm:$0xff] }
  0x66   : > { %9631 = vmatmul.msk.bf16.gmra.mxu2 %vm650_vm0, %v636_v12  ;;  %v495_v12 = vld [vmem:[%s14959_s1 + $0x120] sm:$0xff]  ;;  %1903 = vperm.xlu1 %10219, %v11025_v11  }
  0x67   : > { %9695 = vmatmul.msk.bf16.vlgmr.msrb.gmra.mxu3 %vm650_vm0, %v1399_v13  ;;  %1928 = vperm.xlu0 %10218, %v492_v59   ;;  %v582_v13 = vld [vmem:[%s10771_s22 + $0x59] sm:$0xff] }
  0x68   : > { %v623_v17 = vpack.c.bf16 %v583_v16, %v582_v13  ;;  %1848 = vperm.xlu2 %10220, %v11047_v21  }
  0x6a   : > { %9618 = vmatmul.msk.bf16.gmra.mxu0 %vm650_vm0, %v623_v17  ;;  %v553_v17 = vpack.c.bf16 %v513_v3, %v512_v2  ;;  %v1366_v2 = vld [vmem:[%s10771_s22 + $0x8b] sm:$0xff]  ;;  %v1367_v3 = vld [vmem:[%s10771_s22 + $0x93] sm:$0xff] }
  0x6f   : > { %1943 = vperm.xlu0 %10218, %v495_v12   ;;  %v1365_v12 = vld [vmem:[%s10771_s22 + $0x83] sm:$0xff] }
  0x75   : > { %9641 = vmatmul.msk.bf16.vlgmr.msrb.gmra.mxu1 %vm650_vm0, %v549_v24  ;;  %v11052_v24 = vld [vmem:[%s14959_s1 + $0xf8] sm:$0xff] }
  0x76   : > { %9668 = vmatmul.msk.bf16.vlgmr.msrb.gmra.mxu2 %vm650_vm0, %v1086_v25  ;;  %v498_v25 = vld [vmem:[%s14959_s1 + $0x138] sm:$0xff]  ;;  %1918 = vperm.xlu1 %10219, %v11052_v24  }
  0x77   : > { %9696 = vmatmul.msk.bf16.gmra.mxu3 %vm650_vm0, %v1400_v26  ;;  %1958 = vperm.xlu0 %10218, %v498_v25   ;;  %v510_v26 = vld [vmem:[%s10771_s22 + $0x48] sm:$0xff] }
  0x78   : > { %v552_v41 = vpack.c.bf16 %v511_v30, %v510_v26 }
  0x7a   : > { %9619 = vmatmul.msk.bf16.gmra.mxu0 %vm650_vm0, %v624_v56  ;;  %v1052_v56 = vld [vmem:[%s10771_s22 + $0x82] sm:$0xff] }
  0x7f   : > { %1973 = vperm.xlu0 %10218, %v501_v53   ;;  %v514_v53 = vld [vmem:[%s10771_s22 + $0x68] sm:$0xff] }
  0x85   : > { %9642 = vmatmul.msk.bf16.gmra.mxu1 %vm650_vm0, %v550_v46  ;;  %v1403_v46 = vpack.c.bf16 %v1363_v38, %v1362_v37 }
  0x86   : > { %9669 = vmatmul.msk.bf16.gmra.mxu2 %vm650_vm0, %v1087_v47  ;;  %v11074_v47 = vld [vmem:[%s14959_s1 + $0xa0] sm:$0xff] }
  0x87   : > { %9697 = vmatmul.msk.bf16.gmra.mxu3 %vm650_vm0, %v1401_v48  ;;  %v11079_v48 = vld [vmem:[%s14959_s1 + $0x110] sm:$0xff]  ;;  %1863 = vperm.xlu2 %10220, %v11074_v47  }
  0x88   : > { %1933 = vperm.xlu1 %10219, %v11079_v48  }
  0x8f   : > { %1878 = vperm.xlu2 %10220, %v11101_v0  }
  0x90   : > { %1948 = vperm.xlu1 %10219, %v11106_v1  }
  0x92   : > { %v11015_v5 = vpop.f32.mrf.mxu1 }
  0x95   : > { %9643 = vmatmul.msk.bf16.gmra.mxu1 %vm650_vm0, %v551_v4  ;;  %v1049_v4 = vld [vmem:[%s10771_s22 + $0x6a] sm:$0xff] }
  0x96   : > { %9670 = vmatmul.msk.bf16.gmra.mxu2 %vm650_vm0, %v1088_v6  ;;  %v1050_v6 = vld [vmem:[%s10771_s22 + $0x72] sm:$0xff] }
  0x97   : > { %9698 = vmatmul.msk.bf16.gmra.mxu3 %vm650_vm0, %v1402_v8  ;;  %v1364_v8 = vld [vmem:[%s10771_s22 + $0x7b] sm:$0xff]  ;;  %v1090_v26 = vpack.c.bf16 %v1050_v6, %v1049_v4  ;;  %1893 = vperm.xlu2 %10220, %v11125_v31  }
  0x98   : > { %v1404_v30 = vpack.c.bf16 %v1365_v12, %v1364_v8  ;;  %1963 = vperm.xlu1 %10219, %v11130_v32   ;;  %v554_v8 = vpack.c.bf16 %v515_v54, %v514_v53 }
  0x99   : > { %v11038_v18 = vpop.f32.mrf.mxu2 }
  0x9a   : > { %15029 = vst [vmem:[#allocation6_spill] sm:$0xff] %v11038_v18  ;;  %v11040_v19 = vpop.f32.mrf.mxu3  ;;  %v11042_v20 = vpop.f32.mrf.mxu1 }
  0x9b   : > { %15030 = vst [vmem:[#allocation7_spill] sm:$0xff] %v11040_v19  ;;  %v1371_v19 = vld [vmem:[%s10771_s22 + $0xb3] sm:$0xff] }
  0xa1   : > { %v11065_v39 = vpop.f32.mrf.mxu2 }
  0xa2   : > { %15031 = vst [vmem:[#allocation8_spill] sm:$0xff] %v11065_v39  ;;  %v11067_v40 = vpop.f32.mrf.mxu3  ;;  %v11069_v42 = vpop.f32.mrf.mxu1 }
  0xa3   : > { %15032 = vst [vmem:[#allocation9_spill] sm:$0xff] %v11067_v40  ;;  %v11200_v40 = vld [vmem:[%s14959_s1 + $0x130] sm:$0xff] }
  0xa4   : > { %15053 = vst [vmem:[#allocation30_spill] sm:$0xff] %v11200_v40 }
  0xa5   : > { %9644 = vmatmul.msk.bf16.gmra.mxu1 %vm650_vm0, %v552_v41 }
  0xa6   : > { %9671 = vmatmul.msk.bf16.gmra.mxu2 %vm650_vm0, %v1089_v43  ;;  %v10184_v43 = vld [vmem:[%s14962_s4 + $0x8] sm:$0xff] }
  0xa7   : > { %9699 = vmatmul.msk.bf16.gmra.mxu3 %vm650_vm0, %v1403_v46  ;;  %v11149_v46 = vld [vmem:[%s14959_s1 + $0xe8] sm:$0xff]  ;;  %2304 = vmatpush.bf16.msrb.mxu0 %v10184_v43 }
  0xa8   : > { %1908 = vperm.xlu2 %10220, %v11149_v46  }
  0xa9   : > { %v11092_v59 = vpop.f32.mrf.mxu2 }
  0xaa   : > { %15033 = vst [vmem:[#allocation10_spill] sm:$0xff] %v11092_v59  ;;  %v11094_v60 = vpop.f32.mrf.mxu3  ;;  %v11096_v61 = vpop.f32.mrf.mxu1 }
  0xab   : > { %15034 = vst [vmem:[#allocation11_spill] sm:$0xff] %v11094_v60 }
  0xac   : > { %15035 = vst [vmem:[#allocation12_spill] sm:$0xff] %v11096_v61 }
  0xb1   : > { %v11116_v13 = vpop.f32.mrf.mxu2 }
  0xb2   : > { %15037 = vst [vmem:[#allocation14_spill] sm:$0xff] %v11116_v13  ;;  %v11118_v16 = vpop.f32.mrf.mxu3  ;;  %v11120_v25 = vpop.f32.mrf.mxu1 }
  0xb3   : > { %15038 = vst [vmem:[#allocation15_spill] sm:$0xff] %v11118_v16 }
  0xb4   : > { %15039 = vst [vmem:[#allocation16_spill] sm:$0xff] %v11120_v25 }
  0xb5   : > { %9645 = vmatmul.msk.bf16.gmra.mxu1 %vm650_vm0, %v553_v17  ;;  %v1091_v17 = vpack.c.bf16 %v1052_v56, %v1051_v55  ;;  %v11182_v55 = vld [vmem:[%s14959_s1 + $0x118] sm:$0xff] }
  0xb6   : > { %9672 = vmatmul.msk.bf16.gmra.mxu2 %vm650_vm0, %v1090_v26  ;;  %v1405_v26 = vpack.c.bf16 %v1367_v3, %v1366_v2  ;;  %v516_v56 = vld [vmem:[%s10771_s22 + $0x78] sm:$0xff]  ;;  %v517_v2 = vld [vmem:[%s10771_s22 + $0x80] sm:$0xff]  ;;  %v1053_v3 = vld [vmem:[%s10771_s22 + $0x8a] sm:$0xff] }
  0xb7   : > { %9700 = vmatmul.msk.bf16.gmra.mxu3 %vm650_vm0, %v1404_v30  ;;  %v11167_v30 = vld [vmem:[%s14959_s1 + $0x100] sm:$0xff] }
  0xb8   : > { %1923 = vperm.xlu2 %10220, %v11167_v30  }
  0xb9   : > { %v11137_v37 = vpop.f32.mrf.mxu2 }
  0xba   : > { %15041 = vst [vmem:[#allocation18_spill] sm:$0xff] %v11137_v37  ;;  %v11139_v38 = vpop.f32.mrf.mxu3  ;;  %v11141_v41 = vpop.f32.mrf.mxu1 }
  0xbb   : > { %15042 = vst [vmem:[#allocation19_spill] sm:$0xff] %v11139_v38 }
  0xbc   : > { %15043 = vst [vmem:[#allocation20_spill] sm:$0xff] %v11141_v41 }
  0xc0   : > { %1938 = vperm.xlu2 %10220, %v11182_v55  }
  0xc1   : > { %v11158_v4 = vpop.f32.mrf.mxu2 }
  0xc2   : > { %15044 = vst [vmem:[#allocation21_spill] sm:$0xff] %v11158_v4  ;;  %v11160_v6 = vpop.f32.mrf.mxu3  ;;  %v11162_v12 = vpop.f32.mrf.mxu1 }
  0xc3   : > { %15045 = vst [vmem:[#allocation22_spill] sm:$0xff] %v11160_v6 }
  0xc4   : > { %15046 = vst [vmem:[#allocation23_spill] sm:$0xff] %v11162_v12 }
  0xc5   : > { %9646 = vmatmul.msk.bf16.gmra.mxu1 %vm650_vm0, %v554_v8  ;;  %v1054_v8 = vld [vmem:[%s10771_s22 + $0x92] sm:$0xff] }
  0xc6   : > { %9673 = vmatmul.msk.bf16.gmra.mxu2 %vm650_vm0, %v1091_v17  ;;  %v1368_v17 = vld [vmem:[%s10771_s22 + $0x9b] sm:$0xff]  ;;  %v1092_v16 = vpack.c.bf16 %v1054_v8, %v1053_v3  ;;  %v11215_v3 = vld [vmem:[%s14959_s1 + $0x148] sm:$0xff]  ;;  %v10670_v8 = vmov 0.0  }
  0xc7   : > { %9701 = vmatmul.msk.bf16.gmra.mxu3 %vm650_vm0, %v1405_v26  ;;  %v1406_v60 = vpack.c.bf16 %v1369_v23, %v1368_v17  ;;  %15057 = vst [vmem:[#allocation34_spill] sm:$0xff] %v11215_v3  ;;  %v729_v17 = vpop.f32.mrf.mxu0 }
  0xc8   : > { %1953 = vperm.xlu2 %10220, %v11200_v40   ;;  %2031 = vst.msk [vmem:[#allocation2] sm:$0xff] %vm650_vm0, %v10670_v8 }
  0xc9   : > { %v11173_v43 = vpop.f32.mrf.mxu2  ;;  %2032 = vst.msk [vmem:[#allocation2 + $0x8] sm:$0xff] %vm650_vm0, %v10670_v8 }
  0xca   : > { %15047 = vst [vmem:[#allocation24_spill] sm:$0xff] %v11173_v43  ;;  %v11175_v53 = vpop.f32.mrf.mxu3  ;;  %v11177_v54 = vpop.f32.mrf.mxu1 }
  0xcb   : > { %15048 = vst [vmem:[#allocation25_spill] sm:$0xff] %v11175_v53  ;;  %v555_v53 = vpack.c.bf16 %v517_v2, %v516_v56 }
  0xcc   : > { %15049 = vst [vmem:[#allocation26_spill] sm:$0xff] %v11177_v54  ;;  %v1374_v54 = vld [vmem:[%s10771_s22 + $0xcb] sm:$0xff] }
  0xcd   : > { %2033 = vst.msk [vmem:[#allocation2 + $0x10] sm:$0xff] %vm650_vm0, %v10670_v8 }
  0xce   : > { %3570 = vst.msk [vmem:[#allocation3 + $0x180] sm:$0xff] %vm650_vm0, %v10670_v8 }
  0xcf   : > { %3571 = vst.msk [vmem:[#allocation3 + $0x188] sm:$0xff] %vm650_vm0, %v10670_v8 }
  0xd0   : > { %1968 = vperm.xlu2 %10220, %v11215_v3   ;;  %v2152_v59 = vld [vmem:[#allocation2 + $0x6] sm:$0xff]  ;;  %3572 = vst.msk [vmem:[#allocation3 + $0x190] sm:$0xff] %vm650_vm0, %v10670_v8 }
  0xd1   : > { %v11191_v26 = vpop.f32.mrf.mxu2  ;;  %3978 = vst.msk [vmem:[#allocation4] sm:$0xff] %vm650_vm0, %v10670_v8 }
  0xd2   : > { %15050 = vst [vmem:[#allocation27_spill] sm:$0xff] %v11191_v26  ;;  %v11193_v6 = vpop.f32.mrf.mxu3  ;;  %v11195_v38 = vpop.f32.mrf.mxu1 }
  0xd3   : > { %15051 = vst [vmem:[#allocation28_spill] sm:$0xff] %v11193_v6  ;;  %v1370_v6 = vld [vmem:[%s10771_s22 + $0xab] sm:$0xff] }
  0xd4   : > { %15052 = vst [vmem:[#allocation29_spill] sm:$0xff] %v11195_v38  ;;  %v1407_v13 = vpack.c.bf16 %v1371_v19, %v1370_v6  ;;  %v2153_v39 = vld [vmem:[#allocation2 + $0xe] sm:$0xff]  ;;  %v1060_v38 = vld [vmem:[%s10771_s22 + $0xc2] sm:$0xff] }
  0xd5   : > { %9647 = vmatmul.msk.bf16.gmra.mxu1 %vm650_vm0, %v555_v53  ;;  %v1055_v53 = vld [vmem:[%s10771_s22 + $0x9a] sm:$0xff]  ;;  %v2197_v18 = vpack.c.bf16 %v2153_v39, %v2152_v59  ;;  %3979 = vst.msk [vmem:[#allocation4 + $0x8] sm:$0xff] %vm650_vm0, %v10670_v8  ;;  %v1057_v59 = vld [vmem:[%s10771_s22 + $0xaa] sm:$0xff] }
  0xd6   : > { %9674 = vmatmul.msk.bf16.gmra.mxu2 %vm650_vm0, %v1092_v16  ;;  %v519_v16 = vld [vmem:[%s10771_s22 + $0x90] sm:$0xff]  ;;  %3980 = vst.msk [vmem:[#allocation4 + $0x10] sm:$0xff] %vm650_vm0, %v10670_v8  ;;  %v520_v39 = vld [vmem:[%s10771_s22 + $0x98] sm:$0xff] }
  0xd7   : > { %9702 = vmatmul.msk.bf16.gmra.mxu3 %vm650_vm0, %v1406_v60  ;;  %v518_v60 = vld [vmem:[%s10771_s22 + $0x88] sm:$0xff]  ;;  %9722 = vmatmul.msk.bf16.vlgmr.msrb.gmra.mxu0 %vm650_vm0, %v2197_v18  ;;  %v521_v18 = vld [vmem:[%s10771_s22 + $0xa0] sm:$0xff]  ;;  %6369 = vst.msk [vmem:[#allocation5] sm:$0xff] %vm650_vm0, %v10670_v8 }
  0xd8   : > { %v556_v43 = vpack.c.bf16 %v519_v16, %v518_v60  ;;  %6370 = vst.msk [vmem:[#allocation5 + $0x8] sm:$0xff] %vm650_vm0, %v10670_v8  ;;  %v557_v16 = vpack.c.bf16 %v521_v18, %v520_v39 }
  0xd9   : > { %v11206_v56 = vpop.f32.mrf.mxu2  ;;  %6371 = vst.msk [vmem:[#allocation5 + $0x10] sm:$0xff] %vm650_vm0, %v10670_v8 }
  0xda   : > { %15054 = vst [vmem:[#allocation31_spill] sm:$0xff] %v11206_v56  ;;  %v11208_v23 = vpop.f32.mrf.mxu3  ;;  %v11210_v2 = vpop.f32.mrf.mxu1 }
  0xdb   : > { %15055 = vst [vmem:[#allocation32_spill] sm:$0xff] %v11208_v23  ;;  %v1056_v23 = vld [vmem:[%s10771_s22 + $0xa2] sm:$0xff] }
  0xdc   : > { %15056 = vst [vmem:[#allocation33_spill] sm:$0xff] %v11210_v2  ;;  %v1093_v37 = vpack.c.bf16 %v1056_v23, %v1055_v53 }
  0xdd   : > { %6372 = vst.msk [vmem:[#allocation5 + $0x180] sm:$0xff] %vm650_vm0, %v10670_v8 }
  0xde   : > { %6373 = vst.msk [vmem:[#allocation5 + $0x188] sm:$0xff] %vm650_vm0, %v10670_v8 }
  0xdf   : > { %6374 = vst.msk [vmem:[#allocation5 + $0x190] sm:$0xff] %vm650_vm0, %v10670_v8 }
  0xe1   : > { %v11227_v56 = vpop.f32.mrf.mxu2 }
  0xe2   : > { %15058 = vst [vmem:[#allocation35_spill] sm:$0xff] %v11227_v56  ;;  %v841_v26 = vpop.f32.mrf.mxu3  ;;  %v11229_v4 = vpop.f32.mrf.mxu1 }
  0xe3   : > { %15059 = vst [vmem:[#allocation36_spill] sm:$0xff] %v11229_v4  ;;  %v731_v56 = vpop.f32.mrf.mxu0  ;;  %v1373_v26 = vld [vmem:[%s10771_s22 + $0xc3] sm:$0xff] }
  0xe5   : > { %9648 = vmatmul.msk.bf16.gmra.mxu1 %vm650_vm0, %v556_v43 }
  0xe6   : > { %9675 = vmatmul.msk.bf16.gmra.mxu2 %vm650_vm0, %v1093_v37  ;;  %v1372_v37 = vld [vmem:[%s10771_s22 + $0xbb] sm:$0xff] }
  0xe7   : > { %9703 = vmatmul.msk.bf16.gmra.mxu3 %vm650_vm0, %v1407_v13  ;;  %v1058_v13 = vld [vmem:[%s10771_s22 + $0xb2] sm:$0xff] }
  0xe9   : > { %v11236_v19 = vpop.f32.mrf.mxu2 }
  0xea   : > { %15060 = vst [vmem:[#allocation37_spill] sm:$0xff] %v11236_v19  ;;  %v1508_v6 = vpop.f32.mrf.mxu3  ;;  %v11239_v43 = vpop.f32.mrf.mxu1  ;;  %v1094_v19 = vpack.c.bf16 %v1058_v13, %v1057_v59  ;;  %v11265_v13 = vld [vmem:[%s14961_s3] ss:$0 sm:$0xff] }
  0xeb   : > { %15061 = vst [vmem:[#allocation38_spill] sm:$0xff] %v11239_v43  ;;  %v1408_v43 = vpack.c.bf16 %v1373_v26, %v1372_v37  ;;  %v734_v4 = vpop.f32.mrf.mxu0 }
  0xf1   : > { %v11254_v23 = vpop.f32.mrf.mxu2 }
  0xf2   : > { %15062 = vst [vmem:[#allocation39_spill] sm:$0xff] %v11254_v23  ;;  %v1510_v60 = vpop.f32.mrf.mxu3  ;;  %v927_v53 = vpop.f32.mrf.mxu1  ;;  %v523_v23 = vld [vmem:[%s10771_s22 + $0xb0] sm:$0xff] }
  0xf3   : > { %v928_v2 = vadd.f32 %v927_v53, %v729_v17  ;;  %v736_v26 = vpop.f32.mrf.mxu0  ;;  %v522_v53 = vld [vmem:[%s10771_s22 + $0xa8] sm:$0xff] }
  0xf4   : > { %v558_v32 = vpack.c.bf16 %v523_v23, %v522_v53  ;;  %v1377_v53 = vld [vmem:[%s10771_s22 + $0xe3] sm:$0xff] }
  0xf5   : > { %9649 = vmatmul.msk.bf16.gmra.mxu1 %vm650_vm0, %v557_v16  ;;  %v1764_v16 = vpop.permute.xlu0 %1763 }
  0xf6   : > { %9676 = vmatmul.msk.bf16.gmra.mxu2 %vm650_vm0, %v1094_v19  ;;  %v1059_v19 = vld [vmem:[%s10771_s22 + $0xba] sm:$0xff] }
  0xf7   : > { %9704 = vmatmul.msk.bf16.gmra.mxu3 %vm650_vm0, %v1408_v43  ;;  %v1375_v43 = vld [vmem:[%s10771_s22 + $0xd3] sm:$0xff]  ;;  %v1095_v61 = vpack.c.bf16 %v1060_v38, %v1059_v19  ;;  %v10671_v38 = vmov 1  }
  0xf8   : > { %10221 = vset.pattern.permute.xlu1 %v10671_v38  ;;  %10222 = vset.pattern.permute.xlu2 %v10671_v38 }
  0xf9   : > { %v1195_v39 = vpop.f32.mrf.mxu2  ;;  %3343 = vperm.xlu1 %10221, %v10794_v22   ;;  %3347 = vperm.xlu2 %10222, %v10812_v33  }
  0xfa   : > { %v1513_v18 = vpop.f32.mrf.mxu3  ;;  %v1309_v59 = vadd.f32 %v1195_v39, %v928_v2  ;;  %v929_v8 = vpop.f32.mrf.mxu1  ;;  %10223 = vset.pattern.permute.xlu0 %v10671_v38 }
  0xfb   : > { %v930_v41 = vadd.f32 %v929_v8, %v731_v56  ;;  %v739_v56 = vpop.f32.mrf.mxu0  ;;  %3351 = vperm.xlu0 %10223, %v10833_v44  }
  0xfc   : > { %v1622_v37 = vadd.f32 %v1508_v6, %v1309_v59  ;;  %v1409_v6 = vpack.c.bf16 %v1375_v43, %v1374_v54  ;;  %v1774_v54 = vpop.permute.xlu1 %1773 }
  0xfd   : > { %v1769_v8 = vpop.permute.xlu0 %1768 }
  0xfe   : > { %v1671_v17 = vadd.f32 %v11265_v13, %v1622_v37 }
 0x100   : > { %v1716_v12 = vmax.f32 %v1671_v17, 0.0  ;;  %v1062_v17 = vld [vmem:[%s10771_s22 + $0xd2] sm:$0xff] }
 0x101   : > { %v1197_v2 = vpop.f32.mrf.mxu2  ;;  %3355 = vperm.xlu1 %10221, %v10848_v49   ;;  %3359 = vperm.xlu2 %10222, %v10931_v27  }
 0x102   : > { %v1515_v39 = vpop.f32.mrf.mxu3  ;;  %v1986_v25 = vmul.f32 %v1764_v16, %v1716_v12  ;;  %v1310_v3 = vadd.f32 %v1197_v2, %v930_v41  ;;  %v932_v1 = vpop.f32.mrf.mxu1  ;;  %v1061_v16 = vld [vmem:[%s10771_s22 + $0xca] sm:$0xff] }
 0x103   : > { %v933_v40 = vadd.f32 %v932_v1, %v734_v4  ;;  %v524_v4 = vld [vmem:[%s10771_s22 + $0xb8] sm:$0xff]  ;;  %v741_v43 = vpop.f32.mrf.mxu0  ;;  %3371 = vperm.xlu0 %10223, %v10877_v62  }
 0x104   : > { %2037 = vst.msk [vmem:[#allocation2 + $0x18] sm:$0xff] %vm650_vm0, %v1986_v25  ;;  %v1623_v59 = vadd.f32 %v1510_v60, %v1310_v3  ;;  %v525_v60 = vld [vmem:[%s10771_s22 + $0xc0] sm:$0xff]  ;;  %v1779_v49 = vpop.permute.xlu1 %1778 }
 0x105   : > { %9650 = vmatmul.msk.bf16.gmra.mxu1 %vm650_vm0, %v558_v32 }
 0x106   : > { %v1672_v37 = vadd.f32 %v11265_v13, %v1623_v59  ;;  %9677 = vmatmul.msk.bf16.gmra.mxu2 %vm650_vm0, %v1095_v61  ;;  %v1096_v59 = vpack.c.bf16 %v1062_v17, %v1061_v16  ;;  %v1784_v16 = vpop.permute.xlu2 %1783 }
 0x107   : > { %9705 = vmatmul.msk.bf16.gmra.mxu3 %vm650_vm0, %v1409_v6  ;;  %v559_v6 = vpack.c.bf16 %v525_v60, %v524_v4  ;;  %v526_v60 = vld [vmem:[%s10771_s22 + $0xc8] sm:$0xff] }
 0x108   : > { %v1717_v12 = vmax.f32 %v1672_v37, 0.0 }
 0x109   : > { %v1200_v41 = vpop.f32.mrf.mxu2  ;;  %3363 = vperm.xlu1 %10221, %v10955_v35   ;;  %3367 = vperm.xlu2 %10222, %v10818_v34  }
 0x10a   : > { %v1518_v23 = vpop.f32.mrf.mxu3  ;;  %v1987_v1 = vmul.f32 %v1769_v8, %v1717_v12  ;;  %v1311_v61 = vadd.f32 %v1200_v41, %v933_v40  ;;  %v934_v25 = vpop.f32.mrf.mxu1  ;;  %v1376_v40 = vld [vmem:[%s10771_s22 + $0xdb] sm:$0xff] }
 0x10b   : > { %v935_v22 = vadd.f32 %v934_v25, %v736_v26  ;;  %v1410_v44 = vpack.c.bf16 %v1377_v53, %v1376_v40  ;;  %v2154_v12 = vld [vmem:[#allocation2 + $0x16] sm:$0xff]  ;;  %3383 = vperm.xlu0 %10223, %v10896_v7  }
 0x10c   : > { %2038 = vst.msk [vmem:[#allocation2 + $0x20] sm:$0xff] %vm650_vm0, %v1987_v1  ;;  %v1624_v32 = vadd.f32 %v1513_v18, %v1311_v61  ;;  %v527_v40 = vld [vmem:[%s10771_s22 + $0xd0] sm:$0xff]  ;;  %v1063_v53 = vld [vmem:[%s10771_s22 + $0xda] sm:$0xff] }
 0x10e   : > { %v1673_v3 = vadd.f32 %v11265_v13, %v1624_v32 }
 0x110   : > { %v1718_v19 = vmax.f32 %v1673_v3, 0.0 }
 0x111   : > { %v1202_v33 = vpop.f32.mrf.mxu2  ;;  %3375 = vperm.xlu1 %10221, %v10976_v51   ;;  %3379 = vperm.xlu2 %10222, %v10838_v45   ;;  %v1789_v45 = vpop.permute.xlu2 %1788 }
 0x112   : > { %v1520_v2 = vpop.f32.mrf.mxu3  ;;  %v1988_v37 = vmul.f32 %v1774_v54, %v1718_v19  ;;  %v1312_v18 = vadd.f32 %v1202_v33, %v935_v22  ;;  %v937_v8 = vpop.f32.mrf.mxu1  ;;  %v1064_v19 = vld [vmem:[%s10771_s22 + $0xe2] sm:$0xff]  ;;  %v1378_v22 = vld [vmem:[%s10771_s22 + $0xeb] sm:$0xff]  ;;  %v1379_v33 = vld [vmem:[%s10771_s22 + $0xf3] sm:$0xff] }
 0x113   : > { %v2155_v41 = vld [vmem:[#allocation2 + $0x1e] sm:$0xff]  ;;  %v938_v25 = vadd.f32 %v937_v8, %v739_v56  ;;  %v744_v56 = vpop.f32.mrf.mxu0  ;;  %v1097_v34 = vpack.c.bf16 %v1064_v19, %v1063_v53  ;;  %3395 = vperm.xlu0 %10223, %v10913_v14   ;;  %v1794_v19 = vpop.permute.xlu0 %1793 }
 0x114   : > { %2039 = vst.msk [vmem:[#allocation2 + $0x28] sm:$0xff] %vm650_vm0, %v1988_v37  ;;  %v1625_v1 = vadd.f32 %v1515_v39, %v1312_v18  ;;  %v2198_v61 = vpack.c.bf16 %v2155_v41, %v2154_v12  ;;  %v560_v18 = vpack.c.bf16 %v527_v40, %v526_v60  ;;  %v1411_v12 = vpack.c.bf16 %v1379_v33, %v1378_v22  ;;  %v529_v60 = vld [vmem:[%s10771_s22 + $0xe0] sm:$0xff] }
 0x115   : > { %9651 = vmatmul.msk.bf16.gmra.mxu1 %vm650_vm0, %v559_v6  ;;  %v1380_v40 = vld [vmem:[%s10771_s22 + $0xfb] sm:$0xff]  ;;  %v1381_v53 = vld [vmem:[%s10771_s22 + $0x103] sm:$0xff] }
 0x116   : > { %v1674_v26 = vadd.f32 %v11265_v13, %v1625_v1  ;;  %9678 = vmatmul.msk.bf16.gmra.mxu2 %vm650_vm0, %v1096_v59  ;;  %9723 = vmatmul.msk.bf16.gmra.mxu0 %vm650_vm0, %v2198_v61 }
 0x117   : > { %9706 = vmatmul.msk.bf16.gmra.mxu3 %vm650_vm0, %v1410_v44 }
 0x118   : > { %v1719_v27 = vmax.f32 %v1674_v26, 0.0 }
 0x119   : > { %v1205_v39 = vpop.f32.mrf.mxu2  ;;  %3387 = vperm.xlu1 %10221, %v10997_v57   ;;  %3391 = vperm.xlu2 %10222, %v10853_v50  }
 0x11a   : > { %v1523_v32 = vpop.f32.mrf.mxu3  ;;  %v1989_v62 = vmul.f32 %v1779_v49, %v1719_v27  ;;  %v1313_v4 = vadd.f32 %v1205_v39, %v938_v25  ;;  %v939_v54 = vpop.f32.mrf.mxu1 }
 0x11b   : > { %v940_v59 = vadd.f32 %v939_v54, %v741_v43  ;;  %v2156_v7 = vld [vmem:[#allocation2 + $0x26] sm:$0xff]  ;;  %v746_v26 = vpop.f32.mrf.mxu0  ;;  %3407 = vperm.xlu0 %10223, %v10936_v28   ;;  %v528_v54 = vld [vmem:[%s10771_s22 + $0xd8] sm:$0xff]  ;;  %v1412_v28 = vpack.c.bf16 %v1381_v53, %v1380_v40 }
 0x11c   : > { %2040 = vst.msk [vmem:[#allocation2 + $0x30] sm:$0xff] %vm650_vm0, %v1989_v62  ;;  %v1626_v3 = vadd.f32 %v1518_v23, %v1313_v4  ;;  %v10187_v43 = vld [vmem:[%s14965_s7] sm:$0xff]  ;;  %v561_v50 = vpack.c.bf16 %v529_v60, %v528_v54 }
 0x11d   : > { %4226 = vmatpush.bf16.msra.mxu0 %v10187_v43 }
 0x11e   : > { %v1675_v17 = vadd.f32 %v11265_v13, %v1626_v3 }
 0x120   : > { %v1720_v6 = vmax.f32 %v1675_v17, 0.0  ;;  %v1066_v17 = vld [vmem:[%s10771_s22 + $0xf2] sm:$0xff] }
 0x121   : > { %v1207_v37 = vpop.f32.mrf.mxu2  ;;  %3399 = vperm.xlu1 %10221, %v11020_v9   ;;  %3403 = vperm.xlu2 %10222, %v10882_v63   ;;  %v1799_v63 = vpop.permute.xlu1 %1798 }
 0x122   : > { %v1525_v35 = vpop.f32.mrf.mxu3  ;;  %v1990_v8 = vmul.f32 %v1784_v16, %v1720_v6  ;;  %v1314_v44 = vadd.f32 %v1207_v37, %v940_v59  ;;  %v942_v23 = vpop.f32.mrf.mxu1  ;;  %v1065_v16 = vld [vmem:[%s10771_s22 + $0xea] sm:$0xff] }
 0x123   : > { %v2157_v41 = vld [vmem:[#allocation2 + $0x2e] sm:$0xff]  ;;  %v943_v51 = vadd.f32 %v942_v23, %v744_v56  ;;  %v749_v3 = vpop.f32.mrf.mxu0  ;;  %v1098_v59 = vpack.c.bf16 %v1066_v17, %v1065_v16  ;;  %3419 = vperm.xlu0 %10223, %v10960_v36  }
 0x124   : > { %2041 = vst.msk [vmem:[#allocation2 + $0x38] sm:$0xff] %vm650_vm0, %v1990_v8  ;;  %v1627_v1 = vadd.f32 %v1520_v2, %v1314_v44  ;;  %v2199_v61 = vpack.c.bf16 %v2157_v41, %v2156_v7 }
 0x125   : > { %9652 = vmatmul.msk.bf16.gmra.mxu1 %vm650_vm0, %v560_v18 }
 0x126   : > { %v1676_v25 = vadd.f32 %v11265_v13, %v1627_v1  ;;  %9679 = vmatmul.msk.bf16.gmra.mxu2 %vm650_vm0, %v1097_v34  ;;  %9724 = vmatmul.msk.bf16.gmra.mxu0 %vm650_vm0, %v2199_v61 }
 0x127   : > { %9707 = vmatmul.msk.bf16.gmra.mxu3 %vm650_vm0, %v1411_v12 }
 0x128   : > { %v1721_v2 = vmax.f32 %v1676_v25, 0.0  ;;  %v530_v25 = vld [vmem:[%s10771_s22 + $0xe8] sm:$0xff] }
 0x129   : > { %v1210_v49 = vpop.f32.mrf.mxu2  ;;  %3411 = vperm.xlu1 %10221, %v11047_v21   ;;  %3415 = vperm.xlu2 %10222, %v10903_v10  }
 0x12a   : > { %v1528_v14 = vpop.f32.mrf.mxu3  ;;  %v1991_v27 = vmul.f32 %v1789_v45, %v1721_v2  ;;  %v1315_v39 = vadd.f32 %v1210_v49, %v943_v51  ;;  %v944_v62 = vpop.f32.mrf.mxu1  ;;  %v531_v45 = vld [vmem:[%s10771_s22 + $0xf0] sm:$0xff]  ;;  %v1067_v2 = vld [vmem:[%s10771_s22 + $0xfa] sm:$0xff]  ;;  %v1068_v49 = vld [vmem:[%s10771_s22 + $0x102] sm:$0xff] }
 0x12b   : > { %v945_v33 = vadd.f32 %v944_v62, %v746_v26  ;;  %v2158_v34 = vld [vmem:[#allocation2 + $0x36] sm:$0xff]  ;;  %3431 = vperm.xlu0 %10223, %v10981_v52   ;;  %v1804_v62 = vpop.permute.xlu2 %1803  ;;  %v1099_v10 = vpack.c.bf16 %v1068_v49, %v1067_v2  ;;  %v11385_v2 = vld [vmem:[%s14959_s1 + $0x160] sm:$0xff] }
 0x12c   : > { %2042 = vst.msk [vmem:[#allocation2 + $0x40] sm:$0xff] %vm650_vm0, %v1991_v27  ;;  %v1628_v4 = vadd.f32 %v1523_v32, %v1315_v39  ;;  %v1382_v27 = vld [vmem:[%s10771_s22 + $0x10b] sm:$0xff]  ;;  %v1383_v39 = vld [vmem:[%s10771_s22 + $0x113] sm:$0xff] }
 0x12d   : > { %v1413_v17 = vpack.c.bf16 %v1383_v39, %v1382_v27 }
 0x12e   : > { %v1677_v56 = vadd.f32 %v11265_v13, %v1628_v4 }
 0x130   : > { %v1722_v22 = vmax.f32 %v1677_v56, 0.0 }
 0x131   : > { %v1212_v57 = vpop.f32.mrf.mxu2  ;;  %3423 = vperm.xlu1 %10221, %v11074_v47   ;;  %3427 = vperm.xlu2 %10222, %v10918_v15   ;;  %v1809_v15 = vpop.permute.xlu0 %1808 }
 0x132   : > { %v1530_v6 = vpop.f32.mrf.mxu3  ;;  %v1992_v37 = vmul.f32 %v1794_v19, %v1722_v22  ;;  %v1316_v32 = vadd.f32 %v1212_v57, %v945_v33  ;;  %v947_v18 = vpop.f32.mrf.mxu1 }
 0x133   : > { %v2159_v8 = vld [vmem:[#allocation2 + $0x3e] sm:$0xff]  ;;  %v948_v7 = vadd.f32 %v947_v18, %v749_v3  ;;  %v562_v3 = vpack.c.bf16 %v531_v45, %v530_v25  ;;  %3439 = vperm.xlu0 %10223, %v10941_v29  }
 0x134   : > { %2043 = vst.msk [vmem:[#allocation2 + $0x48] sm:$0xff] %vm650_vm0, %v1992_v37  ;;  %v1629_v44 = vadd.f32 %v1525_v35, %v1316_v32  ;;  %v2200_v23 = vpack.c.bf16 %v2159_v8, %v2158_v34  ;;  %v751_v35 = vpop.f32.mrf.mxu0  ;;  %v15063_v32 = vmov 0   ;;  %v11369_v18 = vld [vmem:[%s14959_s1 + $0x158] sm:$0xff] }
 0x135   : > { %9653 = vmatmul.msk.bf16.gmra.mxu1 %vm650_vm0, %v561_v50 }
 0x136   : > { %v1678_v12 = vadd.f32 %v11265_v13, %v1629_v44  ;;  %9680 = vmatmul.msk.bf16.gmra.mxu2 %vm650_vm0, %v1098_v59  ;;  %9725 = vmatmul.msk.bf16.gmra.mxu0 %vm650_vm0, %v2200_v23  ;;  %v532_v23 = vld [vmem:[%s10771_s22 + $0xf8] sm:$0xff] }
 0x137   : > { %9708 = vmatmul.msk.bf16.gmra.mxu3 %vm650_vm0, %v1412_v28  ;;  %v1819_v28 = vpop.permute.xlu2 %1818 }
 0x138   : > { %v1723_v9 = vmax.f32 %v1678_v12, 0.0  ;;  %v533_v12 = vld [vmem:[%s10771_s22 + $0x100] sm:$0xff] }
 0x139   : > { %v1215_v36 = vpop.f32.mrf.mxu2  ;;  %10224 = vset.pattern.permute.xlu1 %v15063_v32  ;;  %3435 = vperm.xlu2 %10222, %v11101_v0  }
 0x13a   : > { %v1533_v41 = vpop.f32.mrf.mxu3  ;;  %v1993_v1 = vmul.f32 %v1799_v63, %v1723_v9  ;;  %v1317_v61 = vadd.f32 %v1215_v36, %v948_v7  ;;  %v949_v26 = vpop.f32.mrf.mxu1  ;;  %1978 = vperm.xlu1 %10224, %v11369_v18   ;;  %v1069_v7 = vld [vmem:[%s10771_s22 + $0x10a] sm:$0xff]  ;;  %v1070_v63 = vld [vmem:[%s10771_s22 + $0x112] sm:$0xff]  ;;  %v1384_v9 = vld [vmem:[%s10771_s22 + $0x11b] sm:$0xff] }
 0x13b   : > { %v950_v54 = vadd.f32 %v949_v26, %v751_v35  ;;  %v2160_v40 = vld [vmem:[#allocation2 + $0x46] sm:$0xff]  ;;  %3447 = vperm.xlu0 %10223, %v11125_v31   ;;  %v1814_v36 = vpop.permute.xlu1 %1813  ;;  %v1100_v45 = vpack.c.bf16 %v1070_v63, %v1069_v7 }
 0x13c   : > { %2044 = vst.msk [vmem:[#allocation2 + $0x50] sm:$0xff] %vm650_vm0, %v1993_v1  ;;  %v1630_v43 = vadd.f32 %v1528_v14, %v1317_v61  ;;  %v754_v52 = vpop.f32.mrf.mxu0  ;;  %v1385_v35 = vld [vmem:[%s10771_s22 + $0x123] sm:$0xff] }
 0x13d   : > { %v1414_v31 = vpack.c.bf16 %v1385_v35, %v1384_v9 }
 0x13e   : > { %v1679_v51 = vadd.f32 %v11265_v13, %v1630_v43  ;;  %v563_v43 = vpack.c.bf16 %v533_v12, %v532_v23 }
 0x140   : > { %v1724_v4 = vmax.f32 %v1679_v51, 0.0 }
 0x141   : > { %v1217_v56 = vpop.f32.mrf.mxu2  ;;  %3443 = vperm.xlu2 %10222, %v11002_v58  }
 0x142   : > { %v1535_v21 = vpop.f32.mrf.mxu3  ;;  %v1994_v60 = vmul.f32 %v1804_v62, %v1724_v4  ;;  %v1318_v16 = vadd.f32 %v1217_v56, %v950_v54  ;;  %v952_v14 = vpop.f32.mrf.mxu1  ;;  %1983 = vperm.xlu1 %10224, %v11385_v2  }
 0x143   : > { %v2161_v53 = vld [vmem:[#allocation2 + $0x4e] sm:$0xff]  ;;  %v953_v57 = vadd.f32 %v952_v14, %v754_v52  ;;  %3459 = vperm.xlu0 %10223, %v11149_v46   ;;  %v11392_v4 = vpop.permute.xlu2 %1833  ;;  %v1829_v14 = vpop.permute.xlu1 %1828 }
 0x144   : > { %2045 = vst.msk [vmem:[#allocation2 + $0x58] sm:$0xff] %vm650_vm0, %v1994_v60  ;;  %v1631_v19 = vadd.f32 %v1530_v6, %v1318_v16  ;;  %v2201_v22 = vpack.c.bf16 %v2161_v53, %v2160_v40  ;;  %v756_v8 = vpop.f32.mrf.mxu0  ;;  %v534_v52 = vld [vmem:[%s10771_s22 + $0x108] sm:$0xff]  ;;  %v535_v40 = vld [vmem:[%s10771_s22 + $0x110] sm:$0xff]  ;;  %v1071_v53 = vld [vmem:[%s10771_s22 + $0x11a] sm:$0xff] }
 0x145   : > { %9654 = vmatmul.msk.bf16.gmra.mxu1 %vm650_vm0, %v562_v3 }
 0x146   : > { %v1680_v33 = vadd.f32 %v11265_v13, %v1631_v19  ;;  %9681 = vmatmul.msk.bf16.gmra.mxu2 %vm650_vm0, %v1099_v10  ;;  %9726 = vmatmul.msk.bf16.gmra.mxu0 %vm650_vm0, %v2201_v22  ;;  %v1072_v19 = vld [vmem:[%s10771_s22 + $0x122] sm:$0xff]  ;;  %v1387_v22 = vld [vmem:[%s10771_s22 + $0x133] sm:$0xff] }
 0x147   : > { %9709 = vmatmul.msk.bf16.gmra.mxu3 %vm650_vm0, %v1413_v17 }
 0x148   : > { %v1725_v47 = vmax.f32 %v1680_v33, 0.0 }
 0x149   : > { %v1220_v50 = vpop.f32.mrf.mxu2  ;;  %3455 = vperm.xlu2 %10222, %v11025_v11   ;;  %v1386_v11 = vld [vmem:[%s10771_s22 + $0x12b] sm:$0xff] }
 0x14a   : > { %v1538_v6 = vpop.f32.mrf.mxu3  ;;  %v1995_v59 = vmul.f32 %v1809_v15, %v1725_v47  ;;  %v1319_v29 = vadd.f32 %v1220_v50, %v953_v57  ;;  %v954_v37 = vpop.f32.mrf.mxu1  ;;  %10225 = vset.pattern.permute.xlu1 %v10671_v38  ;;  %v1415_v32 = vpack.c.bf16 %v1387_v22, %v1386_v11  ;;  %v15068_v22 = vld [vmem:[#allocation16_spill] sm:$0xff] }
 0x14b   : > { %v955_v0 = vadd.f32 %v954_v37, %v756_v8  ;;  %v2162_v49 = vld [vmem:[#allocation2 + $0x56] sm:$0xff]  ;;  %3471 = vperm.xlu0 %10223, %v11167_v30   ;;  %v1824_v38 = vpop.permute.xlu0 %1823  ;;  %v11413_v33 = vpop.permute.xlu2 %1848  ;;  %v1101_v37 = vpack.c.bf16 %v1072_v19, %v1071_v53 }
 0x14c   : > { %2046 = vst.msk [vmem:[#allocation2 + $0x60] sm:$0xff] %vm650_vm0, %v1995_v59  ;;  %v1632_v34 = vadd.f32 %v1533_v41, %v1319_v29 }
 0x14e   : > { %v1681_v44 = vadd.f32 %v11265_v13, %v1632_v34 }
 0x150   : > { %v1726_v1 = vmax.f32 %v1681_v44, 0.0 }
 0x151   : > { %v1222_v61 = vpop.f32.mrf.mxu2  ;;  %3467 = vperm.xlu2 %10222, %v11052_v24   ;;  %v11427_v24 = vpop.permute.xlu1 %1843 }
 0x152   : > { %v1540_v26 = vpop.f32.mrf.mxu3  ;;  %v1996_v25 = vmul.f32 %v1814_v36, %v1726_v1  ;;  %v1320_v51 = vadd.f32 %v1222_v61, %v955_v0  ;;  %v957_v41 = vpop.f32.mrf.mxu1  ;;  %v15064_v61 = vld [vmem:[#allocation30_spill] sm:$0xff] }
 0x153   : > { %v2163_v27 = vld [vmem:[#allocation2 + $0x5e] sm:$0xff]  ;;  %v958_v56 = vadd.f32 %v957_v41, %v11015_v5  ;;  %3483 = vperm.xlu0 %10223, %v11182_v55   ;;  %v11430_v9 = vpop.permute.xlu2 %1863  ;;  %v1074_v41 = vld [vmem:[%s10771_s22 + $0x132] sm:$0xff]  ;;  %v1839_v19 = vpop.permute.xlu0 %1838 }
 0x154   : > { %2047 = vst.msk [vmem:[#allocation2 + $0x68] sm:$0xff] %vm650_vm0, %v1996_v25  ;;  %v1633_v39 = vadd.f32 %v1535_v21, %v1320_v51  ;;  %v2202_v62 = vpack.c.bf16 %v2163_v27, %v2162_v49  ;;  %v10576_v5 = vld [vmem:[%s14959_s1 + $0xd8] sm:$0xff]  ;;  %v537_v25 = vld [vmem:[%s10771_s22 + $0x120] sm:$0xff]  ;;  %v1073_v51 = vld [vmem:[%s10771_s22 + $0x12a] sm:$0xff] }
 0x155   : > { %9655 = vmatmul.msk.bf16.gmra.mxu1 %vm650_vm0, %v563_v43  ;;  %3451 = vperm.xlu1 %10225, %v10576_v5   ;;  %v536_v43 = vld [vmem:[%s10771_s22 + $0x118] sm:$0xff] }
 0x156   : > { %v1682_v54 = vadd.f32 %v11265_v13, %v1633_v39  ;;  %9682 = vmatmul.msk.bf16.gmra.mxu2 %vm650_vm0, %v1100_v45  ;;  %9727 = vmatmul.msk.bf16.gmra.mxu0 %vm650_vm0, %v2202_v62  ;;  %v1388_v45 = vld [vmem:[%s10771_s22 + $0x13b] sm:$0xff] }
 0x157   : > { %9710 = vmatmul.msk.bf16.gmra.mxu3 %vm650_vm0, %v1414_v31  ;;  %v1389_v31 = vld [vmem:[%s10771_s22 + $0x143] sm:$0xff] }
 0x158   : > { %v1727_v58 = vmax.f32 %v1682_v54, 0.0  ;;  %v565_v54 = vpack.c.bf16 %v537_v25, %v536_v43 }
 0x159   : > { %v1225_v21 = vpop.f32.mrf.mxu2  ;;  %3479 = vperm.xlu2 %10222, %v11079_v48   ;;  %v15065_v48 = vld [vmem:[#allocation12_spill] sm:$0xff]  ;;  %v11448_v5 = vpop.permute.xlu1 %1858 }
 0x15a   : > { %v1543_v46 = vpop.f32.mrf.mxu3  ;;  %v1997_v3 = vmul.f32 %v1819_v28, %v1727_v58  ;;  %v1321_v10 = vadd.f32 %v1225_v21, %v958_v56  ;;  %v959_v60 = vpop.f32.mrf.mxu1 }
 0x15b   : > { %v960_v15 = vadd.f32 %v959_v60, %v11042_v20  ;;  %v2164_v28 = vld [vmem:[#allocation2 + $0x66] sm:$0xff]  ;;  %v10577_v20 = vld [vmem:[%s14959_s1 + $0xf0] sm:$0xff]  ;;  %3495 = vperm.xlu0 %10223, %v15064_v61  }
 0x15c   : > { %2048 = vst.msk [vmem:[#allocation2 + $0x70] sm:$0xff] %vm650_vm0, %v1997_v3  ;;  %v1634_v16 = vadd.f32 %v1538_v6, %v1321_v10  ;;  %v564_v6 = vpack.c.bf16 %v535_v40, %v534_v52  ;;  %v1416_v3 = vpack.c.bf16 %v1389_v31, %v1388_v45  ;;  %v15066_v10 = vld [vmem:[#allocation13_spill] sm:$0xff]  ;;  %v15067_v40 = vld [vmem:[#allocation34_spill] sm:$0xff]  ;;  %v10581_v31 = vld [vmem:[%s14959_s1 + $0x150] sm:$0xff] }
 0x15d   : > { %3463 = vperm.xlu1 %10225, %v10577_v20   ;;  %v1076_v20 = vld [vmem:[%s10771_s22 + $0x142] sm:$0xff] }
 0x15e   : > { %v1683_v17 = vadd.f32 %v11265_v13, %v1634_v16 }
 0x160   : > { %v1728_v57 = vmax.f32 %v1683_v17, 0.0 }
 0x161   : > { %v1227_v47 = vpop.f32.mrf.mxu2  ;;  %3491 = vperm.xlu2 %10222, %v15066_v10   ;;  %v14977_v10 = vmov 2  }
 0x162   : > { %v1545_v50 = vpop.f32.mrf.mxu3  ;;  %v1998_v59 = vmul.f32 %v1824_v38, %v1728_v57  ;;  %v1322_v30 = vadd.f32 %v1227_v47, %v960_v15  ;;  %v962_v29 = vpop.f32.mrf.mxu1 }
 0x163   : > { %v2165_v34 = vld [vmem:[#allocation2 + $0x6e] sm:$0xff]  ;;  %v963_v7 = vadd.f32 %v962_v29, %v11069_v42  ;;  %3507 = vperm.xlu0 %10223, %v15067_v40   ;;  %v10580_v29 = vld [vmem:[%s14959_s1 + $0x138] sm:$0xff] }
 0x164   : > { %2049 = vst.msk [vmem:[#allocation2 + $0x78] sm:$0xff] %vm650_vm0, %v1998_v59  ;;  %v1635_v8 = vadd.f32 %v1540_v26, %v1322_v30  ;;  %v2203_v44 = vpack.c.bf16 %v2165_v34, %v2164_v28  ;;  %v10578_v42 = vld [vmem:[%s14959_s1 + $0x108] sm:$0xff]  ;;  %v15069_v59 = vld [vmem:[#allocation17_spill] sm:$0xff] }
 0x165   : > { %9656 = vmatmul.msk.bf16.gmra.mxu1 %vm650_vm0, %v564_v6  ;;  %3475 = vperm.xlu1 %10225, %v10578_v42   ;;  %v538_v34 = vld [vmem:[%s10771_s22 + $0x128] sm:$0xff]  ;;  %v1078_v40 = vld [vmem:[%s10771_s22 + $0x152] sm:$0xff] }
 0x166   : > { %v1684_v23 = vadd.f32 %v11265_v13, %v1635_v8  ;;  %9683 = vmatmul.msk.bf16.gmra.mxu2 %vm650_vm0, %v1101_v37  ;;  %9728 = vmatmul.msk.bf16.gmra.mxu0 %vm650_vm0, %v2203_v44  ;;  %v11469_v37 = vpop.permute.xlu1 %1873  ;;  %v539_v8 = vld [vmem:[%s10771_s22 + $0x130] sm:$0xff]  ;;  %v1075_v44 = vld [vmem:[%s10771_s22 + $0x13a] sm:$0xff] }
 0x167   : > { %9711 = vmatmul.msk.bf16.gmra.mxu3 %vm650_vm0, %v1415_v32 }
 0x168   : > { %v1729_v12 = vmax.f32 %v1684_v23, 0.0  ;;  %v1390_v23 = vld [vmem:[%s10771_s22 + $0x14b] sm:$0xff] }
 0x169   : > { %v1230_v63 = vpop.f32.mrf.mxu2  ;;  %3503 = vperm.xlu2 %10222, %v15069_v59  }
 0x16a   : > { %v1548_v55 = vpop.f32.mrf.mxu3  ;;  %v1999_v35 = vmul.f32 %v1829_v14, %v1729_v12  ;;  %v1323_v36 = vadd.f32 %v1230_v63, %v963_v7  ;;  %v964_v1 = vpop.f32.mrf.mxu1  ;;  %v1391_v12 = vld [vmem:[%s10771_s22 + $0x153] sm:$0xff] }
 0x16b   : > { %v965_v27 = vadd.f32 %v964_v1, %v15065_v48  ;;  %v2166_v60 = vld [vmem:[#allocation2 + $0x76] sm:$0xff]  ;;  %v11450_v14 = vpop.permute.xlu2 %1878  ;;  %3519 = vperm.xlu0 %10223, %v11385_v2   ;;  %v566_v2 = vpack.c.bf16 %v539_v8, %v538_v34  ;;  %v1417_v43 = vpack.c.bf16 %v1391_v12, %v1390_v23 }
 0x16c   : > { %2050 = vst.msk [vmem:[#allocation2 + $0x80] sm:$0xff] %vm650_vm0, %v1999_v35  ;;  %v1636_v0 = vadd.f32 %v1543_v46, %v1323_v36  ;;  %v1102_v46 = vpack.c.bf16 %v1074_v41, %v1073_v51  ;;  %v15070_v63 = vld [vmem:[#allocation20_spill] sm:$0xff]  ;;  %v11481_v35 = vpop.f32.mrf.mxu0 }
 0x16e   : > { %v1685_v26 = vadd.f32 %v11265_v13, %v1636_v0 }
 0x170   : > { %v1730_v49 = vmax.f32 %v1685_v26, 0.0  ;;  %v1103_v26 = vpack.c.bf16 %v1076_v20, %v1075_v44 }
 0x171   : > { %v1232_v39 = vpop.f32.mrf.mxu2  ;;  %3515 = vperm.xlu2 %10222, %v11369_v18   ;;  %v11496_v18 = vpop.permute.xlu1 %1888 }
 0x172   : > { %v1550_v62 = vpop.f32.mrf.mxu3  ;;  %v2000_v58 = vmul.f32 %v11392_v4, %v1730_v49  ;;  %v1324_v56 = vadd.f32 %v1232_v39, %v965_v27  ;;  %v967_v21 = vpop.f32.mrf.mxu1  ;;  %v10579_v4 = vld [vmem:[%s14959_s1 + $0x120] sm:$0xff]  ;;  %v15071_v27 = vld [vmem:[#allocation23_spill] sm:$0xff] }
 0x173   : > { %v2167_v16 = vld [vmem:[#allocation2 + $0x7e] sm:$0xff]  ;;  %3487 = vperm.xlu1 %10225, %v10579_v4   ;;  %v968_v38 = vadd.f32 %v967_v21, %v15068_v22  ;;  %v11471_v32 = vpop.permute.xlu2 %1893  ;;  %v1077_v4 = vld [vmem:[%s10771_s22 + $0x14a] sm:$0xff]  ;;  %10240 = vset.pattern.permute.xlu0 %v14977_v10  ;;  %v1854_v22 = vpop.permute.xlu0 %1853 }
 0x174   : > { %2051 = vst.msk [vmem:[#allocation2 + $0x88] sm:$0xff] %vm650_vm0, %v2000_v58  ;;  %v1637_v17 = vadd.f32 %v1545_v50, %v1324_v56  ;;  %v2204_v52 = vpack.c.bf16 %v2167_v16, %v2166_v60  ;;  %v11516_v60 = vld [vmem:[%s14959_s1 + $0x8] sm:$0xff]  ;;  %v1104_v34 = vpack.c.bf16 %v1078_v40, %v1077_v4  ;;  %v11581_v4 = vld [vmem:[%s14959_s1 + $0x38] sm:$0xff] }
 0x175   : > { %9657 = vmatmul.msk.bf16.gmra.mxu1 %vm650_vm0, %v565_v54 }
 0x176   : > { %v1686_v53 = vadd.f32 %v11265_v13, %v1637_v17  ;;  %9684 = vmatmul.msk.bf16.gmra.mxu2 %vm650_vm0, %v1102_v46  ;;  %9729 = vmatmul.msk.bf16.gmra.mxu0 %vm650_vm0, %v2204_v52  ;;  %v11502_v46 = vpop.f32.mrf.mxu0  ;;  %v540_v17 = vld [vmem:[%s10771_s22 + $0x138] sm:$0xff]  ;;  %v541_v52 = vld [vmem:[%s10771_s22 + $0x140] sm:$0xff] }
 0x177   : > { %9712 = vmatmul.msk.bf16.gmra.mxu3 %vm650_vm0, %v1416_v3 }
 0x178   : > { %v1731_v11 = vmax.f32 %v1686_v53, 0.0  ;;  %v1392_v53 = vld [vmem:[%s10771_s22 + $0x15b] sm:$0xff] }
 0x179   : > { %v1235_v57 = vpop.f32.mrf.mxu2  ;;  %10227 = vset.pattern.permute.xlu2 %v14977_v10  ;;  %v11536_v59 = vpop.permute.xlu1 %1903 }
 0x17a   : > { %v1553_v15 = vpop.f32.mrf.mxu3  ;;  %v2001_v47 = vmul.f32 %v1839_v19, %v1731_v11  ;;  %v1325_v50 = vadd.f32 %v1235_v57, %v968_v38  ;;  %v969_v6 = vpop.f32.mrf.mxu1  ;;  %4347 = vperm.xlu2 %10227, %v11516_v60   ;;  %v1393_v19 = vld [vmem:[%s10771_s22 + $0x163] sm:$0xff] }
 0x17b   : > { %3499 = vperm.xlu1 %10225, %v10580_v29   ;;  %v2168_v25 = vld [vmem:[#allocation2 + $0x86] sm:$0xff]  ;;  %v11498_v49 = vpop.permute.xlu2 %1908  ;;  %v1418_v8 = vpack.c.bf16 %v1393_v19, %v1392_v53 }
 0x17c   : > { %2052 = vst.msk [vmem:[#allocation2 + $0x90] sm:$0xff] %vm650_vm0, %v2001_v47  ;;  %v1638_v30 = vadd.f32 %v1548_v55, %v1325_v50  ;;  %v970_v55 = vadd.f32 %v969_v6, %v15070_v63  ;;  %v11530_v11 = vld [vmem:[%s14959_s1 + $0x28] sm:$0xff]  ;;  %v15072_v57 = vld [vmem:[#allocation26_spill] sm:$0xff]  ;;  %v567_v6 = vpack.c.bf16 %v541_v52, %v540_v17 }
 0x17d   : > { %4363 = vperm.xlu0 %10240, %v11530_v11  }
 0x17e   : > { %v1687_v28 = vadd.f32 %v11265_v13, %v1638_v30 }
 0x180   : > { %v1732_v7 = vmax.f32 %v1687_v28, 0.0 }
 0x181   : > { %v1237_v36 = vpop.f32.mrf.mxu2 }
 0x182   : > { %v11483_v1 = vpop.f32.mrf.mxu3  ;;  %v2002_v0 = vmul.f32 %v11427_v24, %v1732_v7  ;;  %v1326_v42 = vadd.f32 %v1237_v36, %v970_v55  ;;  %v972_v61 = vpop.f32.mrf.mxu1  ;;  %v14981_v55 = vmov 3  }
 0x183   : > { %v2169_v51 = vld [vmem:[#allocation2 + $0x8e] sm:$0xff]  ;;  %3511 = vperm.xlu1 %10225, %v10581_v31   ;;  %v973_v39 = vadd.f32 %v972_v61, %v15071_v27  ;;  %v11538_v23 = vpop.permute.xlu2 %1923 }
 0x184   : > { %2053 = vst.msk [vmem:[#allocation2 + $0x98] sm:$0xff] %vm650_vm0, %v2002_v0  ;;  %v1639_v41 = vadd.f32 %v1550_v62, %v1326_v42  ;;  %v2205_v45 = vpack.c.bf16 %v2169_v51, %v2168_v25  ;;  %v11557_v51 = vpop.permute.xlu1 %1918  ;;  %v543_v27 = vld [vmem:[%s10771_s22 + $0x150] sm:$0xff] }
 0x185   : > { %9658 = vmatmul.msk.bf16.gmra.mxu1 %vm650_vm0, %v566_v2  ;;  %v15073_v2 = vld [vmem:[#allocation29_spill] sm:$0xff]  ;;  %10241 = vset.pattern.permute.xlu0 %v14981_v55 }
 0x186   : > { %v1688_v24 = vadd.f32 %v11265_v13, %v1639_v41  ;;  %9685 = vmatmul.msk.bf16.gmra.mxu2 %vm650_vm0, %v1103_v26  ;;  %9730 = vmatmul.msk.bf16.gmra.mxu0 %vm650_vm0, %v2205_v45 }
 0x187   : > { %9713 = vmatmul.msk.bf16.gmra.mxu3 %vm650_vm0, %v1417_v43 }
 0x188   : > { %v1733_v48 = vmax.f32 %v1688_v24, 0.0 }
 0x189   : > { %v1240_v62 = vpop.f32.mrf.mxu2 }
 0x18a   : > { %v1558_v54 = vpop.f32.mrf.mxu3  ;;  %v2003_v58 = vmul.f32 %v11413_v33, %v1733_v48  ;;  %v1327_v56 = vadd.f32 %v1240_v62, %v973_v39  ;;  %v974_v21 = vpop.f32.mrf.mxu1  ;;  %v11510_v33 = vld [vmem:[%s14959_s1] sm:$0xff]  ;;  %v542_v48 = vld [vmem:[%s10771_s22 + $0x148] sm:$0xff]  ;;  %v14987_v62 = vmov 4  }
 0x18b   : > { %10226 = vset.pattern.permute.xlu1 %v14977_v10  ;;  %v2170_v44 = vld [vmem:[#allocation2 + $0x96] sm:$0xff]  ;;  %4836 = vperm.xlu0 %10241, %v11510_v33   ;;  %v11562_v31 = vpop.permute.xlu2 %1938  ;;  %v568_v52 = vpack.c.bf16 %v543_v27, %v542_v48 }
 0x18c   : > { %2054 = vst.msk [vmem:[#allocation2 + $0xa0] sm:$0xff] %vm650_vm0, %v2003_v58  ;;  %v1640_v3 = vadd.f32 %v1553_v15, %v1327_v56  ;;  %4343 = vperm.xlu1 %10226, %v11510_v33   ;;  %v975_v15 = vadd.f32 %v974_v21, %v15072_v57  ;;  %v1079_v39 = vld [vmem:[%s10771_s22 + $0x15a] sm:$0xff]  ;;  %10229 = vset.pattern.permute.xlu2 %v14987_v62  ;;  %v1394_v58 = vld [vmem:[%s10771_s22 + $0x16b] sm:$0xff] }
 0x18d   : > { %v1395_v56 = vld [vmem:[%s10771_s22 + $0x173] sm:$0xff]  ;;  %5374 = vperm.xlu2 %10229, %v11510_v33   ;;  %v1396_v27 = vld [vmem:[%s10771_s22 + $0x17b] sm:$0xff] }
 0x18e   : > { %v1689_v16 = vadd.f32 %v11265_v13, %v1640_v3  ;;  %v15074_v21 = vld [vmem:[#allocation33_spill] sm:$0xff] }
 0x18f   : > { %v1082_v48 = vld [vmem:[%s10771_s22 + $0x172] sm:$0xff] }
 0x190   : > { %v1734_v38 = vmax.f32 %v1689_v16, 0.0 }
 0x191   : > { %v1242_v47 = vpop.f32.mrf.mxu2 }
 0x192   : > { %v11534_v50 = vpop.f32.mrf.mxu3  ;;  %v2004_v30 = vmul.f32 %v1854_v22, %v1734_v38  ;;  %v1328_v29 = vadd.f32 %v1242_v47, %v975_v15  ;;  %v977_v28 = vpop.f32.mrf.mxu1  ;;  %v1419_v38 = vpack.c.bf16 %v1395_v56, %v1394_v58  ;;  %v15076_v58 = vld [vmem:[#allocation38_spill] sm:$0xff] }
 0x193   : > { %v2171_v20 = vld [vmem:[#allocation2 + $0x9e] sm:$0xff]  ;;  %v11542_v7 = vpop.f32.mrf.mxu0  ;;  %v978_v0 = vadd.f32 %v977_v28, %v15073_v2  ;;  %4864 = vperm.xlu0 %10241, %v11581_v4   ;;  %v14979_v2 = vmov 5  }
 0x194   : > { %2055 = vst.msk [vmem:[#allocation2 + $0xa8] sm:$0xff] %vm650_vm0, %v2004_v30  ;;  %v1641_v12 = vadd.f32 %v11483_v1, %v1328_v29  ;;  %v2206_v63 = vpack.c.bf16 %v2171_v20, %v2170_v44  ;;  %10228 = vset.pattern.permute.xlu1 %v14981_v55  ;;  %v11590_v29 = vpop.permute.xlu1 %1933 }
 0x195   : > { %9659 = vmatmul.msk.bf16.gmra.mxu1 %vm650_vm0, %v567_v6  ;;  %4840 = vperm.xlu1 %10228, %v11516_v60  }
 0x196   : > { %v1690_v36 = vadd.f32 %v11265_v13, %v1641_v12  ;;  %9686 = vmatmul.msk.bf16.gmra.mxu2 %vm650_vm0, %v1104_v34  ;;  %9731 = vmatmul.msk.bf16.gmra.mxu0 %vm650_vm0, %v2206_v63  ;;  %v11596_v34 = vpop.permute.xlu2 %1953 }
 0x197   : > { %9714 = vmatmul.msk.bf16.gmra.mxu3 %vm650_vm0, %v1418_v8  ;;  %10231 = vset.pattern.permute.xlu2 %v14979_v2 }
 0x198   : > { %v1735_v1 = vmax.f32 %v1690_v36, 0.0  ;;  %5912 = vperm.xlu2 %10231, %v11510_v33  }
 0x199   : > { %v1245_v42 = vpop.f32.mrf.mxu2 }
 0x19a   : > { %v11553_v61 = vpop.f32.mrf.mxu3  ;;  %v2005_v26 = vmul.f32 %v11448_v5, %v1735_v1  ;;  %v1329_v43 = vadd.f32 %v1245_v42, %v978_v0  ;;  %v979_v25 = vpop.f32.mrf.mxu1  ;;  %v1080_v5 = vld [vmem:[%s10771_s22 + $0x162] sm:$0xff] }
 0x19b   : > { %v11560_v45 = vpop.f32.mrf.mxu0  ;;  %v980_v3 = vadd.f32 %v979_v25, %v15074_v21  ;;  %v1105_v22 = vpack.c.bf16 %v1080_v5, %v1079_v39  ;;  %v2172_v57 = vld [vmem:[#allocation2 + $0xa6] sm:$0xff]  ;;  %10250 = vset.pattern.permute.xlu0 %v14987_v62 }
 0x19c   : > { %2056 = vst.msk [vmem:[#allocation2 + $0xb0] sm:$0xff] %vm650_vm0, %v2005_v26  ;;  %v1642_v41 = vadd.f32 %v1558_v54, %v1329_v43  ;;  %v544_v26 = vld [vmem:[%s10771_s22 + $0x158] sm:$0xff]  ;;  %v11620_v43 = vld [vmem:[%s14961_s3] ss:$0 sm:$0xff]  ;;  %v1397_v39 = vld [vmem:[%s10771_s22 + $0x183] sm:$0xff]  ;;  %v11628_v5 = vpop.permute.xlu1 %1948 }
 0x19d   : > { %10230 = vset.pattern.permute.xlu1 %v14987_v62 }
 0x19e   : > { %v1691_v24 = vadd.f32 %v11265_v13, %v1642_v41  ;;  %5378 = vperm.xlu1 %10230, %v11516_v60   ;;  %v545_v41 = vld [vmem:[%s10771_s22 + $0x160] sm:$0xff] }
 0x19f   : > { %v569_v21 = vpack.c.bf16 %v545_v41, %v544_v26 }
 0x1a0   : > { %v1736_v54 = vmax.f32 %v1691_v24, 0.0  ;;  %v1081_v24 = vld [vmem:[%s10771_s22 + $0x16a] sm:$0xff]  ;;  %10233 = vset.pattern.permute.xlu2 %v14977_v10 }
 0x1a1   : > { %v1247_v16 = vpop.f32.mrf.mxu2 }
 0x1a2   : > { %v11576_v17 = vpop.f32.mrf.mxu3  ;;  %v2006_v40 = vmul.f32 %v11430_v9, %v1736_v54  ;;  %v1330_v53 = vadd.f32 %v1247_v16, %v980_v3  ;;  %v982_v19 = vpop.f32.mrf.mxu1  ;;  %v1106_v3 = vpack.c.bf16 %v1082_v48, %v1081_v24  ;;  %v546_v24 = vld [vmem:[%s10771_s22 + $0x168] sm:$0xff]  ;;  %v547_v48 = vld [vmem:[%s10771_s22 + $0x170] sm:$0xff] }
 0x1a3   : > { %v2173_v15 = vld [vmem:[#allocation2 + $0xae] sm:$0xff]  ;;  %v11587_v6 = vpop.f32.mrf.mxu0  ;;  %v1869_v9 = vpop.permute.xlu0 %1868 }
 0x1a4   : > { %2057 = vst.msk [vmem:[#allocation2 + $0xb8] sm:$0xff] %vm650_vm0, %v2006_v40  ;;  %v1643_v47 = vadd.f32 %v11534_v50, %v1330_v53  ;;  %v2207_v30 = vpack.c.bf16 %v2173_v15, %v2172_v57  ;;  %v15075_v50 = vld [vmem:[#allocation36_spill] sm:$0xff]  ;;  %v11634_v16 = vpop.permute.xlu2 %1968  ;;  %v11670_v26 = vpop.permute.xlu1 %1963 }
 0x1a5   : > { %9660 = vmatmul.msk.bf16.gmra.mxu1 %vm650_vm0, %v568_v52  ;;  %v983_v44 = vadd.f32 %v982_v19, %v15075_v50  ;;  %v1420_v19 = vpack.c.bf16 %v1397_v39, %v1396_v27  ;;  %v1083_v27 = vld [vmem:[%s10771_s22 + $0x17a] sm:$0xff]  ;;  %v1084_v39 = vld [vmem:[%s10771_s22 + $0x182] sm:$0xff] }
 0x1a6   : > { %v1692_v28 = vadd.f32 %v11265_v13, %v1643_v47  ;;  %9687 = vmatmul.msk.bf16.gmra.mxu2 %vm650_vm0, %v1105_v22  ;;  %9732 = vmatmul.msk.bf16.gmra.mxu0 %vm650_vm0, %v2207_v30  ;;  %v11605_v13 = vld [vmem:[%s14959_s1 + $0x10] sm:$0xff]  ;;  %v11641_v22 = vld [vmem:[%s14959_s1 + $0x48] sm:$0xff]  ;;  %v10589_v30 = vld [vmem:[%s14959_s1 + $0x18] sm:$0xff] }
 0x1a7   : > { %9715 = vmatmul.msk.bf16.gmra.mxu3 %vm650_vm0, %v1419_v38  ;;  %10232 = vset.pattern.permute.xlu1 %v14977_v10 }
 0x1a8   : > { %v1737_v8 = vmax.f32 %v1692_v28, 0.0  ;;  %4351 = vperm.xlu1 %10232, %v11605_v13   ;;  %5382 = vperm.xlu0 %10250, %v11605_v13  }
 0x1a9   : > { %v1250_v20 = vpop.f32.mrf.mxu2  ;;  %4355 = vperm.xlu2 %10233, %v10589_v30  }
 0x1aa   : > { %v11600_v12 = vpop.f32.mrf.mxu3  ;;  %v2007_v63 = vmul.f32 %v1869_v9, %v1737_v8  ;;  %v1331_v36 = vadd.f32 %v1250_v20, %v983_v44  ;;  %v984_v1 = vpop.f32.mrf.mxu1  ;;  %v15077_v9 = vld [vmem:[#allocation6_spill] sm:$0xff] }
 0x1ab   : > { %v11613_v42 = vpop.f32.mrf.mxu0  ;;  %v985_v56 = vadd.f32 %v984_v1, %v15076_v58  ;;  %v2174_v38 = vld [vmem:[#allocation2 + $0xb6] sm:$0xff]  ;;  %v1884_v58 = vpop.permute.xlu0 %1883 }
 0x1ac   : > { %2058 = vst.msk [vmem:[#allocation2 + $0xc0] sm:$0xff] %vm650_vm0, %v2007_v63  ;;  %v1644_v0 = vadd.f32 %v11553_v61, %v1331_v36  ;;  %v11662_v1 = vpop.permute.xlu2 %3347 }
 0x1ad   : > { %15078 = vst [vmem:[#allocation30_spill] sm:$0xff] %v11662_v1 }
 0x1ae   : > { %v1693_v25 = vadd.f32 %v11620_v43, %v1644_v0  ;;  %v11667_v0 = vld [vmem:[%s14959_s1 + $0x60] sm:$0xff] }
 0x1b0   : > { %v1738_v61 = vmax.f32 %v1693_v25, 0.0  ;;  %10234 = vset.pattern.permute.xlu1 %v14981_v55  ;;  %5410 = vperm.xlu0 %10250, %v11641_v22  }
 0x1b1   : > { %v1252_v54 = vpop.f32.mrf.mxu2  ;;  %4844 = vperm.xlu1 %10234, %v11605_v13   ;;  %10235 = vset.pattern.permute.xlu2 %v14981_v55 }
 0x1b2   : > { %v11631_v33 = vpop.f32.mrf.mxu3  ;;  %v2008_v52 = vmul.f32 %v11469_v37, %v1738_v61  ;;  %v1332_v40 = vadd.f32 %v1252_v54, %v985_v56  ;;  %v987_v53 = vpop.f32.mrf.mxu1  ;;  %4848 = vperm.xlu2 %10235, %v10589_v30   ;;  %v1398_v61 = vld [vmem:[%s10771_s22 + $0x18b] sm:$0xff] }
 0x1b3   : > { %v2175_v57 = vld [vmem:[#allocation2 + $0xbe] sm:$0xff]  ;;  %v11646_v47 = vpop.f32.mrf.mxu0  ;;  %v988_v8 = vadd.f32 %v987_v53, %v15077_v9  ;;  %v15079_v54 = vld [vmem:[#allocation8_spill] sm:$0xff] }
 0x1b4   : > { %2059 = vst.msk [vmem:[#allocation2 + $0xc8] sm:$0xff] %vm650_vm0, %v2008_v52  ;;  %v1645_v15 = vadd.f32 %v11576_v17, %v1332_v40  ;;  %v2208_v37 = vpack.c.bf16 %v2175_v57, %v2174_v38  ;;  %v1107_v38 = vpack.c.bf16 %v1084_v39, %v1083_v27  ;;  %v1421_v57 = vpack.c.bf16 %v1398_v61, %v1398_v61  ;;  %v10591_v39 = vld [vmem:[%s14959_s1 + $0x20] sm:$0xff] }
 0x1b5   : > { %9661 = vmatmul.msk.bf16.gmra.mxu1 %vm650_vm0, %v569_v21 }
 0x1b6   : > { %v1694_v28 = vadd.f32 %v11620_v43, %v1645_v15  ;;  %9688 = vmatmul.msk.bf16.gmra.mxu2 %vm650_vm0, %v1106_v3  ;;  %9733 = vmatmul.msk.bf16.gmra.mxu0 %vm650_vm0, %v2208_v37  ;;  %v11686_v15 = vpop.permute.xlu2 %3359 }
 0x1b7   : > { %9716 = vmatmul.msk.bf16.gmra.mxu3 %vm650_vm0, %v1420_v19  ;;  %15080 = vst [vmem:[#allocation12_spill] sm:$0xff] %v11686_v15 }
 0x1b8   : > { %v1739_v17 = vmax.f32 %v1694_v28, 0.0  ;;  %5422 = vperm.xlu0 %10250, %v11667_v0  }
 0x1b9   : > { %v1255_v50 = vpop.f32.mrf.mxu2  ;;  %10236 = vset.pattern.permute.xlu1 %v14987_v62 }
 0x1ba   : > { %v11658_v44 = vpop.f32.mrf.mxu3  ;;  %v2009_v20 = vmul.f32 %v11450_v14, %v1739_v17  ;;  %v1333_v63 = vadd.f32 %v1255_v50, %v988_v8  ;;  %v989_v36 = vpop.f32.mrf.mxu1  ;;  %5386 = vperm.xlu1 %10236, %v10589_v30   ;;  %10237 = vset.pattern.permute.xlu2 %v14979_v2 }
 0x1bb   : > { %v11674_v25 = vpop.f32.mrf.mxu0  ;;  %v990_v21 = vadd.f32 %v989_v36, %v15079_v54  ;;  %v2176_v37 = vld [vmem:[#allocation2 + $0xc6] sm:$0xff]  ;;  %v11690_v17 = vpop.permute.xlu1 %3343  ;;  %5920 = vperm.xlu2 %10237, %v11605_v13  }
 0x1bc   : > { %2060 = vst.msk [vmem:[#allocation2 + $0xd0] sm:$0xff] %vm650_vm0, %v2009_v20  ;;  %v1646_v14 = vadd.f32 %v11600_v12, %v1333_v63  ;;  %v570_v12 = vpack.c.bf16 %v547_v48, %v546_v24  ;;  %v15081_v63 = vld [vmem:[#allocation10_spill] sm:$0xff] }
 0x1be   : > { %v1695_v41 = vadd.f32 %v11620_v43, %v1646_v14  ;;  %v11706_v48 = vpop.permute.xlu2 %3367 }
 0x1bf   : > { %15082 = vst [vmem:[#allocation13_spill] sm:$0xff] %v11706_v48 }
 0x1c0   : > { %v1740_v56 = vmax.f32 %v1695_v41, 0.0  ;;  %10271 = vset.pattern.permute.xlu0 %v14979_v2 }
 0x1c1   : > { %v1257_v3 = vpop.f32.mrf.mxu2  ;;  %5916 = vperm.xlu0 %10271, %v11516_v60  }
 0x1c2   : > { %v11684_v52 = vpop.f32.mrf.mxu3  ;;  %v2010_v40 = vmul.f32 %v1884_v58, %v1740_v56  ;;  %v1334_v53 = vadd.f32 %v1257_v3, %v990_v21  ;;  %v992_v19 = vpop.f32.mrf.mxu1  ;;  %10238 = vset.pattern.permute.xlu1 %v14979_v2  ;;  %v548_v58 = vld [vmem:[%s10771_s22 + $0x178] sm:$0xff]  ;;  %v1085_v56 = vld [vmem:[%s10771_s22 + $0x18a] sm:$0xff]  ;;  %v15084_v21 = vld [vmem:[#allocation14_spill] sm:$0xff] }
 0x1c3   : > { %v2177_v28 = vld [vmem:[#allocation2 + $0xce] sm:$0xff]  ;;  %v11695_v8 = vpop.f32.mrf.mxu0  ;;  %5924 = vperm.xlu1 %10238, %v10589_v30   ;;  %v993_v36 = vadd.f32 %v992_v19, %v15081_v63  ;;  %v11708_v27 = vpop.permute.xlu1 %3355  ;;  %10239 = vset.pattern.permute.xlu2 %v14977_v10  ;;  %v2932_v19 = vld [vmem:[#allocation2 + $0x20] sm:$0xff]  ;;  %v11733_v63 = vld [vmem:[%s14959_s1 + $0x58] sm:$0xff] }
 0x1c4   : > { %2061 = vst.msk [vmem:[#allocation2 + $0xd8] sm:$0xff] %vm650_vm0, %v2010_v40  ;;  %v1647_v9 = vadd.f32 %v11631_v33, %v1334_v53  ;;  %v2209_v50 = vpack.c.bf16 %v2177_v28, %v2176_v37  ;;  %v571_v53 = vpack.c.bf16 %v548_v58, %v548_v58  ;;  %4359 = vperm.xlu2 %10239, %v10591_v39  }
 0x1c5   : > { %9662 = vmatmul.msk.bf16.gmra.mxu1 %vm650_vm0, %v570_v12  ;;  %15083 = vst [vmem:[#allocation34_spill] sm:$0xff] %v11708_v27  ;;  %v1108_v37 = vpack.c.bf16 %v1085_v56, %v1085_v56 }
 0x1c6   : > { %v1696_v20 = vadd.f32 %v11620_v43, %v1647_v9  ;;  %9689 = vmatmul.msk.bf16.gmra.mxu2 %vm650_vm0, %v1107_v38  ;;  %9734 = vmatmul.msk.bf16.gmra.mxu0 %vm650_vm0, %v2209_v50  ;;  %v11726_v28 = vpop.permute.xlu2 %3379 }
 0x1c7   : > { %9717 = vmatmul.msk.bf16.gmra.mxu3 %vm650_vm0, %v1421_v57  ;;  %15085 = vst [vmem:[#allocation16_spill] sm:$0xff] %v11726_v28 }
 0x1c8   : > { %v1741_v60 = vmax.f32 %v1696_v20, 0.0  ;;  %v2931_v20 = vld [vmem:[#allocation2 + $0x18] sm:$0xff] }
 0x1c9   : > { %v1260_v33 = vpop.f32.mrf.mxu2  ;;  %5928 = vperm.xlu0 %10271, %v10591_v39  }
 0x1ca   : > { %v1578_v30 = vpop.f32.mrf.mxu3  ;;  %v2011_v14 = vmul.f32 %v11496_v18, %v1741_v60  ;;  %v1335_v41 = vadd.f32 %v1260_v33, %v993_v36  ;;  %v994_v24 = vpop.f32.mrf.mxu1 }
 0x1cb   : > { %v11715_v61 = vpop.f32.mrf.mxu0  ;;  %10242 = vset.pattern.permute.xlu1 %v14981_v55  ;;  %v995_v3 = vadd.f32 %v994_v24, %v15084_v21  ;;  %v2178_v9 = vld [vmem:[#allocation2 + $0xd6] sm:$0xff]  ;;  %v11728_v60 = vpop.permute.xlu1 %3363 }
 0x1cc   : > { %2062 = vst.msk [vmem:[#allocation2 + $0xe0] sm:$0xff] %vm650_vm0, %v2011_v14  ;;  %v1648_v13 = vadd.f32 %v11658_v44, %v1335_v41  ;;  %4852 = vperm.xlu1 %10242, %v10591_v39   ;;  %v2976_v14 = vpack.c.bf16 %v2932_v19, %v2931_v20  ;;  %v1899_v24 = vpop.permute.xlu0 %1898  ;;  %10243 = vset.pattern.permute.xlu2 %v14981_v55  ;;  %v2620_v55 = vld [vmem:[#allocation2 + $0x27] sm:$0xff] }
 0x1cd   : > { %15086 = vst [vmem:[#allocation17_spill] sm:$0xff] %v11728_v60  ;;  %4856 = vperm.xlu2 %10243, %v11530_v11  }
 0x1ce   : > { %v1697_v18 = vadd.f32 %v11620_v43, %v1648_v13  ;;  %v11758_v19 = vpop.permute.xlu2 %3391 }
 0x1cf   : > { %15088 = vst [vmem:[#allocation20_spill] sm:$0xff] %v11758_v19 }
 0x1d0   : > { %v1742_v54 = vmax.f32 %v1697_v18, 0.0 }
 0x1d1   : > { %v1262_v12 = vpop.f32.mrf.mxu2  ;;  %5956 = vperm.xlu0 %10271, %v11733_v63  }
 0x1d2   : > { %v11723_v40 = vpop.f32.mrf.mxu3  ;;  %v2012_v44 = vmul.f32 %v11471_v32, %v1742_v54  ;;  %v1336_v38 = vadd.f32 %v1262_v12, %v995_v3  ;;  %v997_v57 = vpop.f32.mrf.mxu1  ;;  %v11752_v12 = vld [vmem:[%s14959_s1 + $0x70] sm:$0xff] }
 0x1d3   : > { %v2179_v50 = vld [vmem:[#allocation2 + $0xde] sm:$0xff]  ;;  %v11738_v36 = vpop.f32.mrf.mxu0 }
 0x1d4   : > { %2063 = vst.msk [vmem:[#allocation2 + $0xe8] sm:$0xff] %vm650_vm0, %v2012_v44  ;;  %v1649_v32 = vadd.f32 %v11684_v52, %v1336_v38  ;;  %v2210_v33 = vpack.c.bf16 %v2179_v50, %v2178_v9  ;;  %10244 = vset.pattern.permute.xlu1 %v14987_v62  ;;  %v15087_v52 = vld [vmem:[#allocation18_spill] sm:$0xff]  ;;  %v11760_v44 = vpop.permute.xlu1 %3375  ;;  %v15090_v50 = vld [vmem:[#allocation21_spill] sm:$0xff] }
 0x1d5   : > { %9663 = vmatmul.msk.bf16.gmra.mxu1 %vm650_vm0, %v571_v53  ;;  %5390 = vperm.xlu1 %10244, %v10591_v39   ;;  %v998_v18 = vadd.f32 %v997_v57, %v15087_v52  ;;  %15089 = vst [vmem:[#allocation23_spill] sm:$0xff] %v11760_v44  ;;  %v2082_v57 = vld [vmem:[#allocation2 + $0x5] sm:$0xff] }
 0x1d6   : > { %v1698_v41 = vadd.f32 %v11620_v43, %v1649_v32  ;;  %9690 = vmatmul.msk.bf16.gmra.mxu2 %vm650_vm0, %v1108_v37  ;;  %9735 = vmatmul.msk.bf16.gmra.mxu0 %vm650_vm0, %v2210_v33  ;;  %v2083_v37 = vld [vmem:[#allocation2 + $0xd] sm:$0xff] }
 0x1d7   : > { %9803 = vmatmul.msk.bf16.vlgmr.msra.gmra.mxu3 %vm650_vm0, %v2976_v14  ;;  %v2619_v14 = vld [vmem:[#allocation2 + $0x1f] sm:$0xff]  ;;  %10245 = vset.pattern.permute.xlu2 %v14987_v62 }
 0x1d8   : > { %v1743_v13 = vmax.f32 %v1698_v41, 0.0  ;;  %v2934_v41 = vld [vmem:[#allocation2 + $0x30] sm:$0xff]  ;;  %5394 = vperm.xlu2 %10245, %v11530_v11  }
 0x1d9   : > { %v1265_v58 = vpop.f32.mrf.mxu2  ;;  %5968 = vperm.xlu0 %10271, %v11752_v12  }
 0x1da   : > { %v1583_v56 = vpop.f32.mrf.mxu3  ;;  %v2013_v54 = vmul.f32 %v1899_v24, %v1743_v13  ;;  %v1337_v21 = vadd.f32 %v1265_v58, %v998_v18  ;;  %v999_v3 = vpop.f32.mrf.mxu1  ;;  %v2618_v18 = vld [vmem:[#allocation2 + $0x17] sm:$0xff] }
 0x1db   : > { %v11756_v53 = vpop.f32.mrf.mxu0  ;;  %v1000_v20 = vadd.f32 %v999_v3, %v15090_v50  ;;  %v2180_v58 = vld [vmem:[#allocation2 + $0xe6] sm:$0xff] }
 0x1dc   : > { %2064 = vst.msk [vmem:[#allocation2 + $0xf0] sm:$0xff] %vm650_vm0, %v2013_v54  ;;  %v1650_v39 = vadd.f32 %v1578_v30, %v1337_v21  ;;  %v2127_v30 = vpack.c.bf16 %v2083_v37, %v2082_v57  ;;  %v2933_v21 = vld [vmem:[#allocation2 + $0x28] sm:$0xff]  ;;  %v11776_v37 = vpop.permute.xlu2 %3403 }
 0x1dd   : > { %10246 = vset.pattern.permute.xlu1 %v14979_v2  ;;  %v2977_v57 = vpack.c.bf16 %v2934_v41, %v2933_v21  ;;  %15092 = vst [vmem:[#allocation29_spill] sm:$0xff] %v11776_v37  ;;  %v2084_v2 = vld [vmem:[#allocation2 + $0x15] sm:$0xff] }
 0x1de   : > { %v1699_v38 = vadd.f32 %v11620_v43, %v1650_v39  ;;  %5932 = vperm.xlu1 %10246, %v11530_v11   ;;  %v11784_v11 = vld [vmem:[%s14959_s1 + $0x40] sm:$0xff] }
 0x1e0   : > { %v1744_v9 = vmax.f32 %v1699_v38, 0.0  ;;  %10247 = vset.pattern.permute.xlu2 %v14977_v10 }
 0x1e1   : > { %v1267_v32 = vpop.f32.mrf.mxu2  ;;  %10280 = vset.pattern.permute.xlu0 %v14977_v10 }
 0x1e2   : > { %v11766_v33 = vpop.f32.mrf.mxu3  ;;  %v2014_v24 = vmul.f32 %v11536_v59, %v1744_v9  ;;  %v1338_v13 = vadd.f32 %v1267_v32, %v1000_v20  ;;  %v1002_v52 = vpop.f32.mrf.mxu1  ;;  %v2663_v59 = vpack.c.bf16 %v2619_v14, %v2618_v18  ;;  %4375 = vperm.xlu0 %10280, %v11784_v11   ;;  %v15094_v20 = vld [vmem:[#allocation24_spill] sm:$0xff] }
 0x1e3   : > { %v2181_v54 = vld [vmem:[#allocation2 + $0xee] sm:$0xff]  ;;  %v11774_v39 = vpop.f32.mrf.mxu0  ;;  %v11779_v9 = vpop.permute.xlu1 %3387  ;;  %v1003_v32 = vadd.f32 %v1002_v52, %v15094_v20 }
 0x1e4   : > { %2065 = vst.msk [vmem:[#allocation2 + $0xf8] sm:$0xff] %vm650_vm0, %v2014_v24  ;;  %v1651_v3 = vadd.f32 %v11723_v40, %v1338_v13  ;;  %v2211_v38 = vpack.c.bf16 %v2181_v54, %v2180_v58  ;;  %v11799_v54 = vpop.permute.xlu2 %3415  ;;  %v10595_v52 = vld [vmem:[%s14959_s1 + $0x30] sm:$0xff] }
 0x1e5   : > { %15091 = vst [vmem:[#allocation26_spill] sm:$0xff] %v11774_v39  ;;  %9749 = vmatmul.msk.bf16.vlgmr.msra.gmra.mxu1 %vm650_vm0, %v2127_v30  ;;  %4367 = vperm.xlu2 %10247, %v10595_v52  }
 0x1e6   : > { %15093 = vst [vmem:[#allocation33_spill] sm:$0xff] %v11779_v9  ;;  %v1700_v40 = vadd.f32 %v11620_v43, %v1651_v3  ;;  %9776 = vmatmul.msk.bf16.vlgmr.msra.gmra.mxu2 %vm650_vm0, %v2663_v59  ;;  %9736 = vmatmul.msk.bf16.gmra.mxu0 %vm650_vm0, %v2211_v38  ;;  %v1914_v3 = vpop.permute.xlu0 %1913  ;;  %v15098_v59 = vld [vmem:[#allocation27_spill] sm:$0xff] }
 0x1e7   : > { %9804 = vmatmul.msk.bf16.gmra.mxu3 %vm650_vm0, %v2977_v57  ;;  %10248 = vset.pattern.permute.xlu1 %v14977_v10  ;;  %15096 = vst [vmem:[#allocation38_spill] sm:$0xff] %v11799_v54 }
 0x1e8   : > { %v1745_v50 = vmax.f32 %v1700_v40, 0.0  ;;  %4371 = vperm.xlu1 %10248, %v11581_v4   ;;  %v2085_v40 = vld [vmem:[#allocation2 + $0x1d] sm:$0xff] }
 0x1e9   : > { %v1270_v30 = vpop.f32.mrf.mxu2  ;;  %v2128_v37 = vpack.c.bf16 %v2085_v40, %v2084_v2  ;;  %v10597_v2 = vld [vmem:[%s14959_s1 + $0x90] sm:$0xff] }
 0x1ea   : > { %v1588_v14 = vpop.f32.mrf.mxu3  ;;  %v2015_v41 = vmul.f32 %v11498_v49, %v1745_v50  ;;  %v1339_v24 = vadd.f32 %v1270_v30, %v1003_v32  ;;  %v1004_v13 = vpop.f32.mrf.mxu1  ;;  %v11809_v49 = vld [vmem:[%s14959_s1 + $0x78] sm:$0xff]  ;;  %v2621_v50 = vld [vmem:[#allocation2 + $0x2f] sm:$0xff]  ;;  %v2936_v30 = vld [vmem:[#allocation2 + $0x40] sm:$0xff] }
 0x1eb   : > { %v11797_v58 = vpop.f32.mrf.mxu0  ;;  %v11804_v21 = vpop.permute.xlu1 %3399  ;;  %4403 = vperm.xlu0 %10280, %v11809_v49   ;;  %v1005_v57 = vadd.f32 %v1004_v13, %v15098_v59  ;;  %v2182_v54 = vld [vmem:[#allocation2 + $0xf6] sm:$0xff] }
 0x1ec   : > { %2066 = vst.msk [vmem:[#allocation2 + $0x100] sm:$0xff] %vm650_vm0, %v2015_v41  ;;  %v1652_v18 = vadd.f32 %v1583_v56, %v1339_v24 }
 0x1ed   : > { %15095 = vst [vmem:[#allocation36_spill] sm:$0xff] %v11797_v58 }
 0x1ee   : > { %15097 = vst [vmem:[#allocation6_spill] sm:$0xff] %v11804_v21  ;;  %v1701_v56 = vadd.f32 %v11620_v43, %v1652_v18  ;;  %v2935_v21 = vld [vmem:[#allocation2 + $0x38] sm:$0xff] }
 0x1ef   : > { %v2978_v58 = vpack.c.bf16 %v2936_v30, %v2935_v21  ;;  %v15104_v30 = vmov 5  }
 0x1f0   : > { %v1746_v38 = vmax.f32 %v1701_v56, 0.0  ;;  %10251 = vset.pattern.permute.xlu1 %v14987_v62  ;;  %v2664_v56 = vpack.c.bf16 %v2621_v50, %v2620_v55  ;;  %v11821_v62 = vpop.permute.xlu2 %3427 }
 0x1f1   : > { %v1272_v20 = vpop.f32.mrf.mxu2  ;;  %5398 = vperm.xlu1 %10251, %v10595_v52   ;;  %15100 = vst [vmem:[#allocation10_spill] sm:$0xff] %v11821_v62  ;;  %v2937_v62 = vld [vmem:[#allocation2 + $0x48] sm:$0xff] }
 0x1f2   : > { %v11814_v32 = vpop.f32.mrf.mxu3  ;;  %v2016_v41 = vmul.f32 %v1914_v3, %v1746_v38  ;;  %v1340_v24 = vadd.f32 %v1272_v20, %v1005_v57  ;;  %v1007_v10 = vpop.f32.mrf.mxu1  ;;  %v15101_v3 = vmov 3  }
 0x1f3   : > { %v2183_v18 = vld [vmem:[#allocation2 + $0xfe] sm:$0xff]  ;;  %v11819_v59 = vpop.f32.mrf.mxu0  ;;  %10249 = vset.pattern.permute.xlu2 %v15101_v3  ;;  %v11825_v38 = vpop.permute.xlu1 %3411  ;;  %4415 = vperm.xlu0 %10280, %v10597_v2   ;;  %v11857_v2 = vld [vmem:[%s14959_s1 + $0x50] sm:$0xff] }
 0x1f4   : > { %2067 = vst.msk [vmem:[#allocation2 + $0x108] sm:$0xff] %vm650_vm0, %v2016_v41  ;;  %v1653_v13 = vadd.f32 %v11766_v33, %v1340_v24  ;;  %v2212_v19 = vpack.c.bf16 %v2183_v18, %v2182_v54  ;;  %4860 = vperm.xlu2 %10249, %v10595_v52   ;;  %v15103_v54 = vld [vmem:[#allocation31_spill] sm:$0xff]  ;;  %v10189_v41 = vld [vmem:[%s14965_s7 + $0x10] sm:$0xff]  ;;  %v15108_v18 = vmov 4  }
 0x1f5   : > { %15099 = vst [vmem:[#allocation8_spill] sm:$0xff] %v11819_v59  ;;  %9750 = vmatmul.msk.bf16.gmra.mxu1 %vm650_vm0, %v2128_v37  ;;  %v1008_v21 = vadd.f32 %v1007_v10, %v15103_v54  ;;  %5257 = vmatpush.bf16.msrb.mxu2 %v10189_v41  ;;  %v2622_v41 = vld [vmem:[#allocation2 + $0x37] sm:$0xff] }
 0x1f6   : > { %15102 = vst [vmem:[#allocation14_spill] sm:$0xff] %v11825_v38  ;;  %v1702_v55 = vadd.f32 %v11620_v43, %v1653_v13  ;;  %9777 = vmatmul.msk.bf16.gmra.mxu2 %vm650_vm0, %v2664_v56  ;;  %9737 = vmatmul.msk.bf16.gmra.mxu0 %vm650_vm0, %v2212_v19  ;;  %v2087_v13 = vld [vmem:[#allocation2 + $0x2d] sm:$0xff] }
 0x1f7   : > { %9805 = vmatmul.msk.bf16.gmra.mxu3 %vm650_vm0, %v2978_v58 }
 0x1f8   : > { %v1747_v33 = vmax.f32 %v1702_v55, 0.0  ;;  %v11845_v10 = vpop.permute.xlu2 %3435  ;;  %v2623_v55 = vld [vmem:[#allocation2 + $0x3f] sm:$0xff] }
 0x1f9   : > { %v1275_v37 = vpop.f32.mrf.mxu2  ;;  %10253 = vset.pattern.permute.xlu1 %v15104_v30  ;;  %15106 = vst [vmem:[#allocation21_spill] sm:$0xff] %v11845_v10  ;;  %v2665_v10 = vpack.c.bf16 %v2623_v55, %v2622_v41 }
 0x1fa   : > { %v11835_v57 = vpop.f32.mrf.mxu3  ;;  %v2017_v40 = vmul.f32 %v11557_v51, %v1747_v33  ;;  %v1341_v50 = vadd.f32 %v1275_v37, %v1008_v21  ;;  %v1009_v20 = vpop.f32.mrf.mxu1  ;;  %5936 = vperm.xlu1 %10253, %v10595_v52   ;;  %v15109_v52 = vld [vmem:[#allocation35_spill] sm:$0xff]  ;;  %v2938_v21 = vld [vmem:[#allocation2 + $0x50] sm:$0xff] }
 0x1fb   : > { %v11840_v58 = vpop.f32.mrf.mxu0  ;;  %v11847_v24 = vpop.permute.xlu1 %3423  ;;  %10289 = vset.pattern.permute.xlu0 %v15101_v3  ;;  %v1010_v56 = vadd.f32 %v1009_v20, %v15109_v52  ;;  %v2184_v20 = vld [vmem:[#allocation2 + $0x106] sm:$0xff]  ;;  %v2979_v9 = vpack.c.bf16 %v2938_v21, %v2937_v62 }
 0x1fc   : > { %2068 = vst.msk [vmem:[#allocation2 + $0x110] sm:$0xff] %vm650_vm0, %v2017_v40  ;;  %v1654_v19 = vadd.f32 %v1588_v14, %v1341_v50  ;;  %10252 = vset.pattern.permute.xlu2 %v15108_v18  ;;  %4876 = vperm.xlu0 %10289, %v11857_v2   ;;  %v1929_v62 = vpop.permute.xlu0 %1928 }
 0x1fd   : > { %15105 = vst [vmem:[#allocation18_spill] sm:$0xff] %v11840_v58  ;;  %5402 = vperm.xlu2 %10252, %v11581_v4  }
 0x1fe   : > { %15107 = vst [vmem:[#allocation24_spill] sm:$0xff] %v11847_v24  ;;  %v1703_v51 = vadd.f32 %v11620_v43, %v1654_v19  ;;  %v2086_v19 = vld [vmem:[#allocation2 + $0x25] sm:$0xff]  ;;  %v15110_v24 = vmov 2  }
 0x1ff   : > { %v2129_v52 = vpack.c.bf16 %v2087_v13, %v2086_v19 }
 0x200   : > { %v1748_v14 = vmax.f32 %v1703_v51, 0.0 }
 0x201   : > { %v1277_v33 = vpop.f32.mrf.mxu2 }
 0x202   : > { %v11860_v54 = vpop.f32.mrf.mxu3  ;;  %v2018_v37 = vmul.f32 %v11538_v23, %v1748_v14  ;;  %v1342_v40 = vadd.f32 %v1277_v33, %v1010_v56  ;;  %v1012_v50 = vpop.f32.mrf.mxu1  ;;  %10255 = vset.pattern.permute.xlu1 %v15110_v24  ;;  %v10190_v23 = vld [vmem:[%s14965_s7 + $0x18] sm:$0xff]  ;;  %v10188_v14 = vld [vmem:[%s14965_s7 + $0x8] sm:$0xff] }
 0x203   : > { %v2185_v51 = vld [vmem:[#allocation2 + $0x10e] sm:$0xff]  ;;  %v11866_v58 = vpop.f32.mrf.mxu0  ;;  %v11874_v56 = vpop.permute.xlu2 %3443  ;;  %4379 = vperm.xlu1 %10255, %v11641_v22   ;;  %5795 = vmatpush.bf16.msrb.mxu3 %v10190_v23  ;;  %v15113_v33 = vld [vmem:[#allocation37_spill] sm:$0xff] }
 0x204   : > { %2069 = vst.msk [vmem:[#allocation2 + $0x118] sm:$0xff] %vm650_vm0, %v2018_v37  ;;  %v1655_v38 = vadd.f32 %v11814_v32, %v1342_v40  ;;  %v2213_v59 = vpack.c.bf16 %v2185_v51, %v2184_v20  ;;  %v11878_v13 = vpop.permute.xlu1 %1978  ;;  %v1013_v21 = vadd.f32 %v1012_v50, %v15113_v33  ;;  %4719 = vmatpush.bf16.msrb.mxu1 %v10188_v14  ;;  %v2089_v14 = vld [vmem:[#allocation2 + $0x3d] sm:$0xff] }
 0x205   : > { %15111 = vst [vmem:[#allocation27_spill] sm:$0xff] %v11866_v58  ;;  %9751 = vmatmul.msk.bf16.gmra.mxu1 %vm650_vm0, %v2129_v52  ;;  %10254 = vset.pattern.permute.xlu2 %v15104_v30  ;;  %v15116_v52 = vld [vmem:[#allocation39_spill] sm:$0xff]  ;;  %v10600_v33 = vld [vmem:[%s14959_s1 + $0xa0] sm:$0xff] }
 0x206   : > { %15112 = vst [vmem:[#allocation31_spill] sm:$0xff] %v11874_v56  ;;  %v1704_v32 = vadd.f32 %v11620_v43, %v1655_v38  ;;  %9778 = vmatmul.msk.bf16.gmra.mxu2 %vm650_vm0, %v2665_v10  ;;  %9738 = vmatmul.msk.bf16.gmra.mxu0 %vm650_vm0, %v2213_v59  ;;  %v11892_v38 = vld [vmem:[%s14959_s1 + $0x88] sm:$0xff] }
 0x207   : > { %9806 = vmatmul.msk.bf16.gmra.mxu3 %vm650_vm0, %v2979_v9  ;;  %5940 = vperm.xlu2 %10254, %v11581_v4  }
 0x208   : > { %v1749_v55 = vmax.f32 %v1704_v32, 0.0  ;;  %4904 = vperm.xlu0 %10289, %v11892_v38  }
 0x209   : > { %v1280_v37 = vpop.f32.mrf.mxu2 }
 0x20a   : > { %v11886_v40 = vpop.f32.mrf.mxu3  ;;  %v2019_v9 = vmul.f32 %v1929_v62, %v1749_v55  ;;  %v1343_v59 = vadd.f32 %v1280_v37, %v1013_v21  ;;  %v1014_v10 = vpop.f32.mrf.mxu1  ;;  %v2940_v55 = vld [vmem:[#allocation2 + $0x60] sm:$0xff] }
 0x20b   : > { %v11897_v19 = vpop.f32.mrf.mxu0  ;;  %v11899_v41 = vpop.permute.xlu2 %3455  ;;  %10257 = vset.pattern.permute.xlu1 %v15101_v3  ;;  %v1015_v23 = vadd.f32 %v1014_v10, %v15116_v52  ;;  %v2186_v10 = vld [vmem:[#allocation2 + $0x116] sm:$0xff] }
 0x20c   : > { %2070 = vst.msk [vmem:[#allocation2 + $0x120] sm:$0xff] %vm650_vm0, %v2019_v9  ;;  %v1656_v50 = vadd.f32 %v11835_v57, %v1343_v59  ;;  %v11902_v4 = vpop.permute.xlu1 %1983  ;;  %4872 = vperm.xlu1 %10257, %v11641_v22   ;;  %v2625_v57 = vld [vmem:[#allocation2 + $0x4f] sm:$0xff] }
 0x20d   : > { %15114 = vst [vmem:[#allocation35_spill] sm:$0xff] %v11897_v19  ;;  %v2088_v59 = vld [vmem:[#allocation2 + $0x35] sm:$0xff] }
 0x20e   : > { %15115 = vst [vmem:[#allocation37_spill] sm:$0xff] %v11899_v41  ;;  %v1705_v20 = vadd.f32 %v11620_v43, %v1656_v50  ;;  %v2624_v50 = vld [vmem:[#allocation2 + $0x47] sm:$0xff]  ;;  %v2130_v52 = vpack.c.bf16 %v2089_v14, %v2088_v59  ;;  %v2939_v41 = vld [vmem:[#allocation2 + $0x58] sm:$0xff] }
 0x20f   : > { %10256 = vset.pattern.permute.xlu2 %v15101_v3  ;;  %v2980_v39 = vpack.c.bf16 %v2940_v55, %v2939_v41  ;;  %v15119_v41 = vld [vmem:[#allocation7_spill] sm:$0xff] }
 0x210   : > { %v1750_v51 = vmax.f32 %v1705_v20, 0.0  ;;  %4916 = vperm.xlu0 %10289, %v10600_v33   ;;  %4868 = vperm.xlu2 %10256, %v11784_v11   ;;  %v2666_v33 = vpack.c.bf16 %v2625_v57, %v2624_v50  ;;  %v1944_v50 = vpop.permute.xlu0 %1943 }
 0x211   : > { %v1282_v32 = vpop.f32.mrf.mxu2 }
 0x212   : > { %v11907_v62 = vpop.f32.mrf.mxu3  ;;  %v2020_v21 = vmul.f32 %v11590_v29, %v1750_v51  ;;  %v1344_v37 = vadd.f32 %v1282_v32, %v1015_v23  ;;  %v1017_v9 = vpop.f32.mrf.mxu1 }
 0x213   : > { %v2187_v20 = vld [vmem:[#allocation2 + $0x11e] sm:$0xff]  ;;  %v11917_v19 = vpop.f32.mrf.mxu0  ;;  %v11919_v29 = vpop.permute.xlu2 %3467  ;;  %v1018_v14 = vadd.f32 %v1017_v9, %v15119_v41 }
 0x214   : > { %2071 = vst.msk [vmem:[#allocation2 + $0x128] sm:$0xff] %vm650_vm0, %v2020_v21  ;;  %v1657_v56 = vadd.f32 %v11860_v54, %v1344_v37  ;;  %v2214_v58 = vpack.c.bf16 %v2187_v20, %v2186_v10  ;;  %v11922_v51 = vpop.permute.xlu1 %3451  ;;  %10259 = vset.pattern.permute.xlu1 %v15104_v30  ;;  %v15122_v20 = vld [vmem:[#allocation9_spill] sm:$0xff] }
 0x215   : > { %15117 = vst [vmem:[#allocation39_spill] sm:$0xff] %v11919_v29  ;;  %9752 = vmatmul.msk.bf16.gmra.mxu1 %vm650_vm0, %v2130_v52  ;;  %5944 = vperm.xlu1 %10259, %v11784_v11   ;;  %v2941_v29 = vld [vmem:[#allocation2 + $0x68] sm:$0xff] }
 0x216   : > { %15118 = vst [vmem:[#allocation40_spill] sm:$0xff] %v11922_v51  ;;  %v1706_v23 = vadd.f32 %v11620_v43, %v1657_v56  ;;  %9779 = vmatmul.msk.bf16.gmra.mxu2 %vm650_vm0, %v2666_v33  ;;  %9739 = vmatmul.msk.bf16.gmra.mxu0 %vm650_vm0, %v2214_v58  ;;  %v2091_v33 = vld [vmem:[#allocation2 + $0x4d] sm:$0xff] }
 0x217   : > { %9807 = vmatmul.msk.bf16.gmra.mxu3 %vm650_vm0, %v2980_v39  ;;  %v11939_v39 = vld [vmem:[%s14959_s1 + $0x98] sm:$0xff] }
 0x218   : > { %v1751_v54 = vmax.f32 %v1706_v23, 0.0  ;;  %10298 = vset.pattern.permute.xlu0 %v15108_v18  ;;  %10258 = vset.pattern.permute.xlu2 %v15108_v18 }
 0x219   : > { %v1285_v32 = vpop.f32.mrf.mxu2  ;;  %5450 = vperm.xlu0 %10298, %v11939_v39   ;;  %5406 = vperm.xlu2 %10258, %v11784_v11   ;;  %v2627_v11 = vld [vmem:[#allocation2 + $0x5f] sm:$0xff] }
 0x21a   : > { %v11931_v57 = vpop.f32.mrf.mxu3  ;;  %v2021_v55 = vmul.f32 %v11562_v31, %v1751_v54  ;;  %v1345_v21 = vadd.f32 %v1285_v32, %v1018_v14  ;;  %v1019_v56 = vpop.f32.mrf.mxu1  ;;  %v2942_v54 = vld [vmem:[#allocation2 + $0x70] sm:$0xff] }
 0x21b   : > { %v11945_v37 = vpop.f32.mrf.mxu0  ;;  %v11947_v31 = vpop.permute.xlu2 %3479  ;;  %v1020_v52 = vadd.f32 %v1019_v56, %v15122_v20 }
 0x21c   : > { %2072 = vst.msk [vmem:[#allocation2 + $0x130] sm:$0xff] %vm650_vm0, %v2021_v55  ;;  %v1658_v58 = vadd.f32 %v11886_v40, %v1345_v21  ;;  %v11949_v9 = vpop.permute.xlu1 %3463  ;;  %v2090_v55 = vld [vmem:[#allocation2 + $0x45] sm:$0xff]  ;;  %v2626_v21 = vld [vmem:[#allocation2 + $0x57] sm:$0xff] }
 0x21d   : > { %15120 = vst [vmem:[#allocation7_spill] sm:$0xff] %v11947_v31  ;;  %10261 = vset.pattern.permute.xlu1 %v15110_v24  ;;  %v2131_v20 = vpack.c.bf16 %v2091_v33, %v2090_v55  ;;  %v2667_v31 = vpack.c.bf16 %v2627_v11, %v2626_v21  ;;  %v15125_v11 = vld [vmem:[#allocation11_spill] sm:$0xff] }
 0x21e   : > { %15121 = vst [vmem:[#allocation41_spill] sm:$0xff] %v11949_v9  ;;  %v1707_v59 = vadd.f32 %v11620_v43, %v1658_v58  ;;  %4383 = vperm.xlu1 %10261, %v11857_v2   ;;  %v10602_v58 = vld [vmem:[%s14959_s1 + $0xb0] sm:$0xff] }
 0x220   : > { %v1752_v10 = vmax.f32 %v1707_v59, 0.0  ;;  %v2188_v59 = vld [vmem:[#allocation2 + $0x126] sm:$0xff] }
 0x221   : > { %v1287_v23 = vpop.f32.mrf.mxu2  ;;  %5462 = vperm.xlu0 %10298, %v10602_v58   ;;  %10260 = vset.pattern.permute.xlu2 %v15104_v30 }
 0x222   : > { %v11955_v40 = vpop.f32.mrf.mxu3  ;;  %v2022_v41 = vmul.f32 %v1944_v50, %v1752_v10  ;;  %v1346_v14 = vadd.f32 %v1287_v23, %v1020_v52  ;;  %v1022_v32 = vpop.f32.mrf.mxu1  ;;  %v2981_v23 = vpack.c.bf16 %v2942_v54, %v2941_v29  ;;  %5948 = vperm.xlu2 %10260, %v11641_v22  }
 0x223   : > { %v2189_v56 = vld [vmem:[#allocation2 + $0x12e] sm:$0xff]  ;;  %v11963_v10 = vpop.f32.mrf.mxu0  ;;  %v11966_v9 = vpop.permute.xlu2 %3491 }
 0x224   : > { %2073 = vst.msk [vmem:[#allocation2 + $0x138] sm:$0xff] %vm650_vm0, %v2022_v41  ;;  %v1659_v50 = vadd.f32 %v11907_v62, %v1346_v14  ;;  %v2215_v52 = vpack.c.bf16 %v2189_v56, %v2188_v59  ;;  %v11969_v58 = vpop.permute.xlu1 %3475  ;;  %v1023_v41 = vadd.f32 %v1022_v32, %v15125_v11  ;;  %v2944_v11 = vld [vmem:[#allocation2 + $0x80] sm:$0xff] }
 0x225   : > { %15123 = vst [vmem:[#allocation9_spill] sm:$0xff] %v11966_v9  ;;  %9753 = vmatmul.msk.bf16.gmra.mxu1 %vm650_vm0, %v2131_v20 }
 0x226   : > { %15124 = vst [vmem:[#allocation42_spill] sm:$0xff] %v11969_v58  ;;  %v1708_v33 = vadd.f32 %v11620_v43, %v1659_v50  ;;  %9780 = vmatmul.msk.bf16.gmra.mxu2 %vm650_vm0, %v2667_v31  ;;  %9740 = vmatmul.msk.bf16.gmra.mxu0 %vm650_vm0, %v2215_v52  ;;  %v10603_v31 = vld [vmem:[%s14959_s1 + $0xa8] sm:$0xff] }
 0x227   : > { %9808 = vmatmul.msk.bf16.gmra.mxu3 %vm650_vm0, %v2981_v23  ;;  %10263 = vset.pattern.permute.xlu1 %v15101_v3  ;;  %v15128_v50 = vld [vmem:[#allocation15_spill] sm:$0xff]  ;;  %v2093_v23 = vld [vmem:[#allocation2 + $0x5d] sm:$0xff] }
 0x228   : > { %v1753_v62 = vmax.f32 %v1708_v33, 0.0  ;;  %4880 = vperm.xlu1 %10263, %v11733_v63  }
 0x229   : > { %v1290_v22 = vpop.f32.mrf.mxu2  ;;  %10307 = vset.pattern.permute.xlu0 %v15104_v30 }
 0x22a   : > { %v11977_v29 = vpop.f32.mrf.mxu3  ;;  %v2023_v54 = vmul.f32 %v11628_v5, %v1753_v62  ;;  %v1347_v14 = vadd.f32 %v1290_v22, %v1023_v41  ;;  %v1024_v55 = vpop.f32.mrf.mxu1  ;;  %5996 = vperm.xlu0 %10307, %v10603_v31   ;;  %10262 = vset.pattern.permute.xlu2 %v15110_v24  ;;  %v2628_v31 = vld [vmem:[#allocation2 + $0x67] sm:$0xff] }
 0x22b   : > { %v11987_v21 = vpop.f32.mrf.mxu0  ;;  %v11990_v59 = vpop.permute.xlu2 %3503  ;;  %4387 = vperm.xlu2 %10262, %v11733_v63   ;;  %v1025_v52 = vadd.f32 %v1024_v55, %v15128_v50  ;;  %v2943_v55 = vld [vmem:[#allocation2 + $0x78] sm:$0xff]  ;;  %v10604_v50 = vld [vmem:[%s14959_s1 + $0xc0] sm:$0xff] }
 0x22c   : > { %2074 = vst.msk [vmem:[#allocation2 + $0x140] sm:$0xff] %vm650_vm0, %v2023_v54  ;;  %v1660_v32 = vadd.f32 %v11931_v57, %v1347_v14  ;;  %v11993_v5 = vpop.permute.xlu1 %3487  ;;  %v2629_v57 = vld [vmem:[#allocation2 + $0x6f] sm:$0xff] }
 0x22d   : > { %15126 = vst [vmem:[#allocation11_spill] sm:$0xff] %v11990_v59  ;;  %v2092_v14 = vld [vmem:[#allocation2 + $0x55] sm:$0xff] }
 0x22e   : > { %15127 = vst [vmem:[#allocation43_spill] sm:$0xff] %v11993_v5  ;;  %v1709_v56 = vadd.f32 %v11620_v43, %v1660_v32  ;;  %v2190_v32 = vld [vmem:[#allocation2 + $0x136] sm:$0xff]  ;;  %v2132_v59 = vpack.c.bf16 %v2093_v23, %v2092_v14 }
 0x230   : > { %v1754_v20 = vmax.f32 %v1709_v56, 0.0  ;;  %10265 = vset.pattern.permute.xlu1 %v15108_v18 }
 0x231   : > { %v1292_v33 = vpop.f32.mrf.mxu2  ;;  %5418 = vperm.xlu1 %10265, %v11733_v63  }
 0x232   : > { %v11997_v62 = vpop.f32.mrf.mxu3  ;;  %v2024_v41 = vmul.f32 %v11596_v34, %v1754_v20  ;;  %v1348_v22 = vadd.f32 %v1292_v33, %v1025_v52  ;;  %v1027_v54 = vpop.f32.mrf.mxu1  ;;  %6008 = vperm.xlu0 %10307, %v10604_v50   ;;  %v2668_v52 = vpack.c.bf16 %v2629_v57, %v2628_v31  ;;  %v2982_v33 = vpack.c.bf16 %v2944_v11, %v2943_v55  ;;  %v15131_v11 = vld [vmem:[#allocation19_spill] sm:$0xff] }
 0x233   : > { %v2191_v56 = vld [vmem:[#allocation2 + $0x13e] sm:$0xff]  ;;  %v12007_v34 = vpop.f32.mrf.mxu0  ;;  %v12009_v5 = vpop.permute.xlu2 %3515  ;;  %10264 = vset.pattern.permute.xlu2 %v15108_v18 }
 0x234   : > { %2075 = vst.msk [vmem:[#allocation2 + $0x148] sm:$0xff] %vm650_vm0, %v2024_v41  ;;  %v1661_v9 = vadd.f32 %v11955_v40, %v1348_v22  ;;  %v2216_v20 = vpack.c.bf16 %v2191_v56, %v2190_v32  ;;  %v12013_v63 = vpop.permute.xlu1 %3499  ;;  %5414 = vperm.xlu2 %10264, %v11857_v2   ;;  %v1959_v40 = vpop.permute.xlu0 %1958  ;;  %v1028_v41 = vadd.f32 %v1027_v54, %v15131_v11  ;;  %v10605_v54 = vld [vmem:[%s14959_s1 + $0xc8] sm:$0xff] }
 0x235   : > { %15129 = vst [vmem:[#allocation15_spill] sm:$0xff] %v12009_v5  ;;  %9754 = vmatmul.msk.bf16.gmra.mxu1 %vm650_vm0, %v2132_v59 }
 0x236   : > { %15130 = vst [vmem:[#allocation44_spill] sm:$0xff] %v12013_v63  ;;  %v1710_v23 = vadd.f32 %v11620_v43, %v1661_v9  ;;  %9781 = vmatmul.msk.bf16.gmra.mxu2 %vm650_vm0, %v2668_v52  ;;  %9741 = vmatmul.msk.bf16.gmra.mxu0 %vm650_vm0, %v2216_v20  ;;  %v2945_v63 = vld [vmem:[#allocation2 + $0x88] sm:$0xff] }
 0x237   : > { %9809 = vmatmul.msk.bf16.gmra.mxu3 %vm650_vm0, %v2982_v33  ;;  %v15134_v33 = vld [vmem:[#allocation22_spill] sm:$0xff] }
 0x238   : > { %v1755_v57 = vmax.f32 %v1710_v23, 0.0 }
 0x239   : > { %v1295_v22 = vpop.f32.mrf.mxu2  ;;  %10267 = vset.pattern.permute.xlu1 %v15110_v24 }
 0x23a   : > { %v1613_v59 = vpop.f32.mrf.mxu3  ;;  %v2025_v14 = vmul.f32 %v1959_v40, %v1755_v57  ;;  %v1349_v31 = vadd.f32 %v1295_v22, %v1028_v41  ;;  %v1029_v32 = vpop.f32.mrf.mxu1  ;;  %4391 = vperm.xlu1 %10267, %v11667_v0   ;;  %10316 = vset.pattern.permute.xlu0 %v15110_v24  ;;  %v2095_v40 = vld [vmem:[#allocation2 + $0x6d] sm:$0xff] }
 0x23b   : > { %v12026_v56 = vpop.f32.mrf.mxu0  ;;  %v12028_v55 = vpop.permute.xlu2 %4347  ;;  %4443 = vperm.xlu0 %10316, %v10605_v54   ;;  %v1030_v23 = vadd.f32 %v1029_v32, %v15134_v33  ;;  %v2946_v41 = vld [vmem:[#allocation2 + $0x90] sm:$0xff]  ;;  %v2094_v54 = vld [vmem:[#allocation2 + $0x65] sm:$0xff] }
 0x23c   : > { %2076 = vst.msk [vmem:[#allocation2 + $0x150] sm:$0xff] %vm650_vm0, %v2025_v14  ;;  %v1662_v9 = vadd.f32 %v11977_v29, %v1349_v31  ;;  %v12033_v50 = vpop.permute.xlu1 %3511  ;;  %10266 = vset.pattern.permute.xlu2 %v15104_v30  ;;  %v2631_v29 = vld [vmem:[#allocation2 + $0x7f] sm:$0xff]  ;;  %v2983_v58 = vpack.c.bf16 %v2946_v41, %v2945_v63 }
 0x23d   : > { %15132 = vst [vmem:[#allocation19_spill] sm:$0xff] %v12028_v55  ;;  %5952 = vperm.xlu2 %10266, %v11857_v2   ;;  %v2630_v55 = vld [vmem:[#allocation2 + $0x77] sm:$0xff] }
 0x23e   : > { %15133 = vst [vmem:[#allocation45_spill] sm:$0xff] %v12033_v50  ;;  %v1711_v20 = vadd.f32 %v11620_v43, %v1662_v9  ;;  %v2192_v9 = vld [vmem:[#allocation2 + $0x146] sm:$0xff]  ;;  %v2133_v50 = vpack.c.bf16 %v2095_v40, %v2094_v54  ;;  %v1974_v54 = vpop.permute.xlu0 %1973 }
 0x240   : > { %v1756_v52 = vmax.f32 %v1711_v20, 0.0  ;;  %v2669_v20 = vpack.c.bf16 %v2631_v29, %v2630_v55 }
 0x241   : > { %v1297_v57 = vpop.f32.mrf.mxu2 }
 0x242   : > { %v12039_v11 = vpop.f32.mrf.mxu3  ;;  %v2026_v22 = vmul.f32 %v11670_v26, %v1756_v52  ;;  %v1350_v14 = vadd.f32 %v1297_v57, %v1030_v23  ;;  %v1032_v31 = vpop.f32.mrf.mxu1  ;;  %10269 = vset.pattern.permute.xlu1 %v15101_v3  ;;  %v10606_v52 = vld [vmem:[%s14959_s1 + $0xe0] sm:$0xff] }
 0x243   : > { %v2193_v5 = vld [vmem:[#allocation2 + $0x14e] sm:$0xff]  ;;  %v12045_v32 = vpop.f32.mrf.mxu0  ;;  %4884 = vperm.xlu1 %10269, %v11667_v0   ;;  %v12048_v26 = vpop.permute.xlu2 %5374  ;;  %4455 = vperm.xlu0 %10316, %v10606_v52  }
 0x244   : > { %2077 = vst.msk [vmem:[#allocation2 + $0x158] sm:$0xff] %vm650_vm0, %v2026_v22  ;;  %v1663_v2 = vadd.f32 %v11997_v62, %v1350_v14  ;;  %v2217_v33 = vpack.c.bf16 %v2193_v5, %v2192_v9  ;;  %v12054_v55 = vpop.permute.xlu1 %4343  ;;  %v15137_v5 = vld [vmem:[#allocation25_spill] sm:$0xff] }
 0x245   : > { %15135 = vst [vmem:[#allocation22_spill] sm:$0xff] %v12048_v26  ;;  %9755 = vmatmul.msk.bf16.gmra.mxu1 %vm650_vm0, %v2133_v50  ;;  %v1033_v62 = vadd.f32 %v1032_v31, %v15137_v5  ;;  %10268 = vset.pattern.permute.xlu2 %v15110_v24  ;;  %v10607_v50 = vld [vmem:[%s14959_s1 + $0x68] sm:$0xff]  ;;  %v2948_v5 = vld [vmem:[#allocation2 + $0xa0] sm:$0xff]  ;;  %v2947_v26 = vld [vmem:[#allocation2 + $0x98] sm:$0xff] }
 0x246   : > { %15136 = vst [vmem:[#allocation46_spill] sm:$0xff] %v12054_v55  ;;  %v1712_v23 = vadd.f32 %v11620_v43, %v1663_v2  ;;  %9782 = vmatmul.msk.bf16.gmra.mxu2 %vm650_vm0, %v2669_v20  ;;  %9742 = vmatmul.msk.bf16.gmra.mxu0 %vm650_vm0, %v2217_v33  ;;  %v15140_v20 = vld [vmem:[#allocation28_spill] sm:$0xff]  ;;  %v2097_v33 = vld [vmem:[#allocation2 + $0x7d] sm:$0xff]  ;;  %v2984_v55 = vpack.c.bf16 %v2948_v5, %v2947_v26 }
 0x247   : > { %9810 = vmatmul.msk.bf16.gmra.mxu3 %vm650_vm0, %v2983_v58  ;;  %4395 = vperm.xlu2 %10268, %v10607_v50   ;;  %v10610_v26 = vld [vmem:[%s14959_s1 + $0xf0] sm:$0xff] }
 0x248   : > { %v1757_v0 = vmax.f32 %v1712_v23, 0.0 }
 0x249   : > { %v1300_v63 = vpop.f32.mrf.mxu2 }
 0x24a   : > { %v12062_v40 = vpop.f32.mrf.mxu3  ;;  %v2027_v43 = vmul.f32 %v11634_v16, %v1757_v0  ;;  %v1351_v29 = vadd.f32 %v1300_v63, %v1033_v62  ;;  %v1034_v57 = vpop.f32.mrf.mxu1  ;;  %v10608_v16 = vld [vmem:[%s14959_s1 + $0xd8] sm:$0xff]  ;;  %v2633_v0 = vld [vmem:[#allocation2 + $0x8f] sm:$0xff] }
 0x24b   : > { %v12069_v41 = vpop.f32.mrf.mxu0  ;;  %10272 = vset.pattern.permute.xlu1 %v15108_v18  ;;  %v12072_v22 = vpop.permute.xlu2 %5912  ;;  %10325 = vset.pattern.permute.xlu0 %v15101_v3  ;;  %v1035_v2 = vadd.f32 %v1034_v57, %v15140_v20 }
 0x24c   : > { %2078 = vst.msk [vmem:[#allocation2 + $0x160] sm:$0xff] %vm650_vm0, %v2027_v43  ;;  %v1664_v58 = vadd.f32 %v1613_v59, %v1351_v29  ;;  %5426 = vperm.xlu1 %10272, %v10607_v50   ;;  %v12075_v14 = vpop.permute.xlu1 %4840  ;;  %4944 = vperm.xlu0 %10325, %v10608_v16   ;;  %v10609_v59 = vld [vmem:[%s14961_s3] ss:$0 sm:$0xff]  ;;  %v2096_v29 = vld [vmem:[#allocation2 + $0x75] sm:$0xff]  ;;  %v2632_v16 = vld [vmem:[#allocation2 + $0x87] sm:$0xff] }
 0x24d   : > { %15138 = vst [vmem:[#allocation25_spill] sm:$0xff] %v12072_v22 }
 0x24e   : > { %15139 = vst [vmem:[#allocation47_spill] sm:$0xff] %v12075_v14  ;;  %v1713_v31 = vadd.f32 %v10609_v59, %v1664_v58  ;;  %v2194_v14 = vld [vmem:[#allocation2 + $0x156] sm:$0xff]  ;;  %v2134_v58 = vpack.c.bf16 %v2097_v33, %v2096_v29 }
 0x24f   : > { %10270 = vset.pattern.permute.xlu2 %v15101_v3 }
 0x250   : > { %v1758_v9 = vmax.f32 %v1713_v31, 0.0  ;;  %4888 = vperm.xlu2 %10270, %v10607_v50  }
 0x251   : > { %v1302_v52 = vpop.f32.mrf.mxu2 }
 0x252   : > { %v1620_v23 = vpop.f32.mrf.mxu3  ;;  %v2028_v62 = vmul.f32 %v1974_v54, %v1758_v9  ;;  %v1352_v63 = vadd.f32 %v1302_v52, %v1035_v2  ;;  %v1037_v43 = vpop.f32.mrf.mxu1 }
 0x253   : > { %v2195_v22 = vld [vmem:[#allocation2 + $0x15e] sm:$0xff]  ;;  %v12087_v31 = vpop.f32.mrf.mxu0  ;;  %v2670_v23 = vpack.c.bf16 %v2633_v0, %v2632_v16  ;;  %v12089_v51 = vpop.permute.xlu2 %4355  ;;  %v2099_v16 = vld [vmem:[#allocation2 + $0x8d] sm:$0xff] }
 0x254   : > { %2079 = vst.msk [vmem:[#allocation2 + $0x168] sm:$0xff] %vm650_vm0, %v2028_v62  ;;  %v1665_v57 = vadd.f32 %v12039_v11, %v1352_v63  ;;  %v2218_v20 = vpack.c.bf16 %v2195_v22, %v2194_v14  ;;  %10274 = vset.pattern.permute.xlu1 %v15104_v30  ;;  %v12093_v54 = vpop.permute.xlu1 %5378  ;;  %v15142_v22 = vld [vmem:[#allocation32_spill] sm:$0xff]  ;;  %4956 = vperm.xlu0 %10325, %v10610_v26  }
 0x255   : > { %15141 = vst [vmem:[#allocation28_spill] sm:$0xff] %v12089_v51  ;;  %9756 = vmatmul.msk.bf16.gmra.mxu1 %vm650_vm0, %v2134_v58  ;;  %5964 = vperm.xlu1 %10274, %v10607_v50   ;;  %v1038_v14 = vadd.f32 %v1037_v43, %v15142_v22  ;;  %v2098_v22 = vld [vmem:[#allocation2 + $0x85] sm:$0xff]  ;;  %v2634_v26 = vld [vmem:[#allocation2 + $0x97] sm:$0xff] }
 0x256   : > { %v1714_v9 = vadd.f32 %v10609_v59, %v1665_v57  ;;  %9783 = vmatmul.msk.bf16.gmra.mxu2 %vm650_vm0, %v2670_v23  ;;  %9743 = vmatmul.msk.bf16.gmra.mxu0 %vm650_vm0, %v2218_v20  ;;  %v2635_v20 = vld [vmem:[#allocation2 + $0x9f] sm:$0xff]  ;;  %v10612_v23 = vld [vmem:[%s14959_s1 + $0xe8] sm:$0xff] }
 0x257   : > { %9811 = vmatmul.msk.bf16.gmra.mxu3 %vm650_vm0, %v2984_v55  ;;  %v10611_v55 = vld [vmem:[%s14959_s1 + $0x60] sm:$0xff] }
 0x258   : > { %v1759_v11 = vmax.f32 %v1714_v9, 0.0  ;;  %10273 = vset.pattern.permute.xlu2 %v15104_v30 }
 0x259   : > { %v1305_v2 = vpop.f32.mrf.mxu2  ;;  %5960 = vperm.xlu2 %10273, %v10611_v55  }
 0x25a   : > { %v3085_v33 = vpop.f32.mrf.mxu3  ;;  %v2029_v52 = vmul.f32 %v11878_v13, %v1759_v11  ;;  %v1353_v0 = vadd.f32 %v1305_v2, %v1038_v14  ;;  %v1039_v5 = vpop.f32.mrf.mxu1  ;;  %v2135_v14 = vpack.c.bf16 %v2099_v16, %v2098_v22  ;;  %v2949_v2 = vld [vmem:[#allocation2 + $0xa8] sm:$0xff] }
 0x25b   : > { %v12109_v62 = vpop.f32.mrf.mxu0  ;;  %v12111_v63 = vpop.permute.xlu2 %4848  ;;  %v2196_v11 = vld [vmem:[#allocation2 + $0x166] sm:$0xff] }
 0x25c   : > { %2080 = vst.msk [vmem:[#allocation2 + $0x170] sm:$0xff] %vm650_vm0, %v2029_v52  ;;  %v1666_v50 = vadd.f32 %v12062_v40, %v1353_v0  ;;  %v12113_v43 = vpop.permute.xlu1 %4351  ;;  %10334 = vset.pattern.permute.xlu0 %v15108_v18  ;;  %v2950_v40 = vld [vmem:[#allocation2 + $0xb0] sm:$0xff]  ;;  %v2671_v0 = vpack.c.bf16 %v2635_v20, %v2634_v26  ;;  %v2101_v26 = vld [vmem:[#allocation2 + $0x9d] sm:$0xff] }
 0x25d   : > { %15143 = vst [vmem:[#allocation32_spill] sm:$0xff] %v12111_v63  ;;  %10276 = vset.pattern.permute.xlu1 %v15101_v3  ;;  %5490 = vperm.xlu0 %10334, %v10612_v23   ;;  %v2985_v5 = vpack.c.bf16 %v2950_v40, %v2949_v2  ;;  %v12146_v40 = vld [vmem:[%s14963_s5] ss:$0 sm:$0xff] }
 0x25e   : > { %15144 = vst [vmem:[#allocation48_spill] sm:$0xff] %v12113_v43  ;;  %v1715_v13 = vadd.f32 %v10609_v59, %v1666_v50  ;;  %4892 = vperm.xlu1 %10276, %v11752_v12   ;;  %v2219_v50 = vpack.c.bf16 %v2196_v11, %v2196_v11 }
 0x260   : > { %v1760_v29 = vmax.f32 %v1715_v13, 0.0 }
 0x261   : > { %v1307_v58 = vpop.f32.mrf.mxu2  ;;  %10275 = vset.pattern.permute.xlu2 %v15110_v24 }
 0x262   : > { %v12118_v57 = vpop.f32.mrf.mxu3  ;;  %v2030_v59 = vmul.f32 %v11902_v4, %v1760_v29  ;;  %v2504_v9 = vpop.f32.mrf.mxu1  ;;  %4399 = vperm.xlu2 %10275, %v11752_v12   ;;  %v10613_v58 = vld [vmem:[%s14959_s1 + $0x100] sm:$0xff] }
 0x263   : > { %v12126_v52 = vpop.f32.mrf.mxu0  ;;  %v12129_v55 = vpop.permute.xlu2 %5920  ;;  %v2505_v13 = vadd.f32 %v2504_v9, %v11481_v35  ;;  %v12151_v35 = vld [vmem:[%s14964_s6] ss:$0 sm:$0xff] }
 0x264   : > { %2081 = vst.msk [vmem:[#allocation2 + $0x178] sm:$0xff] %vm650_vm0, %v2030_v59  ;;  %v12132_v4 = vpop.permute.xlu1 %4844 }
 0x265   : > { %15145 = vst [vmem:[#allocation49_spill] sm:$0xff] %v12129_v55  ;;  %9757 = vmatmul.msk.bf16.gmra.mxu1 %vm650_vm0, %v2135_v14  ;;  %5502 = vperm.xlu0 %10334, %v10613_v58  }
 0x266   : > { %9784 = vmatmul.msk.bf16.gmra.mxu2 %vm650_vm0, %v2671_v0  ;;  %9744 = vmatmul.msk.bf16.gmra.mxu0 %vm650_vm0, %v2219_v50  ;;  %v2952_v50 = vld [vmem:[#allocation2 + $0xc0] sm:$0xff] }
 0x267   : > { %9812 = vmatmul.msk.bf16.gmra.mxu3 %vm650_vm0, %v2985_v5  ;;  %10278 = vset.pattern.permute.xlu1 %v15108_v18  ;;  %v2637_v5 = vld [vmem:[#allocation2 + $0xaf] sm:$0xff] }
 0x268   : > { %5430 = vperm.xlu1 %10278, %v11752_v12  }
 0x269   : > { %v2772_v29 = vpop.f32.mrf.mxu2 }
 0x26a   : > { %v3090_v16 = vpop.f32.mrf.mxu3  ;;  %v2886_v20 = vadd.f32 %v2772_v29, %v2505_v13  ;;  %v2506_v23 = vpop.f32.mrf.mxu1  ;;  %10277 = vset.pattern.permute.xlu2 %v15101_v3 }
 0x26b   : > { %v12153_v9 = vpop.f32.mrf.mxu0  ;;  %v12156_v12 = vpop.permute.xlu2 %4359  ;;  %4896 = vperm.xlu2 %10277, %v11809_v49  }
 0x26c   : > { %v3199_v59 = vadd.f32 %v3085_v33, %v2886_v20  ;;  %15146 = vst [vmem:[#allocation50_spill] sm:$0xff] %v12156_v12  ;;  %v12159_v11 = vpop.permute.xlu1 %5386  ;;  %v2507_v33 = vadd.f32 %v2506_v23, %v11502_v46  ;;  %v2100_v20 = vld [vmem:[#allocation2 + $0x95] sm:$0xff] }
 0x26d   : > { %15147 = vst [vmem:[#allocation51_spill] sm:$0xff] %v12159_v11  ;;  %10343 = vset.pattern.permute.xlu0 %v15104_v30  ;;  %v10614_v46 = vld [vmem:[%s14959_s1 + $0xf8] sm:$0xff]  ;;  %v2136_v23 = vpack.c.bf16 %v2101_v26, %v2100_v20 }
 0x26e   : > { %v3248_v22 = vmul.f32 %v12146_v40, %v3199_v59  ;;  %6036 = vperm.xlu0 %10343, %v10614_v46   ;;  %v2636_v59 = vld [vmem:[#allocation2 + $0xa7] sm:$0xff] }
 0x270   : > { %v3297_v14 = vadd.f32 %v12151_v35, %v3248_v22  ;;  %10281 = vset.pattern.permute.xlu1 %v15104_v30  ;;  %v2951_v22 = vld [vmem:[#allocation2 + $0xb8] sm:$0xff] }
 0x271   : > { %v2774_v2 = vpop.f32.mrf.mxu2  ;;  %5972 = vperm.xlu1 %10281, %v11809_v49  }
 0x272   : > { %v12164_v0 = vpop.f32.mrf.mxu3  ;;  %v3522_v13 = vmul.f32 %v11690_v17, %v3297_v14  ;;  %v2887_v29 = vadd.f32 %v2774_v2, %v2507_v33  ;;  %v2509_v58 = vpop.f32.mrf.mxu1  ;;  %v2672_v14 = vpack.c.bf16 %v2637_v5, %v2636_v59  ;;  %v2986_v33 = vpack.c.bf16 %v2952_v50, %v2951_v22 }
 0x273   : > { %v12175_v11 = vpop.f32.mrf.mxu0  ;;  %v12177_v2 = vpop.permute.xlu2 %4856  ;;  %10279 = vset.pattern.permute.xlu2 %v15108_v18  ;;  %v2510_v5 = vadd.f32 %v2509_v58, %v11542_v7 }
 0x274   : > { %3573 = vst.msk [vmem:[#allocation3 + $0x18] sm:$0xff] %vm650_vm0, %v3522_v13  ;;  %v3200_v12 = vadd.f32 %v12118_v57, %v2887_v29  ;;  %v12181_v51 = vpop.permute.xlu1 %5924  ;;  %5434 = vperm.xlu2 %10279, %v11809_v49   ;;  %v12204_v22 = vpop.permute.xlu0 %3351 }
 0x275   : > { %15148 = vst [vmem:[#allocation52_spill] sm:$0xff] %v12177_v2  ;;  %9758 = vmatmul.msk.bf16.gmra.mxu1 %vm650_vm0, %v2136_v23  ;;  %v10617_v2 = vld [vmem:[%s14959_s1 + $0x128] sm:$0xff] }
 0x276   : > { %15149 = vst [vmem:[#allocation53_spill] sm:$0xff] %v12181_v51  ;;  %v3249_v26 = vmul.f32 %v12146_v40, %v3200_v12  ;;  %9785 = vmatmul.msk.bf16.gmra.mxu2 %vm650_vm0, %v2672_v14  ;;  %v10615_v12 = vld [vmem:[%s14959_s1 + $0x110] sm:$0xff] }
 0x277   : > { %9813 = vmatmul.msk.bf16.gmra.mxu3 %vm650_vm0, %v2986_v33  ;;  %6048 = vperm.xlu0 %10343, %v10615_v12   ;;  %15152 = vst [vmem:[#allocation56_spill] sm:$0xff] %v12204_v22 }
 0x278   : > { %v3298_v57 = vadd.f32 %v12151_v35, %v3249_v26  ;;  %v2103_v26 = vld [vmem:[#allocation2 + $0xad] sm:$0xff] }
 0x279   : > { %v2777_v50 = vpop.f32.mrf.mxu2  ;;  %10283 = vset.pattern.permute.xlu1 %v15110_v24 }
 0x27a   : > { %v3095_v13 = vpop.f32.mrf.mxu3  ;;  %v3523_v29 = vmul.f32 %v11662_v1, %v3298_v57  ;;  %v2888_v20 = vadd.f32 %v2777_v50, %v2510_v5  ;;  %v2511_v46 = vpop.f32.mrf.mxu1  ;;  %4411 = vperm.xlu1 %10283, %v11892_v38   ;;  %v2639_v50 = vld [vmem:[#allocation2 + $0xbf] sm:$0xff] }
 0x27b   : > { %v12196_v23 = vpop.f32.mrf.mxu0  ;;  %v12198_v7 = vpop.permute.xlu2 %5394  ;;  %v2512_v33 = vadd.f32 %v2511_v46, %v11560_v45  ;;  %v2638_v45 = vld [vmem:[#allocation2 + $0xb7] sm:$0xff]  ;;  %v2953_v46 = vld [vmem:[#allocation2 + $0xc8] sm:$0xff] }
 0x27c   : > { %3574 = vst.msk [vmem:[#allocation3 + $0x20] sm:$0xff] %vm650_vm0, %v3523_v29  ;;  %v3201_v49 = vadd.f32 %v3090_v16, %v2888_v20  ;;  %v12200_v58 = vpop.permute.xlu1 %4852  ;;  %10282 = vset.pattern.permute.xlu2 %v15110_v24  ;;  %v10616_v16 = vld [vmem:[%s14959_s1 + $0x80] sm:$0xff]  ;;  %v2954_v29 = vld [vmem:[#allocation2 + $0xd0] sm:$0xff] }
 0x27d   : > { %15150 = vst [vmem:[#allocation54_spill] sm:$0xff] %v12198_v7  ;;  %4407 = vperm.xlu2 %10282, %v10616_v16   ;;  %v2102_v7 = vld [vmem:[#allocation2 + $0xa5] sm:$0xff] }
 0x27e   : > { %15151 = vst [vmem:[#allocation55_spill] sm:$0xff] %v12200_v58  ;;  %v3250_v59 = vmul.f32 %v12146_v40, %v3201_v49  ;;  %v2987_v58 = vpack.c.bf16 %v2954_v29, %v2953_v46 }
 0x27f   : > { %10356 = vset.pattern.permute.xlu0 %v15101_v3 }
 0x280   : > { %v3299_v14 = vadd.f32 %v12151_v35, %v3250_v59  ;;  %v2137_v59 = vpack.c.bf16 %v2103_v26, %v2102_v7  ;;  %4984 = vperm.xlu0 %10356, %v10617_v2  }
 0x281   : > { %v2779_v57 = vpop.f32.mrf.mxu2 }
 0x282   : > { %v12211_v5 = vpop.f32.mrf.mxu3  ;;  %v3524_v20 = vmul.f32 %v12204_v22, %v3299_v14  ;;  %v2889_v12 = vadd.f32 %v2779_v57, %v2512_v33  ;;  %v2514_v49 = vpop.f32.mrf.mxu1  ;;  %10285 = vset.pattern.permute.xlu1 %v15108_v18  ;;  %v2673_v57 = vpack.c.bf16 %v2639_v50, %v2638_v45 }
 0x283   : > { %v12221_v33 = vpop.f32.mrf.mxu0  ;;  %5438 = vperm.xlu1 %10285, %v10616_v16   ;;  %v12223_v7 = vpop.permute.xlu2 %4367 }
 0x284   : > { %3575 = vst.msk [vmem:[#allocation3 + $0x28] sm:$0xff] %vm650_vm0, %v3524_v20  ;;  %v3202_v14 = vadd.f32 %v12164_v0, %v2889_v12  ;;  %v12226_v26 = vpop.permute.xlu1 %5390  ;;  %v2515_v0 = vadd.f32 %v2514_v49, %v11587_v6  ;;  %v10618_v49 = vld [vmem:[%s14959_s1 + $0x118] sm:$0xff] }
 0x285   : > { %15153 = vst [vmem:[#allocation57_spill] sm:$0xff] %v12223_v7  ;;  %9759 = vmatmul.msk.bf16.gmra.mxu1 %vm650_vm0, %v2137_v59  ;;  %10284 = vset.pattern.permute.xlu2 %v15101_v3 }
 0x286   : > { %15154 = vst [vmem:[#allocation58_spill] sm:$0xff] %v12226_v26  ;;  %v3251_v22 = vmul.f32 %v12146_v40, %v3202_v14  ;;  %9786 = vmatmul.msk.bf16.gmra.mxu2 %vm650_vm0, %v2673_v57  ;;  %4900 = vperm.xlu2 %10284, %v10616_v16   ;;  %v3663_v14 = vld [vmem:[#allocation3 + $0x19] sm:$0xff] }
 0x287   : > { %9814 = vmatmul.msk.bf16.gmra.mxu3 %vm650_vm0, %v2987_v58  ;;  %v2955_v26 = vld [vmem:[#allocation2 + $0xd8] sm:$0xff] }
 0x288   : > { %v3300_v2 = vadd.f32 %v12151_v35, %v3251_v22  ;;  %10357 = vset.pattern.permute.xlu0 %v15110_v24 }
 0x289   : > { %v2782_v50 = vpop.f32.mrf.mxu2  ;;  %4483 = vperm.xlu0 %10357, %v10618_v49   ;;  %v2956_v49 = vld [vmem:[#allocation2 + $0xe0] sm:$0xff] }
 0x28a   : > { %v12236_v29 = vpop.f32.mrf.mxu3  ;;  %v3525_v20 = vmul.f32 %v11708_v27, %v3300_v2  ;;  %v2890_v12 = vadd.f32 %v2782_v50, %v2515_v0  ;;  %v2516_v59 = vpop.f32.mrf.mxu1  ;;  %v2105_v2 = vld [vmem:[#allocation2 + $0xbd] sm:$0xff]  ;;  %v2641_v0 = vld [vmem:[#allocation2 + $0xcf] sm:$0xff] }
 0x28b   : > { %v12241_v22 = vpop.f32.mrf.mxu0  ;;  %10287 = vset.pattern.permute.xlu1 %v15104_v30  ;;  %v12244_v6 = vpop.permute.xlu2 %4860  ;;  %v2517_v57 = vadd.f32 %v2516_v59, %v11613_v42  ;;  %v3618_v50 = vld [vmem:[#allocation3 + $0x18] sm:$0xff] }
 0x28c   : > { %3576 = vst.msk [vmem:[#allocation3 + $0x30] sm:$0xff] %vm650_vm0, %v3525_v20  ;;  %v3203_v58 = vadd.f32 %v3095_v13, %v2890_v12  ;;  %5976 = vperm.xlu1 %10287, %v10616_v16   ;;  %v12249_v45 = vpop.permute.xlu1 %5932  ;;  %v3708_v16 = vmax.f32 %v3618_v50, %v3663_v14  ;;  %v2988_v14 = vpack.c.bf16 %v2956_v49, %v2955_v26  ;;  %v3664_v26 = vld [vmem:[#allocation3 + $0x21] sm:$0xff] }
 0x28d   : > { %15155 = vst [vmem:[#allocation59_spill] sm:$0xff] %v12244_v6 }
 0x28e   : > { %15156 = vst [vmem:[#allocation60_spill] sm:$0xff] %v12249_v45  ;;  %v3252_v46 = vmul.f32 %v12146_v40, %v3203_v58  ;;  %10286 = vset.pattern.permute.xlu2 %v15108_v18  ;;  %v2640_v45 = vld [vmem:[#allocation2 + $0xc7] sm:$0xff] }
 0x28f   : > { %5442 = vperm.xlu2 %10286, %v11892_v38   ;;  %v2674_v27 = vpack.c.bf16 %v2641_v0, %v2640_v45 }
 0x290   : > { %v3301_v13 = vadd.f32 %v12151_v35, %v3252_v46  ;;  %v2104_v46 = vld [vmem:[#allocation2 + $0xb5] sm:$0xff] }
 0x291   : > { %v2784_v20 = vpop.f32.mrf.mxu2  ;;  %v2138_v59 = vpack.c.bf16 %v2105_v2, %v2104_v46 }
 0x292   : > { %v12256_v12 = vpop.f32.mrf.mxu3  ;;  %v3526_v7 = vmul.f32 %v11686_v15, %v3301_v13  ;;  %v2891_v58 = vadd.f32 %v2784_v20, %v2517_v57  ;;  %v2519_v6 = vpop.f32.mrf.mxu1  ;;  %v10619_v57 = vld [vmem:[%s14959_s1 + $0x130] sm:$0xff] }
 0x293   : > { %v3753_v42 = vld [vmem:[#allocation3 + $0x2a] sm:$0xff]  ;;  %v12263_v1 = vpop.f32.mrf.mxu0  ;;  %v12265_v13 = vpop.permute.xlu2 %5402  ;;  %4495 = vperm.xlu0 %10357, %v10619_v57   ;;  %v2650_v15 = vld [vmem:[#allocation2 + $0x117] sm:$0xff] }
 0x294   : > { %v3798_v51 = vmax.f32 %v3708_v16, %v3753_v42  ;;  %3577 = vst.msk [vmem:[#allocation3 + $0x38] sm:$0xff] %vm650_vm0, %v3526_v7  ;;  %v3204_v63 = vadd.f32 %v12211_v5, %v2891_v58  ;;  %v3843_v2 = vld [vmem:[#allocation3 + $0x2b] sm:$0xff]  ;;  %10290 = vset.pattern.permute.xlu1 %v15110_v24  ;;  %v12273_v7 = vpop.permute.xlu1 %4371 }
 0x295   : > { %15157 = vst [vmem:[#allocation61_spill] sm:$0xff] %v12265_v13  ;;  %9760 = vmatmul.msk.bf16.gmra.mxu1 %vm650_vm0, %v2138_v59  ;;  %4419 = vperm.xlu1 %10290, %v11939_v39  }
 0x296   : > { %15158 = vst [vmem:[#allocation62_spill] sm:$0xff] %v12273_v7  ;;  %v3888_v5 = vmax.f32 %v3798_v51, %v3843_v2  ;;  %v3253_v45 = vmul.f32 %v12146_v40, %v3204_v63  ;;  %9787 = vmatmul.msk.bf16.gmra.mxu2 %vm650_vm0, %v2674_v27  ;;  %v2520_v51 = vadd.f32 %v2519_v6, %v11646_v47  ;;  %v3619_v63 = vld [vmem:[#allocation3 + $0x20] sm:$0xff]  ;;  %v2961_v7 = vld [vmem:[#allocation2 + $0x108] sm:$0xff] }
 0x297   : > { %9815 = vmatmul.msk.bf16.gmra.mxu3 %vm650_vm0, %v2988_v14  ;;  %v3709_v49 = vmax.f32 %v3619_v63, %v3664_v26  ;;  %10288 = vset.pattern.permute.xlu2 %v15104_v30  ;;  %v10192_v14 = vld [vmem:[%s14968_s10 + $0x8] sm:$0xff] }
 0x298   : > { %v3933_v0 = vmax.f32 %v3888_v5, 0.0  ;;  %v3302_v50 = vadd.f32 %v12151_v35, %v3253_v45  ;;  %5980 = vperm.xlu2 %10288, %v11892_v38   ;;  %v10620_v38 = vld [vmem:[%s14959_s1 + $0x138] sm:$0xff]  ;;  %6642 = vmatpush.bf16.msrb.mxu0 %v10192_v14  ;;  %v3665_v26 = vld [vmem:[#allocation3 + $0x29] sm:$0xff]  ;;  %v2107_v63 = vld [vmem:[#allocation2 + $0xcd] sm:$0xff] }
 0x299   : > { %v2787_v20 = vpop.f32.mrf.mxu2 }
 0x29a   : > { %v12288_v27 = vpop.f32.mrf.mxu3  ;;  %3984 = vst.msk [vmem:[#allocation4 + $0x18] sm:$0xff] %vm650_vm0, %v3933_v0  ;;  %v3527_v16 = vmul.f32 %v11728_v60, %v3302_v50  ;;  %v2892_v58 = vadd.f32 %v2787_v20, %v2520_v51  ;;  %v2521_v46 = vpop.f32.mrf.mxu1  ;;  %v2643_v20 = vld [vmem:[#allocation2 + $0xdf] sm:$0xff] }
 0x29b   : > { %4029 = vst.msk [vmem:[%s12284_s27] sm:$0xff] %vm650_vm0, %v3933_v0  ;;  %v3754_v42 = vld [vmem:[#allocation3 + $0x32] sm:$0xff]  ;;  %v12298_v6 = vpop.f32.mrf.mxu0  ;;  %v12303_v57 = vpop.permute.xlu2 %5940  ;;  %10366 = vset.pattern.permute.xlu0 %v15108_v18  ;;  %v2522_v51 = vadd.f32 %v2521_v46, %v11674_v25  ;;  %v2963_v60 = vld [vmem:[#allocation2 + $0x118] sm:$0xff] }
 0x29c   : > { %v3799_v59 = vmax.f32 %v3709_v49, %v3754_v42  ;;  %3578 = vst.msk [vmem:[#allocation3 + $0x40] sm:$0xff] %vm650_vm0, %v3527_v16  ;;  %v3205_v47 = vadd.f32 %v12236_v29, %v2892_v58  ;;  %v3844_v2 = vld [vmem:[#allocation3 + $0x33] sm:$0xff]  ;;  %v12306_v5 = vpop.permute.xlu1 %5398  ;;  %5530 = vperm.xlu0 %10366, %v10620_v38   ;;  %v3620_v49 = vld [vmem:[#allocation3 + $0x28] sm:$0xff] }
 0x29d   : > { %15159 = vst [vmem:[#allocation63_spill] sm:$0xff] %v12303_v57  ;;  %10292 = vset.pattern.permute.xlu1 %v15101_v3  ;;  %v2958_v42 = vld [vmem:[#allocation2 + $0xf0] sm:$0xff]  ;;  %v2106_v38 = vld [vmem:[#allocation2 + $0xc5] sm:$0xff] }
 0x29e   : > { %15160 = vst [vmem:[#allocation64_spill] sm:$0xff] %v12306_v5  ;;  %v3889_v45 = vmax.f32 %v3799_v59, %v3844_v2  ;;  %v3254_v29 = vmul.f32 %v12146_v40, %v3205_v47  ;;  %4912 = vperm.xlu1 %10292, %v11939_v39   ;;  %v3710_v59 = vmax.f32 %v3620_v49, %v3665_v26  ;;  %v2957_v39 = vld [vmem:[#allocation2 + $0xe8] sm:$0xff] }
 0x29f   : > { %v2139_v46 = vpack.c.bf16 %v2107_v63, %v2106_v38 }
 0x2a0   : > { %v3934_v0 = vmax.f32 %v3889_v45, 0.0  ;;  %v3303_v50 = vadd.f32 %v12151_v35, %v3254_v29  ;;  %v2642_v45 = vld [vmem:[#allocation2 + $0xd7] sm:$0xff]  ;;  %10291 = vset.pattern.permute.xlu2 %v15101_v3 }
 0x2a1   : > { %v2789_v16 = vpop.f32.mrf.mxu2  ;;  %v2675_v29 = vpack.c.bf16 %v2643_v20, %v2642_v45 }
 0x2a2   : > { %v12316_v58 = vpop.f32.mrf.mxu3  ;;  %3985 = vst.msk [vmem:[#allocation4 + $0x20] sm:$0xff] %vm650_vm0, %v3934_v0  ;;  %v3528_v47 = vmul.f32 %v11706_v48, %v3303_v50  ;;  %v2893_v14 = vadd.f32 %v2789_v16, %v2522_v51  ;;  %v2524_v2 = vpop.f32.mrf.mxu1  ;;  %v2989_v50 = vpack.c.bf16 %v2958_v42, %v2957_v39  ;;  %v10621_v51 = vld [vmem:[%s14959_s1 + $0x90] sm:$0xff] }
 0x2a3   : > { %4030 = vst.msk [vmem:[%s12284_s27 + $0x8] sm:$0xff] %vm650_vm0, %v3934_v0  ;;  %v3755_v25 = vld [vmem:[#allocation3 + $0x3a] sm:$0xff]  ;;  %v12325_v49 = vpop.f32.mrf.mxu0  ;;  %4908 = vperm.xlu2 %10291, %v10621_v51   ;;  %v12330_v0 = vpop.permute.xlu2 %4868  ;;  %v3666_v42 = vld [vmem:[#allocation3 + $0x31] sm:$0xff]  ;;  %v2525_v38 = vadd.f32 %v2524_v2, %v11695_v8 }
 0x2a4   : > { %v3800_v57 = vmax.f32 %v3710_v59, %v3755_v25  ;;  %3579 = vst.msk [vmem:[#allocation3 + $0x48] sm:$0xff] %vm650_vm0, %v3528_v47  ;;  %v3206_v26 = vadd.f32 %v12256_v12, %v2893_v14  ;;  %v3845_v63 = vld [vmem:[#allocation3 + $0x3b] sm:$0xff]  ;;  %v12333_v20 = vpop.permute.xlu1 %5936  ;;  %10371 = vset.pattern.permute.xlu0 %v15101_v3  ;;  %v10622_v59 = vld [vmem:[%s14959_s1 + $0x140] sm:$0xff]  ;;  %v12342_v47 = vpop.permute.xlu0 %3371  ;;  %v3621_v25 = vld [vmem:[#allocation3 + $0x30] sm:$0xff] }
 0x2a5   : > { %15161 = vst [vmem:[#allocation65_spill] sm:$0xff] %v12330_v0  ;;  %9761 = vmatmul.msk.bf16.gmra.mxu1 %vm650_vm0, %v2139_v46  ;;  %4996 = vperm.xlu0 %10371, %v10622_v59  }
 0x2a6   : > { %15162 = vst [vmem:[#allocation66_spill] sm:$0xff] %v12333_v20  ;;  %v3255_v16 = vmul.f32 %v12146_v40, %v3206_v26  ;;  %9788 = vmatmul.msk.bf16.gmra.mxu2 %vm650_vm0, %v2675_v29  ;;  %v3890_v12 = vmax.f32 %v3800_v57, %v3845_v63  ;;  %10294 = vset.pattern.permute.xlu1 %v15104_v30  ;;  %v4074_v57 = vld [vmem:[#allocation4 + $0x18] sm:$0xff] }
 0x2a7   : > { %9816 = vmatmul.msk.bf16.gmra.mxu3 %vm650_vm0, %v2989_v50  ;;  %15163 = vst [vmem:[#allocation67_spill] sm:$0xff] %v12342_v47  ;;  %5984 = vperm.xlu1 %10294, %v10621_v51   ;;  %v3711_v26 = vmax.f32 %v3621_v25, %v3666_v42 }
 0x2a8   : > { %v3304_v14 = vadd.f32 %v12151_v35, %v3255_v16  ;;  %v3935_v45 = vmax.f32 %v3890_v12, 0.0 }
 0x2a9   : > { %v2792_v46 = vpop.f32.mrf.mxu2  ;;  %v4075_v39 = vld [vmem:[#allocation4 + $0x20] sm:$0xff] }
 0x2aa   : > { %v12347_v29 = vpop.f32.mrf.mxu3  ;;  %v3529_v50 = vmul.f32 %v12342_v47, %v3304_v14  ;;  %v2894_v63 = vadd.f32 %v2792_v46, %v2525_v38  ;;  %v2526_v59 = vpop.f32.mrf.mxu1  ;;  %v4119_v0 = vpack.c.bf16 %v4075_v39, %v4074_v57  ;;  %3986 = vst.msk [vmem:[#allocation4 + $0x28] sm:$0xff] %vm650_vm0, %v3935_v45  ;;  %v2109_v39 = vld [vmem:[#allocation2 + $0xdd] sm:$0xff]  ;;  %v2644_v47 = vld [vmem:[#allocation2 + $0xe7] sm:$0xff] }
 0x2ab   : > { %v3756_v8 = vld [vmem:[#allocation3 + $0x42] sm:$0xff]  ;;  %4031 = vst.msk [vmem:[%s12284_s27 + $0x10] sm:$0xff] %vm650_vm0, %v3935_v45  ;;  %v12355_v12 = vpop.f32.mrf.mxu0  ;;  %10293 = vset.pattern.permute.xlu2 %v15108_v18  ;;  %v12362_v46 = vpop.permute.xlu2 %5406  ;;  %v3667_v45 = vld [vmem:[#allocation3 + $0x39] sm:$0xff]  ;;  %v2527_v57 = vadd.f32 %v2526_v59, %v11715_v61 }
 0x2ac   : > { %v3801_v2 = vmax.f32 %v3711_v26, %v3756_v8  ;;  %3580 = vst.msk [vmem:[#allocation3 + $0x50] sm:$0xff] %vm650_vm0, %v3529_v50  ;;  %v3207_v16 = vadd.f32 %v12288_v27, %v2894_v63  ;;  %9830 = vmatmul.msk.bf16.vlgmr.msra.gmra.mxu0 %vm650_vm0, %v4119_v0  ;;  %v3846_v42 = vld [vmem:[#allocation3 + $0x43] sm:$0xff]  ;;  %5446 = vperm.xlu2 %10293, %v10621_v51   ;;  %v12359_v14 = vpop.permute.xlu1 %4379  ;;  %v10623_v51 = vld [vmem:[%s14959_s1 + $0x148] sm:$0xff]  ;;  %v3622_v26 = vld [vmem:[#allocation3 + $0x38] sm:$0xff] }
 0x2ad   : > { %15164 = vst [vmem:[#allocation68_spill] sm:$0xff] %v12359_v14  ;;  %10376 = vset.pattern.permute.xlu0 %v15104_v30  ;;  %v2645_v8 = vld [vmem:[#allocation2 + $0xef] sm:$0xff]  ;;  %v3668_v48 = vld [vmem:[#allocation3 + $0x41] sm:$0xff] }
 0x2ae   : > { %v3256_v38 = vmul.f32 %v12146_v40, %v3207_v16  ;;  %v3891_v25 = vmax.f32 %v3801_v2, %v3846_v42  ;;  %15165 = vst [vmem:[#allocation69_spill] sm:$0xff] %v12362_v46  ;;  %6076 = vperm.xlu0 %10376, %v10623_v51   ;;  %v2960_v2 = vld [vmem:[#allocation2 + $0x100] sm:$0xff]  ;;  %v3712_v16 = vmax.f32 %v3622_v26, %v3667_v45  ;;  %v2959_v46 = vld [vmem:[#allocation2 + $0xf8] sm:$0xff] }
 0x2af   : > { %10296 = vset.pattern.permute.xlu1 %v15110_v24  ;;  %v2676_v26 = vpack.c.bf16 %v2645_v8, %v2644_v47  ;;  %v3623_v47 = vld [vmem:[#allocation3 + $0x40] sm:$0xff] }
 0x2b0   : > { %v3305_v27 = vadd.f32 %v12151_v35, %v3256_v38  ;;  %v3936_v0 = vmax.f32 %v3891_v25, 0.0  ;;  %v2108_v38 = vld [vmem:[#allocation2 + $0xd5] sm:$0xff]  ;;  %v12378_v25 = vld [vmem:[%s14959_s1 + $0xa0] sm:$0xff] }
 0x2b1   : > { %v2794_v50 = vpop.f32.mrf.mxu2  ;;  %4423 = vperm.xlu1 %10296, %v12378_v25   ;;  %v2140_v14 = vpack.c.bf16 %v2109_v39, %v2108_v38  ;;  %v4076_v38 = vld [vmem:[#allocation4 + $0x28] sm:$0xff] }
 0x2b2   : > { %v12370_v63 = vpop.f32.mrf.mxu3  ;;  %v3530_v42 = vmul.f32 %v11760_v44, %v3305_v27  ;;  %v2895_v61 = vadd.f32 %v2794_v50, %v2527_v57  ;;  %v2529_v59 = vpop.f32.mrf.mxu1  ;;  %3987 = vst.msk [vmem:[#allocation4 + $0x30] sm:$0xff] %vm650_vm0, %v3936_v0  ;;  %v2990_v50 = vpack.c.bf16 %v2960_v2, %v2959_v46 }
 0x2b3   : > { %v3757_v51 = vld [vmem:[#allocation3 + $0x4a] sm:$0xff]  ;;  %4032 = vst.msk [vmem:[%s12284_s27 + $0x18] sm:$0xff] %vm650_vm0, %v3936_v0  ;;  %v12385_v57 = vpop.f32.mrf.mxu0  ;;  %v2530_v46 = vadd.f32 %v2529_v59, %v11738_v36  ;;  %v12399_v2 = vpop.permute.xlu2 %5948 }
 0x2b4   : > { %v3802_v45 = vmax.f32 %v3712_v16, %v3757_v51  ;;  %3581 = vst.msk [vmem:[#allocation3 + $0x58] sm:$0xff] %vm650_vm0, %v3530_v42  ;;  %v3208_v27 = vadd.f32 %v12316_v58, %v2895_v61  ;;  %v3847_v44 = vld [vmem:[#allocation3 + $0x4b] sm:$0xff]  ;;  %10295 = vset.pattern.permute.xlu2 %v15104_v30  ;;  %v12392_v16 = vpop.permute.xlu1 %4872  ;;  %v10625_v58 = vld [vmem:[%s14959_s1 + $0x98] sm:$0xff]  ;;  %v3713_v42 = vmax.f32 %v3623_v47, %v3668_v48 }
 0x2b5   : > { %9762 = vmatmul.msk.bf16.gmra.mxu1 %vm650_vm0, %v2140_v14  ;;  %15166 = vst [vmem:[#allocation70_spill] sm:$0xff] %v12392_v16  ;;  %5988 = vperm.xlu2 %10295, %v10625_v58  }
 0x2b6   : > { %v3257_v39 = vmul.f32 %v12146_v40, %v3208_v27  ;;  %9789 = vmatmul.msk.bf16.gmra.mxu2 %vm650_vm0, %v2676_v26  ;;  %v3892_v0 = vmax.f32 %v3802_v45, %v3847_v44  ;;  %15167 = vst [vmem:[#allocation71_spill] sm:$0xff] %v12399_v2  ;;  %10381 = vset.pattern.permute.xlu0 %v15110_v24  ;;  %v10626_v45 = vld [vmem:[%s14959_s1 + $0x158] sm:$0xff]  ;;  %v10628_v2 = vld [vmem:[%s14959_s1 + $0x160] sm:$0xff] }
 0x2b7   : > { %9817 = vmatmul.msk.bf16.gmra.mxu3 %vm650_vm0, %v2990_v50  ;;  %4515 = vperm.xlu0 %10381, %v10626_v45   ;;  %v10627_v50 = vld [vmem:[%s14959_s1 + $0xa8] sm:$0xff]  ;;  %v2647_v45 = vld [vmem:[#allocation2 + $0xff] sm:$0xff] }
 0x2b8   : > { %v3306_v14 = vadd.f32 %v12151_v35, %v3257_v39  ;;  %v3937_v8 = vmax.f32 %v3892_v0, 0.0 }
 0x2b9   : > { %v2797_v44 = vpop.f32.mrf.mxu2  ;;  %v4077_v51 = vld [vmem:[#allocation4 + $0x30] sm:$0xff]  ;;  %10299 = vset.pattern.permute.xlu1 %v15101_v3 }
 0x2ba   : > { %v12402_v61 = vpop.f32.mrf.mxu3  ;;  %v3531_v27 = vmul.f32 %v11726_v28, %v3306_v14  ;;  %v2896_v36 = vadd.f32 %v2797_v44, %v2530_v46  ;;  %v2531_v59 = vpop.f32.mrf.mxu1  ;;  %v4120_v26 = vpack.c.bf16 %v4077_v51, %v4076_v38  ;;  %3988 = vst.msk [vmem:[#allocation4 + $0x38] sm:$0xff] %vm650_vm0, %v3937_v8  ;;  %4920 = vperm.xlu1 %10299, %v10627_v50   ;;  %v3669_v44 = vld [vmem:[#allocation3 + $0x49] sm:$0xff]  ;;  %v2111_v51 = vld [vmem:[#allocation2 + $0xed] sm:$0xff] }
 0x2bb   : > { %v3758_v48 = vld [vmem:[#allocation3 + $0x52] sm:$0xff]  ;;  %4033 = vst.msk [vmem:[%s12284_s27 + $0x20] sm:$0xff] %vm650_vm0, %v3937_v8  ;;  %v12417_v58 = vpop.f32.mrf.mxu0  ;;  %v12420_v14 = vpop.permute.xlu0 %3383 }
 0x2bc   : > { %v3803_v39 = vmax.f32 %v3713_v42, %v3758_v48  ;;  %3582 = vst.msk [vmem:[#allocation3 + $0x60] sm:$0xff] %vm650_vm0, %v3531_v27  ;;  %v3209_v0 = vadd.f32 %v12347_v29, %v2896_v36  ;;  %9831 = vmatmul.msk.bf16.gmra.mxu0 %vm650_vm0, %v4120_v26  ;;  %v3848_v47 = vld [vmem:[#allocation3 + $0x53] sm:$0xff]  ;;  %v2532_v42 = vadd.f32 %v2531_v59, %v11756_v53  ;;  %v12426_v27 = vpop.permute.xlu1 %5944  ;;  %v3624_v36 = vld [vmem:[#allocation3 + $0x48] sm:$0xff]  ;;  %v2646_v59 = vld [vmem:[#allocation2 + $0xf7] sm:$0xff] }
 0x2bd   : > { %15168 = vst [vmem:[#allocation72_spill] sm:$0xff] %v12420_v14  ;;  %10297 = vset.pattern.permute.xlu2 %v15110_v24  ;;  %v2962_v28 = vld [vmem:[#allocation2 + $0x110] sm:$0xff]  ;;  %v2110_v53 = vld [vmem:[#allocation2 + $0xe5] sm:$0xff]  ;;  %v2677_v13 = vpack.c.bf16 %v2647_v45, %v2646_v59 }
 0x2be   : > { %v3258_v46 = vmul.f32 %v12146_v40, %v3209_v0  ;;  %v3893_v8 = vmax.f32 %v3803_v39, %v3848_v47  ;;  %4427 = vperm.xlu2 %10297, %v10627_v50   ;;  %15169 = vst [vmem:[#allocation73_spill] sm:$0xff] %v12426_v27  ;;  %v3714_v39 = vmax.f32 %v3624_v36, %v3669_v44  ;;  %v3670_v45 = vld [vmem:[#allocation3 + $0x51] sm:$0xff] }
 0x2bf   : > { %10386 = vset.pattern.permute.xlu0 %v15101_v3  ;;  %v2141_v27 = vpack.c.bf16 %v2111_v51, %v2110_v53  ;;  %v2991_v36 = vpack.c.bf16 %v2962_v28, %v2961_v7  ;;  %v3625_v28 = vld [vmem:[#allocation3 + $0x50] sm:$0xff]  ;;  %v15173_v53 = vld [vmem:[#allocation33_spill] sm:$0xff] }
 0x2c0   : > { %v3307_v38 = vadd.f32 %v12151_v35, %v3258_v46  ;;  %v3938_v29 = vmax.f32 %v3893_v8, 0.0  ;;  %v12433_v8 = vpop.permute.xlu2 %4387  ;;  %5012 = vperm.xlu0 %10386, %v10628_v2  }
 0x2c1   : > { %v2799_v26 = vpop.f32.mrf.mxu2  ;;  %15170 = vst [vmem:[#allocation74_spill] sm:$0xff] %v12433_v8 }
 0x2c2   : > { %v12428_v48 = vpop.f32.mrf.mxu3  ;;  %v3532_v0 = vmul.f32 %v12420_v14, %v3307_v38  ;;  %v2897_v47 = vadd.f32 %v2799_v26, %v2532_v42  ;;  %v2534_v46 = vpop.f32.mrf.mxu1  ;;  %3989 = vst.msk [vmem:[#allocation4 + $0x40] sm:$0xff] %vm650_vm0, %v3938_v29  ;;  %10301 = vset.pattern.permute.xlu1 %v15108_v18  ;;  %v2964_v14 = vld [vmem:[#allocation2 + $0x120] sm:$0xff] }
 0x2c3   : > { %v3759_v16 = vld [vmem:[#allocation3 + $0x5a] sm:$0xff]  ;;  %4034 = vst.msk [vmem:[%s12284_s27 + $0x28] sm:$0xff] %vm650_vm0, %v3938_v29  ;;  %v12443_v42 = vpop.f32.mrf.mxu0  ;;  %5458 = vperm.xlu1 %10301, %v10627_v50  }
 0x2c4   : > { %v3804_v44 = vmax.f32 %v3714_v39, %v3759_v16  ;;  %3583 = vst.msk [vmem:[#allocation3 + $0x68] sm:$0xff] %vm650_vm0, %v3532_v0  ;;  %v3210_v38 = vadd.f32 %v12370_v63, %v2897_v47  ;;  %v3849_v26 = vld [vmem:[#allocation3 + $0x5b] sm:$0xff]  ;;  %v12449_v16 = vpop.permute.xlu0 %3395  ;;  %v15172_v63 = vld [vmem:[#allocation26_spill] sm:$0xff]  ;;  %v3715_v47 = vmax.f32 %v3625_v28, %v3670_v45 }
 0x2c5   : > { %9763 = vmatmul.msk.bf16.gmra.mxu1 %vm650_vm0, %v2141_v27  ;;  %15171 = vst [vmem:[#allocation75_spill] sm:$0xff] %v12449_v16  ;;  %v2535_v39 = vadd.f32 %v2534_v46, %v15172_v63  ;;  %v4078_v27 = vld [vmem:[#allocation4 + $0x38] sm:$0xff]  ;;  %v12459_v46 = vpop.permute.xlu1 %4383 }
 0x2c6   : > { %v3259_v2 = vmul.f32 %v12146_v40, %v3210_v38  ;;  %9790 = vmatmul.msk.bf16.gmra.mxu2 %vm650_vm0, %v2677_v13  ;;  %v3894_v51 = vmax.f32 %v3804_v44, %v3849_v26  ;;  %10300 = vset.pattern.permute.xlu2 %v15108_v18  ;;  %15174 = vst [vmem:[#allocation26_spill] sm:$0xff] %v12459_v46  ;;  %v2112_v46 = vld [vmem:[#allocation2 + $0xf5] sm:$0xff] }
 0x2c7   : > { %9818 = vmatmul.msk.bf16.gmra.mxu3 %vm650_vm0, %v2991_v36  ;;  %5454 = vperm.xlu2 %10300, %v12378_v25  }
 0x2c8   : > { %v3308_v29 = vadd.f32 %v12151_v35, %v3259_v2  ;;  %v3939_v0 = vmax.f32 %v3894_v51, 0.0  ;;  %10389 = vset.pattern.permute.xlu0 %v15104_v30 }
 0x2c9   : > { %v2802_v7 = vpop.f32.mrf.mxu2  ;;  %v4079_v13 = vld [vmem:[#allocation4 + $0x40] sm:$0xff] }
 0x2ca   : > { %v12454_v50 = vpop.f32.mrf.mxu3  ;;  %v3533_v59 = vmul.f32 %v15173_v53, %v3308_v29  ;;  %v2898_v44 = vadd.f32 %v2802_v7, %v2535_v39  ;;  %v2536_v38 = vpop.f32.mrf.mxu1  ;;  %v4121_v36 = vpack.c.bf16 %v4079_v13, %v4078_v27  ;;  %3990 = vst.msk [vmem:[#allocation4 + $0x48] sm:$0xff] %vm650_vm0, %v3939_v0  ;;  %v12475_v39 = vld [vmem:[%s14959_s1 + $0xb0] sm:$0xff] }
 0x2cb   : > { %v3760_v26 = vld [vmem:[#allocation3 + $0x62] sm:$0xff]  ;;  %4035 = vst.msk [vmem:[%s12284_s27 + $0x30] sm:$0xff] %vm650_vm0, %v3939_v0  ;;  %v12466_v45 = vpop.f32.mrf.mxu0  ;;  %v12469_v29 = vpop.permute.xlu2 %5414  ;;  %10303 = vset.pattern.permute.xlu1 %v15110_v24  ;;  %v15176_v27 = vld [vmem:[#allocation36_spill] sm:$0xff] }
 0x2cc   : > { %v3805_v2 = vmax.f32 %v3715_v47, %v3760_v26  ;;  %3584 = vst.msk [vmem:[#allocation3 + $0x70] sm:$0xff] %vm650_vm0, %v3533_v59  ;;  %v3211_v51 = vadd.f32 %v12402_v61, %v2898_v44  ;;  %9832 = vmatmul.msk.bf16.gmra.mxu0 %vm650_vm0, %v4121_v36  ;;  %v3850_v63 = vld [vmem:[#allocation3 + $0x63] sm:$0xff]  ;;  %4431 = vperm.xlu1 %10303, %v12475_v39   ;;  %v3671_v61 = vld [vmem:[#allocation3 + $0x59] sm:$0xff]  ;;  %v12484_v8 = vpop.permute.xlu0 %3407 }
 0x2cd   : > { %15175 = vst [vmem:[#allocation76_spill] sm:$0xff] %v12469_v29  ;;  %v2537_v13 = vadd.f32 %v2536_v38, %v15176_v27  ;;  %v2113_v47 = vld [vmem:[#allocation2 + $0xfd] sm:$0xff]  ;;  %v3626_v44 = vld [vmem:[#allocation3 + $0x58] sm:$0xff]  ;;  %v2648_v27 = vld [vmem:[#allocation2 + $0x107] sm:$0xff] }
 0x2ce   : > { %v3260_v0 = vmul.f32 %v12146_v40, %v3211_v51  ;;  %v3895_v28 = vmax.f32 %v3805_v2, %v3850_v63  ;;  %v2649_v53 = vld [vmem:[#allocation2 + $0x10f] sm:$0xff]  ;;  %15177 = vst [vmem:[#allocation36_spill] sm:$0xff] %v12484_v8  ;;  %v3716_v51 = vmax.f32 %v3626_v44, %v3671_v61 }
 0x2cf   : > { %10302 = vset.pattern.permute.xlu2 %v15104_v30  ;;  %v15178_v2 = vld [vmem:[#allocation20_spill] sm:$0xff] }
 0x2d0   : > { %v3309_v7 = vadd.f32 %v12151_v35, %v3260_v0  ;;  %v3940_v59 = vmax.f32 %v3895_v28, 0.0  ;;  %5992 = vperm.xlu2 %10302, %v12378_v25   ;;  %v2142_v28 = vpack.c.bf16 %v2113_v47, %v2112_v46  ;;  %v3672_v25 = vld [vmem:[#allocation3 + $0x61] sm:$0xff] }
 0x2d1   : > { %v2804_v36 = vpop.f32.mrf.mxu2 }
 0x2d2   : > { %v12481_v26 = vpop.f32.mrf.mxu3  ;;  %v3534_v63 = vmul.f32 %v15178_v2, %v3309_v7  ;;  %v2899_v29 = vadd.f32 %v2804_v36, %v2537_v13  ;;  %v2539_v0 = vpop.f32.mrf.mxu1  ;;  %3991 = vst.msk [vmem:[#allocation4 + $0x50] sm:$0xff] %vm650_vm0, %v3940_v59  ;;  %v2678_v7 = vpack.c.bf16 %v2649_v53, %v2648_v27  ;;  %v2992_v13 = vpack.c.bf16 %v2964_v14, %v2963_v60  ;;  %v3627_v60 = vld [vmem:[#allocation3 + $0x60] sm:$0xff]  ;;  %v15181_v53 = vld [vmem:[#allocation8_spill] sm:$0xff] }
 0x2d3   : > { %v3761_v38 = vld [vmem:[#allocation3 + $0x6a] sm:$0xff]  ;;  %4036 = vst.msk [vmem:[%s12284_s27 + $0x38] sm:$0xff] %vm650_vm0, %v3940_v59  ;;  %v12493_v44 = vpop.f32.mrf.mxu0  ;;  %v12495_v36 = vpop.permute.xlu1 %4880 }
 0x2d4   : > { %v3806_v20 = vmax.f32 %v3716_v51, %v3761_v38  ;;  %3585 = vst.msk [vmem:[#allocation3 + $0x78] sm:$0xff] %vm650_vm0, %v3534_v63  ;;  %v3212_v61 = vadd.f32 %v12428_v48, %v2899_v29  ;;  %v3851_v2 = vld [vmem:[#allocation3 + $0x6b] sm:$0xff]  ;;  %10305 = vset.pattern.permute.xlu1 %v15101_v3  ;;  %v12502_v47 = vpop.permute.xlu2 %5952  ;;  %v2540_v29 = vadd.f32 %v2539_v0, %v15181_v53  ;;  %v10630_v0 = vld [vmem:[%s14959_s1 + $0xb8] sm:$0xff] }
 0x2d5   : > { %15179 = vst [vmem:[#allocation77_spill] sm:$0xff] %v12495_v36  ;;  %9764 = vmatmul.msk.bf16.gmra.mxu1 %vm650_vm0, %v2142_v28  ;;  %4924 = vperm.xlu1 %10305, %v12475_v39   ;;  %v3717_v51 = vmax.f32 %v3627_v60, %v3672_v25  ;;  %v4080_v28 = vld [vmem:[#allocation4 + $0x48] sm:$0xff]  ;;  %v12517_v25 = vpop.permute.xlu0 %3419 }
 0x2d6   : > { %v3261_v46 = vmul.f32 %v12146_v40, %v3212_v61  ;;  %9791 = vmatmul.msk.bf16.gmra.mxu2 %vm650_vm0, %v2678_v7  ;;  %15180 = vst [vmem:[#allocation78_spill] sm:$0xff] %v12502_v47  ;;  %v3896_v48 = vmax.f32 %v3806_v20, %v3851_v2 }
 0x2d7   : > { %9819 = vmatmul.msk.bf16.gmra.mxu3 %vm650_vm0, %v2992_v13  ;;  %15182 = vst [vmem:[#allocation8_spill] sm:$0xff] %v12517_v25 }
 0x2d8   : > { %v3310_v14 = vadd.f32 %v12151_v35, %v3261_v46  ;;  %v3941_v59 = vmax.f32 %v3896_v48, 0.0  ;;  %10304 = vset.pattern.permute.xlu2 %v15110_v24 }
 0x2d9   : > { %v2807_v63 = vpop.f32.mrf.mxu2  ;;  %v4081_v27 = vld [vmem:[#allocation4 + $0x50] sm:$0xff]  ;;  %4435 = vperm.xlu2 %10304, %v10630_v0  }
 0x2da   : > { %v12507_v38 = vpop.f32.mrf.mxu3  ;;  %v3535_v61 = vmul.f32 %v12449_v16, %v3310_v14  ;;  %v2900_v7 = vadd.f32 %v2807_v63, %v2540_v29  ;;  %v2541_v13 = vpop.f32.mrf.mxu1  ;;  %v4122_v20 = vpack.c.bf16 %v4081_v27, %v4080_v28  ;;  %3992 = vst.msk [vmem:[#allocation4 + $0x58] sm:$0xff] %vm650_vm0, %v3941_v59  ;;  %v3673_v63 = vld [vmem:[#allocation3 + $0x69] sm:$0xff] }
 0x2db   : > { %v3762_v2 = vld [vmem:[#allocation3 + $0x72] sm:$0xff]  ;;  %4037 = vst.msk [vmem:[%s12284_s27 + $0x40] sm:$0xff] %vm650_vm0, %v3941_v59  ;;  %v12521_v60 = vpop.f32.mrf.mxu0  ;;  %v12525_v59 = vpop.permute.xlu1 %5418 }
 0x2dc   : > { %v3807_v46 = vmax.f32 %v3717_v51, %v3762_v2  ;;  %3586 = vst.msk [vmem:[#allocation3 + $0x80] sm:$0xff] %vm650_vm0, %v3535_v61  ;;  %v3213_v48 = vadd.f32 %v12454_v50, %v2900_v7  ;;  %9833 = vmatmul.msk.bf16.gmra.mxu0 %vm650_vm0, %v4122_v20  ;;  %v3852_v14 = vld [vmem:[#allocation3 + $0x73] sm:$0xff]  ;;  %v15184_v51 = vld [vmem:[#allocation18_spill] sm:$0xff]  ;;  %v12530_v7 = vpop.permute.xlu2 %4395 }
 0x2dd   : > { %15183 = vst [vmem:[#allocation79_spill] sm:$0xff] %v12525_v59  ;;  %10308 = vset.pattern.permute.xlu1 %v15108_v18  ;;  %v2542_v27 = vadd.f32 %v2541_v13, %v15184_v51  ;;  %v2115_v61 = vld [vmem:[#allocation2 + $0x10d] sm:$0xff]  ;;  %v2651_v2 = vld [vmem:[#allocation2 + $0x11f] sm:$0xff] }
 0x2de   : > { %v3262_v53 = vmul.f32 %v12146_v40, %v3213_v48  ;;  %v3897_v29 = vmax.f32 %v3807_v46, %v3852_v14  ;;  %15185 = vst [vmem:[#allocation18_spill] sm:$0xff] %v12530_v7  ;;  %5466 = vperm.xlu1 %10308, %v10630_v0   ;;  %v3628_v20 = vld [vmem:[#allocation3 + $0x68] sm:$0xff]  ;;  %v2966_v46 = vld [vmem:[#allocation2 + $0x130] sm:$0xff]  ;;  %v2679_v51 = vpack.c.bf16 %v2651_v2, %v2650_v15  ;;  %v2965_v7 = vld [vmem:[#allocation2 + $0x128] sm:$0xff] }
 0x2df   : > { %v3718_v14 = vmax.f32 %v3628_v20, %v3673_v63  ;;  %v15186_v59 = vld [vmem:[#allocation6_spill] sm:$0xff]  ;;  %v12544_v20 = vpop.permute.xlu0 %3431  ;;  %v3674_v2 = vld [vmem:[#allocation3 + $0x71] sm:$0xff] }
 0x2e0   : > { %v3311_v28 = vadd.f32 %v12151_v35, %v3262_v53  ;;  %v3942_v50 = vmax.f32 %v3897_v29, 0.0  ;;  %v2114_v53 = vld [vmem:[#allocation2 + $0x105] sm:$0xff]  ;;  %15187 = vst [vmem:[#allocation80_spill] sm:$0xff] %v12544_v20 }
 0x2e1   : > { %v2809_v16 = vpop.f32.mrf.mxu2  ;;  %v2143_v29 = vpack.c.bf16 %v2115_v61, %v2114_v53  ;;  %10306 = vset.pattern.permute.xlu2 %v15101_v3 }
 0x2e2   : > { %v12532_v48 = vpop.f32.mrf.mxu3  ;;  %v3536_v36 = vmul.f32 %v15186_v59, %v3311_v28  ;;  %v2901_v47 = vadd.f32 %v2809_v16, %v2542_v27  ;;  %v2544_v5 = vpop.f32.mrf.mxu1  ;;  %3993 = vst.msk [vmem:[#allocation4 + $0x60] sm:$0xff] %vm650_vm0, %v3942_v50  ;;  %v2993_v16 = vpack.c.bf16 %v2966_v46, %v2965_v7  ;;  %4928 = vperm.xlu2 %10306, %v10630_v0   ;;  %v3629_v46 = vld [vmem:[#allocation3 + $0x70] sm:$0xff]  ;;  %v2116_v59 = vld [vmem:[#allocation2 + $0x115] sm:$0xff] }
 0x2e3   : > { %v3763_v13 = vld [vmem:[#allocation3 + $0x7a] sm:$0xff]  ;;  %4038 = vst.msk [vmem:[%s12284_s27 + $0x48] sm:$0xff] %vm650_vm0, %v3942_v50  ;;  %v12541_v28 = vpop.f32.mrf.mxu0  ;;  %v12551_v50 = vpop.permute.xlu1 %4391 }
 0x2e4   : > { %v3808_v55 = vmax.f32 %v3718_v14, %v3763_v13  ;;  %3587 = vst.msk [vmem:[#allocation3 + $0x88] sm:$0xff] %vm650_vm0, %v3536_v36  ;;  %v3214_v63 = vadd.f32 %v12481_v26, %v2901_v47  ;;  %v3853_v27 = vld [vmem:[#allocation3 + $0x7b] sm:$0xff]  ;;  %v15188_v26 = vld [vmem:[#allocation27_spill] sm:$0xff] }
 0x2e5   : > { %9765 = vmatmul.msk.bf16.gmra.mxu1 %vm650_vm0, %v2143_v29  ;;  %v2545_v47 = vadd.f32 %v2544_v5, %v15188_v26  ;;  %15189 = vst [vmem:[#allocation27_spill] sm:$0xff] %v12551_v50  ;;  %v3719_v29 = vmax.f32 %v3629_v46, %v3674_v2  ;;  %v12557_v5 = vpop.permute.xlu2 %4888  ;;  %v12570_v2 = vld [vmem:[%s14963_s5] ss:$0 sm:$0xff]  ;;  %v2967_v50 = vld [vmem:[#allocation2 + $0x138] sm:$0xff] }
 0x2e6   : > { %v3263_v15 = vmul.f32 %v12146_v40, %v3214_v63  ;;  %9792 = vmatmul.msk.bf16.gmra.mxu2 %vm650_vm0, %v2679_v51  ;;  %v3898_v61 = vmax.f32 %v3808_v55, %v3853_v27  ;;  %10310 = vset.pattern.permute.xlu1 %v15104_v30  ;;  %v4082_v40 = vld [vmem:[#allocation4 + $0x58] sm:$0xff]  ;;  %v15190_v55 = vld [vmem:[#allocation29_spill] sm:$0xff]  ;;  %15191 = vst [vmem:[#allocation81_spill] sm:$0xff] %v12557_v5 }
 0x2e7   : > { %9820 = vmatmul.msk.bf16.gmra.mxu3 %vm650_vm0, %v2993_v16  ;;  %6004 = vperm.xlu1 %10310, %v10630_v0   ;;  %v12573_v46 = vpop.permute.xlu0 %3439  ;;  %v2652_v5 = vld [vmem:[#allocation2 + $0x127] sm:$0xff] }
 0x2e8   : > { %v3312_v36 = vadd.f32 %v12151_v35, %v3263_v15  ;;  %v3943_v7 = vmax.f32 %v3898_v61, 0.0  ;;  %15192 = vst [vmem:[#allocation82_spill] sm:$0xff] %v12573_v46 }
 0x2e9   : > { %v2812_v14 = vpop.f32.mrf.mxu2  ;;  %v4083_v13 = vld [vmem:[#allocation4 + $0x60] sm:$0xff] }
 0x2ea   : > { %v12554_v53 = vpop.f32.mrf.mxu3  ;;  %v3537_v51 = vmul.f32 %v15190_v55, %v3312_v36  ;;  %v2902_v63 = vadd.f32 %v2812_v14, %v2545_v47  ;;  %v2546_v35 = vpop.f32.mrf.mxu1  ;;  %v4123_v16 = vpack.c.bf16 %v4083_v13, %v4082_v40  ;;  %3994 = vst.msk [vmem:[#allocation4 + $0x68] sm:$0xff] %vm650_vm0, %v3943_v7  ;;  %10309 = vset.pattern.permute.xlu2 %v15104_v30  ;;  %v15193_v40 = vld [vmem:[#allocation35_spill] sm:$0xff]  ;;  %v2117_v13 = vld [vmem:[#allocation2 + $0x11d] sm:$0xff] }
 0x2eb   : > { %v3764_v27 = vld [vmem:[#allocation3 + $0x82] sm:$0xff]  ;;  %4039 = vst.msk [vmem:[%s12284_s27 + $0x50] sm:$0xff] %vm650_vm0, %v3943_v7  ;;  %v2418_v26 = vpop.f32.mrf.mxu0  ;;  %6000 = vperm.xlu2 %10309, %v12475_v39   ;;  %v3675_v7 = vld [vmem:[#allocation3 + $0x79] sm:$0xff]  ;;  %v2547_v39 = vadd.f32 %v2546_v35, %v15193_v40  ;;  %v12587_v35 = vpop.permute.xlu1 %4884  ;;  %v2144_v40 = vpack.c.bf16 %v2117_v13, %v2116_v59 }
 0x2ec   : > { %v3809_v15 = vmax.f32 %v3719_v29, %v3764_v27  ;;  %3588 = vst.msk [vmem:[#allocation3 + $0x90] sm:$0xff] %vm650_vm0, %v3537_v51  ;;  %v3215_v61 = vadd.f32 %v12507_v38, %v2902_v63  ;;  %9834 = vmatmul.msk.bf16.gmra.mxu0 %vm650_vm0, %v4123_v16  ;;  %v3854_v0 = vld [vmem:[#allocation3 + $0x83] sm:$0xff]  ;;  %v3630_v51 = vld [vmem:[#allocation3 + $0x78] sm:$0xff] }
 0x2ed   : > { %v12578_v38 = vld [vmem:[%s14964_s6] ss:$0 sm:$0xff]  ;;  %v2653_v27 = vld [vmem:[#allocation2 + $0x12f] sm:$0xff]  ;;  %15194 = vst [vmem:[#allocation35_spill] sm:$0xff] %v12587_v35 }
 0x2ee   : > { %v3264_v36 = vmul.f32 %v12570_v2, %v3215_v61  ;;  %v3899_v47 = vmax.f32 %v3809_v15, %v3854_v0  ;;  %v2968_v15 = vld [vmem:[#allocation2 + $0x140] sm:$0xff]  ;;  %v3720_v61 = vmax.f32 %v3630_v51, %v3675_v7 }
 0x2ef   : > { %10312 = vset.pattern.permute.xlu1 %v15101_v3  ;;  %v2994_v51 = vpack.c.bf16 %v2968_v15, %v2967_v50  ;;  %v3676_v35 = vld [vmem:[#allocation3 + $0x81] sm:$0xff] }
 0x2f0   : > { %v3313_v14 = vadd.f32 %v12578_v38, %v3264_v36  ;;  %v3944_v29 = vmax.f32 %v3899_v47, 0.0  ;;  %v10633_v36 = vld [vmem:[%s14959_s1 + $0xc0] sm:$0xff] }
 0x2f1   : > { %v2814_v63 = vpop.f32.mrf.mxu2  ;;  %4932 = vperm.xlu1 %10312, %v10633_v36  }
 0x2f2   : > { %v12582_v16 = vpop.f32.mrf.mxu3  ;;  %v3538_v26 = vmul.f32 %v12484_v8, %v3313_v14  ;;  %v2903_v0 = vadd.f32 %v2814_v63, %v2547_v39  ;;  %v2549_v55 = vpop.f32.mrf.mxu1  ;;  %3995 = vst.msk [vmem:[#allocation4 + $0x70] sm:$0xff] %vm650_vm0, %v3944_v29  ;;  %v2680_v39 = vpack.c.bf16 %v2653_v27, %v2652_v5 }
 0x2f3   : > { %v3765_v47 = vld [vmem:[#allocation3 + $0x8a] sm:$0xff]  ;;  %4040 = vst.msk [vmem:[%s12284_s27 + $0x58] sm:$0xff] %vm650_vm0, %v3944_v29  ;;  %v12596_v63 = vpop.permute.xlu2 %5960  ;;  %10311 = vset.pattern.permute.xlu2 %v15110_v24  ;;  %v3631_v29 = vld [vmem:[#allocation3 + $0x80] sm:$0xff]  ;;  %v2550_v50 = vadd.f32 %v2549_v55, %v11917_v19 }
 0x2f4   : > { %v3810_v7 = vmax.f32 %v3720_v61, %v3765_v47  ;;  %3589 = vst.msk [vmem:[#allocation3 + $0x98] sm:$0xff] %vm650_vm0, %v3538_v26  ;;  %v3216_v14 = vadd.f32 %v12532_v48, %v2903_v0  ;;  %v3855_v8 = vld [vmem:[#allocation3 + $0x8b] sm:$0xff]  ;;  %4439 = vperm.xlu2 %10311, %v10633_v36   ;;  %v3721_v27 = vmax.f32 %v3631_v29, %v3676_v35  ;;  %v4084_v26 = vld [vmem:[#allocation4 + $0x68] sm:$0xff]  ;;  %v12607_v47 = vpop.permute.xlu0 %3447  ;;  %v12617_v35 = vpop.permute.xlu1 %5426 }
 0x2f5   : > { %15195 = vst [vmem:[#allocation83_spill] sm:$0xff] %v12596_v63  ;;  %9766 = vmatmul.msk.bf16.gmra.mxu1 %vm650_vm0, %v2144_v40  ;;  %v15197_v40 = vld [vmem:[#allocation14_spill] sm:$0xff] }
 0x2f6   : > { %v3265_v59 = vmul.f32 %v12570_v2, %v3216_v14  ;;  %9793 = vmatmul.msk.bf16.gmra.mxu2 %vm650_vm0, %v2680_v39  ;;  %v3900_v13 = vmax.f32 %v3810_v7, %v3855_v8  ;;  %15196 = vst [vmem:[#allocation84_spill] sm:$0xff] %v12607_v47 }
 0x2f7   : > { %9821 = vmatmul.msk.bf16.gmra.mxu3 %vm650_vm0, %v2994_v51  ;;  %15198 = vst [vmem:[#allocation85_spill] sm:$0xff] %v12617_v35  ;;  %v2969_v35 = vld [vmem:[#allocation2 + $0x148] sm:$0xff] }
 0x2f8   : > { %v3314_v48 = vadd.f32 %v12578_v38, %v3265_v59  ;;  %v3945_v5 = vmax.f32 %v3900_v13, 0.0 }
 0x2f9   : > { %v2817_v15 = vpop.f32.mrf.mxu2  ;;  %v4085_v0 = vld [vmem:[#allocation4 + $0x70] sm:$0xff]  ;;  %10314 = vset.pattern.permute.xlu1 %v15108_v18 }
 0x2fa   : > { %v12605_v61 = vpop.f32.mrf.mxu3  ;;  %v3539_v14 = vmul.f32 %v15197_v40, %v3314_v48  ;;  %v2904_v39 = vadd.f32 %v2817_v15, %v2550_v50  ;;  %v2551_v8 = vpop.f32.mrf.mxu1  ;;  %v4124_v7 = vpack.c.bf16 %v4085_v0, %v4084_v26  ;;  %3996 = vst.msk [vmem:[#allocation4 + $0x78] sm:$0xff] %vm650_vm0, %v3945_v5  ;;  %5470 = vperm.xlu1 %10314, %v10633_v36   ;;  %v3677_v50 = vld [vmem:[#allocation3 + $0x89] sm:$0xff] }
 0x2fb   : > { %v3766_v51 = vld [vmem:[#allocation3 + $0x92] sm:$0xff]  ;;  %4041 = vst.msk [vmem:[%s12284_s27 + $0x60] sm:$0xff] %vm650_vm0, %v3945_v5  ;;  %v12620_v29 = vpop.permute.xlu2 %4399  ;;  %v2552_v5 = vadd.f32 %v2551_v8, %v11945_v37  ;;  %v2655_v15 = vld [vmem:[#allocation2 + $0x13f] sm:$0xff]  ;;  %v2654_v8 = vld [vmem:[#allocation2 + $0x137] sm:$0xff] }
 0x2fc   : > { %v3811_v19 = vmax.f32 %v3721_v27, %v3766_v51  ;;  %3590 = vst.msk [vmem:[#allocation3 + $0xa0] sm:$0xff] %vm650_vm0, %v3539_v14  ;;  %v3217_v55 = vadd.f32 %v12554_v53, %v2904_v39  ;;  %9835 = vmatmul.msk.bf16.gmra.mxu0 %vm650_vm0, %v4124_v7  ;;  %v3856_v59 = vld [vmem:[#allocation3 + $0x93] sm:$0xff]  ;;  %10313 = vset.pattern.permute.xlu2 %v15101_v3  ;;  %v3632_v0 = vld [vmem:[#allocation3 + $0x88] sm:$0xff]  ;;  %v12635_v63 = vpop.permute.xlu0 %3459 }
 0x2fd   : > { %15199 = vst [vmem:[#allocation86_spill] sm:$0xff] %v12620_v29  ;;  %v2119_v27 = vld [vmem:[#allocation2 + $0x12d] sm:$0xff]  ;;  %v3722_v51 = vmax.f32 %v3632_v0, %v3677_v50  ;;  %v2118_v37 = vld [vmem:[#allocation2 + $0x125] sm:$0xff]  ;;  %v2681_v29 = vpack.c.bf16 %v2655_v15, %v2654_v8  ;;  %v12643_v15 = vpop.permute.xlu1 %5964 }
 0x2fe   : > { %v3266_v13 = vmul.f32 %v12570_v2, %v3217_v55  ;;  %v3901_v48 = vmax.f32 %v3811_v19, %v3856_v59  ;;  %v10634_v26 = vld [vmem:[%s14959_s1 + $0xc8] sm:$0xff]  ;;  %v2970_v7 = vld [vmem:[#allocation2 + $0x150] sm:$0xff]  ;;  %v15200_v19 = vld [vmem:[#allocation38_spill] sm:$0xff]  ;;  %v2145_v40 = vpack.c.bf16 %v2119_v27, %v2118_v37  ;;  %15201 = vst [vmem:[#allocation87_spill] sm:$0xff] %v12635_v63 }
 0x2ff   : > { %4936 = vperm.xlu2 %10313, %v10634_v26   ;;  %15202 = vst [vmem:[#allocation88_spill] sm:$0xff] %v12643_v15  ;;  %v3678_v0 = vld [vmem:[#allocation3 + $0x91] sm:$0xff] }
 0x300   : > { %v3315_v36 = vadd.f32 %v12578_v38, %v3266_v13  ;;  %v3946_v53 = vmax.f32 %v3901_v48, 0.0 }
 0x301   : > { %v2819_v14 = vpop.f32.mrf.mxu2 }
 0x302   : > { %v12628_v39 = vpop.f32.mrf.mxu3  ;;  %v3540_v55 = vmul.f32 %v15200_v19, %v3315_v36  ;;  %v2905_v59 = vadd.f32 %v2819_v14, %v2552_v5  ;;  %v2554_v13 = vpop.f32.mrf.mxu1  ;;  %3997 = vst.msk [vmem:[#allocation4 + $0x80] sm:$0xff] %vm650_vm0, %v3946_v53  ;;  %10317 = vset.pattern.permute.xlu1 %v15104_v30  ;;  %v2995_v36 = vpack.c.bf16 %v2970_v7, %v2969_v35  ;;  %v2656_v19 = vld [vmem:[#allocation2 + $0x147] sm:$0xff] }
 0x303   : > { %v3767_v48 = vld [vmem:[#allocation3 + $0x9a] sm:$0xff]  ;;  %4042 = vst.msk [vmem:[%s12284_s27 + $0x68] sm:$0xff] %vm650_vm0, %v3946_v53  ;;  %6012 = vperm.xlu1 %10317, %v10634_v26  }
 0x304   : > { %v3812_v43 = vmax.f32 %v3722_v51, %v3767_v48  ;;  %3591 = vst.msk [vmem:[#allocation3 + $0xa8] sm:$0xff] %vm650_vm0, %v3540_v55  ;;  %v3218_v50 = vadd.f32 %v12582_v16, %v2905_v59  ;;  %v3857_v5 = vld [vmem:[#allocation3 + $0x9b] sm:$0xff]  ;;  %v2555_v51 = vadd.f32 %v2554_v13, %v11963_v10  ;;  %v12647_v16 = vpop.permute.xlu2 %4896 }
 0x305   : > { %9767 = vmatmul.msk.bf16.gmra.mxu1 %vm650_vm0, %v2145_v40  ;;  %15203 = vst [vmem:[#allocation89_spill] sm:$0xff] %v12647_v16  ;;  %v3633_v40 = vld [vmem:[#allocation3 + $0x90] sm:$0xff]  ;;  %v2971_v16 = vld [vmem:[#allocation2 + $0x158] sm:$0xff] }
 0x306   : > { %v3267_v27 = vmul.f32 %v12570_v2, %v3218_v50  ;;  %9794 = vmatmul.msk.bf16.gmra.mxu2 %vm650_vm0, %v2681_v29  ;;  %v3902_v53 = vmax.f32 %v3812_v43, %v3857_v5  ;;  %v4086_v29 = vld [vmem:[#allocation4 + $0x78] sm:$0xff]  ;;  %v3723_v37 = vmax.f32 %v3633_v40, %v3678_v0  ;;  %v12663_v5 = vld [vmem:[%s14959_s1 + $0xd8] sm:$0xff]  ;;  %v12671_v40 = vpop.permute.xlu1 %4892 }
 0x307   : > { %9822 = vmatmul.msk.bf16.gmra.mxu3 %vm650_vm0, %v2995_v36  ;;  %10315 = vset.pattern.permute.xlu2 %v15108_v18  ;;  %15205 = vst [vmem:[#allocation91_spill] sm:$0xff] %v12671_v40  ;;  %v4567_v40 = vld [vmem:[#allocation4 + $0x17] sm:$0xff] }
 0x308   : > { %v3316_v14 = vadd.f32 %v12578_v38, %v3267_v27  ;;  %v3947_v35 = vmax.f32 %v3902_v53, 0.0  ;;  %5474 = vperm.xlu2 %10315, %v10634_v26   ;;  %v12666_v27 = vpop.permute.xlu0 %3471 }
 0x309   : > { %v2822_v7 = vpop.f32.mrf.mxu2  ;;  %v4087_v59 = vld [vmem:[#allocation4 + $0x80] sm:$0xff]  ;;  %15204 = vst [vmem:[#allocation90_spill] sm:$0xff] %v12666_v27 }
 0x30a   : > { %v12650_v55 = vpop.f32.mrf.mxu3  ;;  %v3541_v43 = vmul.f32 %v12517_v25, %v3316_v14  ;;  %v2906_v8 = vadd.f32 %v2822_v7, %v2555_v51  ;;  %v2556_v48 = vpop.f32.mrf.mxu1  ;;  %v4125_v50 = vpack.c.bf16 %v4087_v59, %v4086_v29  ;;  %3998 = vst.msk [vmem:[#allocation4 + $0x88] sm:$0xff] %vm650_vm0, %v3947_v35  ;;  %v3679_v14 = vld [vmem:[#allocation3 + $0x99] sm:$0xff] }
 0x30b   : > { %v3768_v10 = vld [vmem:[#allocation3 + $0xa2] sm:$0xff]  ;;  %4043 = vst.msk [vmem:[%s12284_s27 + $0x70] sm:$0xff] %vm650_vm0, %v3947_v35  ;;  %10319 = vset.pattern.permute.xlu1 %v15110_v24  ;;  %v2557_v51 = vadd.f32 %v2556_v48, %v11987_v21  ;;  %v3634_v29 = vld [vmem:[#allocation3 + $0x98] sm:$0xff] }
 0x30c   : > { %v3813_v13 = vmax.f32 %v3723_v37, %v3768_v10  ;;  %3592 = vst.msk [vmem:[#allocation3 + $0xb0] sm:$0xff] %vm650_vm0, %v3541_v43  ;;  %v3219_v36 = vadd.f32 %v12605_v61, %v2906_v8  ;;  %9836 = vmatmul.msk.bf16.gmra.mxu0 %vm650_vm0, %v4125_v50  ;;  %v3858_v26 = vld [vmem:[#allocation3 + $0xa3] sm:$0xff]  ;;  %4451 = vperm.xlu1 %10319, %v12663_v5   ;;  %v2657_v43 = vld [vmem:[#allocation2 + $0x14f] sm:$0xff]  ;;  %v12677_v21 = vpop.permute.xlu2 %5434 }
 0x30d   : > { %v2121_v35 = vld [vmem:[#allocation2 + $0x13d] sm:$0xff]  ;;  %v3724_v50 = vmax.f32 %v3634_v29, %v3679_v14  ;;  %v15206_v10 = vld [vmem:[#allocation24_spill] sm:$0xff]  ;;  %15207 = vst [vmem:[#allocation92_spill] sm:$0xff] %v12677_v21 }
 0x30e   : > { %v3268_v53 = vmul.f32 %v12570_v2, %v3219_v36  ;;  %v3903_v0 = vmax.f32 %v3813_v13, %v3858_v26  ;;  %v2972_v8 = vld [vmem:[#allocation2 + $0x160] sm:$0xff]  ;;  %v10636_v48 = vld [vmem:[%s14959_s1 + $0xd0] sm:$0xff] }
 0x30f   : > { %v2996_v29 = vpack.c.bf16 %v2972_v8, %v2971_v16 }
 0x310   : > { %v3317_v61 = vadd.f32 %v12578_v38, %v3268_v53  ;;  %v3948_v7 = vmax.f32 %v3903_v0, 0.0  ;;  %10318 = vset.pattern.permute.xlu2 %v15110_v24  ;;  %v2120_v53 = vld [vmem:[#allocation2 + $0x135] sm:$0xff] }
 0x311   : > { %v2824_v59 = vpop.f32.mrf.mxu2  ;;  %4447 = vperm.xlu2 %10318, %v10636_v48   ;;  %v2146_v25 = vpack.c.bf16 %v2121_v35, %v2120_v53  ;;  %v15209_v53 = vld [vmem:[#allocation10_spill] sm:$0xff] }
 0x312   : > { %v12673_v37 = vpop.f32.mrf.mxu3  ;;  %v3542_v13 = vmul.f32 %v15206_v10, %v3317_v61  ;;  %v2907_v36 = vadd.f32 %v2824_v59, %v2557_v51  ;;  %v2559_v26 = vpop.f32.mrf.mxu1  ;;  %3999 = vst.msk [vmem:[#allocation4 + $0x90] sm:$0xff] %vm650_vm0, %v3948_v7  ;;  %v2682_v51 = vpack.c.bf16 %v2657_v43, %v2656_v19  ;;  %v3680_v10 = vld [vmem:[#allocation3 + $0xa1] sm:$0xff] }
 0x313   : > { %v3769_v0 = vld [vmem:[#allocation3 + $0xaa] sm:$0xff]  ;;  %4044 = vst.msk [vmem:[%s12284_s27 + $0x78] sm:$0xff] %vm650_vm0, %v3948_v7  ;;  %v12692_v7 = vpop.permute.xlu0 %3483  ;;  %v2560_v19 = vadd.f32 %v2559_v26, %v12007_v34 }
 0x314   : > { %v3814_v14 = vmax.f32 %v3724_v50, %v3769_v0  ;;  %3593 = vst.msk [vmem:[#allocation3 + $0xb8] sm:$0xff] %vm650_vm0, %v3542_v13  ;;  %v3220_v61 = vadd.f32 %v12628_v39, %v2907_v36  ;;  %v3859_v59 = vld [vmem:[#allocation3 + $0xab] sm:$0xff]  ;;  %10321 = vset.pattern.permute.xlu1 %v15108_v18  ;;  %v3635_v50 = vld [vmem:[#allocation3 + $0xa0] sm:$0xff]  ;;  %v12708_v26 = vpop.permute.xlu2 %4407 }
 0x315   : > { %9768 = vmatmul.msk.bf16.gmra.mxu1 %vm650_vm0, %v2146_v25  ;;  %5478 = vperm.xlu1 %10321, %v10636_v48   ;;  %15208 = vst [vmem:[#allocation93_spill] sm:$0xff] %v12692_v7  ;;  %v3725_v16 = vmax.f32 %v3635_v50, %v3680_v10  ;;  %v4088_v13 = vld [vmem:[#allocation4 + $0x88] sm:$0xff] }
 0x316   : > { %v3269_v21 = vmul.f32 %v12570_v2, %v3220_v61  ;;  %9795 = vmatmul.msk.bf16.gmra.mxu2 %vm650_vm0, %v2682_v51  ;;  %v3904_v35 = vmax.f32 %v3814_v14, %v3859_v59  ;;  %15211 = vst [vmem:[#allocation95_spill] sm:$0xff] %v12708_v26 }
 0x317   : > { %9823 = vmatmul.msk.bf16.gmra.mxu3 %vm650_vm0, %v2996_v29  ;;  %v12699_v29 = vpop.permute.xlu1 %5430 }
 0x318   : > { %v3318_v39 = vadd.f32 %v12578_v38, %v3269_v21  ;;  %v3949_v25 = vmax.f32 %v3904_v35, 0.0  ;;  %15210 = vst [vmem:[#allocation94_spill] sm:$0xff] %v12699_v29 }
 0x319   : > { %v2827_v43 = vpop.f32.mrf.mxu2  ;;  %v4089_v36 = vld [vmem:[#allocation4 + $0x90] sm:$0xff]  ;;  %10320 = vset.pattern.permute.xlu2 %v15101_v3 }
 0x31a   : > { %v12696_v8 = vpop.f32.mrf.mxu3  ;;  %v3543_v0 = vmul.f32 %v15209_v53, %v3318_v39  ;;  %v2908_v61 = vadd.f32 %v2827_v43, %v2560_v19  ;;  %v2561_v14 = vpop.f32.mrf.mxu1  ;;  %v4126_v51 = vpack.c.bf16 %v4089_v36, %v4088_v13  ;;  %4000 = vst.msk [vmem:[#allocation4 + $0x98] sm:$0xff] %vm650_vm0, %v3949_v25  ;;  %4940 = vperm.xlu2 %10320, %v10636_v48   ;;  %v3681_v39 = vld [vmem:[#allocation3 + $0xa9] sm:$0xff]  ;;  %v2658_v53 = vld [vmem:[#allocation2 + $0x157] sm:$0xff] }
 0x31b   : > { %v3770_v21 = vld [vmem:[#allocation3 + $0xb2] sm:$0xff]  ;;  %4045 = vst.msk [vmem:[%s12284_s27 + $0x80] sm:$0xff] %vm650_vm0, %v3949_v25  ;;  %v2562_v25 = vadd.f32 %v2561_v14, %v12026_v56  ;;  %v2659_v43 = vld [vmem:[#allocation2 + $0x15f] sm:$0xff] }
 0x31c   : > { %v3815_v34 = vmax.f32 %v3725_v16, %v3770_v21  ;;  %3594 = vst.msk [vmem:[#allocation3 + $0xc0] sm:$0xff] %vm650_vm0, %v3543_v0  ;;  %v3221_v10 = vadd.f32 %v12650_v55, %v2908_v61  ;;  %9837 = vmatmul.msk.bf16.gmra.mxu0 %vm650_vm0, %v4126_v51  ;;  %v3860_v59 = vld [vmem:[#allocation3 + $0xb3] sm:$0xff]  ;;  %v3636_v55 = vld [vmem:[#allocation3 + $0xa8] sm:$0xff]  ;;  %v12716_v51 = vpop.permute.xlu0 %3495 }
 0x31d   : > { %10323 = vset.pattern.permute.xlu1 %v15104_v30  ;;  %v2123_v16 = vld [vmem:[#allocation2 + $0x14d] sm:$0xff]  ;;  %15212 = vst [vmem:[#allocation96_spill] sm:$0xff] %v12716_v51  ;;  %v3726_v21 = vmax.f32 %v3636_v55, %v3681_v39 }
 0x31e   : > { %v3270_v35 = vmul.f32 %v12570_v2, %v3221_v10  ;;  %v3905_v50 = vmax.f32 %v3815_v34, %v3860_v59  ;;  %6016 = vperm.xlu1 %10323, %v10636_v48   ;;  %v2974_v61 = vld [vmem:[#allocation2 + $0x170] sm:$0xff]  ;;  %v2683_v48 = vpack.c.bf16 %v2659_v43, %v2658_v53 }
 0x320   : > { %v3319_v19 = vadd.f32 %v12578_v38, %v3270_v35  ;;  %v3950_v13 = vmax.f32 %v3905_v50, 0.0  ;;  %v2122_v35 = vld [vmem:[#allocation2 + $0x145] sm:$0xff] }
 0x321   : > { %v2829_v36 = vpop.f32.mrf.mxu2  ;;  %v2147_v14 = vpack.c.bf16 %v2123_v16, %v2122_v35  ;;  %v2973_v50 = vld [vmem:[#allocation2 + $0x168] sm:$0xff]  ;;  %v12732_v16 = vpop.permute.xlu2 %4900 }
 0x322   : > { %v12714_v0 = vpop.f32.mrf.mxu3  ;;  %v3544_v34 = vmul.f32 %v12544_v20, %v3319_v19  ;;  %v2909_v10 = vadd.f32 %v2829_v36, %v2562_v25  ;;  %v2564_v59 = vpop.f32.mrf.mxu1  ;;  %4001 = vst.msk [vmem:[#allocation4 + $0xa0] sm:$0xff] %vm650_vm0, %v3950_v13  ;;  %10322 = vset.pattern.permute.xlu2 %v15108_v18  ;;  %v2997_v19 = vpack.c.bf16 %v2974_v61, %v2973_v50  ;;  %v4090_v35 = vld [vmem:[#allocation4 + $0x98] sm:$0xff] }
 0x323   : > { %v3771_v56 = vld [vmem:[#allocation3 + $0xba] sm:$0xff]  ;;  %4046 = vst.msk [vmem:[%s12284_s27 + $0x88] sm:$0xff] %vm650_vm0, %v3950_v13  ;;  %v12725_v25 = vpop.permute.xlu1 %5972  ;;  %5482 = vperm.xlu2 %10322, %v12663_v5   ;;  %v3682_v13 = vld [vmem:[#allocation3 + $0xb1] sm:$0xff]  ;;  %v2565_v36 = vadd.f32 %v2564_v59, %v12045_v32 }
 0x324   : > { %v3816_v26 = vmax.f32 %v3726_v21, %v3771_v56  ;;  %3595 = vst.msk [vmem:[#allocation3 + $0xc8] sm:$0xff] %vm650_vm0, %v3544_v34  ;;  %v3222_v39 = vadd.f32 %v12673_v37, %v2909_v10  ;;  %v3861_v55 = vld [vmem:[#allocation3 + $0xbb] sm:$0xff]  ;;  %v3637_v21 = vld [vmem:[#allocation3 + $0xb0] sm:$0xff] }
 0x325   : > { %15213 = vst [vmem:[#allocation97_spill] sm:$0xff] %v12725_v25  ;;  %9769 = vmatmul.msk.bf16.gmra.mxu1 %vm650_vm0, %v2147_v14  ;;  %v12742_v14 = vld [vmem:[%s14959_s1 + $0xe8] sm:$0xff] }
 0x326   : > { %v3271_v53 = vmul.f32 %v12570_v2, %v3222_v39  ;;  %9796 = vmatmul.msk.bf16.gmra.mxu2 %vm650_vm0, %v2683_v48  ;;  %15214 = vst [vmem:[#allocation98_spill] sm:$0xff] %v12732_v16  ;;  %v3906_v43 = vmax.f32 %v3816_v26, %v3861_v55  ;;  %10326 = vset.pattern.permute.xlu1 %v15110_v24  ;;  %v15215_v48 = vld [vmem:[#allocation21_spill] sm:$0xff] }
 0x327   : > { %9824 = vmatmul.msk.bf16.gmra.mxu3 %vm650_vm0, %v2997_v19  ;;  %4459 = vperm.xlu1 %10326, %v12742_v14   ;;  %v3727_v26 = vmax.f32 %v3637_v21, %v3682_v13 }
 0x328   : > { %v3320_v37 = vadd.f32 %v12578_v38, %v3271_v53  ;;  %v3951_v61 = vmax.f32 %v3906_v43, 0.0  ;;  %v12751_v53 = vpop.permute.xlu0 %3507 }
 0x329   : > { %v2832_v34 = vpop.f32.mrf.mxu2  ;;  %v4091_v56 = vld [vmem:[#allocation4 + $0xa0] sm:$0xff]  ;;  %v12746_v50 = vpop.f32.mrf.mxu0  ;;  %15216 = vst [vmem:[#allocation99_spill] sm:$0xff] %v12751_v53 }
 0x32a   : > { %v12737_v10 = vpop.f32.mrf.mxu3  ;;  %v3545_v32 = vmul.f32 %v15215_v48, %v3320_v37  ;;  %v2910_v59 = vadd.f32 %v2832_v34, %v2565_v36  ;;  %v2566_v39 = vpop.f32.mrf.mxu1  ;;  %v4127_v19 = vpack.c.bf16 %v4091_v56, %v4090_v35  ;;  %4002 = vst.msk [vmem:[#allocation4 + $0xa8] sm:$0xff] %vm650_vm0, %v3951_v61 }
 0x32b   : > { %v3772_v55 = vld [vmem:[#allocation3 + $0xc2] sm:$0xff]  ;;  %4047 = vst.msk [vmem:[%s12284_s27 + $0x90] sm:$0xff] %vm650_vm0, %v3951_v61  ;;  %10324 = vset.pattern.permute.xlu2 %v15104_v30  ;;  %v12759_v36 = vpop.permute.xlu1 %4411  ;;  %v3683_v61 = vld [vmem:[#allocation3 + $0xb9] sm:$0xff]  ;;  %v2567_v35 = vadd.f32 %v2566_v39, %v12069_v41  ;;  %v12763_v56 = vpop.permute.xlu2 %5442 }
 0x32c   : > { %v3817_v43 = vmax.f32 %v3727_v26, %v3772_v55  ;;  %3596 = vst.msk [vmem:[#allocation3 + $0xd0] sm:$0xff] %vm650_vm0, %v3545_v32  ;;  %v3223_v20 = vadd.f32 %v12696_v8, %v2910_v59  ;;  %9838 = vmatmul.msk.bf16.gmra.mxu0 %vm650_vm0, %v4127_v19  ;;  %v3862_v13 = vld [vmem:[#allocation3 + $0xc3] sm:$0xff]  ;;  %6020 = vperm.xlu2 %10324, %v12663_v5   ;;  %v3638_v32 = vld [vmem:[#allocation3 + $0xb8] sm:$0xff] }
 0x32d   : > { %15217 = vst [vmem:[#allocation100_spill] sm:$0xff] %v12759_v36  ;;  %v2125_v8 = vld [vmem:[#allocation2 + $0x15d] sm:$0xff]  ;;  %v2661_v5 = vld [vmem:[#allocation2 + $0x16f] sm:$0xff] }
 0x32e   : > { %v3272_v37 = vmul.f32 %v12570_v2, %v3223_v20  ;;  %v3907_v21 = vmax.f32 %v3817_v43, %v3862_v13  ;;  %15218 = vst [vmem:[#allocation101_spill] sm:$0xff] %v12763_v56  ;;  %v2975_v55 = vld [vmem:[#allocation2 + $0x178] sm:$0xff]  ;;  %v3728_v20 = vmax.f32 %v3638_v32, %v3683_v61  ;;  %v2660_v56 = vld [vmem:[#allocation2 + $0x167] sm:$0xff] }
 0x32f   : > { %10328 = vset.pattern.permute.xlu1 %v15101_v3  ;;  %v2124_v39 = vld [vmem:[#allocation2 + $0x155] sm:$0xff] }
 0x330   : > { %v3321_v34 = vadd.f32 %v12578_v38, %v3272_v37  ;;  %v3952_v26 = vmax.f32 %v3907_v21, 0.0  ;;  %4952 = vperm.xlu1 %10328, %v12742_v14   ;;  %v2148_v48 = vpack.c.bf16 %v2125_v8, %v2124_v39 }
 0x331   : > { %v2834_v59 = vpop.f32.mrf.mxu2  ;;  %v12769_v37 = vpop.f32.mrf.mxu0 }
 0x332   : > { %v12765_v19 = vpop.f32.mrf.mxu3  ;;  %v3546_v43 = vmul.f32 %v12573_v46, %v3321_v34  ;;  %v2911_v13 = vadd.f32 %v2834_v59, %v2567_v35  ;;  %v2569_v41 = vpop.f32.mrf.mxu1  ;;  %4003 = vst.msk [vmem:[#allocation4 + $0xb0] sm:$0xff] %vm650_vm0, %v3952_v26  ;;  %v2684_v34 = vpack.c.bf16 %v2661_v5, %v2660_v56  ;;  %v2998_v35 = vpack.c.bf16 %v2975_v55, %v2975_v55  ;;  %v3684_v46 = vld [vmem:[#allocation3 + $0xc1] sm:$0xff] }
 0x333   : > { %v3773_v21 = vld [vmem:[#allocation3 + $0xca] sm:$0xff]  ;;  %4048 = vst.msk [vmem:[%s12284_s27 + $0x98] sm:$0xff] %vm650_vm0, %v3952_v26  ;;  %v12779_v59 = vpop.permute.xlu0 %3519  ;;  %v3639_v56 = vld [vmem:[#allocation3 + $0xc0] sm:$0xff]  ;;  %v2570_v5 = vadd.f32 %v2569_v41, %v12087_v31  ;;  %v12789_v55 = vpop.permute.xlu1 %5438 }
 0x334   : > { %v3818_v36 = vmax.f32 %v3728_v20, %v3773_v21  ;;  %3597 = vst.msk [vmem:[#allocation3 + $0xd8] sm:$0xff] %vm650_vm0, %v3546_v43  ;;  %v3224_v61 = vadd.f32 %v12714_v0, %v2911_v13  ;;  %v3863_v32 = vld [vmem:[#allocation3 + $0xcb] sm:$0xff]  ;;  %10327 = vset.pattern.permute.xlu2 %v15101_v3  ;;  %v3729_v43 = vmax.f32 %v3639_v56, %v3684_v46  ;;  %v4092_v21 = vld [vmem:[#allocation4 + $0xa8] sm:$0xff]  ;;  %v12801_v41 = vpop.permute.xlu2 %5980 }
 0x335   : > { %9770 = vmatmul.msk.bf16.gmra.mxu1 %vm650_vm0, %v2148_v48  ;;  %15219 = vst [vmem:[#allocation102_spill] sm:$0xff] %v12779_v59  ;;  %v10638_v0 = vld [vmem:[%s14959_s1 + $0xe0] sm:$0xff] }
 0x336   : > { %v3273_v8 = vmul.f32 %v12570_v2, %v3224_v61  ;;  %9797 = vmatmul.msk.bf16.gmra.mxu2 %vm650_vm0, %v2684_v34  ;;  %v3908_v26 = vmax.f32 %v3818_v36, %v3863_v32  ;;  %4948 = vperm.xlu2 %10327, %v10638_v0   ;;  %15220 = vst [vmem:[#allocation103_spill] sm:$0xff] %v12789_v55  ;;  %v15221_v61 = vld [vmem:[#allocation31_spill] sm:$0xff] }
 0x337   : > { %9825 = vmatmul.msk.bf16.gmra.mxu3 %vm650_vm0, %v2998_v35  ;;  %15222 = vst [vmem:[#allocation104_spill] sm:$0xff] %v12801_v41 }
 0x338   : > { %v3322_v48 = vadd.f32 %v12578_v38, %v3273_v8  ;;  %v3953_v20 = vmax.f32 %v3908_v26, 0.0  ;;  %10330 = vset.pattern.permute.xlu1 %v15104_v30 }
 0x339   : > { %v2837_v13 = vpop.f32.mrf.mxu2  ;;  %v4093_v36 = vld [vmem:[#allocation4 + $0xb0] sm:$0xff]  ;;  %v12794_v32 = vpop.f32.mrf.mxu0  ;;  %6024 = vperm.xlu1 %10330, %v10638_v0  }
 0x33a   : > { %v12791_v39 = vpop.f32.mrf.mxu3  ;;  %v3547_v34 = vmul.f32 %v15221_v61, %v3322_v48  ;;  %v2912_v35 = vadd.f32 %v2837_v13, %v2570_v5  ;;  %v2571_v16 = vpop.f32.mrf.mxu1  ;;  %v4128_v25 = vpack.c.bf16 %v4093_v36, %v4092_v21  ;;  %4004 = vst.msk [vmem:[#allocation4 + $0xb8] sm:$0xff] %vm650_vm0, %v3953_v20  ;;  %v3685_v13 = vld [vmem:[#allocation3 + $0xc9] sm:$0xff]  ;;  %v5643_v21 = vld [vmem:[#allocation4 + $0x5] sm:$0xff] }
 0x33b   : > { %v3774_v31 = vld [vmem:[#allocation3 + $0xd2] sm:$0xff]  ;;  %4049 = vst.msk [vmem:[%s12284_s27 + $0xa0] sm:$0xff] %vm650_vm0, %v3953_v20  ;;  %v12805_v56 = vpop.permute.xlu0 %4363  ;;  %v5644_v36 = vld [vmem:[#allocation4 + $0xd] sm:$0xff] }
 0x33c   : > { %v3819_v46 = vmax.f32 %v3729_v43, %v3774_v31  ;;  %3598 = vst.msk [vmem:[#allocation3 + $0xe0] sm:$0xff] %vm650_vm0, %v3547_v34  ;;  %v3225_v8 = vadd.f32 %v12737_v10, %v2912_v35  ;;  %9839 = vmatmul.msk.bf16.gmra.mxu0 %vm650_vm0, %v4128_v25  ;;  %v3864_v26 = vld [vmem:[#allocation3 + $0xd3] sm:$0xff]  ;;  %v2572_v43 = vadd.f32 %v2571_v16, %v12109_v62  ;;  %v3640_v25 = vld [vmem:[#allocation3 + $0xc8] sm:$0xff]  ;;  %v2662_v61 = vld [vmem:[#allocation2 + $0x177] sm:$0xff] }
 0x33d   : > { %v2126_v34 = vld [vmem:[#allocation2 + $0x165] sm:$0xff]  ;;  %v5688_v29 = vpack.c.bf16 %v5644_v36, %v5643_v21  ;;  %v12827_v21 = vld [vmem:[%s14959_s1 + $0xf0] sm:$0xff] }
 0x33e   : > { %v3274_v48 = vmul.f32 %v12570_v2, %v3225_v8  ;;  %v3909_v5 = vmax.f32 %v3819_v46, %v3864_v26  ;;  %10329 = vset.pattern.permute.xlu2 %v15108_v18  ;;  %v3730_v8 = vmax.f32 %v3640_v25, %v3685_v13  ;;  %v2149_v16 = vpack.c.bf16 %v2126_v34, %v2126_v34 }
 0x33f   : > { %5486 = vperm.xlu2 %10329, %v10638_v0   ;;  %v2685_v13 = vpack.c.bf16 %v2662_v61, %v2662_v61  ;;  %v3686_v61 = vld [vmem:[#allocation3 + $0xd1] sm:$0xff] }
 0x340   : > { %v3323_v20 = vadd.f32 %v12578_v38, %v3274_v48  ;;  %v3954_v10 = vmax.f32 %v3909_v5, 0.0  ;;  %v12821_v48 = vpop.permute.xlu1 %5976 }
 0x341   : > { %v2839_v35 = vpop.f32.mrf.mxu2  ;;  %v12814_v41 = vpop.f32.mrf.mxu0  ;;  %10332 = vset.pattern.permute.xlu1 %v15110_v24  ;;  %15223 = vst [vmem:[#allocation105_spill] sm:$0xff] %v12821_v48 }
 0x342   : > { %v12811_v31 = vpop.f32.mrf.mxu3  ;;  %v3548_v46 = vmul.f32 %v12607_v47, %v3323_v20  ;;  %v2913_v26 = vadd.f32 %v2839_v35, %v2572_v43  ;;  %v2574_v55 = vpop.f32.mrf.mxu1  ;;  %4005 = vst.msk [vmem:[#allocation4 + $0xc0] sm:$0xff] %vm650_vm0, %v3954_v10  ;;  %4463 = vperm.xlu1 %10332, %v12827_v21  }
 0x343   : > { %v3775_v62 = vld [vmem:[#allocation3 + $0xda] sm:$0xff]  ;;  %4050 = vst.msk [vmem:[%s12284_s27 + $0xa8] sm:$0xff] %vm650_vm0, %v3954_v10  ;;  %v12831_v20 = vpop.permute.xlu2 %4908  ;;  %v12836_v34 = vpop.permute.xlu0 %4836  ;;  %v2575_v25 = vadd.f32 %v2574_v55, %v12126_v52 }
 0x344   : > { %v3820_v0 = vmax.f32 %v3730_v8, %v3775_v62  ;;  %3599 = vst.msk [vmem:[#allocation3 + $0xe8] sm:$0xff] %vm650_vm0, %v3548_v46  ;;  %v3226_v5 = vadd.f32 %v12765_v19, %v2913_v26  ;;  %v3865_v36 = vld [vmem:[#allocation3 + $0xdb] sm:$0xff]  ;;  %v3641_v8 = vld [vmem:[#allocation3 + $0xd0] sm:$0xff] }
 0x345   : > { %9771 = vmatmul.msk.bf16.gmra.mxu1 %vm650_vm0, %v2149_v16  ;;  %15224 = vst [vmem:[#allocation106_spill] sm:$0xff] %v12831_v20  ;;  %v4094_v62 = vld [vmem:[#allocation4 + $0xb8] sm:$0xff] }
 0x346   : > { %v3275_v43 = vmul.f32 %v12570_v2, %v3226_v5  ;;  %9798 = vmatmul.msk.bf16.gmra.mxu2 %vm650_vm0, %v2685_v13  ;;  %v3910_v19 = vmax.f32 %v3820_v0, %v3865_v36  ;;  %v15225_v0 = vld [vmem:[#allocation40_spill] sm:$0xff] }
 0x347   : > { %9911 = vmatmul.msk.bf16.vlgmr.msrb.gmra.mxu3 %vm650_vm0, %v5688_v29  ;;  %10331 = vset.pattern.permute.xlu2 %v15104_v30  ;;  %v3731_v29 = vmax.f32 %v3641_v8, %v3686_v61  ;;  %v10640_v61 = vld [vmem:[%s14959_s1 + $0xf8] sm:$0xff]  ;;  %v5646_v20 = vld [vmem:[#allocation4 + $0x1d] sm:$0xff] }
 0x348   : > { %v3324_v10 = vadd.f32 %v12578_v38, %v3275_v43  ;;  %v3955_v35 = vmax.f32 %v3910_v19, 0.0  ;;  %6028 = vperm.xlu2 %10331, %v12742_v14   ;;  %v5106_v8 = vld [vmem:[#allocation4 + $0xe] sm:$0xff] }
 0x349   : > { %v2842_v46 = vpop.f32.mrf.mxu2  ;;  %v4095_v16 = vld [vmem:[#allocation4 + $0xc0] sm:$0xff]  ;;  %v12845_v36 = vpop.f32.mrf.mxu0 }
 0x34a   : > { %v12841_v26 = vpop.f32.mrf.mxu3  ;;  %v3549_v5 = vmul.f32 %v15225_v0, %v3324_v10  ;;  %v2914_v13 = vadd.f32 %v2842_v46, %v2575_v25  ;;  %v2576_v43 = vpop.f32.mrf.mxu1  ;;  %v4129_v52 = vpack.c.bf16 %v4095_v16, %v4094_v62  ;;  %4006 = vst.msk [vmem:[#allocation4 + $0xc8] sm:$0xff] %vm650_vm0, %v3955_v35  ;;  %10335 = vset.pattern.permute.xlu1 %v15101_v3  ;;  %v3687_v62 = vld [vmem:[#allocation3 + $0xd9] sm:$0xff] }
 0x34b   : > { %v3776_v55 = vld [vmem:[#allocation3 + $0xe2] sm:$0xff]  ;;  %4051 = vst.msk [vmem:[%s12284_s27 + $0xb0] sm:$0xff] %vm650_vm0, %v3955_v35  ;;  %4960 = vperm.xlu1 %10335, %v10640_v61   ;;  %v12857_v10 = vpop.permute.xlu1 %4419  ;;  %v12860_v16 = vpop.permute.xlu2 %5446 }
 0x34c   : > { %v3821_v19 = vmax.f32 %v3731_v29, %v3776_v55  ;;  %3600 = vst.msk [vmem:[#allocation3 + $0xf0] sm:$0xff] %vm650_vm0, %v3549_v5  ;;  %v3227_v47 = vadd.f32 %v12791_v39, %v2914_v13  ;;  %9840 = vmatmul.msk.bf16.gmra.mxu0 %vm650_vm0, %v4129_v52  ;;  %v3866_v14 = vld [vmem:[#allocation3 + $0xe3] sm:$0xff]  ;;  %v2577_v29 = vadd.f32 %v2576_v43, %v12153_v9  ;;  %v4568_v5 = vld [vmem:[#allocation4 + $0x1f] sm:$0xff] }
 0x34d   : > { %15226 = vst [vmem:[#allocation107_spill] sm:$0xff] %v12857_v10  ;;  %v5105_v35 = vld [vmem:[#allocation4 + $0x6] sm:$0xff]  ;;  %v4612_v43 = vpack.c.bf16 %v4568_v5, %v4567_v40 }
 0x34e   : > { %v3276_v25 = vmul.f32 %v12570_v2, %v3227_v47  ;;  %v3911_v46 = vmax.f32 %v3821_v19, %v3866_v14  ;;  %15227 = vst [vmem:[#allocation108_spill] sm:$0xff] %v12860_v16  ;;  %v3642_v52 = vld [vmem:[#allocation3 + $0xd8] sm:$0xff]  ;;  %v5150_v10 = vpack.c.bf16 %v5106_v8, %v5105_v35  ;;  %v15228_v19 = vld [vmem:[#allocation37_spill] sm:$0xff]  ;;  %v12873_v35 = vpop.permute.xlu0 %4864 }
 0x34f   : > { %v3732_v47 = vmax.f32 %v3642_v52, %v3687_v62  ;;  %v3688_v52 = vld [vmem:[#allocation3 + $0xe1] sm:$0xff] }
 0x350   : > { %v3325_v39 = vadd.f32 %v12578_v38, %v3276_v25  ;;  %v3956_v13 = vmax.f32 %v3911_v46, 0.0  ;;  %10333 = vset.pattern.permute.xlu2 %v15110_v24  ;;  %v5645_v46 = vld [vmem:[#allocation4 + $0x15] sm:$0xff]  ;;  %v3643_v5 = vld [vmem:[#allocation3 + $0xe0] sm:$0xff] }
 0x351   : > { %v2844_v55 = vpop.f32.mrf.mxu2  ;;  %v12868_v16 = vpop.f32.mrf.mxu0  ;;  %4467 = vperm.xlu2 %10333, %v10640_v61  }
 0x352   : > { %v12864_v0 = vpop.f32.mrf.mxu3  ;;  %v3550_v14 = vmul.f32 %v15228_v19, %v3325_v39  ;;  %v2915_v48 = vadd.f32 %v2844_v55, %v2577_v29  ;;  %v2579_v25 = vpop.f32.mrf.mxu1  ;;  %4007 = vst.msk [vmem:[#allocation4 + $0xd0] sm:$0xff] %vm650_vm0, %v3956_v13  ;;  %v5689_v39 = vpack.c.bf16 %v5646_v20, %v5645_v46 }
 0x353   : > { %v3777_v9 = vld [vmem:[#allocation3 + $0xea] sm:$0xff]  ;;  %4052 = vst.msk [vmem:[%s12284_s27 + $0xb8] sm:$0xff] %vm650_vm0, %v3956_v13  ;;  %10337 = vset.pattern.permute.xlu1 %v15108_v18  ;;  %v12882_v13 = vpop.permute.xlu1 %4912 }
 0x354   : > { %v3822_v8 = vmax.f32 %v3732_v47, %v3777_v9  ;;  %3601 = vst.msk [vmem:[#allocation3 + $0xf8] sm:$0xff] %vm650_vm0, %v3550_v14  ;;  %v3228_v62 = vadd.f32 %v12811_v31, %v2915_v48  ;;  %v3867_v29 = vld [vmem:[#allocation3 + $0xeb] sm:$0xff]  ;;  %5498 = vperm.xlu1 %10337, %v10640_v61   ;;  %v2580_v48 = vadd.f32 %v2579_v25, %v12175_v11  ;;  %v12896_v25 = vpop.permute.xlu2 %5988 }
 0x355   : > { %9857 = vmatmul.msk.bf16.vlgmr.msrb.gmra.mxu1 %vm650_vm0, %v4612_v43  ;;  %15229 = vst [vmem:[#allocation109_spill] sm:$0xff] %v12882_v13  ;;  %v3733_v47 = vmax.f32 %v3643_v5, %v3688_v52  ;;  %v4096_v43 = vld [vmem:[#allocation4 + $0xc8] sm:$0xff] }
 0x356   : > { %v3277_v55 = vmul.f32 %v12570_v2, %v3228_v62  ;;  %9884 = vmatmul.msk.bf16.vlgmr.msrb.gmra.mxu2 %vm650_vm0, %v5150_v10  ;;  %v3912_v40 = vmax.f32 %v3822_v8, %v3867_v29  ;;  %15230 = vst [vmem:[#allocation110_spill] sm:$0xff] %v12896_v25  ;;  %v5647_v25 = vld [vmem:[#allocation4 + $0x25] sm:$0xff] }
 0x357   : > { %9912 = vmatmul.msk.bf16.gmra.mxu3 %vm650_vm0, %v5689_v39 }
 0x358   : > { %v3326_v31 = vadd.f32 %v12578_v38, %v3277_v55  ;;  %v3957_v20 = vmax.f32 %v3912_v40, 0.0  ;;  %v12901_v40 = vpop.permute.xlu0 %5382 }
 0x359   : > { %v2847_v14 = vpop.f32.mrf.mxu2  ;;  %v4097_v46 = vld [vmem:[#allocation4 + $0xd0] sm:$0xff]  ;;  %v12889_v8 = vpop.f32.mrf.mxu0  ;;  %10336 = vset.pattern.permute.xlu2 %v15108_v18 }
 0x35a   : > { %v12886_v9 = vpop.f32.mrf.mxu3  ;;  %v3551_v10 = vmul.f32 %v12635_v63, %v3326_v31  ;;  %v2916_v62 = vadd.f32 %v2847_v14, %v2580_v48  ;;  %v2581_v61 = vpop.f32.mrf.mxu1  ;;  %v4130_v39 = vpack.c.bf16 %v4097_v46, %v4096_v43  ;;  %4008 = vst.msk [vmem:[#allocation4 + $0xd8] sm:$0xff] %vm650_vm0, %v3957_v20  ;;  %5494 = vperm.xlu2 %10336, %v12827_v21   ;;  %v3689_v48 = vld [vmem:[#allocation3 + $0xe9] sm:$0xff]  ;;  %v5108_v43 = vld [vmem:[#allocation4 + $0x1e] sm:$0xff] }
 0x35b   : > { %v3778_v29 = vld [vmem:[#allocation3 + $0xf2] sm:$0xff]  ;;  %4053 = vst.msk [vmem:[%s12284_s27 + $0xc0] sm:$0xff] %vm650_vm0, %v3957_v20  ;;  %v4570_v14 = vld [vmem:[#allocation4 + $0x2f] sm:$0xff] }
 0x35c   : > { %v3823_v11 = vmax.f32 %v3733_v47, %v3778_v29  ;;  %3602 = vst.msk [vmem:[#allocation3 + $0x100] sm:$0xff] %vm650_vm0, %v3551_v10  ;;  %v3229_v52 = vadd.f32 %v12841_v26, %v2916_v62  ;;  %9841 = vmatmul.msk.bf16.gmra.mxu0 %vm650_vm0, %v4130_v39  ;;  %v3868_v55 = vld [vmem:[#allocation3 + $0xf3] sm:$0xff]  ;;  %10339 = vset.pattern.permute.xlu1 %v15110_v24  ;;  %v12910_v26 = vld [vmem:[%s14959_s1 + $0x100] sm:$0xff] }
 0x35d   : > { %v2582_v47 = vadd.f32 %v2581_v61, %v12196_v23  ;;  %4471 = vperm.xlu1 %10339, %v12910_v26   ;;  %v3644_v10 = vld [vmem:[#allocation3 + $0xe8] sm:$0xff] }
 0x35e   : > { %v3278_v5 = vmul.f32 %v12570_v2, %v3229_v52  ;;  %v3913_v31 = vmax.f32 %v3823_v11, %v3868_v55  ;;  %v5648_v39 = vld [vmem:[#allocation4 + $0x2d] sm:$0xff]  ;;  %v3734_v29 = vmax.f32 %v3644_v10, %v3689_v48  ;;  %v12922_v48 = vpop.permute.xlu1 %5984 }
 0x35f   : > { %v4569_v55 = vld [vmem:[#allocation4 + $0x27] sm:$0xff]  ;;  %15232 = vst [vmem:[#allocation111_spill] sm:$0xff] %v12922_v48  ;;  %v5649_v48 = vld [vmem:[#allocation4 + $0x35] sm:$0xff] }
 0x360   : > { %v3327_v20 = vadd.f32 %v12578_v38, %v3278_v5  ;;  %v3958_v46 = vmax.f32 %v3913_v31, 0.0  ;;  %v15231_v38 = vld [vmem:[#allocation41_spill] sm:$0xff]  ;;  %v5107_v5 = vld [vmem:[#allocation4 + $0x16] sm:$0xff]  ;;  %v4613_v63 = vpack.c.bf16 %v4570_v14, %v4569_v55  ;;  %v12928_v14 = vpop.permute.xlu2 %4427 }
 0x361   : > { %v2849_v2 = vpop.f32.mrf.mxu2  ;;  %v12916_v61 = vpop.f32.mrf.mxu0  ;;  %v5151_v19 = vpack.c.bf16 %v5108_v43, %v5107_v5  ;;  %15233 = vst [vmem:[#allocation112_spill] sm:$0xff] %v12928_v14  ;;  %v12933_v43 = vld [vmem:[%s14963_s5] ss:$0 sm:$0xff]  ;;  %v5650_v14 = vld [vmem:[#allocation4 + $0x3d] sm:$0xff] }
 0x362   : > { %v12913_v62 = vpop.f32.mrf.mxu3  ;;  %v3552_v11 = vmul.f32 %v15231_v38, %v3327_v20  ;;  %v2917_v23 = vadd.f32 %v2849_v2, %v2582_v47  ;;  %v2584_v52 = vpop.f32.mrf.mxu1  ;;  %4009 = vst.msk [vmem:[#allocation4 + $0xe0] sm:$0xff] %vm650_vm0, %v3958_v46  ;;  %10338 = vset.pattern.permute.xlu2 %v15104_v30  ;;  %v5690_v47 = vpack.c.bf16 %v5648_v39, %v5647_v25  ;;  %v3690_v25 = vld [vmem:[#allocation3 + $0xf1] sm:$0xff] }
 0x363   : > { %v3779_v31 = vld [vmem:[#allocation3 + $0xfa] sm:$0xff]  ;;  %4054 = vst.msk [vmem:[%s12284_s27 + $0xc8] sm:$0xff] %vm650_vm0, %v3958_v46  ;;  %6032 = vperm.xlu2 %10338, %v12827_v21   ;;  %v12938_v2 = vpop.permute.xlu0 %5410  ;;  %v2585_v39 = vadd.f32 %v2584_v52, %v12221_v33 }
 0x364   : > { %v3824_v13 = vmax.f32 %v3734_v29, %v3779_v31  ;;  %3603 = vst.msk [vmem:[#allocation3 + $0x108] sm:$0xff] %vm650_vm0, %v3552_v11  ;;  %v3230_v20 = vadd.f32 %v12864_v0, %v2917_v23  ;;  %v3869_v10 = vld [vmem:[#allocation3 + $0xfb] sm:$0xff]  ;;  %v15234_v31 = vld [vmem:[#allocation39_spill] sm:$0xff] }
 0x365   : > { %9858 = vmatmul.msk.bf16.gmra.mxu1 %vm650_vm0, %v4613_v63  ;;  %v12943_v63 = vld [vmem:[%s14964_s6] ss:$0 sm:$0xff]  ;;  %10341 = vset.pattern.permute.xlu1 %v15101_v3 }
 0x366   : > { %v3279_v46 = vmul.f32 %v12933_v43, %v3230_v20  ;;  %9885 = vmatmul.msk.bf16.gmra.mxu2 %vm650_vm0, %v5151_v19  ;;  %v3914_v0 = vmax.f32 %v3824_v13, %v3869_v10  ;;  %v3645_v19 = vld [vmem:[#allocation3 + $0xf0] sm:$0xff]  ;;  %4964 = vperm.xlu1 %10341, %v12910_v26  }
 0x367   : > { %9913 = vmatmul.msk.bf16.gmra.mxu3 %vm650_vm0, %v5690_v47  ;;  %v4098_v13 = vld [vmem:[#allocation4 + $0xd8] sm:$0xff]  ;;  %v3735_v5 = vmax.f32 %v3645_v19, %v3690_v25 }
 0x368   : > { %v3328_v21 = vadd.f32 %v12943_v63, %v3279_v46  ;;  %v3959_v29 = vmax.f32 %v3914_v0, 0.0 }
 0x369   : > { %v2852_v11 = vpop.f32.mrf.mxu2  ;;  %v4099_v55 = vld [vmem:[#allocation4 + $0xe0] sm:$0xff]  ;;  %v12952_v10 = vpop.f32.mrf.mxu0 }
 0x36a   : > { %v12948_v23 = vpop.f32.mrf.mxu3  ;;  %v3553_v20 = vmul.f32 %v15234_v31, %v3328_v21  ;;  %v2918_v47 = vadd.f32 %v2852_v11, %v2585_v39  ;;  %v2586_v46 = vpop.f32.mrf.mxu1  ;;  %v4131_v33 = vpack.c.bf16 %v4099_v55, %v4098_v13  ;;  %4010 = vst.msk [vmem:[#allocation4 + $0xe8] sm:$0xff] %vm650_vm0, %v3959_v29  ;;  %v12964_v21 = vld [vmem:[%s14959_s1 + $0x108] sm:$0xff]  ;;  %v3691_v11 = vld [vmem:[#allocation3 + $0xf9] sm:$0xff]  ;;  %v5110_v31 = vld [vmem:[#allocation4 + $0x2e] sm:$0xff] }
 0x36b   : > { %v3780_v52 = vld [vmem:[#allocation3 + $0x102] sm:$0xff]  ;;  %4055 = vst.msk [vmem:[%s12284_s27 + $0xd0] sm:$0xff] %vm650_vm0, %v3959_v29  ;;  %10340 = vset.pattern.permute.xlu2 %v15110_v24  ;;  %v12967_v39 = vpop.permute.xlu1 %4423  ;;  %v12970_v13 = vpop.permute.xlu2 %5454  ;;  %v2587_v55 = vadd.f32 %v2586_v46, %v12241_v22 }
 0x36c   : > { %v3825_v0 = vmax.f32 %v3735_v5, %v3780_v52  ;;  %3604 = vst.msk [vmem:[#allocation3 + $0x110] sm:$0xff] %vm650_vm0, %v3553_v20  ;;  %v3231_v38 = vadd.f32 %v12886_v9, %v2918_v47  ;;  %9842 = vmatmul.msk.bf16.gmra.mxu0 %vm650_vm0, %v4131_v33  ;;  %v3870_v25 = vld [vmem:[#allocation3 + $0x103] sm:$0xff]  ;;  %4475 = vperm.xlu2 %10340, %v12964_v21   ;;  %v4572_v5 = vld [vmem:[#allocation4 + $0x3f] sm:$0xff]  ;;  %v12984_v15 = vpop.permute.xlu0 %5422 }
 0x36d   : > { %15235 = vst [vmem:[#allocation113_spill] sm:$0xff] %v12967_v39  ;;  %v3646_v47 = vld [vmem:[#allocation3 + $0xf8] sm:$0xff]  ;;  %v4571_v39 = vld [vmem:[#allocation4 + $0x37] sm:$0xff] }
 0x36e   : > { %v3280_v29 = vmul.f32 %v12933_v43, %v3231_v38  ;;  %v3915_v19 = vmax.f32 %v3825_v0, %v3870_v25  ;;  %15236 = vst [vmem:[#allocation114_spill] sm:$0xff] %v12970_v13  ;;  %10344 = vset.pattern.permute.xlu1 %v15108_v18  ;;  %v3736_v38 = vmax.f32 %v3646_v47, %v3691_v11 }
 0x36f   : > { %5506 = vperm.xlu1 %10344, %v12964_v21   ;;  %v4614_v46 = vpack.c.bf16 %v4572_v5, %v4571_v39  ;;  %15237 = vst [vmem:[#allocation115_spill] sm:$0xff] %v12984_v15  ;;  %v5691_v47 = vpack.c.bf16 %v5650_v14, %v5649_v48 }
 0x370   : > { %v3329_v9 = vadd.f32 %v12943_v63, %v3280_v29  ;;  %v3960_v20 = vmax.f32 %v3915_v19, 0.0  ;;  %v5109_v19 = vld [vmem:[#allocation4 + $0x26] sm:$0xff] }
 0x371   : > { %v2854_v33 = vpop.f32.mrf.mxu2  ;;  %v12978_v13 = vpop.f32.mrf.mxu0 }
 0x372   : > { %v12974_v52 = vpop.f32.mrf.mxu3  ;;  %v3554_v0 = vmul.f32 %v12666_v27, %v3329_v9  ;;  %v2919_v25 = vadd.f32 %v2854_v33, %v2587_v55  ;;  %v2589_v29 = vpop.f32.mrf.mxu1  ;;  %4011 = vst.msk [vmem:[#allocation4 + $0xf0] sm:$0xff] %vm650_vm0, %v3960_v20  ;;  %v5152_v55 = vpack.c.bf16 %v5110_v31, %v5109_v19  ;;  %v3692_v27 = vld [vmem:[#allocation3 + $0x101] sm:$0xff] }
 0x373   : > { %v3781_v22 = vld [vmem:[#allocation3 + $0x10a] sm:$0xff]  ;;  %4056 = vst.msk [vmem:[%s12284_s27 + $0xd8] sm:$0xff] %vm650_vm0, %v3960_v20  ;;  %v3647_v20 = vld [vmem:[#allocation3 + $0x100] sm:$0xff]  ;;  %v2590_v48 = vadd.f32 %v2589_v29, %v12263_v1  ;;  %v13008_v1 = vpop.permute.xlu2 %5992 }
 0x374   : > { %v3826_v11 = vmax.f32 %v3736_v38, %v3781_v22  ;;  %3605 = vst.msk [vmem:[#allocation3 + $0x118] sm:$0xff] %vm650_vm0, %v3554_v0  ;;  %v3232_v9 = vadd.f32 %v12913_v62, %v2919_v25  ;;  %v3871_v33 = vld [vmem:[#allocation3 + $0x10b] sm:$0xff]  ;;  %10342 = vset.pattern.permute.xlu2 %v15101_v3  ;;  %v12994_v38 = vpop.permute.xlu1 %4920  ;;  %v3737_v31 = vmax.f32 %v3647_v20, %v3692_v27  ;;  %v4100_v22 = vld [vmem:[#allocation4 + $0xe8] sm:$0xff]  ;;  %v13013_v20 = vpop.permute.xlu0 %5916 }
 0x375   : > { %9859 = vmatmul.msk.bf16.gmra.mxu1 %vm650_vm0, %v4614_v46  ;;  %4968 = vperm.xlu2 %10342, %v12964_v21   ;;  %15238 = vst [vmem:[#allocation116_spill] sm:$0xff] %v12994_v38  ;;  %v15239_v19 = vld [vmem:[#allocation42_spill] sm:$0xff]  ;;  %v4573_v38 = vld [vmem:[#allocation4 + $0x47] sm:$0xff] }
 0x376   : > { %v3281_v39 = vmul.f32 %v12933_v43, %v3232_v9  ;;  %9886 = vmatmul.msk.bf16.gmra.mxu2 %vm650_vm0, %v5152_v55  ;;  %v3916_v5 = vmax.f32 %v3826_v11, %v3871_v33  ;;  %15240 = vst [vmem:[#allocation117_spill] sm:$0xff] %v13008_v1  ;;  %v5651_v1 = vld [vmem:[#allocation4 + $0x45] sm:$0xff] }
 0x377   : > { %9914 = vmatmul.msk.bf16.gmra.mxu3 %vm650_vm0, %v5691_v47  ;;  %10346 = vset.pattern.permute.xlu1 %v15104_v30 }
 0x378   : > { %v3330_v62 = vadd.f32 %v12943_v63, %v3281_v39  ;;  %v3961_v14 = vmax.f32 %v3916_v5, 0.0  ;;  %6044 = vperm.xlu1 %10346, %v12964_v21  }
 0x379   : > { %v2857_v0 = vpop.f32.mrf.mxu2  ;;  %v4101_v46 = vld [vmem:[#allocation4 + $0xf0] sm:$0xff]  ;;  %v13001_v55 = vpop.f32.mrf.mxu0 }
 0x37a   : > { %v12998_v25 = vpop.f32.mrf.mxu3  ;;  %v3555_v9 = vmul.f32 %v15239_v19, %v3330_v62  ;;  %v2920_v11 = vadd.f32 %v2857_v0, %v2590_v48  ;;  %v2591_v47 = vpop.f32.mrf.mxu1  ;;  %v4132_v33 = vpack.c.bf16 %v4101_v46, %v4100_v22  ;;  %4012 = vst.msk [vmem:[#allocation4 + $0xf8] sm:$0xff] %vm650_vm0, %v3961_v14  ;;  %v3693_v0 = vld [vmem:[#allocation3 + $0x109] sm:$0xff]  ;;  %v5112_v22 = vld [vmem:[#allocation4 + $0x3e] sm:$0xff] }
 0x37b   : > { %v3782_v39 = vld [vmem:[#allocation3 + $0x112] sm:$0xff]  ;;  %4057 = vst.msk [vmem:[%s12284_s27 + $0xe0] sm:$0xff] %vm650_vm0, %v3961_v14  ;;  %v2592_v14 = vadd.f32 %v2591_v47, %v12298_v6 }
 0x37c   : > { %v3827_v27 = vmax.f32 %v3737_v31, %v3782_v39  ;;  %3606 = vst.msk [vmem:[#allocation3 + $0x120] sm:$0xff] %vm650_vm0, %v3555_v9  ;;  %v3233_v29 = vadd.f32 %v12948_v23, %v2920_v11  ;;  %9843 = vmatmul.msk.bf16.gmra.mxu0 %vm650_vm0, %v4132_v33  ;;  %v3872_v5 = vld [vmem:[#allocation3 + $0x113] sm:$0xff]  ;;  %v4574_v31 = vld [vmem:[#allocation4 + $0x4f] sm:$0xff]  ;;  %v13029_v15 = vpop.permute.xlu1 %5458 }
 0x37d   : > { %10345 = vset.pattern.permute.xlu2 %v15104_v30  ;;  %v3648_v23 = vld [vmem:[#allocation3 + $0x108] sm:$0xff]  ;;  %15242 = vst [vmem:[#allocation118_spill] sm:$0xff] %v13029_v15 }
 0x37e   : > { %v3282_v62 = vmul.f32 %v12933_v43, %v3233_v29  ;;  %v3917_v48 = vmax.f32 %v3827_v27, %v3872_v5  ;;  %6040 = vperm.xlu2 %10345, %v12910_v26   ;;  %v5652_v33 = vld [vmem:[#allocation4 + $0x4d] sm:$0xff]  ;;  %v3738_v39 = vmax.f32 %v3648_v23, %v3693_v0  ;;  %v15241_v27 = vld [vmem:[#allocation7_spill] sm:$0xff]  ;;  %v10645_v23 = vld [vmem:[%s14959_s1 + $0x110] sm:$0xff] }
 0x37f   : > { %v5111_v6 = vld [vmem:[#allocation4 + $0x36] sm:$0xff] }
 0x380   : > { %v3331_v21 = vadd.f32 %v12943_v63, %v3282_v62  ;;  %v3962_v46 = vmax.f32 %v3917_v48, 0.0  ;;  %v4615_v48 = vpack.c.bf16 %v4574_v31, %v4573_v38  ;;  %v5153_v26 = vpack.c.bf16 %v5112_v22, %v5111_v6  ;;  %10348 = vset.pattern.permute.xlu1 %v15101_v3  ;;  %v13037_v31 = vpop.permute.xlu2 %4435 }
 0x381   : > { %v2859_v9 = vpop.f32.mrf.mxu2  ;;  %v13023_v19 = vpop.f32.mrf.mxu0  ;;  %4972 = vperm.xlu1 %10348, %v10645_v23   ;;  %15243 = vst [vmem:[#allocation119_spill] sm:$0xff] %v13037_v31  ;;  %v4575_v31 = vld [vmem:[#allocation4 + $0x57] sm:$0xff] }
 0x382   : > { %v13020_v11 = vpop.f32.mrf.mxu3  ;;  %v3556_v29 = vmul.f32 %v15241_v27, %v3331_v21  ;;  %v2921_v5 = vadd.f32 %v2859_v9, %v2592_v14  ;;  %v2594_v62 = vpop.f32.mrf.mxu1  ;;  %4013 = vst.msk [vmem:[#allocation4 + $0x100] sm:$0xff] %vm650_vm0, %v3962_v46  ;;  %v5692_v14 = vpack.c.bf16 %v5652_v33, %v5651_v1  ;;  %v3694_v9 = vld [vmem:[#allocation3 + $0x111] sm:$0xff] }
 0x383   : > { %v3783_v47 = vld [vmem:[#allocation3 + $0x11a] sm:$0xff]  ;;  %4058 = vst.msk [vmem:[%s12284_s27 + $0xe8] sm:$0xff] %vm650_vm0, %v3962_v46  ;;  %v2595_v33 = vadd.f32 %v2594_v62, %v12325_v49 }
 0x384   : > { %v3828_v0 = vmax.f32 %v3738_v39, %v3783_v47  ;;  %3607 = vst.msk [vmem:[#allocation3 + $0x128] sm:$0xff] %vm650_vm0, %v3556_v29  ;;  %v3234_v21 = vadd.f32 %v12974_v52, %v2921_v5  ;;  %v3873_v38 = vld [vmem:[#allocation3 + $0x11b] sm:$0xff]  ;;  %v13042_v52 = vpop.permute.xlu0 %5928  ;;  %v3649_v29 = vld [vmem:[#allocation3 + $0x110] sm:$0xff] }
 0x385   : > { %9860 = vmatmul.msk.bf16.gmra.mxu1 %vm650_vm0, %v4615_v48  ;;  %v4102_v47 = vld [vmem:[#allocation4 + $0xf8] sm:$0xff] }
 0x386   : > { %v3283_v22 = vmul.f32 %v12933_v43, %v3234_v21  ;;  %9887 = vmatmul.msk.bf16.gmra.mxu2 %vm650_vm0, %v5153_v26  ;;  %v3918_v46 = vmax.f32 %v3828_v0, %v3873_v38  ;;  %10347 = vset.pattern.permute.xlu2 %v15110_v24  ;;  %v3739_v26 = vmax.f32 %v3649_v29, %v3694_v9 }
 0x387   : > { %9915 = vmatmul.msk.bf16.gmra.mxu3 %vm650_vm0, %v5692_v14  ;;  %4479 = vperm.xlu2 %10347, %v10645_v23  }
 0x388   : > { %v3332_v1 = vadd.f32 %v12943_v63, %v3283_v22  ;;  %v3963_v39 = vmax.f32 %v3918_v46, 0.0 }
 0x389   : > { %v2862_v5 = vpop.f32.mrf.mxu2  ;;  %v4103_v48 = vld [vmem:[#allocation4 + $0x100] sm:$0xff]  ;;  %v13050_v14 = vpop.f32.mrf.mxu0  ;;  %10350 = vset.pattern.permute.xlu1 %v15108_v18 }
 0x38a   : > { %v13047_v6 = vpop.f32.mrf.mxu3  ;;  %v3557_v0 = vmul.f32 %v12692_v7, %v3332_v1  ;;  %v2922_v21 = vadd.f32 %v2862_v5, %v2595_v33  ;;  %v2596_v38 = vpop.f32.mrf.mxu1  ;;  %v4133_v22 = vpack.c.bf16 %v4103_v48, %v4102_v47  ;;  %4014 = vst.msk [vmem:[#allocation4 + $0x108] sm:$0xff] %vm650_vm0, %v3963_v39  ;;  %5510 = vperm.xlu1 %10350, %v10645_v23   ;;  %v3695_v5 = vld [vmem:[#allocation3 + $0x119] sm:$0xff] }
 0x38b   : > { %v3784_v49 = vld [vmem:[#allocation3 + $0x122] sm:$0xff]  ;;  %4059 = vst.msk [vmem:[%s12284_s27 + $0xf0] sm:$0xff] %vm650_vm0, %v3963_v39  ;;  %v13059_v1 = vpop.permute.xlu1 %4431  ;;  %v13062_v47 = vpop.permute.xlu2 %4928  ;;  %v2597_v48 = vadd.f32 %v2596_v38, %v12355_v12  ;;  %v5654_v23 = vld [vmem:[#allocation4 + $0x5d] sm:$0xff] }
 0x38c   : > { %v3829_v62 = vmax.f32 %v3739_v26, %v3784_v49  ;;  %3608 = vst.msk [vmem:[#allocation3 + $0x130] sm:$0xff] %vm650_vm0, %v3557_v0  ;;  %v3235_v46 = vadd.f32 %v12998_v25, %v2922_v21  ;;  %9844 = vmatmul.msk.bf16.gmra.mxu0 %vm650_vm0, %v4133_v22  ;;  %v3874_v9 = vld [vmem:[#allocation3 + $0x123] sm:$0xff]  ;;  %v4576_v26 = vld [vmem:[#allocation4 + $0x5f] sm:$0xff] }
 0x38d   : > { %15244 = vst [vmem:[#allocation120_spill] sm:$0xff] %v13059_v1  ;;  %v3650_v0 = vld [vmem:[#allocation3 + $0x118] sm:$0xff]  ;;  %v5114_v49 = vld [vmem:[#allocation4 + $0x4e] sm:$0xff] }
 0x38e   : > { %v3284_v33 = vmul.f32 %v12933_v43, %v3235_v46  ;;  %v3919_v29 = vmax.f32 %v3829_v62, %v3874_v9  ;;  %15245 = vst [vmem:[#allocation121_spill] sm:$0xff] %v13062_v47  ;;  %v3740_v46 = vmax.f32 %v3650_v0, %v3695_v5  ;;  %v15246_v62 = vld [vmem:[#allocation43_spill] sm:$0xff]  ;;  %v10646_v12 = vld [vmem:[%s14959_s1 + $0x118] sm:$0xff]  ;;  %v13078_v5 = vpop.permute.xlu0 %5956 }
 0x38f   : > { %10349 = vset.pattern.permute.xlu2 %v15101_v3  ;;  %v5113_v47 = vld [vmem:[#allocation4 + $0x46] sm:$0xff]  ;;  %v5653_v1 = vld [vmem:[#allocation4 + $0x55] sm:$0xff] }
 0x390   : > { %v3333_v39 = vadd.f32 %v12943_v63, %v3284_v33  ;;  %v3964_v25 = vmax.f32 %v3919_v29, 0.0  ;;  %4976 = vperm.xlu2 %10349, %v10646_v12   ;;  %v4616_v29 = vpack.c.bf16 %v4576_v26, %v4575_v31  ;;  %v5154_v0 = vpack.c.bf16 %v5114_v49, %v5113_v47  ;;  %v3696_v15 = vld [vmem:[#allocation3 + $0x121] sm:$0xff] }
 0x391   : > { %v2864_v21 = vpop.f32.mrf.mxu2  ;;  %v13070_v27 = vpop.f32.mrf.mxu0 }
 0x392   : > { %v13066_v22 = vpop.f32.mrf.mxu3  ;;  %v3558_v9 = vmul.f32 %v15246_v62, %v3333_v39  ;;  %v2923_v7 = vadd.f32 %v2864_v21, %v2597_v48  ;;  %v2599_v33 = vpop.f32.mrf.mxu1  ;;  %4015 = vst.msk [vmem:[#allocation4 + $0x110] sm:$0xff] %vm650_vm0, %v3964_v25  ;;  %v5693_v21 = vpack.c.bf16 %v5654_v23, %v5653_v1  ;;  %10352 = vset.pattern.permute.xlu1 %v15104_v30 }
 0x393   : > { %v3785_v38 = vld [vmem:[#allocation3 + $0x12a] sm:$0xff]  ;;  %4060 = vst.msk [vmem:[%s12284_s27 + $0xf8] sm:$0xff] %vm650_vm0, %v3964_v25  ;;  %6052 = vperm.xlu1 %10352, %v10646_v12   ;;  %v3651_v25 = vld [vmem:[#allocation3 + $0x120] sm:$0xff] }
 0x394   : > { %v3830_v39 = vmax.f32 %v3740_v46, %v3785_v38  ;;  %3609 = vst.msk [vmem:[#allocation3 + $0x138] sm:$0xff] %vm650_vm0, %v3558_v9  ;;  %v3236_v48 = vadd.f32 %v13020_v11, %v2923_v7  ;;  %v3875_v62 = vld [vmem:[#allocation3 + $0x12b] sm:$0xff]  ;;  %v13087_v46 = vpop.permute.xlu1 %4924  ;;  %v2600_v11 = vadd.f32 %v2599_v33, %v12385_v57  ;;  %v3741_v47 = vmax.f32 %v3651_v25, %v3696_v15  ;;  %v4104_v9 = vld [vmem:[#allocation4 + $0x108] sm:$0xff]  ;;  %v13100_v57 = vpop.permute.xlu2 %6000 }
 0x395   : > { %9861 = vmatmul.msk.bf16.gmra.mxu1 %vm650_vm0, %v4616_v29  ;;  %15247 = vst [vmem:[#allocation122_spill] sm:$0xff] %v13087_v46  ;;  %v15248_v29 = vld [vmem:[#allocation9_spill] sm:$0xff] }
 0x396   : > { %v3285_v31 = vmul.f32 %v12933_v43, %v3236_v48  ;;  %9888 = vmatmul.msk.bf16.gmra.mxu2 %vm650_vm0, %v5154_v0  ;;  %v3920_v26 = vmax.f32 %v3830_v39, %v3875_v62  ;;  %15250 = vst [vmem:[#allocation124_spill] sm:$0xff] %v13100_v57  ;;  %v13105_v25 = vpop.permute.xlu0 %5968 }
 0x397   : > { %9916 = vmatmul.msk.bf16.gmra.mxu3 %vm650_vm0, %v5693_v21  ;;  %15251 = vst [vmem:[#allocation125_spill] sm:$0xff] %v13105_v25  ;;  %v5655_v25 = vld [vmem:[#allocation4 + $0x65] sm:$0xff] }
 0x398   : > { %v3334_v7 = vadd.f32 %v12943_v63, %v3285_v31  ;;  %v3965_v1 = vmax.f32 %v3920_v26, 0.0  ;;  %10351 = vset.pattern.permute.xlu2 %v15108_v18 }
 0x399   : > { %v2867_v49 = vpop.f32.mrf.mxu2  ;;  %v4105_v38 = vld [vmem:[#allocation4 + $0x110] sm:$0xff]  ;;  %v13094_v62 = vpop.f32.mrf.mxu0  ;;  %5514 = vperm.xlu2 %10351, %v10646_v12  }
 0x39a   : > { %v13091_v23 = vpop.f32.mrf.mxu3  ;;  %v3559_v48 = vmul.f32 %v15248_v29, %v3334_v7  ;;  %v2924_v0 = vadd.f32 %v2867_v49, %v2600_v11  ;;  %15249 = vst [vmem:[#allocation123_spill] sm:$0xff] %v13094_v62  ;;  %v2601_v39 = vpop.f32.mrf.mxu1  ;;  %v4134_v21 = vpack.c.bf16 %v4105_v38, %v4104_v9  ;;  %v3697_v49 = vld [vmem:[#allocation3 + $0x129] sm:$0xff]  ;;  %v5116_v9 = vld [vmem:[#allocation4 + $0x5e] sm:$0xff] }
 0x39b   : > { %4016 = vst.msk [vmem:[#allocation4 + $0x118] sm:$0xff] %vm650_vm0, %v3965_v1  ;;  %v3786_v31 = vld [vmem:[#allocation3 + $0x132] sm:$0xff]  ;;  %10354 = vset.pattern.permute.xlu1 %v15110_v24 }
 0x39c   : > { %4061 = vst.msk [vmem:[%s12284_s27 + $0x100] sm:$0xff] %vm650_vm0, %v3965_v1  ;;  %v3831_v15 = vmax.f32 %v3741_v47, %v3786_v31  ;;  %v3237_v33 = vadd.f32 %v13047_v6, %v2924_v0  ;;  %9845 = vmatmul.msk.bf16.gmra.mxu0 %vm650_vm0, %v4134_v21  ;;  %v3876_v26 = vld [vmem:[#allocation3 + $0x133] sm:$0xff]  ;;  %v2602_v1 = vadd.f32 %v2601_v39, %v12417_v58  ;;  %v4578_v47 = vld [vmem:[#allocation4 + $0x6f] sm:$0xff]  ;;  %v13126_v62 = vpop.permute.xlu1 %5466 }
 0x39d   : > { %3610 = vst.msk [vmem:[#allocation3 + $0x140] sm:$0xff] %vm650_vm0, %v3559_v48  ;;  %v13114_v6 = vld [vmem:[%s14959_s1 + $0x128] sm:$0xff]  ;;  %v3652_v48 = vld [vmem:[#allocation3 + $0x128] sm:$0xff] }
 0x39e   : > { %v3286_v7 = vmul.f32 %v12933_v43, %v3237_v33  ;;  %v3921_v11 = vmax.f32 %v3831_v15, %v3876_v26  ;;  %4491 = vperm.xlu1 %10354, %v13114_v6   ;;  %v5656_v31 = vld [vmem:[#allocation4 + $0x6d] sm:$0xff]  ;;  %v3742_v15 = vmax.f32 %v3652_v48, %v3697_v49  ;;  %15252 = vst [vmem:[#allocation126_spill] sm:$0xff] %v13126_v62  ;;  %v4579_v62 = vld [vmem:[#allocation4 + $0x77] sm:$0xff] }
 0x39f   : > { %v10648_v48 = vld [vmem:[%s14959_s1 + $0x120] sm:$0xff] }
 0x3a0   : > { %v3335_v12 = vadd.f32 %v12943_v63, %v3286_v7  ;;  %v3966_v38 = vmax.f32 %v3921_v11, 0.0  ;;  %v4577_v7 = vld [vmem:[#allocation4 + $0x67] sm:$0xff]  ;;  %v5115_v11 = vld [vmem:[#allocation4 + $0x56] sm:$0xff] }
 0x3a1   : > { %v2869_v0 = vpop.f32.mrf.mxu2  ;;  %v13120_v39 = vpop.f32.mrf.mxu0  ;;  %v4617_v57 = vpack.c.bf16 %v4578_v47, %v4577_v7  ;;  %v5155_v46 = vpack.c.bf16 %v5116_v9, %v5115_v11  ;;  %10353 = vset.pattern.permute.xlu2 %v15110_v24 }
 0x3a2   : > { %v13117_v21 = vpop.f32.mrf.mxu3  ;;  %v3560_v33 = vmul.f32 %v12716_v51, %v3335_v12  ;;  %v2925_v58 = vadd.f32 %v2869_v0, %v2602_v1  ;;  %v2604_v26 = vpop.f32.mrf.mxu1  ;;  %4017 = vst.msk [vmem:[#allocation4 + $0x120] sm:$0xff] %vm650_vm0, %v3966_v38  ;;  %v5694_v1 = vpack.c.bf16 %v5656_v31, %v5655_v25  ;;  %4487 = vperm.xlu2 %10353, %v10648_v48   ;;  %v3698_v0 = vld [vmem:[#allocation3 + $0x131] sm:$0xff] }
 0x3a3   : > { %4062 = vst.msk [vmem:[%s12284_s27 + $0x108] sm:$0xff] %vm650_vm0, %v3966_v38  ;;  %v13134_v9 = vpop.permute.xlu2 %4439  ;;  %v2605_v31 = vadd.f32 %v2604_v26, %v12443_v42  ;;  %v4106_v7 = vld [vmem:[#allocation4 + $0x118] sm:$0xff] }
 0x3a4   : > { %v3787_v29 = vld [vmem:[#allocation3 + $0x13a] sm:$0xff]  ;;  %3611 = vst.msk [vmem:[#allocation3 + $0x148] sm:$0xff] %vm650_vm0, %v3560_v33  ;;  %v3238_v12 = vadd.f32 %v13066_v22, %v2925_v58  ;;  %v13139_v22 = vpop.permute.xlu0 %4375 }
 0x3a5   : > { %v3832_v49 = vmax.f32 %v3742_v15, %v3787_v29  ;;  %v3877_v47 = vld [vmem:[#allocation3 + $0x13b] sm:$0xff]  ;;  %9862 = vmatmul.msk.bf16.gmra.mxu1 %vm650_vm0, %v4617_v57  ;;  %15253 = vst [vmem:[#allocation127_spill] sm:$0xff] %v13134_v9  ;;  %v3653_v57 = vld [vmem:[#allocation3 + $0x130] sm:$0xff] }
 0x3a6   : > { %v3287_v38 = vmul.f32 %v12933_v43, %v3238_v12  ;;  %9889 = vmatmul.msk.bf16.gmra.mxu2 %vm650_vm0, %v5155_v46  ;;  %10358 = vset.pattern.permute.xlu1 %v15108_v18  ;;  %v3743_v11 = vmax.f32 %v3653_v57, %v3698_v0  ;;  %v5658_v9 = vld [vmem:[#allocation4 + $0x7d] sm:$0xff] }
 0x3a7   : > { %9917 = vmatmul.msk.bf16.gmra.mxu3 %vm650_vm0, %v5694_v1  ;;  %v3922_v29 = vmax.f32 %v3832_v49, %v3877_v47  ;;  %5518 = vperm.xlu1 %10358, %v10648_v48   ;;  %v15254_v49 = vld [vmem:[#allocation44_spill] sm:$0xff] }
 0x3a8   : > { %v3336_v25 = vadd.f32 %v12943_v63, %v3287_v38 }
 0x3a9   : > { %v3967_v15 = vmax.f32 %v3922_v29, 0.0  ;;  %v2872_v33 = vpop.f32.mrf.mxu2  ;;  %v4107_v46 = vld [vmem:[#allocation4 + $0x120] sm:$0xff]  ;;  %v13147_v47 = vpop.f32.mrf.mxu0 }
 0x3aa   : > { %v13144_v58 = vpop.f32.mrf.mxu3  ;;  %v3561_v12 = vmul.f32 %v15254_v49, %v3336_v25  ;;  %v2926_v1 = vadd.f32 %v2872_v33, %v2605_v31  ;;  %15255 = vst [vmem:[#allocation128_spill] sm:$0xff] %v13147_v47  ;;  %v2606_v38 = vpop.f32.mrf.mxu1  ;;  %v4135_v51 = vpack.c.bf16 %v4107_v46, %v4106_v7  ;;  %10355 = vset.pattern.permute.xlu2 %v15101_v3  ;;  %v3699_v33 = vld [vmem:[#allocation3 + $0x139] sm:$0xff]  ;;  %v5118_v49 = vld [vmem:[#allocation4 + $0x6e] sm:$0xff] }
 0x3ab   : > { %4018 = vst.msk [vmem:[#allocation4 + $0x128] sm:$0xff] %vm650_vm0, %v3967_v15  ;;  %v3788_v42 = vld [vmem:[#allocation3 + $0x142] sm:$0xff]  ;;  %4980 = vperm.xlu2 %10355, %v10648_v48   ;;  %v13156_v25 = vpop.permute.xlu1 %6004  ;;  %v13159_v7 = vpop.permute.xlu2 %4936  ;;  %v5657_v47 = vld [vmem:[#allocation4 + $0x75] sm:$0xff] }
 0x3ac   : > { %4063 = vst.msk [vmem:[%s12284_s27 + $0x110] sm:$0xff] %vm650_vm0, %v3967_v15  ;;  %v3833_v26 = vmax.f32 %v3743_v11, %v3788_v42  ;;  %v3239_v29 = vadd.f32 %v13091_v23, %v2926_v1  ;;  %9846 = vmatmul.msk.bf16.gmra.mxu0 %vm650_vm0, %v4135_v51  ;;  %v3878_v0 = vld [vmem:[#allocation3 + $0x143] sm:$0xff]  ;;  %v13161_v15 = vpop.permute.xlu0 %4403  ;;  %v2607_v23 = vadd.f32 %v2606_v38, %v12466_v45  ;;  %v4580_v11 = vld [vmem:[#allocation4 + $0x7f] sm:$0xff] }
 0x3ad   : > { %3612 = vst.msk [vmem:[#allocation3 + $0x150] sm:$0xff] %vm650_vm0, %v3561_v12  ;;  %v3654_v12 = vld [vmem:[#allocation3 + $0x138] sm:$0xff]  ;;  %v4618_v38 = vpack.c.bf16 %v4580_v11, %v4579_v62  ;;  %v3655_v11 = vld [vmem:[#allocation3 + $0x140] sm:$0xff] }
 0x3ae   : > { %15256 = vst [vmem:[#allocation129_spill] sm:$0xff] %v13156_v25  ;;  %v3288_v31 = vmul.f32 %v12933_v43, %v3239_v29  ;;  %v3923_v57 = vmax.f32 %v3833_v26, %v3878_v0  ;;  %v3744_v26 = vmax.f32 %v3654_v12, %v3699_v33  ;;  %v15259_v29 = vld [vmem:[#allocation11_spill] sm:$0xff] }
 0x3af   : > { %15257 = vst [vmem:[#allocation130_spill] sm:$0xff] %v13159_v7  ;;  %10360 = vset.pattern.permute.xlu1 %v15104_v30 }
 0x3b0   : > { %15258 = vst [vmem:[#allocation131_spill] sm:$0xff] %v13161_v15  ;;  %v3337_v46 = vadd.f32 %v12943_v63, %v3288_v31  ;;  %v3968_v51 = vmax.f32 %v3923_v57, 0.0  ;;  %6056 = vperm.xlu1 %10360, %v10648_v48   ;;  %v5117_v57 = vld [vmem:[#allocation4 + $0x66] sm:$0xff] }
 0x3b1   : > { %v2874_v1 = vpop.f32.mrf.mxu2  ;;  %v13169_v25 = vpop.f32.mrf.mxu0 }
 0x3b2   : > { %v13165_v42 = vpop.f32.mrf.mxu3  ;;  %v3562_v0 = vmul.f32 %v15259_v29, %v3337_v46  ;;  %v2927_v7 = vadd.f32 %v2874_v1, %v2607_v23  ;;  %v2609_v31 = vpop.f32.mrf.mxu1  ;;  %4019 = vst.msk [vmem:[#allocation4 + $0x130] sm:$0xff] %vm650_vm0, %v3968_v51  ;;  %v5156_v46 = vpack.c.bf16 %v5118_v49, %v5117_v57  ;;  %v5695_v23 = vpack.c.bf16 %v5658_v9, %v5657_v47  ;;  %v3700_v1 = vld [vmem:[#allocation3 + $0x141] sm:$0xff]  ;;  %v5119_v29 = vld [vmem:[#allocation4 + $0x76] sm:$0xff] }
 0x3b3   : > { %4064 = vst.msk [vmem:[%s12284_s27 + $0x118] sm:$0xff] %vm650_vm0, %v3968_v51  ;;  %10359 = vset.pattern.permute.xlu2 %v15108_v18  ;;  %v13182_v51 = vpop.permute.xlu1 %4932  ;;  %v2610_v49 = vadd.f32 %v2609_v31, %v12493_v44  ;;  %v13198_v31 = vld [vmem:[%s14959_s1 + $0x138] sm:$0xff] }
 0x3b4   : > { %v3789_v45 = vld [vmem:[#allocation3 + $0x14a] sm:$0xff]  ;;  %3613 = vst.msk [vmem:[#allocation3 + $0x158] sm:$0xff] %vm650_vm0, %v3562_v0  ;;  %v3240_v33 = vadd.f32 %v13117_v21, %v2927_v7  ;;  %5522 = vperm.xlu2 %10359, %v13114_v6   ;;  %v4416_v21 = vpop.permute.xlu0 %4415  ;;  %v3745_v7 = vmax.f32 %v3655_v11, %v3700_v1  ;;  %v13201_v1 = vpop.permute.xlu2 %5474 }
 0x3b5   : > { %v3834_v15 = vmax.f32 %v3744_v26, %v3789_v45  ;;  %v3879_v12 = vld [vmem:[#allocation3 + $0x14b] sm:$0xff]  ;;  %9863 = vmatmul.msk.bf16.gmra.mxu1 %vm650_vm0, %v4618_v38  ;;  %15260 = vst [vmem:[#allocation132_spill] sm:$0xff] %v13182_v51  ;;  %v4108_v45 = vld [vmem:[#allocation4 + $0x128] sm:$0xff] }
 0x3b6   : > { %v3289_v48 = vmul.f32 %v12933_v43, %v3240_v33  ;;  %9890 = vmatmul.msk.bf16.gmra.mxu2 %vm650_vm0, %v5156_v46  ;;  %15261 = vst [vmem:[#allocation133_spill] sm:$0xff] %v13201_v1 }
 0x3b7   : > { %9918 = vmatmul.msk.bf16.gmra.mxu3 %vm650_vm0, %v5695_v23  ;;  %v3924_v62 = vmax.f32 %v3834_v15, %v3879_v12 }
 0x3b8   : > { %v3338_v9 = vadd.f32 %v12943_v63, %v3289_v48  ;;  %10362 = vset.pattern.permute.xlu1 %v15110_v24 }
 0x3b9   : > { %v3969_v47 = vmax.f32 %v3924_v62, 0.0  ;;  %v2877_v26 = vpop.f32.mrf.mxu2  ;;  %v4109_v38 = vld [vmem:[#allocation4 + $0x130] sm:$0xff]  ;;  %v4273_v33 = vpop.f32.mrf.mxu0  ;;  %4499 = vperm.xlu1 %10362, %v13198_v31  }
 0x3ba   : > { %v13186_v0 = vpop.f32.mrf.mxu3  ;;  %v3563_v15 = vmul.f32 %v12751_v53, %v3338_v9  ;;  %v2928_v57 = vadd.f32 %v2877_v26, %v2610_v49  ;;  %v2611_v46 = vpop.f32.mrf.mxu1  ;;  %v4136_v23 = vpack.c.bf16 %v4109_v38, %v4108_v45  ;;  %v13191_v44 = vmul.f32 %v4416_v21, %v4273_v33  ;;  %v3701_v49 = vld [vmem:[#allocation3 + $0x149] sm:$0xff]  ;;  %v5120_v38 = vld [vmem:[#allocation4 + $0x7e] sm:$0xff] }
 0x3bb   : > { %4020 = vst.msk [vmem:[#allocation4 + $0x138] sm:$0xff] %vm650_vm0, %v3969_v47  ;;  %v3790_v12 = vld [vmem:[#allocation3 + $0x152] sm:$0xff]  ;;  %v2612_v26 = vadd.f32 %v2611_v46, %v12521_v60  ;;  %v4582_v45 = vld [vmem:[#allocation4 + $0x8f] sm:$0xff] }
 0x3bc   : > { %4065 = vst.msk [vmem:[%s12284_s27 + $0x120] sm:$0xff] %vm650_vm0, %v3969_v47  ;;  %v3835_v48 = vmax.f32 %v3745_v7, %v3790_v12  ;;  %v3241_v62 = vadd.f32 %v13144_v58, %v2928_v57  ;;  %9847 = vmatmul.msk.bf16.gmra.mxu0 %vm650_vm0, %v4136_v23  ;;  %v3880_v11 = vld [vmem:[#allocation3 + $0x153] sm:$0xff]  ;;  %10361 = vset.pattern.permute.xlu2 %v15104_v30  ;;  %v5660_v33 = vld [vmem:[#allocation4 + $0x8d] sm:$0xff] }
 0x3bd   : > { %3614 = vst.msk [vmem:[#allocation3 + $0x160] sm:$0xff] %vm650_vm0, %v3563_v15  ;;  %6060 = vperm.xlu2 %10361, %v13114_v6   ;;  %v3656_v15 = vld [vmem:[#allocation3 + $0x148] sm:$0xff]  ;;  %v15262_v12 = vld [vmem:[#allocation45_spill] sm:$0xff] }
 0x3be   : > { %v3290_v21 = vmul.f32 %v12933_v43, %v3241_v62  ;;  %v3925_v9 = vmax.f32 %v3835_v48, %v3880_v11  ;;  %v3746_v23 = vmax.f32 %v3656_v15, %v3701_v49  ;;  %v5659_v6 = vld [vmem:[#allocation4 + $0x85] sm:$0xff] }
 0x3c0   : > { %v3339_v47 = vadd.f32 %v12943_v63, %v3290_v21  ;;  %v3970_v7 = vmax.f32 %v3925_v9, 0.0  ;;  %v4581_v21 = vld [vmem:[#allocation4 + $0x87] sm:$0xff]  ;;  %v5157_v9 = vpack.c.bf16 %v5120_v38, %v5119_v29 }
 0x3c1   : > { %v2879_v58 = vpop.f32.mrf.mxu2  ;;  %v13212_v11 = vpop.f32.mrf.mxu0  ;;  %v4619_v46 = vpack.c.bf16 %v4582_v45, %v4581_v21  ;;  %10364 = vset.pattern.permute.xlu1 %v15101_v3 }
 0x3c2   : > { %v3197_v57 = vpop.f32.mrf.mxu3  ;;  %v3564_v48 = vmul.f32 %v15262_v12, %v3339_v47  ;;  %v2929_v62 = vadd.f32 %v2879_v58, %v2612_v26  ;;  %v2614_v53 = vpop.f32.mrf.mxu1  ;;  %4021 = vst.msk [vmem:[#allocation4 + $0x140] sm:$0xff] %vm650_vm0, %v3970_v7  ;;  %v5696_v26 = vpack.c.bf16 %v5660_v33, %v5659_v6  ;;  %4992 = vperm.xlu1 %10364, %v13198_v31   ;;  %v4110_v21 = vld [vmem:[#allocation4 + $0x138] sm:$0xff] }
 0x3c3   : > { %4066 = vst.msk [vmem:[%s12284_s27 + $0x128] sm:$0xff] %vm650_vm0, %v3970_v7  ;;  %v13218_v57 = vpop.permute.xlu1 %5470  ;;  %v13224_v45 = vpop.permute.xlu2 %4447  ;;  %v3702_v7 = vld [vmem:[#allocation3 + $0x151] sm:$0xff] }
 0x3c4   : > { %v3791_v60 = vld [vmem:[#allocation3 + $0x15a] sm:$0xff]  ;;  %15263 = vst [vmem:[#allocation134_spill] sm:$0xff] %v13218_v57  ;;  %v3242_v47 = vadd.f32 %v13165_v42, %v2929_v62  ;;  %v2615_v42 = vadd.f32 %v2614_v53, %v12541_v28  ;;  %v15265_v6 = vld [vmem:[#allocation15_spill] sm:$0xff] }
 0x3c5   : > { %v3836_v49 = vmax.f32 %v3746_v23, %v3791_v60  ;;  %3615 = vst.msk [vmem:[#allocation3 + $0x168] sm:$0xff] %vm650_vm0, %v3564_v48  ;;  %v3881_v15 = vld [vmem:[#allocation3 + $0x15b] sm:$0xff]  ;;  %9864 = vmatmul.msk.bf16.gmra.mxu1 %vm650_vm0, %v4619_v46  ;;  %10363 = vset.pattern.permute.xlu2 %v15101_v3  ;;  %v3657_v23 = vld [vmem:[#allocation3 + $0x150] sm:$0xff] }
 0x3c6   : > { %15264 = vst [vmem:[#allocation135_spill] sm:$0xff] %v13224_v45  ;;  %v3291_v29 = vmul.f32 %v12933_v43, %v3242_v47  ;;  %9891 = vmatmul.msk.bf16.gmra.mxu2 %vm650_vm0, %v5157_v9  ;;  %v10650_v46 = vld [vmem:[%s14959_s1 + $0x130] sm:$0xff]  ;;  %v3747_v9 = vmax.f32 %v3657_v23, %v3702_v7 }
 0x3c7   : > { %9919 = vmatmul.msk.bf16.gmra.mxu3 %vm650_vm0, %v5696_v26  ;;  %v3926_v38 = vmax.f32 %v3836_v49, %v3881_v15  ;;  %4988 = vperm.xlu2 %10363, %v10650_v46  }
 0x3c8   : > { %v3340_v58 = vadd.f32 %v12943_v63, %v3291_v29 }
 0x3c9   : > { %v3971_v33 = vmax.f32 %v3926_v38, 0.0  ;;  %v2882_v48 = vpop.f32.mrf.mxu2  ;;  %v4111_v60 = vld [vmem:[#allocation4 + $0x140] sm:$0xff]  ;;  %v13238_v28 = vpop.f32.mrf.mxu0 }
 0x3ca   : > { %v13232_v62 = vpop.f32.mrf.mxu3  ;;  %v3565_v49 = vmul.f32 %v15265_v6, %v3340_v58  ;;  %v2930_v47 = vadd.f32 %v2882_v48, %v2615_v42  ;;  %v2616_v53 = vpop.f32.mrf.mxu1  ;;  %v4137_v26 = vpack.c.bf16 %v4111_v60, %v4110_v21  ;;  %10367 = vset.pattern.permute.xlu1 %v15104_v30  ;;  %v3703_v48 = vld [vmem:[#allocation3 + $0x159] sm:$0xff] }
 0x3cb   : > { %4022 = vst.msk [vmem:[#allocation4 + $0x148] sm:$0xff] %vm650_vm0, %v3971_v33  ;;  %6064 = vperm.xlu1 %10367, %v10650_v46   ;;  %v13247_v58 = vpop.permute.xlu1 %6012  ;;  %v13250_v21 = vpop.permute.xlu2 %4940  ;;  %v4584_v60 = vld [vmem:[#allocation4 + $0x9f] sm:$0xff]  ;;  %v5122_v53 = vld [vmem:[#allocation4 + $0x8e] sm:$0xff] }
 0x3cc   : > { %v3792_v15 = vld [vmem:[#allocation3 + $0x162] sm:$0xff]  ;;  %4067 = vst.msk [vmem:[%s12284_s27 + $0x130] sm:$0xff] %vm650_vm0, %v3971_v33  ;;  %v3243_v38 = vadd.f32 %v13186_v0, %v2930_v47  ;;  %9848 = vmatmul.msk.bf16.gmra.mxu0 %vm650_vm0, %v4137_v26  ;;  %v5662_v26 = vld [vmem:[#allocation4 + $0x9d] sm:$0xff] }
 0x3cd   : > { %v3837_v29 = vmax.f32 %v3747_v9, %v3792_v15  ;;  %3616 = vst.msk [vmem:[#allocation3 + $0x170] sm:$0xff] %vm650_vm0, %v3565_v49  ;;  %v3882_v7 = vld [vmem:[#allocation3 + $0x163] sm:$0xff]  ;;  %v3658_v49 = vld [vmem:[#allocation3 + $0x158] sm:$0xff] }
 0x3ce   : > { %15266 = vst [vmem:[#allocation136_spill] sm:$0xff] %v13247_v58  ;;  %v3292_v42 = vmul.f32 %v12933_v43, %v3243_v38  ;;  %v3748_v15 = vmax.f32 %v3658_v49, %v3703_v48 }
 0x3cf   : > { %v3927_v23 = vmax.f32 %v3837_v29, %v3882_v7  ;;  %15267 = vst [vmem:[#allocation137_spill] sm:$0xff] %v13250_v21  ;;  %10365 = vset.pattern.permute.xlu2 %v15108_v18  ;;  %v4583_v7 = vld [vmem:[#allocation4 + $0x97] sm:$0xff] }
 0x3d0   : > { %v3341_v33 = vadd.f32 %v12943_v63, %v3292_v42  ;;  %5526 = vperm.xlu2 %10365, %v10650_v46   ;;  %v4620_v42 = vpack.c.bf16 %v4584_v60, %v4583_v7  ;;  %v13271_v60 = vld [vmem:[%s14959_s1 + $0x140] sm:$0xff] }
 0x3d1   : > { %v3972_v9 = vmax.f32 %v3927_v23, 0.0  ;;  %v2884_v0 = vpop.f32.mrf.mxu2  ;;  %v13257_v29 = vpop.f32.mrf.mxu0  ;;  %v5121_v23 = vld [vmem:[#allocation4 + $0x86] sm:$0xff] }
 0x3d2   : > { %v13253_v47 = vpop.f32.mrf.mxu3  ;;  %v3566_v43 = vmul.f32 %v12779_v59, %v3341_v33  ;;  %v4721_v38 = vpop.f32.mrf.mxu1  ;;  %v5661_v0 = vld [vmem:[#allocation4 + $0x95] sm:$0xff]  ;;  %v5158_v12 = vpack.c.bf16 %v5122_v53, %v5121_v23  ;;  %v4112_v7 = vld [vmem:[#allocation4 + $0x148] sm:$0xff] }
 0x3d3   : > { %4023 = vst.msk [vmem:[#allocation4 + $0x150] sm:$0xff] %vm650_vm0, %v3972_v9  ;;  %v5697_v48 = vpack.c.bf16 %v5662_v26, %v5661_v0  ;;  %10369 = vset.pattern.permute.xlu1 %v15110_v24  ;;  %v5015_v33 = vmul.f32 %v12836_v34, %v4721_v38  ;;  %v13276_v26 = vpop.permute.xlu1 %4451  ;;  %v3659_v23 = vld [vmem:[#allocation3 + $0x160] sm:$0xff]  ;;  %v3660_v0 = vld [vmem:[#allocation3 + $0x168] sm:$0xff] }
 0x3d4   : > { %v3793_v63 = vld [vmem:[#allocation3 + $0x16a] sm:$0xff]  ;;  %4068 = vst.msk [vmem:[%s12284_s27 + $0x138] sm:$0xff] %vm650_vm0, %v3972_v9  ;;  %4503 = vperm.xlu1 %10369, %v13271_v60  }
 0x3d5   : > { %v3838_v6 = vmax.f32 %v3748_v15, %v3793_v63  ;;  %3617 = vst.msk [vmem:[#allocation3 + $0x178] sm:$0xff] %vm650_vm0, %v3566_v43  ;;  %v3883_v49 = vld [vmem:[#allocation3 + $0x16b] sm:$0xff]  ;;  %9865 = vmatmul.msk.bf16.gmra.mxu1 %vm650_vm0, %v4620_v42  ;;  %v3704_v15 = vld [vmem:[#allocation3 + $0x161] sm:$0xff] }
 0x3d6   : > { %9892 = vmatmul.msk.bf16.gmra.mxu2 %vm650_vm0, %v5158_v12  ;;  %v15268_v9 = vld [vmem:[#allocation46_spill] sm:$0xff] }
 0x3d7   : > { %9920 = vmatmul.msk.bf16.gmra.mxu3 %vm650_vm0, %v5697_v48  ;;  %v3928_v46 = vmax.f32 %v3838_v6, %v3883_v49  ;;  %v4522_v53 = vmul.f32 %v15268_v9, %v12746_v50  ;;  %15269 = vst [vmem:[#allocation46_spill] sm:$0xff] %v13276_v26  ;;  %v3705_v43 = vld [vmem:[#allocation3 + $0x169] sm:$0xff] }
 0x3d8   : > { %v3796_v63 = vld [vmem:[#allocation3 + $0x182] sm:$0xff]  ;;  %v3797_v42 = vld [vmem:[#allocation3 + $0x18a] sm:$0xff]  ;;  %10368 = vset.pattern.permute.xlu2 %v15104_v30  ;;  %v3750_v21 = vmax.f32 %v3660_v0, %v3705_v43 }
 0x3d9   : > { %v3973_v34 = vmax.f32 %v3928_v46, 0.0  ;;  %v5259_v38 = vpop.f32.mrf.mxu2  ;;  %v3661_v48 = vld [vmem:[#allocation3 + $0x170] sm:$0xff]  ;;  %v5060_v49 = vadd.f32 %v5015_v33, %v4522_v53  ;;  %v13280_v59 = vpop.f32.mrf.mxu0  ;;  %v15271_v50 = vld [vmem:[#allocation22_spill] sm:$0xff]  ;;  %v3749_v46 = vmax.f32 %v3659_v23, %v3704_v15  ;;  %6068 = vperm.xlu2 %10368, %v13198_v31  }
 0x3da   : > { %v13278_v12 = vpop.f32.mrf.mxu3  ;;  %v4113_v6 = vld [vmem:[#allocation4 + $0x150] sm:$0xff]  ;;  %15270 = vst [vmem:[#allocation138_spill] sm:$0xff] %v13280_v59  ;;  %v5553_v9 = vmul.f32 %v15271_v50, %v5259_v38  ;;  %v4723_v26 = vpop.f32.mrf.mxu1  ;;  %v15274_v31 = vld [vmem:[#allocation47_spill] sm:$0xff] }
 0x3db   : > { %v4138_v45 = vpack.c.bf16 %v4113_v6, %v4112_v7  ;;  %4024 = vst.msk [vmem:[#allocation4 + $0x158] sm:$0xff] %vm650_vm0, %v3973_v34  ;;  %v13288_v33 = vpop.permute.xlu2 %5482  ;;  %v15273_v7 = vld [vmem:[#allocation25_spill] sm:$0xff]  ;;  %v13295_v15 = vld [vmem:[%s14966_s8] ss:$0 sm:$0xff]  ;;  %v5016_v23 = vmul.f32 %v15274_v31, %v4723_v26 }
 0x3dc   : > { %v3662_v58 = vld [vmem:[#allocation3 + $0x178] sm:$0xff]  ;;  %4069 = vst.msk [vmem:[%s12284_s27 + $0x140] sm:$0xff] %vm650_vm0, %v3973_v34  ;;  %v6091_v6 = vmul.f32 %v15273_v7, %v13232_v62  ;;  %v5598_v59 = vadd.f32 %v5553_v9, %v5060_v49  ;;  %v3886_v0 = vld [vmem:[#allocation3 + $0x183] sm:$0xff]  ;;  %v15275_v9 = vld [vmem:[#allocation19_spill] sm:$0xff]  ;;  %10372 = vset.pattern.permute.xlu1 %v15101_v3 }
 0x3dd   : > { %v3706_v1 = vld [vmem:[#allocation3 + $0x171] sm:$0xff]  ;;  %v3707_v57 = vld [vmem:[#allocation3 + $0x179] sm:$0xff]  ;;  %15272 = vst [vmem:[#allocation22_spill] sm:$0xff] %v13288_v33  ;;  %9849 = vmatmul.msk.bf16.gmra.mxu0 %vm650_vm0, %v4138_v45  ;;  %v13302_v62 = vld [vmem:[%s14967_s9] ss:$0 sm:$0xff]  ;;  %v4523_v7 = vmul.f32 %v15275_v9, %v12769_v37 }
 0x3de   : > { %v3751_v53 = vmax.f32 %v3661_v48, %v3706_v1  ;;  %v3752_v51 = vmax.f32 %v3662_v58, %v3707_v57  ;;  %v3794_v38 = vld [vmem:[#allocation3 + $0x172] sm:$0xff]  ;;  %v3795_v50 = vld [vmem:[#allocation3 + $0x17a] sm:$0xff]  ;;  %v6136_v58 = vadd.f32 %v6091_v6, %v5598_v59 }
 0x3df   : > { %v3839_v43 = vmax.f32 %v3749_v46, %v3794_v38  ;;  %v3840_v34 = vmax.f32 %v3750_v21, %v3795_v50  ;;  %v3884_v1 = vld [vmem:[#allocation3 + $0x173] sm:$0xff]  ;;  %v3885_v57 = vld [vmem:[#allocation3 + $0x17b] sm:$0xff]  ;;  %v3887_v21 = vld [vmem:[#allocation3 + $0x18b] sm:$0xff] }
 0x3e0   : > { %v3841_v48 = vmax.f32 %v3751_v53, %v3796_v63  ;;  %v3842_v49 = vmax.f32 %v3752_v51, %v3797_v42  ;;  %v6185_v26 = vmul.f32 %v13295_v15, %v6136_v58  ;;  %v4586_v46 = vld [vmem:[#allocation4 + $0xaf] sm:$0xff]  ;;  %v10652_v59 = vld [vmem:[%s14959_s1 + $0x148] sm:$0xff]  ;;  %v6092_v51 = vmul.f32 %v13013_v20, %v13253_v47 }
 0x3e1   : > { %v3929_v33 = vmax.f32 %v3839_v43, %v3884_v1  ;;  %v3930_v45 = vmax.f32 %v3840_v34, %v3885_v57  ;;  %5000 = vperm.xlu1 %10372, %v10652_v59   ;;  %v5061_v63 = vadd.f32 %v5016_v23, %v4523_v7  ;;  %v5261_v42 = vpop.f32.mrf.mxu2  ;;  %v5124_v53 = vld [vmem:[#allocation4 + $0x9e] sm:$0xff]  ;;  %v5664_v50 = vld [vmem:[#allocation4 + $0xad] sm:$0xff]  ;;  %v13316_v31 = vpop.f32.mrf.mxu0  ;;  %v5123_v47 = vld [vmem:[#allocation4 + $0x96] sm:$0xff]  ;;  %10370 = vset.pattern.permute.xlu2 %v15110_v24 }
 0x3e2   : > { %v3931_v38 = vmax.f32 %v3841_v48, %v3886_v0  ;;  %v13313_v37 = vpop.f32.mrf.mxu3  ;;  %v6234_v34 = vadd.f32 %v13302_v62, %v6185_v26  ;;  %v5554_v1 = vmul.f32 %v12093_v54, %v5261_v42  ;;  %v4726_v57 = vpop.f32.mrf.mxu1  ;;  %v4585_v0 = vld [vmem:[#allocation4 + $0xa7] sm:$0xff]  ;;  %v3932_v48 = vmax.f32 %v3842_v49, %v3887_v21  ;;  %4507 = vperm.xlu2 %10370, %v10652_v59  }
 0x3e3   : > { %v3974_v6 = vmax.f32 %v3929_v33, 0.0  ;;  %v3975_v43 = vmax.f32 %v3930_v45, 0.0  ;;  %v4621_v20 = vpack.c.bf16 %v4586_v46, %v4585_v0  ;;  %v5663_v23 = vld [vmem:[#allocation4 + $0xa5] sm:$0xff]  ;;  %v13321_v33 = vpop.permute.xlu1 %5478  ;;  %v5159_v45 = vpack.c.bf16 %v5124_v53, %v5123_v47  ;;  %v13328_v49 = vpop.permute.xlu2 %6020 }
 0x3e4   : > { %v3976_v58 = vmax.f32 %v3931_v38, 0.0  ;;  %v6279_v9 = vmax.f32 %v6234_v34, 0.0  ;;  %v5599_v7 = vadd.f32 %v5554_v1, %v5061_v63  ;;  %v5698_v26 = vpack.c.bf16 %v5664_v50, %v5663_v23  ;;  %v4114_v34 = vld [vmem:[#allocation4 + $0x158] sm:$0xff]  ;;  %v15277_v0 = vld [vmem:[#allocation49_spill] sm:$0xff] }
 0x3e5   : > { %4025 = vst.msk [vmem:[#allocation4 + $0x160] sm:$0xff] %vm650_vm0, %v3974_v6  ;;  %v5017_v54 = vmul.f32 %v12132_v4, %v4726_v57  ;;  %9866 = vmatmul.msk.bf16.gmra.mxu1 %vm650_vm0, %v4621_v20  ;;  %v3977_v38 = vmax.f32 %v3932_v48, 0.0  ;;  %v15276_v4 = vld [vmem:[#allocation48_spill] sm:$0xff]  ;;  %v6093_v48 = vmul.f32 %v15277_v0, %v13278_v12  ;;  %v15278_v20 = vld [vmem:[#allocation30_spill] sm:$0xff] }
 0x3e6   : > { %4070 = vst.msk [vmem:[%s12284_s27 + $0x148] sm:$0xff] %vm650_vm0, %v3974_v6  ;;  %v6324_v21 = vmul.f32 %v6279_v9, %v11690_v17  ;;  %v6137_v46 = vadd.f32 %v6092_v51, %v5599_v7  ;;  %9893 = vmatmul.msk.bf16.gmra.mxu2 %vm650_vm0, %v5159_v45  ;;  %v4524_v63 = vmul.f32 %v15276_v4, %v12794_v32  ;;  %v15279_v9 = vld [vmem:[#allocation32_spill] sm:$0xff] }
 0x3e7   : > { %4026 = vst.msk [vmem:[#allocation4 + $0x168] sm:$0xff] %vm650_vm0, %v3975_v43  ;;  %9921 = vmatmul.msk.bf16.gmra.mxu3 %vm650_vm0, %v5698_v26  ;;  %v15280_v45 = vld [vmem:[#allocation28_spill] sm:$0xff] }
 0x3e8   : > { %4027 = vst.msk [vmem:[#allocation4 + $0x170] sm:$0xff] %vm650_vm0, %v3976_v58  ;;  %v6186_v42 = vmul.f32 %v13295_v15, %v6137_v46  ;;  %v5062_v50 = vadd.f32 %v5017_v54, %v4524_v63  ;;  %v4525_v26 = vmul.f32 %v15280_v45, %v12814_v41  ;;  %v5126_v46 = vld [vmem:[#allocation4 + $0xae] sm:$0xff]  ;;  %v5666_v63 = vld [vmem:[#allocation4 + $0xbd] sm:$0xff] }
 0x3e9   : > { %4071 = vst.msk [vmem:[%s12284_s27 + $0x150] sm:$0xff] %vm650_vm0, %v3975_v43  ;;  %10374 = vset.pattern.permute.xlu1 %v15108_v18  ;;  %v5264_v17 = vpop.f32.mrf.mxu2  ;;  %v13346_v6 = vpop.f32.mrf.mxu0  ;;  %v15281_v41 = vld [vmem:[#allocation51_spill] sm:$0xff] }
 0x3ea   : > { %6375 = vst.msk [vmem:[#allocation5 + $0x18] sm:$0xff] %vm650_vm0, %v6324_v21  ;;  %v13341_v51 = vpop.f32.mrf.mxu3  ;;  %5538 = vperm.xlu1 %10374, %v10652_v59   ;;  %v6235_v53 = vadd.f32 %v13302_v62, %v6186_v42  ;;  %v5555_v32 = vmul.f32 %v12901_v40, %v5264_v17  ;;  %v4728_v43 = vpop.f32.mrf.mxu1  ;;  %10373 = vset.pattern.permute.xlu2 %v15108_v18  ;;  %v4588_v21 = vld [vmem:[#allocation4 + $0xbf] sm:$0xff] }
 0x3eb   : > { %4072 = vst.msk [vmem:[%s12284_s27 + $0x158] sm:$0xff] %vm650_vm0, %v3976_v58  ;;  %5534 = vperm.xlu2 %10373, %v13271_v60   ;;  %v13357_v40 = vpop.permute.xlu1 %6016  ;;  %v5018_v7 = vmul.f32 %v15279_v9, %v4728_v43  ;;  %v13363_v54 = vpop.permute.xlu2 %4948  ;;  %v4587_v43 = vld [vmem:[#allocation4 + $0xb7] sm:$0xff]  ;;  %v15283_v9 = vld [vmem:[#allocation56_spill] sm:$0xff] }
 0x3ec   : > { %v4115_v1 = vld [vmem:[#allocation4 + $0x160] sm:$0xff]  ;;  %4028 = vst.msk [vmem:[#allocation4 + $0x178] sm:$0xff] %vm650_vm0, %v3977_v38  ;;  %v6280_v58 = vmax.f32 %v6235_v53, 0.0  ;;  %v5600_v59 = vadd.f32 %v5555_v32, %v5062_v50 }
 0x3ed   : > { %v4139_v57 = vpack.c.bf16 %v4115_v1, %v4114_v34  ;;  %4073 = vst.msk [vmem:[%s12284_s27 + $0x160] sm:$0xff] %vm650_vm0, %v3977_v38  ;;  %v5063_v17 = vadd.f32 %v5018_v7, %v4525_v26  ;;  %v5125_v34 = vld [vmem:[#allocation4 + $0xa6] sm:$0xff]  ;;  %v15284_v26 = vld [vmem:[#allocation55_spill] sm:$0xff] }
 0x3ee   : > { %v6325_v47 = vmul.f32 %v6280_v58, %v15278_v20  ;;  %v6138_v23 = vadd.f32 %v6093_v48, %v5600_v59  ;;  %v13377_v1 = vld [vmem:[%s14959_s1 + $0x150] sm:$0xff]  ;;  %v5160_v0 = vpack.c.bf16 %v5126_v46, %v5125_v34  ;;  %v5665_v48 = vld [vmem:[#allocation4 + $0xb5] sm:$0xff]  ;;  %v15282_v58 = vld [vmem:[#allocation53_spill] sm:$0xff] }
 0x3ef   : > { %9850 = vmatmul.msk.bf16.gmra.mxu0 %vm650_vm0, %v4139_v57  ;;  %v4622_v57 = vpack.c.bf16 %v4588_v21, %v4587_v43  ;;  %v6094_v59 = vmul.f32 %v15282_v58, %v13313_v37  ;;  %v15285_v37 = vld [vmem:[#allocation50_spill] sm:$0xff] }
 0x3f0   : > { %6376 = vst.msk [vmem:[#allocation5 + $0x20] sm:$0xff] %vm650_vm0, %v6325_v47  ;;  %v6187_v12 = vmul.f32 %v13295_v15, %v6138_v23  ;;  %v5699_v23 = vpack.c.bf16 %v5666_v63, %v5665_v48  ;;  %v4526_v21 = vmul.f32 %v15285_v37, %v12845_v36  ;;  %v4117_v63 = vld [vmem:[#allocation4 + $0x170] sm:$0xff]  ;;  %v6095_v48 = vmul.f32 %v13042_v52, %v13341_v51  ;;  %v10193_v51 = vld [vmem:[%s14968_s10 + $0x10] sm:$0xff]  ;;  %v10194_v37 = vld [vmem:[%s14968_s10 + $0x18] sm:$0xff] }
 0x3f1   : > { %v5266_v38 = vpop.f32.mrf.mxu2  ;;  %v13371_v53 = vpop.f32.mrf.mxu0  ;;  %v15286_v43 = vld [vmem:[#allocation58_spill] sm:$0xff]  ;;  %7108 = vmatpush.bf16.msra.mxu2 %v10193_v51  ;;  %7421 = vmatpush.bf16.msra.mxu3 %v10194_v37  ;;  %v15292_v51 = vld [vmem:[#allocation59_spill] sm:$0xff] }
 0x3f2   : > { %v13367_v4 = vpop.f32.mrf.mxu3  ;;  %10377 = vset.pattern.permute.xlu1 %v15110_v24  ;;  %v6236_v42 = vadd.f32 %v13302_v62, %v6187_v12  ;;  %v5556_v50 = vmul.f32 %v15281_v41, %v5266_v38  ;;  %v4731_v32 = vpop.f32.mrf.mxu1 }
 0x3f3   : > { %4511 = vperm.xlu1 %10377, %v13377_v1   ;;  %10375 = vset.pattern.permute.xlu2 %v15104_v30  ;;  %v5019_v12 = vmul.f32 %v15284_v26, %v4731_v32  ;;  %v13391_v46 = vpop.permute.xlu1 %4459  ;;  %v5128_v26 = vld [vmem:[#allocation4 + $0xbe] sm:$0xff] }
 0x3f4   : > { %v6281_v20 = vmax.f32 %v6236_v42, 0.0  ;;  %v5601_v47 = vadd.f32 %v5556_v50, %v5063_v17  ;;  %6072 = vperm.xlu2 %10375, %v13271_v60  }
 0x3f5   : > { %9867 = vmatmul.msk.bf16.gmra.mxu1 %vm650_vm0, %v4622_v57  ;;  %v5064_v50 = vadd.f32 %v5019_v12, %v4526_v21  ;;  %v4116_v57 = vld [vmem:[#allocation4 + $0x168] sm:$0xff]  ;;  %v4527_v12 = vmul.f32 %v12805_v56, %v12868_v16  ;;  %v10191_v21 = vld [vmem:[%s14968_s10] sm:$0xff] }
 0x3f6   : > { %v6326_v7 = vmul.f32 %v6281_v20, %v15283_v9  ;;  %v6139_v45 = vadd.f32 %v6094_v59, %v5601_v47  ;;  %9894 = vmatmul.msk.bf16.gmra.mxu2 %vm650_vm0, %v5160_v0  ;;  %v4140_v36 = vpack.c.bf16 %v4117_v63, %v4116_v57  ;;  %v13403_v0 = vpop.permute.xlu2 %5486  ;;  %v15287_v20 = vld [vmem:[#allocation34_spill] sm:$0xff]  ;;  %v15288_v9 = vld [vmem:[#allocation52_spill] sm:$0xff]  ;;  %6840 = vmatpush.bf16.msra.mxu1 %v10191_v21 }
 0x3f7   : > { %9922 = vmatmul.msk.bf16.gmra.mxu3 %vm650_vm0, %v5699_v23  ;;  %v5668_v16 = vld [vmem:[#allocation4 + $0xcd] sm:$0xff]  ;;  %v5127_v57 = vld [vmem:[#allocation4 + $0xb6] sm:$0xff] }
 0x3f8   : > { %6377 = vst.msk [vmem:[#allocation5 + $0x28] sm:$0xff] %vm650_vm0, %v6326_v7  ;;  %v6188_v38 = vmul.f32 %v13295_v15, %v6139_v45  ;;  %v4590_v45 = vld [vmem:[#allocation4 + $0xcf] sm:$0xff] }
 0x3f9   : > { %v5269_v42 = vpop.f32.mrf.mxu2  ;;  %v13398_v32 = vpop.f32.mrf.mxu0 }
 0x3fa   : > { %v13395_v17 = vpop.f32.mrf.mxu3  ;;  %v6237_v41 = vadd.f32 %v13302_v62, %v6188_v38  ;;  %v5557_v60 = vmul.f32 %v15286_v43, %v5269_v42  ;;  %v4733_v34 = vpop.f32.mrf.mxu1 }
 0x3fb   : > { %10379 = vset.pattern.permute.xlu1 %v15108_v18  ;;  %v5020_v7 = vmul.f32 %v15288_v9, %v4733_v34  ;;  %v4589_v34 = vld [vmem:[#allocation4 + $0xc7] sm:$0xff] }
 0x3fc   : > { %5542 = vperm.xlu1 %10379, %v13377_v1   ;;  %v6282_v58 = vmax.f32 %v6237_v41, 0.0  ;;  %v5602_v59 = vadd.f32 %v5557_v60, %v5064_v50  ;;  %10378 = vset.pattern.permute.xlu2 %v15101_v3  ;;  %v15289_v50 = vld [vmem:[#allocation54_spill] sm:$0xff] }
 0x3fd   : > { %5004 = vperm.xlu2 %10378, %v13377_v1   ;;  %v5065_v42 = vadd.f32 %v5020_v7, %v4527_v12  ;;  %v10654_v12 = vld [vmem:[%s14959_s1 + $0x158] sm:$0xff] }
 0x3fe   : > { %v6327_v47 = vmul.f32 %v6282_v58, %v15287_v20  ;;  %v6140_v23 = vadd.f32 %v6095_v48, %v5602_v59  ;;  %v5161_v48 = vpack.c.bf16 %v5128_v26, %v5127_v57  ;;  %v5667_v58 = vld [vmem:[#allocation4 + $0xc5] sm:$0xff]  ;;  %v13432_v59 = vpop.permute.xlu1 %4952 }
 0x3ff   : > { %9851 = vmatmul.msk.bf16.gmra.mxu0 %vm650_vm0, %v4140_v36  ;;  %v4623_v36 = vpack.c.bf16 %v4590_v45, %v4589_v34  ;;  %v15290_v20 = vld [vmem:[#allocation60_spill] sm:$0xff]  ;;  %v5700_v7 = vpack.c.bf16 %v5668_v16, %v5667_v58  ;;  %v13440_v45 = vpop.permute.xlu2 %6028  ;;  %v4118_v16 = vld [vmem:[#allocation4 + $0x178] sm:$0xff]  ;;  %v15295_v58 = vld [vmem:[#allocation66_spill] sm:$0xff] }
 0x400   : > { %6378 = vst.msk [vmem:[#allocation5 + $0x30] sm:$0xff] %vm650_vm0, %v6327_v47  ;;  %v6189_v52 = vmul.f32 %v13295_v15, %v6140_v23  ;;  %v6096_v47 = vmul.f32 %v15290_v20, %v13367_v4  ;;  %v15291_v26 = vld [vmem:[#allocation12_spill] sm:$0xff]  ;;  %v15293_v4 = vld [vmem:[#allocation57_spill] sm:$0xff]  ;;  %v6097_v20 = vmul.f32 %v15295_v58, %v13395_v17 }
 0x401   : > { %v5271_v38 = vpop.f32.mrf.mxu2  ;;  %v13428_v41 = vpop.f32.mrf.mxu0  ;;  %v4528_v21 = vmul.f32 %v15293_v4, %v12889_v8  ;;  %v15294_v34 = vld [vmem:[#allocation64_spill] sm:$0xff] }
 0x402   : > { %v13425_v56 = vpop.f32.mrf.mxu3  ;;  %v6238_v63 = vadd.f32 %v13302_v62, %v6189_v52  ;;  %v5558_v43 = vmul.f32 %v15289_v50, %v5271_v38  ;;  %v4736_v60 = vpop.f32.mrf.mxu1  ;;  %v4592_v4 = vld [vmem:[#allocation4 + $0xdf] sm:$0xff] }
 0x403   : > { %v5021_v37 = vmul.f32 %v15292_v51, %v4736_v60 }
 0x404   : > { %10382 = vset.pattern.permute.xlu1 %v15101_v3  ;;  %v6283_v23 = vmax.f32 %v6238_v63, 0.0  ;;  %v5603_v9 = vadd.f32 %v5558_v43, %v5065_v42  ;;  %v10195_v63 = vld [vmem:[%s14968_s10 + $0x20] sm:$0xff] }
 0x405   : > { %5008 = vperm.xlu1 %10382, %v10654_v12   ;;  %9868 = vmatmul.msk.bf16.gmra.mxu1 %vm650_vm0, %v4623_v36  ;;  %v5066_v60 = vadd.f32 %v5021_v37, %v4528_v21  ;;  %v5130_v21 = vld [vmem:[#allocation4 + $0xce] sm:$0xff] }
 0x406   : > { %v6328_v52 = vmul.f32 %v6283_v23, %v15291_v26  ;;  %v6141_v3 = vadd.f32 %v6096_v47, %v5603_v9  ;;  %9895 = vmatmul.msk.bf16.gmra.mxu2 %vm650_vm0, %v5161_v48  ;;  %10380 = vset.pattern.permute.xlu2 %v15104_v30  ;;  %v4141_v48 = vpack.c.bf16 %v4118_v16, %v4118_v16  ;;  %v15296_v9 = vld [vmem:[#allocation17_spill] sm:$0xff] }
 0x407   : > { %9923 = vmatmul.msk.bf16.gmra.mxu3 %vm650_vm0, %v5700_v7  ;;  %6080 = vperm.xlu2 %10380, %v13377_v1   ;;  %v13465_v1 = vpop.permute.xlu1 %6024  ;;  %v13471_v37 = vpop.permute.xlu2 %4467 }
 0x408   : > { %6379 = vst.msk [vmem:[#allocation5 + $0x38] sm:$0xff] %vm650_vm0, %v6328_v52  ;;  %v6190_v38 = vmul.f32 %v13295_v15, %v6141_v3  ;;  %7734 = vmatpush.bf16.msra.mxu0 %v10195_v63  ;;  %v15297_v3 = vld [vmem:[#allocation62_spill] sm:$0xff]  ;;  %v5670_v63 = vld [vmem:[#allocation4 + $0xdd] sm:$0xff] }
 0x409   : > { %v5274_v42 = vpop.f32.mrf.mxu2  ;;  %v13458_v8 = vpop.f32.mrf.mxu0  ;;  %v4529_v51 = vmul.f32 %v15297_v3, %v12916_v61  ;;  %v15298_v61 = vld [vmem:[#allocation61_spill] sm:$0xff] }
 0x40a   : > { %v13454_v50 = vpop.f32.mrf.mxu3  ;;  %v6239_v43 = vadd.f32 %v13302_v62, %v6190_v38  ;;  %v5559_v57 = vmul.f32 %v15294_v34, %v5274_v42  ;;  %v4738_v36 = vpop.f32.mrf.mxu1 }
 0x40b   : > { %v5022_v52 = vmul.f32 %v12873_v35, %v4738_v36  ;;  %v5129_v36 = vld [vmem:[#allocation4 + $0xc6] sm:$0xff] }
 0x40c   : > { %v6284_v47 = vmax.f32 %v6239_v43, 0.0  ;;  %v5604_v23 = vadd.f32 %v5559_v57, %v5066_v60  ;;  %v4591_v57 = vld [vmem:[#allocation4 + $0xd7] sm:$0xff]  ;;  %v5162_v58 = vpack.c.bf16 %v5130_v21, %v5129_v36  ;;  %v4530_v21 = vmul.f32 %v13139_v22, %v12952_v10  ;;  %v15302_v36 = vld [vmem:[#allocation69_spill] sm:$0xff] }
 0x40d   : > { %10384 = vset.pattern.permute.xlu1 %v15104_v30  ;;  %v5067_v35 = vadd.f32 %v5022_v52, %v4529_v51  ;;  %v15300_v52 = vld [vmem:[#allocation13_spill] sm:$0xff] }
 0x40e   : > { %6084 = vperm.xlu1 %10384, %v10654_v12   ;;  %v6329_v7 = vmul.f32 %v6284_v47, %v15296_v9  ;;  %v6142_v26 = vadd.f32 %v6097_v20, %v5604_v23  ;;  %v5669_v20 = vld [vmem:[#allocation4 + $0xd5] sm:$0xff]  ;;  %v15303_v22 = vld [vmem:[#allocation73_spill] sm:$0xff] }
 0x40f   : > { %9852 = vmatmul.msk.bf16.gmra.mxu0 %vm650_vm0, %v4141_v48  ;;  %10383 = vset.pattern.permute.xlu2 %v15108_v18  ;;  %v4624_v48 = vpack.c.bf16 %v4592_v4, %v4591_v57  ;;  %v15299_v47 = vld [vmem:[#allocation63_spill] sm:$0xff]  ;;  %v6491_v4 = vld [vmem:[#allocation5 + $0xe] sm:$0xff]  ;;  %v13504_v10 = vpop.permute.xlu2 %5494 }
 0x410   : > { %6380 = vst.msk [vmem:[#allocation5 + $0x40] sm:$0xff] %vm650_vm0, %v6329_v7  ;;  %v6191_v17 = vmul.f32 %v13295_v15, %v6142_v26  ;;  %5546 = vperm.xlu2 %10383, %v10654_v12   ;;  %v6098_v23 = vmul.f32 %v15299_v47, %v13425_v56  ;;  %v5701_v26 = vpack.c.bf16 %v5670_v63, %v5669_v20  ;;  %v6490_v12 = vld [vmem:[#allocation5 + $0x6] sm:$0xff]  ;;  %v10655_v56 = vld [vmem:[%s14959_s1 + $0x160] sm:$0xff] }
 0x411   : > { %v5276_v38 = vpop.f32.mrf.mxu2  ;;  %v13479_v43 = vpop.f32.mrf.mxu0  ;;  %v6099_v47 = vmul.f32 %v15303_v22, %v13454_v50  ;;  %v15307_v22 = vld [vmem:[#allocation71_spill] sm:$0xff] }
 0x412   : > { %v13475_v16 = vpop.f32.mrf.mxu3  ;;  %v6240_v42 = vadd.f32 %v13302_v62, %v6191_v17  ;;  %v5560_v60 = vmul.f32 %v15298_v61, %v5276_v38  ;;  %v4741_v34 = vpop.f32.mrf.mxu1  ;;  %v15301_v17 = vld [vmem:[#allocation65_spill] sm:$0xff]  ;;  %v6535_v61 = vpack.c.bf16 %v6491_v4, %v6490_v12  ;;  %v5132_v4 = vld [vmem:[#allocation4 + $0xde] sm:$0xff] }
 0x413   : > { %v5023_v38 = vmul.f32 %v15301_v17, %v4741_v34  ;;  %v15306_v17 = vld [vmem:[#allocation68_spill] sm:$0xff]  ;;  %v4594_v12 = vld [vmem:[#allocation4 + $0xef] sm:$0xff] }
 0x414   : > { %v6285_v9 = vmax.f32 %v6240_v42, 0.0  ;;  %v5605_v7 = vadd.f32 %v5560_v60, %v5067_v35 }
 0x415   : > { %9869 = vmatmul.msk.bf16.gmra.mxu1 %vm650_vm0, %v4624_v48  ;;  %v5068_v34 = vadd.f32 %v5023_v38, %v4530_v21 }
 0x416   : > { %10387 = vset.pattern.permute.xlu1 %v15108_v18  ;;  %v6330_v3 = vmul.f32 %v6285_v9, %v15300_v52  ;;  %v6143_v51 = vadd.f32 %v6098_v23, %v5605_v7  ;;  %9896 = vmatmul.msk.bf16.gmra.mxu2 %vm650_vm0, %v5162_v58  ;;  %v4464_v18 = vpop.permute.xlu1 %4463  ;;  %v15304_v7 = vld [vmem:[#allocation67_spill] sm:$0xff] }
 0x417   : > { %9924 = vmatmul.msk.bf16.gmra.mxu3 %vm650_vm0, %v5701_v26  ;;  %5550 = vperm.xlu1 %10387, %v10655_v56  }
 0x418   : > { %6381 = vst.msk [vmem:[#allocation5 + $0x48] sm:$0xff] %vm650_vm0, %v6330_v3  ;;  %v6192_v63 = vmul.f32 %v13295_v15, %v6143_v51  ;;  %10385 = vset.pattern.permute.xlu2 %v15110_v24  ;;  %v15305_v3 = vld [vmem:[#allocation70_spill] sm:$0xff]  ;;  %v4531_v24 = vmul.f32 %v15306_v17, %v12978_v13 }
 0x419   : > { %v5279_v42 = vpop.f32.mrf.mxu2  ;;  %v4303_v57 = vpop.f32.mrf.mxu0  ;;  %4519 = vperm.xlu2 %10385, %v10655_v56   ;;  %v5131_v13 = vld [vmem:[#allocation4 + $0xd6] sm:$0xff] }
 0x41a   : > { %v13497_v35 = vpop.f32.mrf.mxu3  ;;  %v6241_v60 = vadd.f32 %v13302_v62, %v6192_v63  ;;  %v5561_v48 = vmul.f32 %v15302_v36, %v5279_v42  ;;  %v4743_v58 = vpop.f32.mrf.mxu1  ;;  %v13502_v20 = vmul.f32 %v4464_v18, %v4303_v57  ;;  %v5672_v18 = vld [vmem:[#allocation4 + $0xed] sm:$0xff] }
 0x41b   : > { %v5024_v51 = vmul.f32 %v15305_v3, %v4743_v58  ;;  %v4593_v57 = vld [vmem:[#allocation4 + $0xe7] sm:$0xff] }
 0x41c   : > { %v6286_v23 = vmax.f32 %v6241_v60, 0.0  ;;  %v5606_v9 = vadd.f32 %v5561_v48, %v5068_v34  ;;  %v4625_v36 = vpack.c.bf16 %v4594_v12, %v4593_v57  ;;  %v5163_v48 = vpack.c.bf16 %v5132_v4, %v5131_v13  ;;  %v5671_v58 = vld [vmem:[#allocation4 + $0xe5] sm:$0xff]  ;;  %v15311_v13 = vld [vmem:[#allocation78_spill] sm:$0xff] }
 0x41d   : > { %v5069_v42 = vadd.f32 %v5024_v51, %v4531_v24  ;;  %v6493_v24 = vld [vmem:[#allocation5 + $0x1e] sm:$0xff] }
 0x41e   : > { %v6331_v26 = vmul.f32 %v6286_v23, %v15304_v7  ;;  %v6144_v52 = vadd.f32 %v6099_v47, %v5606_v9  ;;  %v6100_v47 = vmul.f32 %v15307_v22, %v13475_v16  ;;  %v5702_v7 = vpack.c.bf16 %v5672_v18, %v5671_v58  ;;  %v15312_v58 = vld [vmem:[#allocation16_spill] sm:$0xff] }
 0x41f   : > { %9938 = vmatmul.msk.bf16.vlgmr.msrb.gmra.mxu0 %vm650_vm0, %v6535_v61 }
 0x420   : > { %6382 = vst.msk [vmem:[#allocation5 + $0x50] sm:$0xff] %vm650_vm0, %v6331_v26  ;;  %v6193_v38 = vmul.f32 %v13295_v15, %v6144_v52  ;;  %v4877_v26 = vpop.permute.xlu0 %4876  ;;  %v13525_v52 = vpop.permute.xlu2 %6032 }
 0x421   : > { %v5281_v21 = vpop.f32.mrf.mxu2  ;;  %v13518_v61 = vpop.f32.mrf.mxu0  ;;  %10388 = vset.pattern.permute.xlu2 %v15104_v30  ;;  %v15309_v30 = vld [vmem:[#allocation26_spill] sm:$0xff] }
 0x422   : > { %v13515_v50 = vpop.f32.mrf.mxu3  ;;  %v6242_v63 = vadd.f32 %v13302_v62, %v6193_v38  ;;  %v5562_v60 = vmul.f32 %v12938_v2, %v5281_v21  ;;  %v4746_v34 = vpop.f32.mrf.mxu1  ;;  %6088 = vperm.xlu2 %10388, %v10655_v56   ;;  %v15308_v2 = vld [vmem:[#allocation23_spill] sm:$0xff]  ;;  %v4532_v16 = vmul.f32 %v15309_v30, %v13001_v55  ;;  %v6101_v55 = vmul.f32 %v15311_v13, %v13497_v35 }
 0x423   : > { %v5025_v17 = vmul.f32 %v4877_v26, %v4746_v34  ;;  %v6492_v34 = vld [vmem:[#allocation5 + $0x16] sm:$0xff] }
 0x424   : > { %v6287_v23 = vmax.f32 %v6242_v63, 0.0  ;;  %v5607_v9 = vadd.f32 %v5562_v60, %v5069_v42  ;;  %v15310_v63 = vld [vmem:[#allocation76_spill] sm:$0xff]  ;;  %v6536_v57 = vpack.c.bf16 %v6493_v24, %v6492_v34  ;;  %v5673_v13 = vld [vmem:[#allocation4 + $0xf5] sm:$0xff] }
 0x425   : > { %9870 = vmatmul.msk.bf16.gmra.mxu1 %vm650_vm0, %v4625_v36  ;;  %v5070_v21 = vadd.f32 %v5025_v17, %v4532_v16  ;;  %v5134_v17 = vld [vmem:[#allocation4 + $0xee] sm:$0xff]  ;;  %v5674_v16 = vld [vmem:[#allocation4 + $0xfd] sm:$0xff] }
 0x426   : > { %v6332_v3 = vmul.f32 %v6287_v23, %v15308_v2  ;;  %v6145_v51 = vadd.f32 %v6100_v47, %v5607_v9  ;;  %9897 = vmatmul.msk.bf16.gmra.mxu2 %vm650_vm0, %v5163_v48  ;;  %v15313_v23 = vld [vmem:[#allocation77_spill] sm:$0xff] }
 0x427   : > { %9925 = vmatmul.msk.bf16.gmra.mxu3 %vm650_vm0, %v5702_v7  ;;  %v15314_v7 = vld [vmem:[#allocation74_spill] sm:$0xff] }
 0x428   : > { %6383 = vst.msk [vmem:[#allocation5 + $0x58] sm:$0xff] %vm650_vm0, %v6332_v3  ;;  %v6194_v56 = vmul.f32 %v13295_v15, %v6145_v51  ;;  %v4533_v26 = vmul.f32 %v15314_v7, %v13023_v19  ;;  %v4476_v2 = vpop.permute.xlu2 %4475  ;;  %v4596_v51 = vld [vmem:[#allocation4 + $0xff] sm:$0xff] }
 0x429   : > { %v5284_v38 = vpop.f32.mrf.mxu2  ;;  %v13535_v18 = vpop.f32.mrf.mxu0 }
 0x42a   : > { %v5827_v12 = vpop.f32.mrf.mxu3  ;;  %v6243_v4 = vadd.f32 %v13302_v62, %v6194_v56  ;;  %v5563_v42 = vmul.f32 %v15310_v63, %v5284_v38  ;;  %v4748_v60 = vpop.f32.mrf.mxu1 }
 0x42b   : > { %v5026_v9 = vmul.f32 %v15313_v23, %v4748_v60  ;;  %v5133_v60 = vld [vmem:[#allocation4 + $0xe6] sm:$0xff] }
 0x42c   : > { %v6288_v36 = vmax.f32 %v6243_v4, 0.0  ;;  %v5608_v48 = vadd.f32 %v5563_v42, %v5070_v21  ;;  %v15315_v4 = vld [vmem:[#allocation79_spill] sm:$0xff] }
 0x42d   : > { %v5071_v24 = vadd.f32 %v5026_v9, %v4533_v26  ;;  %v4595_v42 = vld [vmem:[#allocation4 + $0xf7] sm:$0xff] }
 0x42e   : > { %v6333_v22 = vmul.f32 %v6288_v36, %v15312_v58  ;;  %v6146_v47 = vadd.f32 %v6101_v55, %v5608_v48  ;;  %v4626_v34 = vpack.c.bf16 %v4596_v51, %v4595_v42  ;;  %v6102_v55 = vmul.f32 %v13078_v5, %v13515_v50  ;;  %v15317_v9 = vld [vmem:[#allocation35_spill] sm:$0xff]  ;;  %v6495_v50 = vld [vmem:[#allocation5 + $0x2e] sm:$0xff] }
 0x42f   : > { %9939 = vmatmul.msk.bf16.gmra.mxu0 %vm650_vm0, %v6536_v57  ;;  %v5164_v57 = vpack.c.bf16 %v5134_v17, %v5133_v60  ;;  %v5703_v58 = vpack.c.bf16 %v5674_v16, %v5673_v13  ;;  %v15318_v26 = vld [vmem:[#allocation27_spill] sm:$0xff] }
 0x430   : > { %6384 = vst.msk [vmem:[#allocation5 + $0x60] sm:$0xff] %vm650_vm0, %v6333_v22  ;;  %v6195_v3 = vmul.f32 %v13295_v15, %v6146_v47  ;;  %v15316_v22 = vld [vmem:[#allocation72_spill] sm:$0xff] }
 0x431   : > { %v5286_v35 = vpop.f32.mrf.mxu2  ;;  %v4310_v38 = vpop.f32.mrf.mxu0 }
 0x432   : > { %v5829_v30 = vpop.f32.mrf.mxu3  ;;  %v6244_v56 = vadd.f32 %v13302_v62, %v6195_v3  ;;  %v5564_v21 = vmul.f32 %v15315_v4, %v5286_v35  ;;  %v4751_v63 = vpop.f32.mrf.mxu1  ;;  %v13549_v19 = vmul.f32 %v4476_v2, %v4310_v38  ;;  %v4534_v2 = vmul.f32 %v15318_v26, %v13050_v14  ;;  %v6494_v4 = vld [vmem:[#allocation5 + $0x26] sm:$0xff] }
 0x433   : > { %v5027_v7 = vmul.f32 %v15317_v9, %v4751_v63  ;;  %v15320_v63 = vld [vmem:[#allocation83_spill] sm:$0xff] }
 0x434   : > { %v6289_v36 = vmax.f32 %v6244_v56, 0.0  ;;  %v5609_v48 = vadd.f32 %v5564_v21, %v5071_v24  ;;  %v15319_v56 = vld [vmem:[#allocation115_spill] sm:$0xff]  ;;  %v6537_v21 = vpack.c.bf16 %v6495_v50, %v6494_v4  ;;  %v6103_v42 = vmul.f32 %v15320_v63, %v5827_v12  ;;  %v15325_v50 = vld [vmem:[#allocation85_spill] sm:$0xff]  ;;  %v15326_v4 = vld [vmem:[#allocation88_spill] sm:$0xff] }
 0x435   : > { %9871 = vmatmul.msk.bf16.gmra.mxu1 %vm650_vm0, %v4626_v34  ;;  %v5072_v35 = vadd.f32 %v5027_v7, %v4534_v2  ;;  %v15321_v34 = vld [vmem:[#allocation33_spill] sm:$0xff] }
 0x436   : > { %v6334_v47 = vmul.f32 %v6289_v36, %v15316_v22  ;;  %v6147_v23 = vadd.f32 %v6102_v55, %v5609_v48  ;;  %9898 = vmatmul.msk.bf16.gmra.mxu2 %vm650_vm0, %v5164_v57  ;;  %v15322_v55 = vld [vmem:[#allocation81_spill] sm:$0xff]  ;;  %v15323_v48 = vld [vmem:[#allocation18_spill] sm:$0xff] }
 0x437   : > { %9926 = vmatmul.msk.bf16.gmra.mxu3 %vm650_vm0, %v5703_v58  ;;  %v4535_v58 = vmul.f32 %v15323_v48, %v13070_v27  ;;  %v5676_v7 = vld [vmem:[#allocation4 + $0x10d] sm:$0xff] }
 0x438   : > { %6385 = vst.msk [vmem:[#allocation5 + $0x68] sm:$0xff] %vm650_vm0, %v6334_v47  ;;  %v6196_v5 = vmul.f32 %v13295_v15, %v6147_v23  ;;  %v4598_v47 = vld [vmem:[#allocation4 + $0x10f] sm:$0xff]  ;;  %v5136_v23 = vld [vmem:[#allocation4 + $0xfe] sm:$0xff] }
 0x439   : > { %v5289_v3 = vpop.f32.mrf.mxu2  ;;  %v13563_v16 = vpop.f32.mrf.mxu0  ;;  %v15330_v48 = vld [vmem:[#allocation86_spill] sm:$0xff] }
 0x43a   : > { %v5832_v51 = vpop.f32.mrf.mxu3  ;;  %v6245_v17 = vadd.f32 %v13302_v62, %v6196_v5  ;;  %v5565_v24 = vmul.f32 %v15319_v56, %v5289_v3  ;;  %v4753_v38 = vpop.f32.mrf.mxu1  ;;  %v5135_v56 = vld [vmem:[#allocation4 + $0xf6] sm:$0xff] }
 0x43b   : > { %v5028_v36 = vmul.f32 %v15322_v55, %v4753_v38  ;;  %v5675_v38 = vld [vmem:[#allocation4 + $0x105] sm:$0xff] }
 0x43c   : > { %v6290_v14 = vmax.f32 %v6245_v17, 0.0  ;;  %v5610_v60 = vadd.f32 %v5565_v24, %v5072_v35  ;;  %v4597_v35 = vld [vmem:[#allocation4 + $0x107] sm:$0xff]  ;;  %v5165_v24 = vpack.c.bf16 %v5136_v23, %v5135_v56 }
 0x43d   : > { %v5073_v2 = vadd.f32 %v5028_v36, %v4535_v58  ;;  %v4627_v27 = vpack.c.bf16 %v4598_v47, %v4597_v35  ;;  %v15329_v36 = vld [vmem:[#allocation123_spill] sm:$0xff]  ;;  %v15333_v56 = vld [vmem:[#allocation125_spill] sm:$0xff] }
 0x43e   : > { %v6335_v57 = vmul.f32 %v6290_v14, %v15321_v34  ;;  %v6148_v13 = vadd.f32 %v6103_v42, %v5610_v60  ;;  %v5704_v14 = vpack.c.bf16 %v5676_v7, %v5675_v38  ;;  %v15327_v60 = vld [vmem:[#allocation20_spill] sm:$0xff]  ;;  %v4536_v58 = vmul.f32 %v15330_v48, %v15329_v36  ;;  %v5138_v36 = vld [vmem:[#allocation4 + $0x10e] sm:$0xff] }
 0x43f   : > { %9940 = vmatmul.msk.bf16.gmra.mxu0 %vm650_vm0, %v6537_v21  ;;  %v6104_v21 = vmul.f32 %v15326_v4, %v5829_v30  ;;  %v15334_v4 = vld [vmem:[#allocation75_spill] sm:$0xff] }
 0x440   : > { %6386 = vst.msk [vmem:[#allocation5 + $0x70] sm:$0xff] %vm650_vm0, %v6335_v57  ;;  %v6197_v22 = vmul.f32 %v13295_v15, %v6148_v13  ;;  %v15328_v13 = vld [vmem:[#allocation91_spill] sm:$0xff] }
 0x441   : > { %v5291_v9 = vpop.f32.mrf.mxu2  ;;  %v13575_v5 = vpop.f32.mrf.mxu0 }
 0x442   : > { %v5834_v12 = vpop.f32.mrf.mxu3  ;;  %v6246_v26 = vadd.f32 %v13302_v62, %v6197_v22  ;;  %15324 = vst [vmem:[#allocation25_spill] sm:$0xff] %v13575_v5  ;;  %v5566_v3 = vmul.f32 %v15325_v50, %v5291_v9  ;;  %v4756_v17 = vpop.f32.mrf.mxu1  ;;  %v6497_v22 = vld [vmem:[#allocation5 + $0x3e] sm:$0xff] }
 0x443   : > { %v5029_v55 = vmul.f32 %v15328_v13, %v4756_v17  ;;  %v6496_v17 = vld [vmem:[#allocation5 + $0x36] sm:$0xff] }
 0x444   : > { %v6291_v63 = vmax.f32 %v6246_v26, 0.0  ;;  %v5611_v42 = vadd.f32 %v5566_v3, %v5073_v2  ;;  %v15332_v2 = vld [vmem:[#allocation94_spill] sm:$0xff]  ;;  %v6538_v35 = vpack.c.bf16 %v6497_v22, %v6496_v17 }
 0x445   : > { %9872 = vmatmul.msk.bf16.gmra.mxu1 %vm650_vm0, %v4627_v27  ;;  %v5074_v7 = vadd.f32 %v5029_v55, %v4536_v58  ;;  %v6105_v27 = vmul.f32 %v15333_v56, %v5832_v51  ;;  %v4600_v55 = vld [vmem:[#allocation4 + $0x11f] sm:$0xff]  ;;  %v13606_v56 = vpop.permute.xlu1 %4960 }
 0x446   : > { %v6336_v34 = vmul.f32 %v6291_v63, %v15327_v60  ;;  %v6149_v57 = vadd.f32 %v6104_v21, %v5611_v42  ;;  %9899 = vmatmul.msk.bf16.gmra.mxu2 %vm650_vm0, %v5165_v24  ;;  %v15335_v42 = vld [vmem:[#allocation89_spill] sm:$0xff]  ;;  %v15336_v60 = vld [vmem:[#allocation131_spill] sm:$0xff] }
 0x447   : > { %9927 = vmatmul.msk.bf16.gmra.mxu3 %vm650_vm0, %v5704_v14  ;;  %v5678_v58 = vld [vmem:[#allocation4 + $0x11d] sm:$0xff] }
 0x448   : > { %6387 = vst.msk [vmem:[#allocation5 + $0x78] sm:$0xff] %vm650_vm0, %v6336_v34  ;;  %v6198_v30 = vmul.f32 %v13295_v15, %v6149_v57  ;;  %v4537_v34 = vmul.f32 %v15336_v60, %v13120_v39  ;;  %v4905_v57 = vpop.permute.xlu0 %4904  ;;  %v4599_v39 = vld [vmem:[#allocation4 + $0x117] sm:$0xff] }
 0x449   : > { %v5294_v47 = vpop.f32.mrf.mxu2  ;;  %v13589_v26 = vpop.f32.mrf.mxu0  ;;  %v15341_v60 = vld [vmem:[#allocation98_spill] sm:$0xff] }
 0x44a   : > { %v5837_v23 = vpop.f32.mrf.mxu3  ;;  %v6247_v9 = vadd.f32 %v13302_v62, %v6198_v30  ;;  %15331 = vst [vmem:[#allocation47_spill] sm:$0xff] %v13589_v26  ;;  %v5567_v50 = vmul.f32 %v15332_v2, %v5294_v47  ;;  %v4758_v3 = vpop.f32.mrf.mxu1 }
 0x44b   : > { %v5030_v14 = vmul.f32 %v15335_v42, %v4758_v3  ;;  %v4628_v3 = vpack.c.bf16 %v4600_v55, %v4599_v39  ;;  %v15343_v55 = vld [vmem:[#allocation95_spill] sm:$0xff] }
 0x44c   : > { %v6292_v24 = vmax.f32 %v6247_v9, 0.0  ;;  %v5612_v38 = vadd.f32 %v5567_v50, %v5074_v7  ;;  %v15338_v9 = vld [vmem:[#allocation92_spill] sm:$0xff] }
 0x44d   : > { %v5075_v22 = vadd.f32 %v5030_v14, %v4537_v34  ;;  %v5137_v50 = vld [vmem:[#allocation4 + $0x106] sm:$0xff] }
 0x44e   : > { %v6337_v21 = vmul.f32 %v6292_v24, %v15334_v4  ;;  %v6150_v63 = vadd.f32 %v6105_v27, %v5612_v38  ;;  %v5166_v17 = vpack.c.bf16 %v5138_v36, %v5137_v50  ;;  %v15339_v27 = vld [vmem:[#allocation97_spill] sm:$0xff] }
 0x44f   : > { %9941 = vmatmul.msk.bf16.gmra.mxu0 %vm650_vm0, %v6538_v35  ;;  %v5677_v35 = vld [vmem:[#allocation4 + $0x115] sm:$0xff]  ;;  %v6106_v24 = vmul.f32 %v15339_v27, %v5834_v12  ;;  %v15346_v27 = vld [vmem:[#allocation105_spill] sm:$0xff] }
 0x450   : > { %6388 = vst.msk [vmem:[#allocation5 + $0x80] sm:$0xff] %vm650_vm0, %v6337_v21  ;;  %v6199_v13 = vmul.f32 %v13295_v15, %v6150_v63  ;;  %v5705_v21 = vpack.c.bf16 %v5678_v58, %v5677_v35  ;;  %v15340_v63 = vld [vmem:[#allocation6_spill] sm:$0xff]  ;;  %v13622_v35 = vpop.permute.xlu0 %4916 }
 0x451   : > { %v5296_v51 = vpop.f32.mrf.mxu2  ;;  %v13603_v47 = vpop.f32.mrf.mxu0 }
 0x452   : > { %v13600_v48 = vpop.f32.mrf.mxu3  ;;  %v6248_v30 = vadd.f32 %v13302_v62, %v6199_v13  ;;  %15337 = vst [vmem:[#allocation19_spill] sm:$0xff] %v13603_v47  ;;  %v5568_v7 = vmul.f32 %v15338_v9, %v5296_v51  ;;  %v4761_v2 = vpop.f32.mrf.mxu1  ;;  %v15342_v13 = vld [vmem:[#allocation128_spill] sm:$0xff] }
 0x453   : > { %v5031_v34 = vmul.f32 %v15341_v60, %v4761_v2  ;;  %v4538_v36 = vmul.f32 %v15343_v55, %v15342_v13  ;;  %v6499_v51 = vld [vmem:[#allocation5 + $0x4e] sm:$0xff]  ;;  %v15345_v2 = vld [vmem:[#allocation103_spill] sm:$0xff] }
 0x454   : > { %v6293_v38 = vmax.f32 %v6248_v30, 0.0  ;;  %v5613_v4 = vadd.f32 %v5568_v7, %v5075_v22 }
 0x455   : > { %9873 = vmatmul.msk.bf16.gmra.mxu1 %vm650_vm0, %v4628_v3  ;;  %v5076_v9 = vadd.f32 %v5031_v34, %v4538_v36  ;;  %v6498_v3 = vld [vmem:[#allocation5 + $0x46] sm:$0xff]  ;;  %v4602_v36 = vld [vmem:[#allocation4 + $0x12f] sm:$0xff] }
 0x456   : > { %v6338_v42 = vmul.f32 %v6293_v38, %v15340_v63  ;;  %v6151_v14 = vadd.f32 %v6106_v24, %v5613_v4  ;;  %9900 = vmatmul.msk.bf16.gmra.mxu2 %vm650_vm0, %v5166_v17  ;;  %v6539_v17 = vpack.c.bf16 %v6499_v51, %v6498_v3  ;;  %v6107_v24 = vmul.f32 %v15346_v27, %v5837_v23  ;;  %v15347_v63 = vld [vmem:[#allocation29_spill] sm:$0xff]  ;;  %v15348_v34 = vld [vmem:[#allocation100_spill] sm:$0xff] }
 0x457   : > { %9928 = vmatmul.msk.bf16.gmra.mxu3 %vm650_vm0, %v5705_v21  ;;  %v13626_v21 = vpop.permute.xlu1 %5498  ;;  %v4539_v13 = vmul.f32 %v15348_v34, %v13169_v25  ;;  %v4601_v3 = vld [vmem:[#allocation4 + $0x127] sm:$0xff]  ;;  %v5139_v25 = vld [vmem:[#allocation4 + $0x116] sm:$0xff] }
 0x458   : > { %6389 = vst.msk [vmem:[#allocation5 + $0x88] sm:$0xff] %vm650_vm0, %v6338_v42  ;;  %v6200_v12 = vmul.f32 %v13295_v15, %v6151_v14  ;;  %v5451_v34 = vpop.permute.xlu0 %5450 }
 0x459   : > { %v5299_v58 = vpop.f32.mrf.mxu2 }
 0x45a   : > { %v5842_v30 = vpop.f32.mrf.mxu3  ;;  %v6249_v22 = vadd.f32 %v13302_v62, %v6200_v12  ;;  %v13619_v7 = vpop.f32.mrf.mxu0  ;;  %v5569_v39 = vmul.f32 %v15345_v2, %v5299_v58  ;;  %v5140_v12 = vld [vmem:[#allocation4 + $0x11e] sm:$0xff]  ;;  %v5680_v58 = vld [vmem:[#allocation4 + $0x12d] sm:$0xff] }
 0x45b   : > { %15344 = vst [vmem:[#allocation48_spill] sm:$0xff] %v13619_v7  ;;  %v4763_v50 = vpop.f32.mrf.mxu1  ;;  %v5167_v27 = vpack.c.bf16 %v5140_v12, %v5139_v25  ;;  %v6501_v12 = vld [vmem:[#allocation5 + $0x5e] sm:$0xff]  ;;  %v6500_v25 = vld [vmem:[#allocation5 + $0x56] sm:$0xff] }
 0x45c   : > { %v6294_v38 = vmax.f32 %v6249_v22, 0.0  ;;  %v5614_v4 = vadd.f32 %v5569_v39, %v5076_v9  ;;  %v5032_v60 = vmul.f32 %v4905_v57, %v4763_v50  ;;  %v15350_v39 = vld [vmem:[#allocation101_spill] sm:$0xff] }
 0x45e   : > { %v6339_v42 = vmul.f32 %v6294_v38, %v15347_v63  ;;  %v6152_v14 = vadd.f32 %v6107_v24, %v5614_v4  ;;  %v5077_v9 = vadd.f32 %v5032_v60, %v4539_v13  ;;  %v5679_v24 = vld [vmem:[#allocation4 + $0x125] sm:$0xff] }
 0x45f   : > { %9942 = vmatmul.msk.bf16.gmra.mxu0 %vm650_vm0, %v6539_v17  ;;  %v4629_v17 = vpack.c.bf16 %v4602_v36, %v4601_v3  ;;  %v15351_v38 = vld [vmem:[#allocation104_spill] sm:$0xff]  ;;  %v13646_v36 = vpop.permute.xlu1 %4471 }
 0x460   : > { %6390 = vst.msk [vmem:[#allocation5 + $0x90] sm:$0xff] %vm650_vm0, %v6339_v42  ;;  %v6201_v55 = vmul.f32 %v13295_v15, %v6152_v14  ;;  %v6108_v4 = vmul.f32 %v15351_v38, %v13600_v48  ;;  %v5706_v14 = vpack.c.bf16 %v5680_v58, %v5679_v24  ;;  %v15352_v60 = vld [vmem:[#allocation36_spill] sm:$0xff] }
 0x461   : > { %v5301_v23 = vpop.f32.mrf.mxu2 }
 0x462   : > { %v13633_v51 = vpop.f32.mrf.mxu3  ;;  %v6250_v22 = vadd.f32 %v13302_v62, %v6201_v55  ;;  %v13636_v2 = vpop.f32.mrf.mxu0  ;;  %v5570_v57 = vmul.f32 %v15350_v39, %v5301_v23 }
 0x463   : > { %15349 = vst [vmem:[#allocation49_spill] sm:$0xff] %v13636_v2  ;;  %v4766_v50 = vpop.f32.mrf.mxu1  ;;  %v15353_v2 = vld [vmem:[#allocation106_spill] sm:$0xff] }
 0x464   : > { %v6295_v63 = vmax.f32 %v6250_v22, 0.0  ;;  %v5615_v42 = vadd.f32 %v5570_v57, %v5077_v9  ;;  %v5033_v23 = vmul.f32 %v15353_v2, %v4766_v50  ;;  %v15355_v2 = vld [vmem:[#allocation108_spill] sm:$0xff] }
 0x465   : > { %9874 = vmatmul.msk.bf16.gmra.mxu1 %vm650_vm0, %v4629_v17  ;;  %v6540_v17 = vpack.c.bf16 %v6501_v12, %v6500_v25  ;;  %v5142_v12 = vld [vmem:[#allocation4 + $0x12e] sm:$0xff] }
 0x466   : > { %v6340_v13 = vmul.f32 %v6295_v63, %v15352_v60  ;;  %v6153_v55 = vadd.f32 %v6108_v4, %v5615_v42  ;;  %9901 = vmatmul.msk.bf16.gmra.mxu2 %vm650_vm0, %v5167_v27  ;;  %v5078_v39 = vadd.f32 %v5033_v23, %v13191_v44  ;;  %v15356_v27 = vld [vmem:[#allocation111_spill] sm:$0xff] }
 0x467   : > { %9929 = vmatmul.msk.bf16.gmra.mxu3 %vm650_vm0, %v5706_v14  ;;  %v6109_v24 = vmul.f32 %v15356_v27, %v5842_v30  ;;  %v15358_v14 = vld [vmem:[#allocation109_spill] sm:$0xff]  ;;  %v15359_v44 = vld [vmem:[#allocation107_spill] sm:$0xff]  ;;  %v13671_v30 = vld [vmem:[%s14966_s8] ss:$0 sm:$0xff] }
 0x468   : > { %6391 = vst.msk [vmem:[#allocation5 + $0x98] sm:$0xff] %vm650_vm0, %v6340_v13  ;;  %v6202_v48 = vmul.f32 %v13295_v15, %v6153_v55  ;;  %v15357_v15 = vld [vmem:[#allocation14_spill] sm:$0xff]  ;;  %v4541_v60 = vmul.f32 %v15359_v44, %v13212_v11  ;;  %v13663_v13 = vpop.permute.xlu0 %5462  ;;  %v13665_v55 = vpop.permute.xlu2 %4968 }
 0x469   : > { %v5304_v58 = vpop.f32.mrf.mxu2  ;;  %v13679_v11 = vld [vmem:[%s14967_s9] ss:$0 sm:$0xff]  ;;  %v4603_v27 = vld [vmem:[#allocation4 + $0x137] sm:$0xff] }
 0x46a   : > { %v13650_v22 = vpop.f32.mrf.mxu3  ;;  %v6251_v9 = vadd.f32 %v13302_v62, %v6202_v48  ;;  %v5571_v50 = vmul.f32 %v15355_v2, %v5304_v58  ;;  %v4604_v48 = vld [vmem:[#allocation4 + $0x13f] sm:$0xff] }
 0x46b   : > { %v4768_v3 = vpop.f32.mrf.mxu1 }
 0x46c   : > { %v13654_v57 = vpop.f32.mrf.mxu0  ;;  %v6296_v38 = vmax.f32 %v6251_v9, 0.0  ;;  %v5616_v4 = vadd.f32 %v5571_v50, %v5078_v39  ;;  %v5034_v62 = vmul.f32 %v15358_v14, %v4768_v3  ;;  %v5682_v39 = vld [vmem:[#allocation4 + $0x13d] sm:$0xff] }
 0x46d   : > { %15354 = vst [vmem:[#allocation30_spill] sm:$0xff] %v13654_v57 }
 0x46e   : > { %v6341_v63 = vmul.f32 %v6296_v38, %v15357_v15  ;;  %v6154_v42 = vadd.f32 %v6109_v24, %v5616_v4  ;;  %v5079_v50 = vadd.f32 %v5034_v62, %v4541_v60  ;;  %v5141_v24 = vld [vmem:[#allocation4 + $0x126] sm:$0xff]  ;;  %v4630_v38 = vpack.c.bf16 %v4604_v48, %v4603_v27  ;;  %v5681_v15 = vld [vmem:[#allocation4 + $0x135] sm:$0xff] }
 0x46f   : > { %9943 = vmatmul.msk.bf16.gmra.mxu0 %vm650_vm0, %v6540_v17  ;;  %v5168_v4 = vpack.c.bf16 %v5142_v12, %v5141_v24  ;;  %v5707_v7 = vpack.c.bf16 %v5682_v39, %v5681_v15  ;;  %v15362_v62 = vld [vmem:[#allocation38_spill] sm:$0xff]  ;;  %v15363_v48 = vld [vmem:[#allocation113_spill] sm:$0xff]  ;;  %v6502_v24 = vld [vmem:[#allocation5 + $0x66] sm:$0xff] }
 0x470   : > { %6392 = vst.msk [vmem:[#allocation5 + $0xa0] sm:$0xff] %vm650_vm0, %v6341_v63  ;;  %v6203_v23 = vmul.f32 %v13671_v30, %v6154_v42  ;;  %v13684_v63 = vpop.permute.xlu1 %4964  ;;  %v15361_v42 = vld [vmem:[#allocation110_spill] sm:$0xff]  ;;  %v4542_v12 = vmul.f32 %v15363_v48, %v13238_v28  ;;  %v15366_v28 = vld [vmem:[#allocation117_spill] sm:$0xff] }
 0x471   : > { %v5306_v58 = vpop.f32.mrf.mxu2  ;;  %v6110_v14 = vmul.f32 %v15361_v42, %v13633_v51  ;;  %v6111_v15 = vmul.f32 %v15366_v28, %v13650_v22  ;;  %v5144_v22 = vld [vmem:[#allocation4 + $0x13e] sm:$0xff]  ;;  %v15371_v28 = vld [vmem:[#allocation118_spill] sm:$0xff] }
 0x472   : > { %v13674_v9 = vpop.f32.mrf.mxu3  ;;  %v6252_v2 = vadd.f32 %v13679_v11, %v6203_v23  ;;  %v5572_v25 = vmul.f32 %v5451_v34, %v5306_v58  ;;  %v6503_v58 = vld [vmem:[#allocation5 + $0x6e] sm:$0xff] }
 0x473   : > { %v4771_v17 = vpop.f32.mrf.mxu1 }
 0x474   : > { %v13682_v3 = vpop.f32.mrf.mxu0  ;;  %v6297_v44 = vmax.f32 %v6252_v2, 0.0  ;;  %v5617_v57 = vadd.f32 %v5572_v25, %v5079_v50  ;;  %v5035_v34 = vmul.f32 %v13622_v35, %v4771_v17  ;;  %v15365_v35 = vld [vmem:[#allocation114_spill] sm:$0xff] }
 0x475   : > { %15360 = vst [vmem:[#allocation32_spill] sm:$0xff] %v13682_v3  ;;  %9875 = vmatmul.msk.bf16.gmra.mxu1 %vm650_vm0, %v4630_v38  ;;  %v5997_v38 = vpop.permute.xlu0 %5996 }
 0x476   : > { %v6342_v60 = vmul.f32 %v6297_v44, %v15362_v62  ;;  %v6155_v23 = vadd.f32 %v6110_v14, %v5617_v57  ;;  %9902 = vmatmul.msk.bf16.gmra.mxu2 %vm650_vm0, %v5168_v4  ;;  %v5080_v25 = vadd.f32 %v5035_v34, %v4542_v12  ;;  %v13701_v4 = vpop.permute.xlu2 %6040  ;;  %v15367_v62 = vld [vmem:[#allocation8_spill] sm:$0xff] }
 0x477   : > { %9930 = vmatmul.msk.bf16.gmra.mxu3 %vm650_vm0, %v5707_v7  ;;  %v6541_v7 = vpack.c.bf16 %v6503_v58, %v6502_v24  ;;  %v15368_v34 = vld [vmem:[#allocation116_spill] sm:$0xff] }
 0x478   : > { %6393 = vst.msk [vmem:[#allocation5 + $0xa8] sm:$0xff] %vm650_vm0, %v6342_v60  ;;  %v6204_v51 = vmul.f32 %v13671_v30, %v6155_v23  ;;  %v13706_v44 = vpop.permute.xlu1 %5506  ;;  %v15369_v12 = vld [vmem:[#allocation112_spill] sm:$0xff] }
 0x479   : > { %v5309_v39 = vpop.f32.mrf.mxu2 }
 0x47a   : > { %v5852_v2 = vpop.f32.mrf.mxu3  ;;  %v6253_v50 = vadd.f32 %v13679_v11, %v6204_v51  ;;  %v5573_v17 = vmul.f32 %v15365_v35, %v5309_v39  ;;  %v4543_v51 = vmul.f32 %v15369_v12, %v13257_v29  ;;  %v4606_v39 = vld [vmem:[#allocation4 + $0x14f] sm:$0xff] }
 0x47b   : > { %v4773_v27 = vpop.f32.mrf.mxu1  ;;  %v5684_v35 = vld [vmem:[#allocation4 + $0x14d] sm:$0xff]  ;;  %v5143_v29 = vld [vmem:[#allocation4 + $0x136] sm:$0xff] }
 0x47c   : > { %v13698_v57 = vpop.f32.mrf.mxu0  ;;  %v6298_v42 = vmax.f32 %v6253_v50, 0.0  ;;  %v5618_v14 = vadd.f32 %v5573_v17, %v5080_v25  ;;  %v5036_v48 = vmul.f32 %v15368_v34, %v4773_v27 }
 0x47d   : > { %15364 = vst [vmem:[#allocation28_spill] sm:$0xff] %v13698_v57  ;;  %v13722_v3 = vpop.permute.xlu0 %6008 }
 0x47e   : > { %v6343_v60 = vmul.f32 %v6298_v42, %v15367_v62  ;;  %v6156_v23 = vadd.f32 %v6111_v15, %v5618_v14  ;;  %v5081_v24 = vadd.f32 %v5036_v48, %v4543_v51  ;;  %v4605_v42 = vld [vmem:[#allocation4 + $0x147] sm:$0xff]  ;;  %v5169_v62 = vpack.c.bf16 %v5144_v22, %v5143_v29  ;;  %v13724_v48 = vpop.permute.xlu2 %4479 }
 0x47f   : > { %9944 = vmatmul.msk.bf16.gmra.mxu0 %vm650_vm0, %v6541_v7  ;;  %v4631_v14 = vpack.c.bf16 %v4606_v39, %v4605_v42  ;;  %v15372_v51 = vld [vmem:[#allocation24_spill] sm:$0xff]  ;;  %v15374_v39 = vld [vmem:[#allocation138_spill] sm:$0xff] }
 0x480   : > { %6394 = vst.msk [vmem:[#allocation5 + $0xb0] sm:$0xff] %vm650_vm0, %v6343_v60  ;;  %v6205_v58 = vmul.f32 %v13671_v30, %v6156_v23  ;;  %v5683_v60 = vld [vmem:[#allocation4 + $0x145] sm:$0xff]  ;;  %v6112_v23 = vmul.f32 %v5997_v38, %v13674_v9  ;;  %v13732_v22 = vpop.permute.xlu1 %6044 }
 0x481   : > { %v5311_v50 = vpop.f32.mrf.mxu2  ;;  %v5708_v57 = vpack.c.bf16 %v5684_v35, %v5683_v60  ;;  %v15375_v9 = vld [vmem:[#allocation120_spill] sm:$0xff] }
 0x482   : > { %v13714_v25 = vpop.f32.mrf.mxu3  ;;  %v6254_v17 = vadd.f32 %v13679_v11, %v6205_v58  ;;  %v5574_v27 = vmul.f32 %v15371_v28, %v5311_v50  ;;  %v15373_v28 = vld [vmem:[#allocation122_spill] sm:$0xff]  ;;  %v4544_v38 = vmul.f32 %v15375_v9, %v15374_v39  ;;  %v15379_v39 = vld [vmem:[#allocation121_spill] sm:$0xff] }
 0x483   : > { %v4776_v15 = vpop.f32.mrf.mxu1 }
 0x484   : > { %v13717_v7 = vpop.f32.mrf.mxu0  ;;  %v6299_v34 = vmax.f32 %v6254_v17, 0.0  ;;  %v5619_v12 = vadd.f32 %v5574_v27, %v5081_v24  ;;  %v6505_v17 = vld [vmem:[#allocation5 + $0x7e] sm:$0xff] }
 0x485   : > { %15370 = vst [vmem:[#allocation51_spill] sm:$0xff] %v13717_v7  ;;  %9876 = vmatmul.msk.bf16.gmra.mxu1 %vm650_vm0, %v4631_v14  ;;  %v5037_v7 = vmul.f32 %v15373_v28, %v4776_v15 }
 0x486   : > { %v6344_v58 = vmul.f32 %v6299_v34, %v15372_v51  ;;  %v6157_v50 = vadd.f32 %v6112_v23, %v5619_v12  ;;  %9903 = vmatmul.msk.bf16.gmra.mxu2 %vm650_vm0, %v5169_v62  ;;  %v6504_v62 = vld [vmem:[#allocation5 + $0x76] sm:$0xff]  ;;  %v15377_v23 = vld [vmem:[#allocation124_spill] sm:$0xff] }
 0x487   : > { %9931 = vmatmul.msk.bf16.gmra.mxu3 %vm650_vm0, %v5708_v57  ;;  %v5082_v29 = vadd.f32 %v5037_v7, %v4544_v38  ;;  %v6542_v60 = vpack.c.bf16 %v6505_v17, %v6504_v62  ;;  %v6113_v34 = vmul.f32 %v15377_v23, %v5852_v2  ;;  %v15380_v7 = vld [vmem:[#allocation119_spill] sm:$0xff]  ;;  %v5146_v17 = vld [vmem:[#allocation4 + $0x14e] sm:$0xff] }
 0x488   : > { %6395 = vst.msk [vmem:[#allocation5 + $0xb8] sm:$0xff] %vm650_vm0, %v6344_v58  ;;  %v6206_v35 = vmul.f32 %v13671_v30, %v6157_v50  ;;  %v15378_v58 = vld [vmem:[#allocation10_spill] sm:$0xff]  ;;  %v4545_v38 = vmul.f32 %v15380_v7, %v13316_v31  ;;  %v4608_v2 = vld [vmem:[#allocation4 + $0x15f] sm:$0xff] }
 0x489   : > { %v5314_v24 = vpop.f32.mrf.mxu2 }
 0x48a   : > { %v5857_v27 = vpop.f32.mrf.mxu3  ;;  %v6255_v42 = vadd.f32 %v13679_v11, %v6206_v35  ;;  %v5575_v14 = vmul.f32 %v13663_v13, %v5314_v24  ;;  %v4444_v35 = vpop.permute.xlu0 %4443 }
 0x48b   : > { %v4778_v57 = vpop.f32.mrf.mxu1 }
 0x48c   : > { %v13737_v15 = vpop.f32.mrf.mxu0  ;;  %v6300_v12 = vmax.f32 %v6255_v42, 0.0  ;;  %v5620_v51 = vadd.f32 %v5575_v14, %v5082_v29  ;;  %v5038_v9 = vmul.f32 %v15379_v39, %v4778_v57  ;;  %v5686_v29 = vld [vmem:[#allocation4 + $0x15d] sm:$0xff]  ;;  %v13754_v39 = vpop.permute.xlu1 %4972 }
 0x48d   : > { %15376 = vst [vmem:[#allocation53_spill] sm:$0xff] %v13737_v15  ;;  %v13746_v15 = vpop.permute.xlu2 %4976 }
 0x48e   : > { %v6345_v50 = vmul.f32 %v6300_v12, %v15378_v58  ;;  %v6158_v28 = vadd.f32 %v6113_v34, %v5620_v51  ;;  %v5083_v62 = vadd.f32 %v5038_v9, %v4545_v38  ;;  %v4607_v34 = vld [vmem:[#allocation4 + $0x157] sm:$0xff]  ;;  %v5145_v12 = vld [vmem:[#allocation4 + $0x146] sm:$0xff] }
 0x48f   : > { %9945 = vmatmul.msk.bf16.gmra.mxu0 %vm650_vm0, %v6542_v60  ;;  %v15381_v60 = vld [vmem:[#allocation126_spill] sm:$0xff]  ;;  %v4632_v51 = vpack.c.bf16 %v4608_v2, %v4607_v34  ;;  %v5170_v58 = vpack.c.bf16 %v5146_v17, %v5145_v12  ;;  %v15383_v9 = vld [vmem:[#allocation80_spill] sm:$0xff]  ;;  %v15385_v2 = vld [vmem:[#allocation127_spill] sm:$0xff] }
 0x490   : > { %6396 = vst.msk [vmem:[#allocation5 + $0xc0] sm:$0xff] %vm650_vm0, %v6345_v50  ;;  %v6207_v13 = vmul.f32 %v13671_v30, %v6158_v28  ;;  %v5685_v50 = vld [vmem:[#allocation4 + $0x155] sm:$0xff]  ;;  %v15382_v28 = vld [vmem:[#allocation129_spill] sm:$0xff]  ;;  %v4546_v17 = vmul.f32 %v15385_v2, %v13346_v6  ;;  %v6506_v12 = vld [vmem:[#allocation5 + $0x86] sm:$0xff]  ;;  %v4547_v2 = vmul.f32 %v4444_v35, %v13371_v53 }
 0x491   : > { %v5316_v24 = vpop.f32.mrf.mxu2  ;;  %v6114_v7 = vmul.f32 %v15382_v28, %v13714_v25  ;;  %v5709_v5 = vpack.c.bf16 %v5686_v29, %v5685_v50  ;;  %v6507_v29 = vld [vmem:[#allocation5 + $0x8e] sm:$0xff]  ;;  %v5147_v53 = vld [vmem:[#allocation4 + $0x156] sm:$0xff] }
 0x492   : > { %v13750_v42 = vpop.f32.mrf.mxu3  ;;  %v6256_v14 = vadd.f32 %v13679_v11, %v6207_v13  ;;  %v5576_v23 = vmul.f32 %v15381_v60, %v5316_v24  ;;  %v15384_v24 = vld [vmem:[#allocation132_spill] sm:$0xff]  ;;  %v13765_v60 = vpop.permute.xlu0 %4455 }
 0x493   : > { %v4781_v31 = vpop.f32.mrf.mxu1 }
 0x494   : > { %v4340_v57 = vpop.f32.mrf.mxu0  ;;  %v6301_v47 = vmax.f32 %v6256_v14, 0.0  ;;  %v5621_v26 = vadd.f32 %v5576_v23, %v5083_v62  ;;  %v15386_v23 = vld [vmem:[#allocation134_spill] sm:$0xff] }
 0x495   : > { %9877 = vmatmul.msk.bf16.gmra.mxu1 %vm650_vm0, %v4632_v51  ;;  %v5039_v57 = vmul.f32 %v15384_v24, %v4781_v31  ;;  %v6543_v51 = vpack.c.bf16 %v6507_v29, %v6506_v12  ;;  %v13773_v6 = vpop.permute.xlu2 %5514  ;;  %v15388_v24 = vld [vmem:[#allocation130_spill] sm:$0xff]  ;;  %v5148_v29 = vld [vmem:[#allocation4 + $0x15e] sm:$0xff] }
 0x496   : > { %v6346_v38 = vmul.f32 %v6301_v47, %v15383_v9  ;;  %v6159_v13 = vadd.f32 %v6114_v7, %v5621_v26  ;;  %9904 = vmatmul.msk.bf16.gmra.mxu2 %vm650_vm0, %v5170_v58  ;;  %v6115_v58 = vmul.f32 %v13722_v3, %v5857_v27  ;;  %v13777_v7 = vpop.permute.xlu1 %5510  ;;  %v15387_v9 = vld [vmem:[#allocation21_spill] sm:$0xff] }
 0x497   : > { %9932 = vmatmul.msk.bf16.gmra.mxu3 %vm650_vm0, %v5709_v5  ;;  %v5084_v47 = vadd.f32 %v5039_v57, %v4546_v17 }
 0x498   : > { %6397 = vst.msk [vmem:[#allocation5 + $0xc8] sm:$0xff] %vm650_vm0, %v6346_v38  ;;  %v6208_v25 = vmul.f32 %v13671_v30, %v6159_v13 }
 0x499   : > { %v5319_v14 = vpop.f32.mrf.mxu2 }
 0x49a   : > { %v5862_v62 = vpop.f32.mrf.mxu3  ;;  %v6257_v26 = vadd.f32 %v13679_v11, %v6208_v25  ;;  %v5577_v31 = vmul.f32 %v15386_v23, %v5319_v14  ;;  %v4610_v25 = vld [vmem:[#allocation4 + $0x16f] sm:$0xff]  ;;  %v5687_v14 = vld [vmem:[#allocation4 + $0x165] sm:$0xff] }
 0x49b   : > { %v4783_v5 = vpop.f32.mrf.mxu1  ;;  %v15389_v23 = vld [vmem:[#allocation133_spill] sm:$0xff] }
 0x49c   : > { %v13771_v34 = vpop.f32.mrf.mxu0  ;;  %v6302_v50 = vmax.f32 %v6257_v26, 0.0  ;;  %v5622_v28 = vadd.f32 %v5577_v31, %v5084_v47  ;;  %v5040_v57 = vmul.f32 %v15388_v24, %v4783_v5  ;;  %v5710_v24 = vpack.c.bf16 %v5687_v14, %v5687_v14 }
 0x49e   : > { %v6347_v38 = vmul.f32 %v6302_v50, %v15387_v9  ;;  %v6160_v13 = vadd.f32 %v6115_v58, %v5622_v28  ;;  %v5085_v47 = vadd.f32 %v5040_v57, %v4547_v2  ;;  %v5171_v58 = vpack.c.bf16 %v5148_v29, %v5147_v53  ;;  %v4945_v50 = vpop.permute.xlu0 %4944  ;;  %v15391_v28 = vld [vmem:[#allocation136_spill] sm:$0xff]  ;;  %v15392_v57 = vld [vmem:[#allocation82_spill] sm:$0xff] }
 0x49f   : > { %9946 = vmatmul.msk.bf16.gmra.mxu0 %vm650_vm0, %v6543_v51  ;;  %v4609_v51 = vld [vmem:[#allocation4 + $0x167] sm:$0xff]  ;;  %v6116_v9 = vmul.f32 %v15391_v28, %v13750_v42  ;;  %v13801_v42 = vpop.permute.xlu1 %6052 }
 0x4a0   : > { %6398 = vst.msk [vmem:[#allocation5 + $0xd0] sm:$0xff] %vm650_vm0, %v6347_v38  ;;  %v6209_v17 = vmul.f32 %v13671_v30, %v6160_v13  ;;  %v4633_v35 = vpack.c.bf16 %v4610_v25, %v4609_v51  ;;  %v15394_v25 = vld [vmem:[#allocation135_spill] sm:$0xff]  ;;  %v6508_v28 = vld [vmem:[#allocation5 + $0x96] sm:$0xff] }
 0x4a1   : > { %v5321_v3 = vpop.f32.mrf.mxu2  ;;  %v4548_v29 = vmul.f32 %v15394_v25, %v13398_v32  ;;  %v6117_v32 = vmul.f32 %v13357_v40, %v5862_v62  ;;  %v4611_v40 = vld [vmem:[#allocation4 + $0x177] sm:$0xff]  ;;  %v5149_v62 = vld [vmem:[#allocation4 + $0x166] sm:$0xff] }
 0x4a2   : > { %v13784_v27 = vpop.f32.mrf.mxu3  ;;  %v6258_v26 = vadd.f32 %v13679_v11, %v6209_v17  ;;  %v5578_v31 = vmul.f32 %v15389_v23, %v5321_v3  ;;  %v13793_v17 = vpop.permute.xlu2 %4487  ;;  %v15393_v23 = vld [vmem:[#allocation137_spill] sm:$0xff] }
 0x4a3   : > { %v4786_v5 = vpop.f32.mrf.mxu1 }
 0x4a4   : > { %v13788_v12 = vpop.f32.mrf.mxu0  ;;  %v6303_v38 = vmax.f32 %v6258_v26, 0.0  ;;  %v5623_v13 = vadd.f32 %v5578_v31, %v5085_v47  ;;  %v6509_v26 = vld [vmem:[#allocation5 + $0x9e] sm:$0xff] }
 0x4a5   : > { %15390 = vst [vmem:[#allocation56_spill] sm:$0xff] %v13788_v12  ;;  %9878 = vmatmul.msk.bf16.gmra.mxu1 %vm650_vm0, %v4633_v35  ;;  %v5041_v12 = vmul.f32 %v15393_v23, %v4786_v5 }
 0x4a6   : > { %v6348_v2 = vmul.f32 %v6303_v38, %v15392_v57  ;;  %v6161_v3 = vadd.f32 %v6116_v9, %v5623_v13  ;;  %9905 = vmatmul.msk.bf16.gmra.mxu2 %vm650_vm0, %v5171_v58  ;;  %v6544_v9 = vpack.c.bf16 %v6509_v26, %v6508_v28  ;;  %v15395_v57 = vld [vmem:[#allocation31_spill] sm:$0xff]  ;;  %v4634_v28 = vpack.c.bf16 %v4611_v40, %v4611_v40 }
 0x4a7   : > { %9933 = vmatmul.msk.bf16.gmra.mxu3 %vm650_vm0, %v5710_v24  ;;  %v5086_v53 = vadd.f32 %v5041_v12, %v4548_v29  ;;  %v13811_v24 = vpop.permute.xlu0 %4956  ;;  %v15396_v12 = vld [vmem:[#allocation46_spill] sm:$0xff]  ;;  %v4550_v40 = vmul.f32 %v13765_v60, %v13458_v8 }
 0x4a8   : > { %6399 = vst.msk [vmem:[#allocation5 + $0xd8] sm:$0xff] %vm650_vm0, %v6348_v2  ;;  %v6210_v14 = vmul.f32 %v13671_v30, %v6161_v3 }
 0x4a9   : > { %v5324_v47 = vpop.f32.mrf.mxu2 }
 0x4aa   : > { %v5867_v31 = vpop.f32.mrf.mxu3  ;;  %v6259_v51 = vadd.f32 %v13679_v11, %v6210_v14  ;;  %v5579_v5 = vmul.f32 %v13321_v33, %v5324_v47  ;;  %v4549_v33 = vmul.f32 %v15396_v12, %v13428_v41  ;;  %v13816_v25 = vpop.permute.xlu2 %4980  ;;  %v7270_v47 = vld [vmem:[#allocation5 + $0x1f] sm:$0xff] }
 0x4ab   : > { %v4788_v58 = vpop.f32.mrf.mxu1  ;;  %v6119_v8 = vmul.f32 %v13465_v1, %v5867_v31 }
 0x4ac   : > { %v13807_v35 = vpop.f32.mrf.mxu0  ;;  %v6304_v38 = vmax.f32 %v6259_v51, 0.0  ;;  %v5624_v13 = vadd.f32 %v5579_v5, %v5086_v53  ;;  %v5042_v23 = vmul.f32 %v4945_v50, %v4788_v58  ;;  %v15397_v5 = vld [vmem:[#allocation22_spill] sm:$0xff] }
 0x4ae   : > { %v6349_v2 = vmul.f32 %v6304_v38, %v15395_v57  ;;  %v6162_v3 = vadd.f32 %v6117_v32, %v5624_v13  ;;  %v5087_v53 = vadd.f32 %v5042_v23, %v4549_v33  ;;  %v7269_v32 = vld [vmem:[#allocation5 + $0x17] sm:$0xff]  ;;  %v13826_v38 = vpop.permute.xlu1 %4491  ;;  %v6118_v13 = vmul.f32 %v13328_v49, %v13784_v27  ;;  %v15398_v23 = vld [vmem:[#allocation84_spill] sm:$0xff] }
 0x4af   : > { %9947 = vmatmul.msk.bf16.gmra.mxu0 %vm650_vm0, %v6544_v9  ;;  %v5172_v9 = vpack.c.bf16 %v5149_v62, %v5149_v62  ;;  %v5491_v49 = vpop.permute.xlu0 %5490  ;;  %v6511_v62 = vld [vmem:[#allocation5 + $0xae] sm:$0xff] }
 0x4b0   : > { %6400 = vst.msk [vmem:[#allocation5 + $0xe0] sm:$0xff] %vm650_vm0, %v6349_v2  ;;  %v6211_v29 = vmul.f32 %v13671_v30, %v6162_v3  ;;  %v13830_v3 = vpack.c.bf16 %v7270_v47, %v7269_v32 }
 0x4b1   : > { %v5326_v14 = vpop.f32.mrf.mxu2 }
 0x4b2   : > { %v13820_v26 = vpop.f32.mrf.mxu3  ;;  %v6260_v51 = vadd.f32 %v13679_v11, %v6211_v29  ;;  %v5580_v50 = vmul.f32 %v15397_v5, %v5326_v14 }
 0x4b3   : > { %v4791_v41 = vpop.f32.mrf.mxu1 }
 0x4b4   : > { %v13824_v58 = vpop.f32.mrf.mxu0  ;;  %v6305_v57 = vmax.f32 %v6260_v51, 0.0  ;;  %v5625_v2 = vadd.f32 %v5580_v50, %v5087_v53  ;;  %v5043_v29 = vmul.f32 %v13363_v54, %v4791_v41  ;;  %v6510_v41 = vld [vmem:[#allocation5 + $0xa6] sm:$0xff] }
 0x4b5   : > { %9879 = vmatmul.msk.bf16.gmra.mxu1 %vm650_vm0, %v4634_v28  ;;  %v6545_v28 = vpack.c.bf16 %v6511_v62, %v6510_v41 }
 0x4b6   : > { %v6350_v12 = vmul.f32 %v6305_v57, %v15398_v23  ;;  %v6163_v33 = vadd.f32 %v6118_v13, %v5625_v2  ;;  %9906 = vmatmul.msk.bf16.gmra.mxu2 %vm650_vm0, %v5172_v9  ;;  %v5088_v53 = vadd.f32 %v5043_v29, %v4550_v40  ;;  %v13846_v9 = vpop.permute.xlu2 %5522  ;;  %v13850_v13 = vpop.permute.xlu1 %5518  ;;  %v15399_v57 = vld [vmem:[#allocation40_spill] sm:$0xff] }
 0x4b7   : > { %10019 = vmatmul.msk.bf16.vlgmr.msra.gmra.mxu3 %vm650_vm0, %v13830_v3  ;;  %v6956_v29 = vld [vmem:[#allocation5 + $0x7] sm:$0xff]  ;;  %v6957_v40 = vld [vmem:[#allocation5 + $0xf] sm:$0xff] }
 0x4b8   : > { %6401 = vst.msk [vmem:[#allocation5 + $0xe8] sm:$0xff] %vm650_vm0, %v6350_v12  ;;  %v6212_v27 = vmul.f32 %v13671_v30, %v6163_v33  ;;  %v6420_v12 = vld [vmem:[#allocation5 + $0x5] sm:$0xff]  ;;  %v6421_v33 = vld [vmem:[#allocation5 + $0xd] sm:$0xff] }
 0x4b9   : > { %v5329_v14 = vpop.f32.mrf.mxu2 }
 0x4ba   : > { %v5872_v47 = vpop.f32.mrf.mxu3  ;;  %v6261_v51 = vadd.f32 %v13679_v11, %v6212_v27  ;;  %v5581_v54 = vmul.f32 %v13403_v0, %v5329_v14  ;;  %v4551_v27 = vmul.f32 %v13391_v46, %v13479_v43  ;;  %v6465_v14 = vpack.c.bf16 %v6421_v33, %v6420_v12 }
 0x4bb   : > { %v4793_v50 = vpop.f32.mrf.mxu1  ;;  %v6120_v46 = vmul.f32 %v13440_v45, %v13820_v26  ;;  %v6513_v26 = vld [vmem:[#allocation5 + $0xbe] sm:$0xff] }
 0x4bc   : > { %v13844_v5 = vpop.f32.mrf.mxu0  ;;  %v6306_v60 = vmax.f32 %v6261_v51, 0.0  ;;  %v5626_v32 = vadd.f32 %v5581_v54, %v5088_v53  ;;  %v5044_v0 = vmul.f32 %v13432_v59, %v4793_v50  ;;  %v7272_v51 = vld [vmem:[#allocation5 + $0x2f] sm:$0xff] }
 0x4be   : > { %v6351_v2 = vmul.f32 %v6306_v60, %v15399_v57  ;;  %v6164_v23 = vadd.f32 %v6119_v8, %v5626_v32  ;;  %v5089_v54 = vadd.f32 %v5044_v0, %v4551_v27  ;;  %v7271_v8 = vld [vmem:[#allocation5 + $0x27] sm:$0xff]  ;;  %v13861_v60 = vpop.permute.xlu0 %5502  ;;  %v13875_v33 = vpop.permute.xlu1 %6056 }
 0x4bf   : > { %9948 = vmatmul.msk.bf16.gmra.mxu0 %vm650_vm0, %v6545_v28  ;;  %v7001_v28 = vpack.c.bf16 %v6957_v40, %v6956_v29  ;;  %v13865_v57 = vpack.c.bf16 %v7272_v51, %v7271_v8  ;;  %v6512_v51 = vld [vmem:[#allocation5 + $0xb6] sm:$0xff] }
 0x4c0   : > { %6402 = vst.msk [vmem:[#allocation5 + $0xf0] sm:$0xff] %vm650_vm0, %v6351_v2  ;;  %v6213_v1 = vmul.f32 %v13671_v30, %v6164_v23  ;;  %v13868_v2 = vpop.permute.xlu2 %6060  ;;  %v15400_v23 = vld [vmem:[#allocation37_spill] sm:$0xff] }
 0x4c1   : > { %v5331_v31 = vpop.f32.mrf.mxu2 }
 0x4c2   : > { %v5874_v62 = vpop.f32.mrf.mxu3  ;;  %v6262_v53 = vadd.f32 %v13679_v11, %v6213_v1  ;;  %v5582_v41 = vmul.f32 %v5491_v49, %v5331_v31 }
 0x4c3   : > { %v4796_v50 = vpop.f32.mrf.mxu1 }
 0x4c4   : > { %v13859_v59 = vpop.f32.mrf.mxu0  ;;  %v6307_v43 = vmax.f32 %v6262_v53, 0.0  ;;  %v5627_v32 = vadd.f32 %v5582_v41, %v5089_v54  ;;  %v5045_v12 = vmul.f32 %v13811_v24, %v4796_v50  ;;  %v4553_v53 = vmul.f32 %v13471_v37, %v13518_v61  ;;  %v6423_v61 = vld [vmem:[#allocation5 + $0x1d] sm:$0xff] }
 0x4c5   : > { %9965 = vmatmul.msk.bf16.vlgmr.msra.gmra.mxu1 %vm650_vm0, %v6465_v14  ;;  %v6546_v41 = vpack.c.bf16 %v6513_v26, %v6512_v51  ;;  %v6121_v50 = vmul.f32 %v13525_v52, %v5872_v47  ;;  %v6422_v26 = vld [vmem:[#allocation5 + $0x15] sm:$0xff] }
 0x4c6   : > { %v6352_v49 = vmul.f32 %v6307_v43, %v15400_v23  ;;  %v6165_v0 = vadd.f32 %v6120_v46, %v5627_v32  ;;  %9992 = vmatmul.msk.bf16.vlgmr.msra.gmra.mxu2 %vm650_vm0, %v7001_v28  ;;  %v5090_v1 = vadd.f32 %v5045_v12, %v13502_v20  ;;  %v6037_v20 = vpop.permute.xlu0 %6036  ;;  %v15401_v43 = vld [vmem:[#allocation87_spill] sm:$0xff] }
 0x4c7   : > { %10020 = vmatmul.msk.bf16.gmra.mxu3 %vm650_vm0, %v13865_v57 }
 0x4c8   : > { %6403 = vst.msk [vmem:[#allocation5 + $0xf8] sm:$0xff] %vm650_vm0, %v6352_v49  ;;  %v6214_v45 = vmul.f32 %v13671_v30, %v6165_v0  ;;  %v13890_v23 = vpop.permute.xlu2 %4988  ;;  %v7274_v0 = vld [vmem:[#allocation5 + $0x3f] sm:$0xff] }
 0x4c9   : > { %v5334_v29 = vpop.f32.mrf.mxu2 }
 0x4ca   : > { %v5877_v40 = vpop.f32.mrf.mxu3  ;;  %v6263_v27 = vadd.f32 %v13679_v11, %v6214_v45  ;;  %v5583_v24 = vmul.f32 %v13504_v10, %v5334_v29  ;;  %v6466_v29 = vpack.c.bf16 %v6423_v61, %v6422_v26  ;;  %v6514_v61 = vld [vmem:[#allocation5 + $0xc6] sm:$0xff] }
 0x4cb   : > { %v4798_v14 = vpop.f32.mrf.mxu1 }
 0x4cc   : > { %v13882_v31 = vpop.f32.mrf.mxu0  ;;  %v5046_v54 = vmul.f32 %v13606_v56, %v4798_v14  ;;  %v6308_v28 = vmax.f32 %v6263_v27, 0.0  ;;  %v5628_v8 = vadd.f32 %v5583_v24, %v5090_v1  ;;  %v7273_v27 = vld [vmem:[#allocation5 + $0x37] sm:$0xff]  ;;  %v13898_v1 = vpop.permute.xlu1 %4499  ;;  %v6122_v24 = vmul.f32 %v6037_v20, %v5874_v62 }
 0x4cd   : > { %v4554_v62 = vmul.f32 %v13646_v36, %v13535_v18  ;;  %v6123_v18 = vmul.f32 %v13701_v4, %v5877_v40 }
 0x4ce   : > { %v5091_v46 = vadd.f32 %v5046_v54, %v4553_v53  ;;  %v6353_v10 = vmul.f32 %v6308_v28, %v15401_v43  ;;  %v6166_v32 = vadd.f32 %v6121_v50, %v5628_v8  ;;  %v13900_v53 = vpack.c.bf16 %v7274_v0, %v7273_v27  ;;  %v15402_v54 = vld [vmem:[#allocation41_spill] sm:$0xff]  ;;  %v6049_v28 = vpop.permute.xlu0 %6048 }
 0x4cf   : > { %9949 = vmatmul.msk.bf16.gmra.mxu0 %vm650_vm0, %v6546_v41 }
 0x4d0   : > { %6404 = vst.msk [vmem:[#allocation5 + $0x100] sm:$0xff] %vm650_vm0, %v6353_v10  ;;  %v6215_v37 = vmul.f32 %v13671_v30, %v6166_v32  ;;  %v13917_v0 = vpop.permute.xlu2 %5526 }
 0x4d1   : > { %v5336_v56 = vpop.f32.mrf.mxu2 }
 0x4d2   : > { %v5879_v49 = vpop.f32.mrf.mxu3  ;;  %v6264_v52 = vadd.f32 %v13679_v11, %v6215_v37  ;;  %v5584_v47 = vmul.f32 %v13626_v21, %v5336_v56 }
 0x4d3   : > { %v4801_v45 = vpop.f32.mrf.mxu1 }
 0x4d4   : > { %v13896_v12 = vpop.f32.mrf.mxu0  ;;  %v6309_v14 = vmax.f32 %v6264_v52, 0.0  ;;  %v5629_v51 = vadd.f32 %v5584_v47, %v5091_v46  ;;  %v5047_v21 = vmul.f32 %v13684_v63, %v4801_v45  ;;  %v6515_v46 = vld [vmem:[#allocation5 + $0xce] sm:$0xff]  ;;  %v13921_v47 = vpop.permute.xlu1 %4992  ;;  %v15403_v45 = vld [vmem:[#allocation39_spill] sm:$0xff] }
 0x4d5   : > { %9966 = vmatmul.msk.bf16.gmra.mxu1 %vm650_vm0, %v6466_v29  ;;  %v6547_v56 = vpack.c.bf16 %v6515_v46, %v6514_v61  ;;  %v7275_v46 = vld [vmem:[#allocation5 + $0x47] sm:$0xff] }
 0x4d6   : > { %v6354_v41 = vmul.f32 %v6309_v14, %v15402_v54  ;;  %v6167_v50 = vadd.f32 %v6122_v24, %v5629_v51  ;;  %9993 = vmatmul.msk.bf16.gmra.mxu2 %vm650_vm0, %v13830_v3  ;;  %v5092_v63 = vadd.f32 %v5047_v21, %v4554_v62  ;;  %v6425_v24 = vld [vmem:[#allocation5 + $0x2d] sm:$0xff]  ;;  %v6424_v62 = vld [vmem:[#allocation5 + $0x25] sm:$0xff] }
 0x4d7   : > { %10021 = vmatmul.msk.bf16.gmra.mxu3 %vm650_vm0, %v13900_v53  ;;  %v7276_v54 = vld [vmem:[#allocation5 + $0x4f] sm:$0xff] }
 0x4d8   : > { %6405 = vst.msk [vmem:[#allocation5 + $0x108] sm:$0xff] %vm650_vm0, %v6354_v41  ;;  %v6216_v8 = vmul.f32 %v13671_v30, %v6167_v50 }
 0x4d9   : > { %v5339_v20 = vpop.f32.mrf.mxu2 }
 0x4da   : > { %v5882_v43 = vpop.f32.mrf.mxu3  ;;  %v6265_v10 = vadd.f32 %v13679_v11, %v6216_v8  ;;  %v5585_v32 = vmul.f32 %v13861_v60, %v5339_v20  ;;  %v13932_v8 = vpop.permute.xlu0 %4984  ;;  %v6124_v20 = vmul.f32 %v13732_v22, %v5879_v49  ;;  %v4556_v22 = vmul.f32 %v13724_v48, %v13563_v16 }
 0x4db   : > { %v4803_v37 = vpop.f32.mrf.mxu1  ;;  %v6125_v16 = vmul.f32 %v6049_v28, %v5882_v43 }
 0x4dc   : > { %v13915_v3 = vpop.f32.mrf.mxu0  ;;  %v6310_v36 = vmax.f32 %v6265_v10, 0.0  ;;  %v5630_v52 = vadd.f32 %v5585_v32, %v5092_v63  ;;  %v5048_v60 = vmul.f32 %v13665_v55, %v4803_v37  ;;  %v6467_v55 = vpack.c.bf16 %v6425_v24, %v6424_v62  ;;  %v13938_v37 = vpop.permute.xlu2 %6068  ;;  %v15406_v62 = vld [vmem:[#allocation25_spill] sm:$0xff] }
 0x4dd   : > { %v13935_v32 = vpack.c.bf16 %v7276_v54, %v7275_v46  ;;  %v13948_v49 = vpop.permute.xlu1 %6064 }
 0x4de   : > { %v6355_v26 = vmul.f32 %v6310_v36, %v15403_v45  ;;  %v6168_v29 = vadd.f32 %v6123_v18, %v5630_v52  ;;  %v5093_v40 = vadd.f32 %v5048_v60, %v13549_v19  ;;  %v15404_v19 = vld [vmem:[#allocation90_spill] sm:$0xff] }
 0x4df   : > { %9950 = vmatmul.msk.bf16.gmra.mxu0 %vm650_vm0, %v6547_v56  ;;  %v6517_v36 = vld [vmem:[#allocation5 + $0xde] sm:$0xff] }
 0x4e0   : > { %6406 = vst.msk [vmem:[#allocation5 + $0x110] sm:$0xff] %vm650_vm0, %v6355_v26  ;;  %v6217_v27 = vmul.f32 %v13671_v30, %v6168_v29 }
 0x4e1   : > { %v5341_v14 = vpop.f32.mrf.mxu2 }
 0x4e2   : > { %v5884_v51 = vpop.f32.mrf.mxu3  ;;  %v6266_v4 = vadd.f32 %v13679_v11, %v6217_v27  ;;  %v5586_v41 = vmul.f32 %v13706_v44, %v5341_v14  ;;  %v6516_v27 = vld [vmem:[#allocation5 + $0xd6] sm:$0xff]  ;;  %v4484_v54 = vpop.permute.xlu0 %4483 }
 0x4e3   : > { %v4806_v21 = vpop.f32.mrf.mxu1  ;;  %v6548_v24 = vpack.c.bf16 %v6517_v36, %v6516_v27 }
 0x4e4   : > { %v13930_v50 = vpop.f32.mrf.mxu0  ;;  %v6311_v10 = vmax.f32 %v6266_v4, 0.0  ;;  %v5631_v63 = vadd.f32 %v5586_v41, %v5093_v40  ;;  %v5049_v56 = vmul.f32 %v13754_v39, %v4806_v21  ;;  %v15405_v4 = vld [vmem:[#allocation42_spill] sm:$0xff]  ;;  %v13960_v46 = vpop.permute.xlu2 %4507 }
 0x4e5   : > { %9967 = vmatmul.msk.bf16.gmra.mxu1 %vm650_vm0, %v6467_v55  ;;  %v4557_v55 = vmul.f32 %v4484_v54, %v15406_v62  ;;  %v13968_v36 = vpop.permute.xlu1 %4503 }
 0x4e6   : > { %v6356_v44 = vmul.f32 %v6311_v10, %v15404_v19  ;;  %v6169_v61 = vadd.f32 %v6124_v20, %v5631_v63  ;;  %9994 = vmatmul.msk.bf16.gmra.mxu2 %vm650_vm0, %v13865_v57  ;;  %v5094_v26 = vadd.f32 %v5049_v56, %v4556_v22  ;;  %v6427_v20 = vld [vmem:[#allocation5 + $0x3d] sm:$0xff]  ;;  %v6426_v56 = vld [vmem:[#allocation5 + $0x35] sm:$0xff] }
 0x4e7   : > { %10022 = vmatmul.msk.bf16.gmra.mxu3 %vm650_vm0, %v13935_v32  ;;  %v7278_v10 = vld [vmem:[#allocation5 + $0x5f] sm:$0xff]  ;;  %v6468_v22 = vpack.c.bf16 %v6427_v20, %v6426_v56 }
 0x4e8   : > { %6407 = vst.msk [vmem:[#allocation5 + $0x118] sm:$0xff] %vm650_vm0, %v6356_v44  ;;  %v6218_v18 = vmul.f32 %v13671_v30, %v6169_v61 }
 0x4e9   : > { %v5344_v52 = vpop.f32.mrf.mxu2 }
 0x4ea   : > { %v5887_v45 = vpop.f32.mrf.mxu3  ;;  %v6267_v39 = vadd.f32 %v13679_v11, %v6218_v18  ;;  %v5587_v57 = vmul.f32 %v13777_v7, %v5344_v52  ;;  %v7277_v18 = vld [vmem:[#allocation5 + $0x57] sm:$0xff]  ;;  %v6126_v52 = vmul.f32 %v13801_v42, %v5884_v51 }
 0x4eb   : > { %v4808_v60 = vpop.f32.mrf.mxu1 }
 0x4ec   : > { %v13954_v29 = vpop.f32.mrf.mxu0  ;;  %v6312_v48 = vmax.f32 %v6267_v39, 0.0  ;;  %v5632_v14 = vadd.f32 %v5587_v57, %v5094_v26  ;;  %v5050_v21 = vmul.f32 %v13746_v15, %v4808_v60  ;;  %v13971_v57 = vpack.c.bf16 %v7278_v10, %v7277_v18  ;;  %v15407_v60 = vld [vmem:[#allocation7_spill] sm:$0xff]  ;;  %v15409_v10 = vld [vmem:[#allocation93_spill] sm:$0xff] }
 0x4ed   : > { %v7280_v18 = vld [vmem:[#allocation5 + $0x6f] sm:$0xff] }
 0x4ee   : > { %v6357_v40 = vmul.f32 %v6312_v48, %v15405_v4  ;;  %v6170_v41 = vadd.f32 %v6125_v16, %v5632_v14  ;;  %v5095_v19 = vadd.f32 %v5050_v21, %v4557_v55  ;;  %v15408_v16 = vld [vmem:[#allocation47_spill] sm:$0xff]  ;;  %v6519_v48 = vld [vmem:[#allocation5 + $0xee] sm:$0xff]  ;;  %v13988_v55 = vpop.permute.xlu2 %5534 }
 0x4ef   : > { %9951 = vmatmul.msk.bf16.gmra.mxu0 %vm650_vm0, %v6548_v24  ;;  %v4558_v42 = vmul.f32 %v13793_v17, %v15408_v16  ;;  %v6518_v21 = vld [vmem:[#allocation5 + $0xe6] sm:$0xff]  ;;  %v6127_v17 = vmul.f32 %v13875_v33, %v5887_v45 }
 0x4f0   : > { %6408 = vst.msk [vmem:[#allocation5 + $0x120] sm:$0xff] %vm650_vm0, %v6357_v40  ;;  %v6219_v7 = vmul.f32 %v13671_v30, %v6170_v41  ;;  %v6549_v62 = vpack.c.bf16 %v6519_v48, %v6518_v21 }
 0x4f1   : > { %v5346_v28 = vpop.f32.mrf.mxu2 }
 0x4f2   : > { %v5889_v43 = vpop.f32.mrf.mxu3  ;;  %v6268_v63 = vadd.f32 %v13679_v11, %v6219_v7  ;;  %v5588_v44 = vmul.f32 %v13773_v6, %v5346_v28  ;;  %v13992_v28 = vpop.permute.xlu1 %5000 }
 0x4f3   : > { %v4811_v15 = vpop.f32.mrf.mxu1  ;;  %v6128_v16 = vmul.f32 %v13868_v2, %v5889_v43  ;;  %v15412_v2 = vld [vmem:[#allocation48_spill] sm:$0xff] }
 0x4f4   : > { %v13966_v61 = vpop.f32.mrf.mxu0  ;;  %v6313_v39 = vmax.f32 %v6268_v63, 0.0  ;;  %v5633_v26 = vadd.f32 %v5588_v44, %v5095_v19  ;;  %v5051_v6 = vmul.f32 %v13816_v25, %v4811_v15  ;;  %v15410_v44 = vld [vmem:[#allocation19_spill] sm:$0xff] }
 0x4f5   : > { %9968 = vmatmul.msk.bf16.gmra.mxu1 %vm650_vm0, %v6468_v22  ;;  %v4559_v15 = vmul.f32 %v13826_v38, %v15410_v44  ;;  %v6429_v22 = vld [vmem:[#allocation5 + $0x4d] sm:$0xff] }
 0x4f6   : > { %v6358_v27 = vmul.f32 %v6313_v39, %v15407_v60  ;;  %v6171_v24 = vadd.f32 %v6126_v52, %v5633_v26  ;;  %9995 = vmatmul.msk.bf16.gmra.mxu2 %vm650_vm0, %v13900_v53  ;;  %v5096_v40 = vadd.f32 %v5051_v6, %v4558_v42  ;;  %v7279_v38 = vld [vmem:[#allocation5 + $0x67] sm:$0xff] }
 0x4f7   : > { %10023 = vmatmul.msk.bf16.gmra.mxu3 %vm650_vm0, %v13971_v57  ;;  %v14005_v48 = vpack.c.bf16 %v7280_v18, %v7279_v38 }
 0x4f8   : > { %6409 = vst.msk [vmem:[#allocation5 + $0x128] sm:$0xff] %vm650_vm0, %v6358_v27  ;;  %v6220_v51 = vmul.f32 %v13671_v30, %v6171_v24  ;;  %v4496_v24 = vpop.permute.xlu0 %4495 }
 0x4f9   : > { %v5349_v14 = vpop.f32.mrf.mxu2  ;;  %v4560_v43 = vmul.f32 %v4496_v24, %v15412_v2  ;;  %v6431_v24 = vld [vmem:[#allocation5 + $0x5d] sm:$0xff] }
 0x4fa   : > { %v5892_v54 = vpop.f32.mrf.mxu3  ;;  %v6269_v4 = vadd.f32 %v13679_v11, %v6220_v51  ;;  %v5589_v25 = vmul.f32 %v13850_v13, %v5349_v14  ;;  %v14008_v14 = vpop.permute.xlu2 %6072 }
 0x4fb   : > { %v4813_v53 = vpop.f32.mrf.mxu1 }
 0x4fc   : > { %v13986_v41 = vpop.f32.mrf.mxu0  ;;  %v6314_v7 = vmax.f32 %v6269_v4, 0.0  ;;  %v5634_v20 = vadd.f32 %v5589_v25, %v5096_v40  ;;  %v5052_v13 = vmul.f32 %v13932_v8, %v4813_v53  ;;  %v6428_v8 = vld [vmem:[#allocation5 + $0x45] sm:$0xff]  ;;  %v14017_v53 = vpop.permute.xlu1 %5538 }
 0x4fd   : > { %v6469_v6 = vpack.c.bf16 %v6429_v22, %v6428_v8  ;;  %v15411_v4 = vld [vmem:[#allocation43_spill] sm:$0xff] }
 0x4fe   : > { %v6359_v63 = vmul.f32 %v6314_v7, %v15409_v10  ;;  %v6172_v19 = vadd.f32 %v6127_v17, %v5634_v20  ;;  %v5097_v39 = vadd.f32 %v5052_v13, %v4559_v15  ;;  %v6129_v15 = vmul.f32 %v13948_v49, %v5892_v54 }
 0x4ff   : > { %9952 = vmatmul.msk.bf16.gmra.mxu0 %vm650_vm0, %v6549_v62  ;;  %v6521_v62 = vld [vmem:[#allocation5 + $0xfe] sm:$0xff] }
 0x500   : > { %6410 = vst.msk [vmem:[#allocation5 + $0x130] sm:$0xff] %vm650_vm0, %v6359_v63  ;;  %v6221_v56 = vmul.f32 %v13671_v30, %v6172_v19  ;;  %v6520_v19 = vld [vmem:[#allocation5 + $0xf6] sm:$0xff]  ;;  %v5531_v13 = vpop.permute.xlu0 %5530 }
 0x501   : > { %v5351_v33 = vpop.f32.mrf.mxu2  ;;  %v6550_v44 = vpack.c.bf16 %v6521_v62, %v6520_v19 }
 0x502   : > { %v5894_v45 = vpop.f32.mrf.mxu3  ;;  %v6270_v52 = vadd.f32 %v13679_v11, %v6221_v56  ;;  %v5590_v26 = vmul.f32 %v13846_v9, %v5351_v33  ;;  %v15413_v33 = vld [vmem:[#allocation9_spill] sm:$0xff] }
 0x503   : > { %v4816_v27 = vpop.f32.mrf.mxu1 }
 0x504   : > { %v14002_v60 = vpop.f32.mrf.mxu0  ;;  %v6315_v42 = vmax.f32 %v6270_v52, 0.0  ;;  %v5635_v51 = vadd.f32 %v5590_v26, %v5097_v39  ;;  %v5053_v25 = vmul.f32 %v13890_v23, %v4816_v27  ;;  %v15414_v26 = vld [vmem:[#allocation49_spill] sm:$0xff]  ;;  %v14031_v27 = vpop.permute.xlu2 %5004 }
 0x505   : > { %9969 = vmatmul.msk.bf16.gmra.mxu1 %vm650_vm0, %v6469_v6  ;;  %v7282_v6 = vld [vmem:[#allocation5 + $0x7f] sm:$0xff] }
 0x506   : > { %v6360_v40 = vmul.f32 %v6315_v42, %v15411_v4  ;;  %v6173_v9 = vadd.f32 %v6128_v16, %v5635_v51  ;;  %9996 = vmatmul.msk.bf16.gmra.mxu2 %vm650_vm0, %v13935_v32  ;;  %v5098_v23 = vadd.f32 %v5053_v25, %v4560_v43  ;;  %v6430_v4 = vld [vmem:[#allocation5 + $0x55] sm:$0xff]  ;;  %v6130_v25 = vmul.f32 %v13938_v37, %v5894_v45 }
 0x507   : > { %10024 = vmatmul.msk.bf16.gmra.mxu3 %vm650_vm0, %v14005_v48  ;;  %v14055_v45 = vld [vmem:[%s14966_s8] ss:$0 sm:$0xff] }
 0x508   : > { %6411 = vst.msk [vmem:[#allocation5 + $0x138] sm:$0xff] %vm650_vm0, %v6360_v40  ;;  %v6222_v21 = vmul.f32 %v13671_v30, %v6173_v9  ;;  %v14038_v40 = vpop.permute.xlu1 %4511  ;;  %v7281_v9 = vld [vmem:[#allocation5 + $0x77] sm:$0xff] }
 0x509   : > { %v5354_v17 = vpop.f32.mrf.mxu2  ;;  %v14041_v43 = vpack.c.bf16 %v7282_v6, %v7281_v9 }
 0x50a   : > { %v5897_v7 = vpop.f32.mrf.mxu3  ;;  %v6271_v20 = vadd.f32 %v13679_v11, %v6222_v21  ;;  %v5591_v10 = vmul.f32 %v13917_v0, %v5354_v17  ;;  %v4561_v0 = vmul.f32 %v13898_v1, %v15414_v26  ;;  %v6470_v1 = vpack.c.bf16 %v6431_v24, %v6430_v4  ;;  %v4997_v21 = vpop.permute.xlu0 %4996  ;;  %v15417_v24 = vld [vmem:[#allocation44_spill] sm:$0xff] }
 0x50b   : > { %v4818_v63 = vpop.f32.mrf.mxu1  ;;  %v6131_v26 = vmul.f32 %v14008_v14, %v5897_v7  ;;  %v6433_v4 = vld [vmem:[#allocation5 + $0x6d] sm:$0xff] }
 0x50c   : > { %v14023_v32 = vpop.f32.mrf.mxu0  ;;  %v6316_v56 = vmax.f32 %v6271_v20, 0.0  ;;  %v5636_v22 = vadd.f32 %v5591_v10, %v5098_v23  ;;  %v5054_v39 = vmul.f32 %v13921_v47, %v4818_v63  ;;  %v15416_v23 = vld [vmem:[#allocation30_spill] sm:$0xff]  ;;  %v6523_v63 = vld [vmem:[#allocation5 + $0x10e] sm:$0xff] }
 0x50d   : > { %v4562_v37 = vmul.f32 %v13968_v36, %v15416_v23  ;;  %v7284_v7 = vld [vmem:[#allocation5 + $0x8f] sm:$0xff] }
 0x50e   : > { %v6361_v18 = vmul.f32 %v6316_v56, %v15413_v33  ;;  %v6174_v52 = vadd.f32 %v6129_v15, %v5636_v22  ;;  %v5099_v16 = vadd.f32 %v5054_v39, %v4561_v0  ;;  %v6522_v33 = vld [vmem:[#allocation5 + $0x106] sm:$0xff]  ;;  %v6081_v39 = vpop.permute.xlu2 %6080 }
 0x50f   : > { %9953 = vmatmul.msk.bf16.gmra.mxu0 %vm650_vm0, %v6550_v44 }
 0x510   : > { %6412 = vst.msk [vmem:[#allocation5 + $0x140] sm:$0xff] %vm650_vm0, %v6361_v18  ;;  %v6223_v8 = vmul.f32 %v13671_v30, %v6174_v52  ;;  %v5543_v18 = vpop.permute.xlu1 %5542  ;;  %v6551_v52 = vpack.c.bf16 %v6523_v63, %v6522_v33  ;;  %v15419_v63 = vld [vmem:[#allocation11_spill] sm:$0xff] }
 0x511   : > { %v5356_v49 = vpop.f32.mrf.mxu2 }
 0x512   : > { %v5899_v54 = vpop.f32.mrf.mxu3  ;;  %v6272_v38 = vadd.f32 %v13679_v11, %v6223_v8  ;;  %v5592_v42 = vmul.f32 %v5531_v13, %v5356_v49  ;;  %v15415_v11 = vld [vmem:[#allocation96_spill] sm:$0xff] }
 0x513   : > { %v4821_v47 = vpop.f32.mrf.mxu1 }
 0x514   : > { %v14036_v51 = vpop.f32.mrf.mxu0  ;;  %v6317_v2 = vmax.f32 %v6272_v38, 0.0  ;;  %v5637_v30 = vadd.f32 %v5592_v42, %v5099_v16  ;;  %v5055_v20 = vmul.f32 %v4997_v21, %v4821_v47  ;;  %v15418_v16 = vld [vmem:[#allocation32_spill] sm:$0xff]  ;;  %v6077_v42 = vpop.permute.xlu0 %6076 }
 0x515   : > { %9970 = vmatmul.msk.bf16.gmra.mxu1 %vm650_vm0, %v6470_v1  ;;  %v6432_v21 = vld [vmem:[#allocation5 + $0x65] sm:$0xff] }
 0x516   : > { %v6362_v62 = vmul.f32 %v6317_v2, %v15415_v11  ;;  %v6175_v17 = vadd.f32 %v6130_v25, %v5637_v30  ;;  %9997 = vmatmul.msk.bf16.gmra.mxu2 %vm650_vm0, %v13971_v57  ;;  %v14061_v57 = vld [vmem:[%s14967_s9] ss:$0 sm:$0xff]  ;;  %v5100_v36 = vadd.f32 %v5055_v20, %v4562_v37  ;;  %v6471_v11 = vpack.c.bf16 %v6433_v4, %v6432_v21 }
 0x517   : > { %10025 = vmatmul.msk.bf16.gmra.mxu3 %vm650_vm0, %v14041_v43 }
 0x518   : > { %6413 = vst.msk [vmem:[#allocation5 + $0x148] sm:$0xff] %vm650_vm0, %v6362_v62  ;;  %v6224_v10 = vmul.f32 %v14055_v45, %v6175_v17  ;;  %v6132_v62 = vmul.f32 %v6077_v42, %v5899_v54  ;;  %v5009_v37 = vpop.permute.xlu1 %5008  ;;  %v15420_v54 = vld [vmem:[#allocation28_spill] sm:$0xff] }
 0x519   : > { %v5359_v19 = vpop.f32.mrf.mxu2 }
 0x51a   : > { %v5902_v13 = vpop.f32.mrf.mxu3  ;;  %v6273_v44 = vadd.f32 %v14061_v57, %v6224_v10  ;;  %v5593_v15 = vmul.f32 %v13988_v55, %v5359_v19  ;;  %v4563_v55 = vmul.f32 %v13960_v46, %v15418_v16  ;;  %v7283_v46 = vld [vmem:[#allocation5 + $0x87] sm:$0xff]  ;;  %v5547_v10 = vpop.permute.xlu2 %5546 }
 0x51b   : > { %v4823_v22 = vpop.f32.mrf.mxu1  ;;  %v14079_v23 = vpack.c.bf16 %v7284_v7, %v7283_v46  ;;  %v15422_v7 = vld [vmem:[#allocation51_spill] sm:$0xff] }
 0x51c   : > { %v14065_v56 = vpop.f32.mrf.mxu0  ;;  %v6318_v0 = vmax.f32 %v6273_v44, 0.0  ;;  %v5638_v8 = vadd.f32 %v5593_v15, %v5100_v36  ;;  %v5056_v38 = vmul.f32 %v13992_v28, %v4823_v22  ;;  %v4564_v36 = vmul.f32 %v14038_v40, %v15420_v54  ;;  %v6525_v22 = vld [vmem:[#allocation5 + $0x11e] sm:$0xff] }
 0x51e   : > { %v6363_v49 = vmul.f32 %v6318_v0, %v15417_v24  ;;  %v6176_v6 = vadd.f32 %v6131_v26, %v5638_v8  ;;  %v5101_v25 = vadd.f32 %v5056_v38, %v4563_v55  ;;  %v6524_v24 = vld [vmem:[#allocation5 + $0x116] sm:$0xff]  ;;  %v6133_v38 = vmul.f32 %v6081_v39, %v5902_v13  ;;  %v15421_v55 = vld [vmem:[#allocation99_spill] sm:$0xff] }
 0x51f   : > { %9954 = vmatmul.msk.bf16.gmra.mxu0 %vm650_vm0, %v6551_v52  ;;  %v7286_v13 = vld [vmem:[#allocation5 + $0x9f] sm:$0xff] }
 0x520   : > { %6414 = vst.msk [vmem:[#allocation5 + $0x150] sm:$0xff] %vm650_vm0, %v6363_v49  ;;  %v6225_v47 = vmul.f32 %v14055_v45, %v6176_v6  ;;  %v4516_v49 = vpop.permute.xlu0 %4515  ;;  %v6552_v6 = vpack.c.bf16 %v6525_v22, %v6524_v24  ;;  %v6527_v24 = vld [vmem:[#allocation5 + $0x12e] sm:$0xff] }
 0x521   : > { %v5361_v1 = vpop.f32.mrf.mxu2 }
 0x522   : > { %v5904_v14 = vpop.f32.mrf.mxu3  ;;  %v6274_v9 = vadd.f32 %v14061_v57, %v6225_v47  ;;  %v5594_v2 = vmul.f32 %v14017_v53, %v5361_v1  ;;  %v6085_v1 = vpop.permute.xlu1 %6084 }
 0x523   : > { %v4826_v28 = vpop.f32.mrf.mxu1 }
 0x524   : > { %v14077_v30 = vpop.f32.mrf.mxu0  ;;  %v6319_v17 = vmax.f32 %v6274_v9, 0.0  ;;  %v5639_v20 = vadd.f32 %v5594_v2, %v5101_v25  ;;  %v5057_v53 = vmul.f32 %v14031_v27, %v4826_v28  ;;  %v4565_v9 = vmul.f32 %v4516_v49, %v15422_v7  ;;  %v4520_v25 = vpop.permute.xlu2 %4519  ;;  %v6435_v2 = vld [vmem:[#allocation5 + $0x7d] sm:$0xff] }
 0x525   : > { %9971 = vmatmul.msk.bf16.gmra.mxu1 %vm650_vm0, %v6471_v11 }
 0x526   : > { %v6364_v19 = vmul.f32 %v6319_v17, %v15419_v63  ;;  %v6177_v44 = vadd.f32 %v6132_v62, %v5639_v20  ;;  %9998 = vmatmul.msk.bf16.gmra.mxu2 %vm650_vm0, %v14005_v48  ;;  %v5102_v0 = vadd.f32 %v5057_v53, %v4564_v36  ;;  %v6434_v20 = vld [vmem:[#allocation5 + $0x75] sm:$0xff] }
 0x527   : > { %10026 = vmatmul.msk.bf16.gmra.mxu3 %vm650_vm0, %v14079_v23  ;;  %v6472_v63 = vpack.c.bf16 %v6435_v2, %v6434_v20 }
 0x528   : > { %6415 = vst.msk [vmem:[#allocation5 + $0x158] sm:$0xff] %vm650_vm0, %v6364_v19  ;;  %v6226_v15 = vmul.f32 %v14055_v45, %v6177_v44  ;;  %v7285_v19 = vld [vmem:[#allocation5 + $0x97] sm:$0xff]  ;;  %v6134_v44 = vmul.f32 %v6085_v1, %v5904_v14 }
 0x529   : > { %v5364_v33 = vpop.f32.mrf.mxu2  ;;  %v14103_v36 = vpack.c.bf16 %v7286_v13, %v7285_v19 }
 0x52a   : > { %v5907_v52 = vpop.f32.mrf.mxu3  ;;  %v6275_v26 = vadd.f32 %v14061_v57, %v6226_v15  ;;  %v5595_v27 = vmul.f32 %v5543_v18, %v5364_v33  ;;  %v15423_v15 = vld [vmem:[#allocation45_spill] sm:$0xff] }
 0x52b   : > { %v4828_v48 = vpop.f32.mrf.mxu1 }
 0x52c   : > { %v14093_v8 = vpop.f32.mrf.mxu0  ;;  %v6320_v16 = vmax.f32 %v6275_v26, 0.0  ;;  %v5640_v40 = vadd.f32 %v5595_v27, %v5102_v0  ;;  %v5058_v4 = vmul.f32 %v5009_v37, %v4828_v48  ;;  %v5013_v37 = vpop.permute.xlu0 %5012  ;;  %v15424_v0 = vld [vmem:[#allocation53_spill] sm:$0xff] }
 0x52d   : > { %v4566_v27 = vmul.f32 %v4520_v25, %v15424_v0  ;;  %v6089_v14 = vpop.permute.xlu2 %6088 }
 0x52e   : > { %v6365_v42 = vmul.f32 %v6320_v16, %v15421_v55  ;;  %v6178_v47 = vadd.f32 %v6133_v38, %v5640_v40  ;;  %v5103_v11 = vadd.f32 %v5058_v4, %v4565_v9  ;;  %v6135_v4 = vmul.f32 %v6089_v14, %v5907_v52  ;;  %v15425_v9 = vld [vmem:[#allocation15_spill] sm:$0xff] }
 0x52f   : > { %9955 = vmatmul.msk.bf16.gmra.mxu0 %vm650_vm0, %v6552_v6 }
 0x530   : > { %6416 = vst.msk [vmem:[#allocation5 + $0x160] sm:$0xff] %vm650_vm0, %v6365_v42  ;;  %v6227_v18 = vmul.f32 %v14055_v45, %v6178_v47  ;;  %v6526_v42 = vld [vmem:[#allocation5 + $0x126] sm:$0xff] }
 0x531   : > { %v5366_v28 = vpop.f32.mrf.mxu2  ;;  %v6553_v47 = vpack.c.bf16 %v6527_v24, %v6526_v42 }
 0x532   : > { %v5909_v21 = vpop.f32.mrf.mxu3  ;;  %v6276_v39 = vadd.f32 %v14061_v57, %v6227_v18  ;;  %v5596_v46 = vmul.f32 %v5547_v10, %v5366_v28  ;;  %v5551_v10 = vpop.permute.xlu1 %5550  ;;  %v6437_v28 = vld [vmem:[#allocation5 + $0x8d] sm:$0xff] }
 0x533   : > { %v4831_v17 = vpop.f32.mrf.mxu1 }
 0x534   : > { %v14101_v62 = vpop.f32.mrf.mxu0  ;;  %v6321_v53 = vmax.f32 %v6276_v39, 0.0  ;;  %v5641_v54 = vadd.f32 %v5596_v46, %v5103_v11  ;;  %v5059_v26 = vmul.f32 %v5013_v37, %v4831_v17  ;;  %v7288_v39 = vld [vmem:[#allocation5 + $0xaf] sm:$0xff]  ;;  %v6436_v17 = vld [vmem:[#allocation5 + $0x85] sm:$0xff] }
 0x535   : > { %9972 = vmatmul.msk.bf16.gmra.mxu1 %vm650_vm0, %v6472_v63  ;;  %v6473_v20 = vpack.c.bf16 %v6437_v28, %v6436_v17  ;;  %v7287_v37 = vld [vmem:[#allocation5 + $0xa7] sm:$0xff] }
 0x536   : > { %v6366_v22 = vmul.f32 %v6321_v53, %v15423_v15  ;;  %v6179_v33 = vadd.f32 %v6134_v44, %v5641_v54  ;;  %9999 = vmatmul.msk.bf16.gmra.mxu2 %vm650_vm0, %v14041_v43  ;;  %v5104_v16 = vadd.f32 %v5059_v26, %v4566_v27  ;;  %v7323_v19 = vpack.c.bf16 %v7288_v39, %v7287_v37  ;;  %v15426_v44 = vld [vmem:[#allocation102_spill] sm:$0xff] }
 0x537   : > { %10027 = vmatmul.msk.bf16.gmra.mxu3 %vm650_vm0, %v14103_v36 }
 0x538   : > { %6417 = vst.msk [vmem:[#allocation5 + $0x168] sm:$0xff] %vm650_vm0, %v6366_v22  ;;  %v6228_v48 = vmul.f32 %v14055_v45, %v6179_v33 }
 0x539   : > { %v5369_v49 = vpop.f32.mrf.mxu2 }
 0x53a   : > { %v7423_v6 = vpop.f32.mrf.mxu3  ;;  %v6277_v38 = vadd.f32 %v14061_v57, %v6228_v48  ;;  %v5597_v40 = vmul.f32 %v5551_v10, %v5369_v49  ;;  %v6528_v10 = vld [vmem:[#allocation5 + $0x136] sm:$0xff] }
 0x53b   : > { %v4833_v43 = vpop.f32.mrf.mxu1  ;;  %v6439_v48 = vld [vmem:[#allocation5 + $0x9d] sm:$0xff] }
 0x53c   : > { %v14115_v55 = vpop.f32.mrf.mxu0  ;;  %v6322_v1 = vmax.f32 %v6277_v38, 0.0  ;;  %v5642_v7 = vadd.f32 %v5597_v40, %v5104_v16  ;;  %v7290_v38 = vld [vmem:[#allocation5 + $0xbf] sm:$0xff]  ;;  %v6438_v43 = vld [vmem:[#allocation5 + $0x95] sm:$0xff] }
 0x53d   : > { %v6474_v42 = vpack.c.bf16 %v6439_v48, %v6438_v43 }
 0x53e   : > { %v6367_v25 = vmul.f32 %v6322_v1, %v15425_v9  ;;  %v6180_v18 = vadd.f32 %v6135_v4, %v5642_v7  ;;  %v6531_v7 = vld [vmem:[#allocation5 + $0x14e] sm:$0xff] }
 0x53f   : > { %9956 = vmatmul.msk.bf16.gmra.mxu0 %vm650_vm0, %v6553_v47  ;;  %v7289_v47 = vld [vmem:[#allocation5 + $0xb7] sm:$0xff] }
 0x540   : > { %6418 = vst.msk [vmem:[#allocation5 + $0x170] sm:$0xff] %vm650_vm0, %v6367_v25  ;;  %v6229_v2 = vmul.f32 %v14055_v45, %v6180_v18  ;;  %v14139_v4 = vpack.c.bf16 %v7290_v38, %v7289_v47  ;;  %v7294_v47 = vld [vmem:[#allocation5 + $0xdf] sm:$0xff] }
 0x541   : > { %v5371_v21 = vpop.f32.mrf.mxu2 }
 0x542   : > { %v7425_v13 = vpop.f32.mrf.mxu3  ;;  %v6278_v11 = vadd.f32 %v14061_v57, %v6229_v2  ;;  %v6529_v57 = vld [vmem:[#allocation5 + $0x13e] sm:$0xff]  ;;  %v6530_v21 = vld [vmem:[#allocation5 + $0x146] sm:$0xff] }
 0x543   : > { %v6842_v52 = vpop.f32.mrf.mxu1  ;;  %v6554_v0 = vpack.c.bf16 %v6529_v57, %v6528_v10  ;;  %v7291_v57 = vld [vmem:[#allocation5 + $0xc7] sm:$0xff]  ;;  %v6533_v10 = vld [vmem:[#allocation5 + $0x15e] sm:$0xff] }
 0x544   : > { %v14122_v46 = vpop.f32.mrf.mxu0  ;;  %v6323_v63 = vmax.f32 %v6278_v11, 0.0  ;;  %v6843_v45 = vadd.f32 %v6842_v52, %v13771_v34  ;;  %v6441_v11 = vld [vmem:[#allocation5 + $0xad] sm:$0xff] }
 0x545   : > { %9973 = vmatmul.msk.bf16.gmra.mxu1 %vm650_vm0, %v6473_v20  ;;  %v7292_v20 = vld [vmem:[#allocation5 + $0xcf] sm:$0xff] }
 0x546   : > { %v6368_v53 = vmul.f32 %v6323_v63, %v15426_v44  ;;  %10000 = vmatmul.msk.bf16.gmra.mxu2 %vm650_vm0, %v14079_v23  ;;  %v15427_v23 = vld [vmem:[#allocation56_spill] sm:$0xff] }
 0x547   : > { %10028 = vmatmul.msk.bf16.gmra.mxu3 %vm650_vm0, %v7323_v19  ;;  %v6440_v44 = vld [vmem:[#allocation5 + $0xa5] sm:$0xff] }
 0x548   : > { %6419 = vst.msk [vmem:[#allocation5 + $0x178] sm:$0xff] %vm650_vm0, %v6368_v53  ;;  %v10197_v53 = vld [vmem:[%s14968_s10 + $0x30] sm:$0xff] }
 0x549   : > { %v7110_v54 = vpop.f32.mrf.mxu2  ;;  %8360 = vmatpush.bf16.msrb.mxu2 %v10197_v53 }
 0x54a   : > { %v7428_v15 = vpop.f32.mrf.mxu3  ;;  %v7224_v33 = vadd.f32 %v7110_v54, %v6843_v45  ;;  %v6475_v45 = vpack.c.bf16 %v6441_v11, %v6440_v44  ;;  %v10198_v54 = vld [vmem:[%s14968_s10 + $0x38] sm:$0xff] }
 0x54b   : > { %v6844_v26 = vpop.f32.mrf.mxu1  ;;  %8673 = vmatpush.bf16.msrb.mxu3 %v10198_v54  ;;  %v7296_v54 = vld [vmem:[#allocation5 + $0xef] sm:$0xff] }
 0x54c   : > { %v14131_v22 = vpop.f32.mrf.mxu0  ;;  %v14133_v27 = vadd.f32 %v7423_v6, %v7224_v33  ;;  %v6845_v14 = vadd.f32 %v6844_v26, %v15427_v23  ;;  %v10196_v33 = vld [vmem:[%s14968_s10 + $0x28] sm:$0xff] }
 0x54d   : > { %8047 = vmatpush.bf16.msrb.mxu1 %v10196_v33 }
 0x54f   : > { %9957 = vmatmul.msk.bf16.gmra.mxu0 %vm650_vm0, %v6554_v0 }
 0x551   : > { %v7112_v24 = vpop.f32.mrf.mxu2 }
 0x552   : > { %v7430_v49 = vpop.f32.mrf.mxu3  ;;  %v7225_v16 = vadd.f32 %v7112_v24, %v6845_v14 }
 0x553   : > { %v6847_v40 = vpop.f32.mrf.mxu1 }
 0x554   : > { %v14137_v34 = vpop.f32.mrf.mxu0  ;;  %v14141_v1 = vadd.f32 %v7425_v13, %v7225_v16  ;;  %v6848_v6 = vadd.f32 %v6847_v40, %v13807_v35  ;;  %v6555_v13 = vpack.c.bf16 %v6531_v7, %v6530_v21  ;;  %v6443_v40 = vld [vmem:[#allocation5 + $0xbd] sm:$0xff] }
 0x555   : > { %9974 = vmatmul.msk.bf16.gmra.mxu1 %vm650_vm0, %v6474_v42 }
 0x556   : > { %10001 = vmatmul.msk.bf16.gmra.mxu2 %vm650_vm0, %v14103_v36 }
 0x557   : > { %10029 = vmatmul.msk.bf16.gmra.mxu3 %vm650_vm0, %v14139_v4 }
 0x559   : > { %v7115_v9 = vpop.f32.mrf.mxu2 }
 0x55a   : > { %v7433_v25 = vpop.f32.mrf.mxu3  ;;  %v7226_v2 = vadd.f32 %v7115_v9, %v6848_v6 }
 0x55b   : > { %v6849_v28 = vpop.f32.mrf.mxu1 }
 0x55c   : > { %v14149_v18 = vpop.f32.mrf.mxu0  ;;  %v14151_v39 = vadd.f32 %v7428_v15, %v7226_v2  ;;  %v6850_v36 = vadd.f32 %v6849_v28, %v13824_v58  ;;  %v7325_v58 = vpack.c.bf16 %v7292_v20, %v7291_v57  ;;  %v6442_v2 = vld [vmem:[#allocation5 + $0xb5] sm:$0xff] }
 0x55d   : > { %v7293_v28 = vld [vmem:[#allocation5 + $0xd7] sm:$0xff] }
 0x55e   : > { %v7326_v21 = vpack.c.bf16 %v7294_v47, %v7293_v28  ;;  %v7582_v47 = vld [vmem:[#allocation5 + $0x18] sm:$0xff] }
 0x55f   : > { %9958 = vmatmul.msk.bf16.gmra.mxu0 %vm650_vm0, %v6555_v13  ;;  %v7298_v28 = vld [vmem:[#allocation5 + $0xff] sm:$0xff] }
 0x561   : > { %v7117_v52 = vpop.f32.mrf.mxu2 }
 0x562   : > { %v7435_v17 = vpop.f32.mrf.mxu3  ;;  %v7227_v37 = vadd.f32 %v7117_v52, %v6850_v36  ;;  %v6534_v36 = vld [vmem:[#allocation5 + $0x166] sm:$0xff] }
 0x563   : > { %v6852_v63 = vpop.f32.mrf.mxu1  ;;  %v6557_v44 = vpack.c.bf16 %v6534_v36, %v6534_v36 }
 0x564   : > { %v14155_v35 = vpop.f32.mrf.mxu0  ;;  %v14163_v15 = vadd.f32 %v7430_v49, %v7227_v37  ;;  %v6853_v26 = vadd.f32 %v6852_v63, %v13844_v5  ;;  %v6532_v49 = vld [vmem:[#allocation5 + $0x156] sm:$0xff] }
 0x565   : > { %9975 = vmatmul.msk.bf16.gmra.mxu1 %vm650_vm0, %v6475_v45  ;;  %v6556_v38 = vpack.c.bf16 %v6533_v10, %v6532_v49  ;;  %v6445_v45 = vld [vmem:[#allocation5 + $0xcd] sm:$0xff]  ;;  %v6444_v10 = vld [vmem:[#allocation5 + $0xc5] sm:$0xff] }
 0x566   : > { %10002 = vmatmul.msk.bf16.gmra.mxu2 %vm650_vm0, %v7323_v19  ;;  %v10199_v19 = vld [vmem:[%s14968_s10 + $0x40] sm:$0xff] }
 0x567   : > { %10030 = vmatmul.msk.bf16.gmra.mxu3 %vm650_vm0, %v7325_v58  ;;  %8986 = vmatpush.bf16.msrb.mxu0 %v10199_v19 }
 0x569   : > { %v7120_v0 = vpop.f32.mrf.mxu2 }
 0x56a   : > { %v7438_v23 = vpop.f32.mrf.mxu3  ;;  %v7228_v48 = vadd.f32 %v7120_v0, %v6853_v26  ;;  %v6477_v0 = vpack.c.bf16 %v6445_v45, %v6444_v10  ;;  %v7584_v10 = vld [vmem:[#allocation5 + $0x28] sm:$0xff] }
 0x56b   : > { %v6854_v24 = vpop.f32.mrf.mxu1 }
 0x56c   : > { %v14172_v14 = vpop.f32.mrf.mxu0  ;;  %v14174_v16 = vadd.f32 %v7433_v25, %v7228_v48  ;;  %v6855_v5 = vadd.f32 %v6854_v24, %v13859_v59  ;;  %v6476_v25 = vpack.c.bf16 %v6443_v40, %v6442_v2  ;;  %v7295_v48 = vld [vmem:[#allocation5 + $0xe7] sm:$0xff] }
 0x56d   : > { %v7327_v24 = vpack.c.bf16 %v7296_v54, %v7295_v48 }
 0x56f   : > { %9959 = vmatmul.msk.bf16.gmra.mxu0 %vm650_vm0, %v6556_v38 }
 0x571   : > { %v7122_v43 = vpop.f32.mrf.mxu2 }
 0x572   : > { %v7440_v42 = vpop.f32.mrf.mxu3  ;;  %v7229_v7 = vadd.f32 %v7122_v43, %v6855_v5 }
 0x573   : > { %v6857_v9 = vpop.f32.mrf.mxu1 }
 0x574   : > { %v14181_v6 = vpop.f32.mrf.mxu0  ;;  %v14183_v13 = vadd.f32 %v7435_v17, %v7229_v7  ;;  %v6858_v59 = vadd.f32 %v6857_v9, %v13882_v31 }
 0x575   : > { %9976 = vmatmul.msk.bf16.gmra.mxu1 %vm650_vm0, %v6476_v25 }
 0x576   : > { %10003 = vmatmul.msk.bf16.gmra.mxu2 %vm650_vm0, %v14139_v4 }
 0x577   : > { %10031 = vmatmul.msk.bf16.gmra.mxu3 %vm650_vm0, %v7326_v21 }
 0x579   : > { %v7125_v11 = vpop.f32.mrf.mxu2 }
 0x57a   : > { %v7443_v52 = vpop.f32.mrf.mxu3  ;;  %v7230_v37 = vadd.f32 %v7125_v11, %v6858_v59  ;;  %v6446_v11 = vld [vmem:[#allocation5 + $0xd5] sm:$0xff] }
 0x57b   : > { %v6859_v63 = vpop.f32.mrf.mxu1 }
 0x57c   : > { %v14190_v20 = vpop.f32.mrf.mxu0  ;;  %v14192_v53 = vadd.f32 %v7438_v23, %v7230_v37  ;;  %v6860_v17 = vadd.f32 %v6859_v63, %v13896_v12  ;;  %v7583_v23 = vld [vmem:[#allocation5 + $0x20] sm:$0xff]  ;;  %v7297_v63 = vld [vmem:[#allocation5 + $0xf7] sm:$0xff] }
 0x57d   : > { %v7627_v7 = vpack.c.bf16 %v7583_v23, %v7582_v47  ;;  %v6448_v47 = vld [vmem:[#allocation5 + $0xe5] sm:$0xff] }
 0x57f   : > { %9960 = vmatmul.msk.bf16.gmra.mxu0 %vm650_vm0, %v6557_v44  ;;  %v7328_v44 = vpack.c.bf16 %v7298_v28, %v7297_v63  ;;  %v7586_v63 = vld [vmem:[#allocation5 + $0x38] sm:$0xff] }
 0x581   : > { %v7127_v4 = vpop.f32.mrf.mxu2 }
 0x582   : > { %v7445_v57 = vpop.f32.mrf.mxu3  ;;  %v7231_v31 = vadd.f32 %v7127_v4, %v6860_v17 }
 0x583   : > { %v6862_v26 = vpop.f32.mrf.mxu1 }
 0x584   : > { %v14196_v33 = vpop.f32.mrf.mxu0  ;;  %v14198_v49 = vadd.f32 %v7440_v42, %v7231_v31  ;;  %v6863_v12 = vadd.f32 %v6862_v26, %v13915_v3 }
 0x585   : > { %9977 = vmatmul.msk.bf16.gmra.mxu1 %vm650_vm0, %v6477_v0 }
 0x586   : > { %10004 = vmatmul.msk.bf16.gmra.mxu2 %vm650_vm0, %v7325_v58  ;;  %v6447_v58 = vld [vmem:[#allocation5 + $0xdd] sm:$0xff] }
 0x587   : > { %10032 = vmatmul.msk.bf16.gmra.mxu3 %vm650_vm0, %v7327_v24  ;;  %v6478_v37 = vpack.c.bf16 %v6447_v58, %v6446_v11 }
 0x589   : > { %v7130_v38 = vpop.f32.mrf.mxu2 }
 0x58a   : > { %v7448_v19 = vpop.f32.mrf.mxu3  ;;  %v7232_v40 = vadd.f32 %v7130_v38, %v6863_v12  ;;  %v7300_v38 = vld [vmem:[#allocation5 + $0x10f] sm:$0xff] }
 0x58b   : > { %v6864_v43 = vpop.f32.mrf.mxu1 }
 0x58c   : > { %v14204_v5 = vpop.f32.mrf.mxu0  ;;  %v14206_v9 = vadd.f32 %v7443_v52, %v7232_v40  ;;  %v6865_v42 = vadd.f32 %v6864_v43, %v13930_v50  ;;  %v7585_v52 = vld [vmem:[#allocation5 + $0x30] sm:$0xff] }
 0x58d   : > { %v7628_v0 = vpack.c.bf16 %v7585_v52, %v7584_v10 }
 0x58f   : > { %10046 = vmatmul.msk.bf16.vlgmr.msra.gmra.mxu0 %vm650_vm0, %v7627_v7 }
 0x591   : > { %v7132_v2 = vpop.f32.mrf.mxu2 }
 0x592   : > { %v7450_v25 = vpop.f32.mrf.mxu3  ;;  %v7233_v59 = vadd.f32 %v7132_v2, %v6865_v42  ;;  %v7299_v42 = vld [vmem:[#allocation5 + $0x107] sm:$0xff] }
 0x593   : > { %v6867_v36 = vpop.f32.mrf.mxu1  ;;  %v7329_v58 = vpack.c.bf16 %v7300_v38, %v7299_v42 }
 0x594   : > { %v14210_v3 = vpop.f32.mrf.mxu0  ;;  %v14212_v17 = vadd.f32 %v7445_v57, %v7233_v59  ;;  %v6868_v50 = vadd.f32 %v6867_v36, %v13954_v29 }
 0x595   : > { %9978 = vmatmul.msk.bf16.gmra.mxu1 %vm650_vm0, %v6478_v37 }
 0x596   : > { %10005 = vmatmul.msk.bf16.gmra.mxu2 %vm650_vm0, %v7326_v21  ;;  %v6449_v21 = vld [vmem:[#allocation5 + $0xed] sm:$0xff] }
 0x597   : > { %10033 = vmatmul.msk.bf16.gmra.mxu3 %vm650_vm0, %v7328_v44  ;;  %v6479_v7 = vpack.c.bf16 %v6449_v21, %v6448_v47 }
 0x599   : > { %v7135_v45 = vpop.f32.mrf.mxu2 }
 0x59a   : > { %v7453_v4 = vpop.f32.mrf.mxu3  ;;  %v7234_v31 = vadd.f32 %v7135_v45, %v6868_v50 }
 0x59b   : > { %v6869_v26 = vpop.f32.mrf.mxu1 }
 0x59c   : > { %v14218_v54 = vpop.f32.mrf.mxu0  ;;  %v14220_v48 = vadd.f32 %v7448_v19, %v7234_v31  ;;  %v6870_v57 = vadd.f32 %v6869_v26, %v13966_v61  ;;  %v7587_v19 = vld [vmem:[#allocation5 + $0x40] sm:$0xff] }
 0x59d   : > { %v7629_v50 = vpack.c.bf16 %v7587_v19, %v7586_v63  ;;  %v7302_v26 = vld [vmem:[#allocation5 + $0x11f] sm:$0xff]  ;;  %v7588_v19 = vld [vmem:[#allocation5 + $0x48] sm:$0xff] }
 0x59f   : > { %10047 = vmatmul.msk.bf16.gmra.mxu0 %vm650_vm0, %v7628_v0 }
 0x5a1   : > { %v7137_v12 = vpop.f32.mrf.mxu2 }
 0x5a2   : > { %v7455_v23 = vpop.f32.mrf.mxu3  ;;  %v7235_v40 = vadd.f32 %v7137_v12, %v6870_v57  ;;  %v6450_v57 = vld [vmem:[#allocation5 + $0xf5] sm:$0xff] }
 0x5a3   : > { %v6872_v43 = vpop.f32.mrf.mxu1  ;;  %v7301_v12 = vld [vmem:[#allocation5 + $0x117] sm:$0xff] }
 0x5a4   : > { %v14224_v29 = vpop.f32.mrf.mxu0  ;;  %v14226_v2 = vadd.f32 %v7450_v25, %v7235_v40  ;;  %v6873_v61 = vadd.f32 %v6872_v43, %v13986_v41  ;;  %v7330_v38 = vpack.c.bf16 %v7302_v26, %v7301_v12 }
 0x5a5   : > { %9979 = vmatmul.msk.bf16.gmra.mxu1 %vm650_vm0, %v6479_v7 }
 0x5a6   : > { %10006 = vmatmul.msk.bf16.gmra.mxu2 %vm650_vm0, %v7327_v24  ;;  %v6451_v24 = vld [vmem:[#allocation5 + $0xfd] sm:$0xff] }
 0x5a7   : > { %10034 = vmatmul.msk.bf16.gmra.mxu3 %vm650_vm0, %v7329_v58  ;;  %v6480_v21 = vpack.c.bf16 %v6451_v24, %v6450_v57 }
 0x5a9   : > { %v7140_v28 = vpop.f32.mrf.mxu2 }
 0x5aa   : > { %v7458_v59 = vpop.f32.mrf.mxu3  ;;  %v7236_v11 = vadd.f32 %v7140_v28, %v6873_v61 }
 0x5ab   : > { %v6874_v37 = vpop.f32.mrf.mxu1 }
 0x5ac   : > { %v14232_v36 = vpop.f32.mrf.mxu0  ;;  %v14234_v52 = vadd.f32 %v7453_v4, %v7236_v11  ;;  %v6875_v25 = vadd.f32 %v6874_v37, %v14002_v60  ;;  %v7589_v4 = vld [vmem:[#allocation5 + $0x50] sm:$0xff] }
 0x5ad   : > { %v7630_v28 = vpack.c.bf16 %v7589_v4, %v7588_v19 }
 0x5af   : > { %10048 = vmatmul.msk.bf16.gmra.mxu0 %vm650_vm0, %v7629_v50  ;;  %v7304_v50 = vld [vmem:[#allocation5 + $0x12f] sm:$0xff] }
 0x5b1   : > { %v7142_v45 = vpop.f32.mrf.mxu2 }
 0x5b2   : > { %v7460_v31 = vpop.f32.mrf.mxu3  ;;  %v7237_v10 = vadd.f32 %v7142_v45, %v6875_v25  ;;  %v6452_v45 = vld [vmem:[#allocation5 + $0x105] sm:$0xff] }
 0x5b3   : > { %v6877_v0 = vpop.f32.mrf.mxu1 }
 0x5b4   : > { %v14238_v41 = vpop.f32.mrf.mxu0  ;;  %v14240_v40 = vadd.f32 %v7455_v23, %v7237_v10  ;;  %v6878_v60 = vadd.f32 %v6877_v0, %v14023_v32  ;;  %v7303_v10 = vld [vmem:[#allocation5 + $0x127] sm:$0xff] }
 0x5b5   : > { %9980 = vmatmul.msk.bf16.gmra.mxu1 %vm650_vm0, %v6480_v21  ;;  %v7331_v0 = vpack.c.bf16 %v7304_v50, %v7303_v10 }
 0x5b6   : > { %10007 = vmatmul.msk.bf16.gmra.mxu2 %vm650_vm0, %v7328_v44  ;;  %v6453_v44 = vld [vmem:[#allocation5 + $0x10d] sm:$0xff] }
 0x5b7   : > { %10035 = vmatmul.msk.bf16.gmra.mxu3 %vm650_vm0, %v7330_v38  ;;  %v6481_v26 = vpack.c.bf16 %v6453_v44, %v6452_v45  ;;  %v7306_v44 = vld [vmem:[#allocation5 + $0x13f] sm:$0xff]  ;;  %v7305_v45 = vld [vmem:[#allocation5 + $0x137] sm:$0xff] }
 0x5b9   : > { %v7145_v43 = vpop.f32.mrf.mxu2 }
 0x5ba   : > { %v7463_v47 = vpop.f32.mrf.mxu3  ;;  %v7238_v42 = vadd.f32 %v7145_v43, %v6878_v60 }
 0x5bb   : > { %v6879_v61 = vpop.f32.mrf.mxu1 }
 0x5bc   : > { %v14246_v7 = vpop.f32.mrf.mxu0  ;;  %v14248_v11 = vadd.f32 %v7458_v59, %v7238_v42  ;;  %v6880_v23 = vadd.f32 %v6879_v61, %v14036_v51  ;;  %v7591_v59 = vld [vmem:[#allocation5 + $0x60] sm:$0xff]  ;;  %v7590_v42 = vld [vmem:[#allocation5 + $0x58] sm:$0xff] }
 0x5bd   : > { %v7631_v61 = vpack.c.bf16 %v7591_v59, %v7590_v42  ;;  %v7592_v42 = vld [vmem:[#allocation5 + $0x68] sm:$0xff] }
 0x5bf   : > { %10049 = vmatmul.msk.bf16.gmra.mxu0 %vm650_vm0, %v7630_v28 }
 0x5c1   : > { %v7147_v37 = vpop.f32.mrf.mxu2 }
 0x5c2   : > { %v7465_v63 = vpop.f32.mrf.mxu3  ;;  %v7239_v25 = vadd.f32 %v7147_v37, %v6880_v23 }
 0x5c3   : > { %v6882_v24 = vpop.f32.mrf.mxu1 }
 0x5c4   : > { %v14252_v32 = vpop.f32.mrf.mxu0  ;;  %v14254_v57 = vadd.f32 %v7460_v31, %v7239_v25  ;;  %v6883_v51 = vadd.f32 %v6882_v24, %v14065_v56  ;;  %v6454_v25 = vld [vmem:[#allocation5 + $0x115] sm:$0xff] }
 0x5c5   : > { %9981 = vmatmul.msk.bf16.gmra.mxu1 %vm650_vm0, %v6481_v26  ;;  %v7332_v26 = vpack.c.bf16 %v7306_v44, %v7305_v45  ;;  %v7308_v44 = vld [vmem:[#allocation5 + $0x14f] sm:$0xff]  ;;  %v7307_v45 = vld [vmem:[#allocation5 + $0x147] sm:$0xff] }
 0x5c6   : > { %10008 = vmatmul.msk.bf16.gmra.mxu2 %vm650_vm0, %v7329_v58  ;;  %v6455_v58 = vld [vmem:[#allocation5 + $0x11d] sm:$0xff] }
 0x5c7   : > { %10036 = vmatmul.msk.bf16.gmra.mxu3 %vm650_vm0, %v7331_v0  ;;  %v6482_v24 = vpack.c.bf16 %v6455_v58, %v6454_v25  ;;  %v6456_v25 = vld [vmem:[#allocation5 + $0x125] sm:$0xff] }
 0x5c9   : > { %v7150_v21 = vpop.f32.mrf.mxu2 }
 0x5ca   : > { %v7468_v12 = vpop.f32.mrf.mxu3  ;;  %v7240_v4 = vadd.f32 %v7150_v21, %v6883_v51 }
 0x5cb   : > { %v6884_v43 = vpop.f32.mrf.mxu1 }
 0x5cc   : > { %v14260_v60 = vpop.f32.mrf.mxu0  ;;  %v14262_v19 = vadd.f32 %v7463_v47, %v7240_v4  ;;  %v6885_v31 = vadd.f32 %v6884_v43, %v14077_v30  ;;  %v7593_v47 = vld [vmem:[#allocation5 + $0x70] sm:$0xff] }
 0x5cf   : > { %10050 = vmatmul.msk.bf16.gmra.mxu0 %vm650_vm0, %v7631_v61  ;;  %v7632_v61 = vpack.c.bf16 %v7593_v47, %v7592_v42 }
 0x5d1   : > { %v7152_v28 = vpop.f32.mrf.mxu2 }
 0x5d2   : > { %v7470_v23 = vpop.f32.mrf.mxu3  ;;  %v7241_v37 = vadd.f32 %v7152_v28, %v6885_v31 }
 0x5d3   : > { %v6887_v50 = vpop.f32.mrf.mxu1 }
 0x5d4   : > { %v14266_v56 = vpop.f32.mrf.mxu0  ;;  %v14268_v10 = vadd.f32 %v7465_v63, %v7241_v37  ;;  %v6888_v30 = vadd.f32 %v6887_v50, %v14093_v8 }
 0x5d5   : > { %9982 = vmatmul.msk.bf16.gmra.mxu1 %vm650_vm0, %v6482_v24 }
 0x5d6   : > { %10009 = vmatmul.msk.bf16.gmra.mxu2 %vm650_vm0, %v7330_v38  ;;  %v6457_v38 = vld [vmem:[#allocation5 + $0x12d] sm:$0xff] }
 0x5d7   : > { %10037 = vmatmul.msk.bf16.gmra.mxu3 %vm650_vm0, %v7332_v26  ;;  %v6483_v24 = vpack.c.bf16 %v6457_v38, %v6456_v25  ;;  %v7310_v25 = vld [vmem:[#allocation5 + $0x15f] sm:$0xff] }
 0x5d9   : > { %v7155_v51 = vpop.f32.mrf.mxu2 }
 0x5da   : > { %v7473_v59 = vpop.f32.mrf.mxu3  ;;  %v7242_v4 = vadd.f32 %v7155_v51, %v6888_v30  ;;  %v7333_v30 = vpack.c.bf16 %v7308_v44, %v7307_v45  ;;  %v6458_v45 = vld [vmem:[#allocation5 + $0x135] sm:$0xff] }
 0x5db   : > { %v6889_v43 = vpop.f32.mrf.mxu1 }
 0x5dc   : > { %v14274_v21 = vpop.f32.mrf.mxu0  ;;  %v14276_v31 = vadd.f32 %v7468_v12, %v7242_v4  ;;  %v6890_v63 = vadd.f32 %v6889_v43, %v14101_v62  ;;  %v7595_v12 = vld [vmem:[#allocation5 + $0x80] sm:$0xff] }
 0x5de   : > { %15428 = vst [vmem:[#allocation55_spill] sm:$0xff] %v14276_v31 }
 0x5df   : > { %10051 = vmatmul.msk.bf16.gmra.mxu0 %vm650_vm0, %v7632_v61 }
 0x5e1   : > { %v7157_v58 = vpop.f32.mrf.mxu2 }
 0x5e2   : > { %v7475_v28 = vpop.f32.mrf.mxu3  ;;  %v7243_v37 = vadd.f32 %v7157_v58, %v6890_v63  ;;  %v7594_v63 = vld [vmem:[#allocation5 + $0x78] sm:$0xff] }
 0x5e3   : > { %v6892_v50 = vpop.f32.mrf.mxu1  ;;  %v7633_v38 = vpack.c.bf16 %v7595_v12, %v7594_v63 }
 0x5e4   : > { %v14280_v8 = vpop.f32.mrf.mxu0  ;;  %v14282_v51 = vadd.f32 %v7470_v23, %v7243_v37  ;;  %v6893_v62 = vadd.f32 %v6892_v50, %v14115_v55 }
 0x5e5   : > { %9983 = vmatmul.msk.bf16.gmra.mxu1 %vm650_vm0, %v6483_v24 }
 0x5e6   : > { %15429 = vst [vmem:[#allocation50_spill] sm:$0xff] %v14282_v51  ;;  %10010 = vmatmul.msk.bf16.gmra.mxu2 %vm650_vm0, %v7331_v0  ;;  %v6459_v0 = vld [vmem:[#allocation5 + $0x13d] sm:$0xff] }
 0x5e7   : > { %10038 = vmatmul.msk.bf16.gmra.mxu3 %vm650_vm0, %v7333_v30  ;;  %v6484_v51 = vpack.c.bf16 %v6459_v0, %v6458_v45 }
 0x5e9   : > { %v7160_v47 = vpop.f32.mrf.mxu2 }
 0x5ea   : > { %v7478_v4 = vpop.f32.mrf.mxu3  ;;  %v7244_v42 = vadd.f32 %v7160_v47, %v6893_v62  ;;  %v7309_v62 = vld [vmem:[#allocation5 + $0x157] sm:$0xff] }
 0x5eb   : > { %v6894_v61 = vpop.f32.mrf.mxu1  ;;  %v7334_v47 = vpack.c.bf16 %v7310_v25, %v7309_v62  ;;  %v6460_v62 = vld [vmem:[#allocation5 + $0x145] sm:$0xff] }
 0x5ec   : > { %v14288_v43 = vpop.f32.mrf.mxu0  ;;  %v14290_v58 = vadd.f32 %v7473_v59, %v7244_v42  ;;  %v6895_v23 = vadd.f32 %v6894_v61, %v14122_v46  ;;  %v7597_v59 = vld [vmem:[#allocation5 + $0x90] sm:$0xff] }
 0x5ee   : > { %15430 = vst [vmem:[#allocation58_spill] sm:$0xff] %v14290_v58  ;;  %v7311_v58 = vld [vmem:[#allocation5 + $0x167] sm:$0xff] }
 0x5ef   : > { %10052 = vmatmul.msk.bf16.gmra.mxu0 %vm650_vm0, %v7633_v38 }
 0x5f1   : > { %v7162_v44 = vpop.f32.mrf.mxu2 }
 0x5f2   : > { %v7480_v37 = vpop.f32.mrf.mxu3  ;;  %v7245_v50 = vadd.f32 %v7162_v44, %v6895_v23  ;;  %v7596_v23 = vld [vmem:[#allocation5 + $0x88] sm:$0xff] }
 0x5f3   : > { %v6897_v24 = vpop.f32.mrf.mxu1  ;;  %v7634_v0 = vpack.c.bf16 %v7597_v59, %v7596_v23 }
 0x5f4   : > { %v14294_v55 = vpop.f32.mrf.mxu0  ;;  %v14296_v31 = vadd.f32 %v7475_v28, %v7245_v50  ;;  %v6898_v46 = vadd.f32 %v6897_v24, %v14131_v22  ;;  %v7312_v50 = vld [vmem:[#allocation5 + $0x16f] sm:$0xff] }
 0x5f5   : > { %9984 = vmatmul.msk.bf16.gmra.mxu1 %vm650_vm0, %v6484_v51 }
 0x5f6   : > { %15431 = vst [vmem:[#allocation34_spill] sm:$0xff] %v14296_v31  ;;  %10011 = vmatmul.msk.bf16.gmra.mxu2 %vm650_vm0, %v7332_v26  ;;  %v6461_v26 = vld [vmem:[#allocation5 + $0x14d] sm:$0xff] }
 0x5f7   : > { %10039 = vmatmul.msk.bf16.gmra.mxu3 %vm650_vm0, %v7334_v47  ;;  %v6485_v31 = vpack.c.bf16 %v6461_v26, %v6460_v62 }
 0x5f9   : > { %v7165_v12 = vpop.f32.mrf.mxu2 }
 0x5fa   : > { %v7483_v42 = vpop.f32.mrf.mxu3  ;;  %v7246_v63 = vadd.f32 %v7165_v12, %v6898_v46  ;;  %v7335_v46 = vpack.c.bf16 %v7312_v50, %v7311_v58 }
 0x5fb   : > { %v6899_v38 = vpop.f32.mrf.mxu1 }
 0x5fc   : > { %v14302_v61 = vpop.f32.mrf.mxu0  ;;  %v14304_v44 = vadd.f32 %v7478_v4, %v7246_v63  ;;  %v6900_v28 = vadd.f32 %v6899_v38, %v14137_v34  ;;  %v7599_v4 = vld [vmem:[#allocation5 + $0xa0] sm:$0xff] }
 0x5ff   : > { %10053 = vmatmul.msk.bf16.gmra.mxu0 %vm650_vm0, %v7634_v0 }
 0x601   : > { %v7167_v51 = vpop.f32.mrf.mxu2 }
 0x602   : > { %v7485_v25 = vpop.f32.mrf.mxu3  ;;  %v7247_v24 = vadd.f32 %v7167_v51, %v6900_v28  ;;  %v7598_v28 = vld [vmem:[#allocation5 + $0x98] sm:$0xff] }
 0x603   : > { %v6902_v45 = vpop.f32.mrf.mxu1 }
 0x604   : > { %v6756_v22 = vpop.f32.mrf.mxu0  ;;  %v14308_v12 = vadd.f32 %v7480_v37, %v7247_v24  ;;  %v6903_v34 = vadd.f32 %v6902_v45, %v14149_v18  ;;  %v7635_v37 = vpack.c.bf16 %v7599_v4, %v7598_v28 }
 0x605   : > { %9985 = vmatmul.msk.bf16.gmra.mxu1 %vm650_vm0, %v6485_v31  ;;  %v7313_v22 = vld [vmem:[#allocation5 + $0x177] sm:$0xff] }
 0x606   : > { %10012 = vmatmul.msk.bf16.gmra.mxu2 %vm650_vm0, %v7333_v30  ;;  %v6463_v30 = vld [vmem:[#allocation5 + $0x15d] sm:$0xff] }
 0x607   : > { %10040 = vmatmul.msk.bf16.gmra.mxu3 %vm650_vm0, %v7335_v46  ;;  %v6462_v46 = vld [vmem:[#allocation5 + $0x155] sm:$0xff] }
 0x609   : > { %v7170_v59 = vpop.f32.mrf.mxu2 }
 0x60a   : > { %v7488_v63 = vpop.f32.mrf.mxu3  ;;  %v7248_v38 = vadd.f32 %v7170_v59, %v6903_v34  ;;  %v7336_v59 = vpack.c.bf16 %v7313_v22, %v7313_v22 }
 0x60b   : > { %v6904_v0 = vpop.f32.mrf.mxu1 }
 0x60c   : > { %v7736_v23 = vpop.f32.mrf.mxu0  ;;  %v14317_v51 = vadd.f32 %v7483_v42, %v7248_v38  ;;  %v6905_v31 = vadd.f32 %v6904_v0, %v14155_v35  ;;  %v7601_v42 = vld [vmem:[#allocation5 + $0xb0] sm:$0xff] }
 0x60d   : > { %v14315_v26 = vadd.f32 %v7736_v23, %v14133_v27  ;;  %v6486_v27 = vpack.c.bf16 %v6463_v30, %v6462_v46 }
 0x60f   : > { %10054 = vmatmul.msk.bf16.gmra.mxu0 %vm650_vm0, %v7635_v37 }
 0x611   : > { %v7172_v50 = vpop.f32.mrf.mxu2 }
 0x612   : > { %v7490_v18 = vpop.f32.mrf.mxu3  ;;  %v7249_v24 = vadd.f32 %v7172_v50, %v6905_v31  ;;  %v6464_v50 = vld [vmem:[#allocation5 + $0x165] sm:$0xff] }
 0x613   : > { %v6907_v62 = vpop.f32.mrf.mxu1 }
 0x614   : > { %v7738_v45 = vpop.f32.mrf.mxu0  ;;  %v14324_v4 = vadd.f32 %v7485_v25, %v7249_v24  ;;  %v6908_v35 = vadd.f32 %v6907_v62, %v14172_v14  ;;  %v8522_v24 = vld [vmem:[#allocation5 + $0x32] sm:$0xff] }
 0x615   : > { %v14322_v34 = vadd.f32 %v7738_v45, %v14141_v1  ;;  %9986 = vmatmul.msk.bf16.gmra.mxu1 %vm650_vm0, %v6486_v27  ;;  %v7600_v1 = vld [vmem:[#allocation5 + $0xa8] sm:$0xff] }
 0x616   : > { %10013 = vmatmul.msk.bf16.gmra.mxu2 %vm650_vm0, %v7334_v47  ;;  %v7636_v25 = vpack.c.bf16 %v7601_v42, %v7600_v1 }
 0x617   : > { %10041 = vmatmul.msk.bf16.gmra.mxu3 %vm650_vm0, %v7336_v59  ;;  %v6487_v59 = vpack.c.bf16 %v6464_v50, %v6464_v50 }
 0x619   : > { %v7175_v38 = vpop.f32.mrf.mxu2 }
 0x61a   : > { %v7493_v23 = vpop.f32.mrf.mxu3  ;;  %v7250_v0 = vadd.f32 %v7175_v38, %v6908_v35  ;;  %v7023_v35 = vpack.c.bf16 %v7311_v58, %v7311_v58  ;;  %v7603_v38 = vld [vmem:[#allocation5 + $0xc0] sm:$0xff] }
 0x61b   : > { %v6909_v37 = vpop.f32.mrf.mxu1 }
 0x61c   : > { %v7741_v28 = vpop.f32.mrf.mxu0  ;;  %v14333_v30 = vadd.f32 %v7488_v63, %v7250_v0  ;;  %v6910_v47 = vadd.f32 %v6909_v37, %v14181_v6 }
 0x61d   : > { %v14331_v31 = vadd.f32 %v7741_v28, %v14151_v39  ;;  %v8521_v39 = vld [vmem:[#allocation5 + $0x2a] sm:$0xff] }
 0x61e   : > { %v8566_v42 = vpack.c.bf16 %v8522_v24, %v8521_v39 }
 0x61f   : > { %10055 = vmatmul.msk.bf16.gmra.mxu0 %vm650_vm0, %v7636_v25  ;;  %v7602_v25 = vld [vmem:[#allocation5 + $0xb8] sm:$0xff] }
 0x621   : > { %v7177_v22 = vpop.f32.mrf.mxu2 }
 0x622   : > { %v7495_v14 = vpop.f32.mrf.mxu3  ;;  %v7251_v45 = vadd.f32 %v7177_v22, %v6910_v47  ;;  %v7896_v22 = vld [vmem:[#allocation5 + $0x21] sm:$0xff] }
 0x623   : > { %v6912_v46 = vpop.f32.mrf.mxu1 }
 0x624   : > { %v7743_v62 = vpop.f32.mrf.mxu0  ;;  %v14340_v63 = vadd.f32 %v7490_v18, %v7251_v45  ;;  %v6913_v6 = vadd.f32 %v6912_v46, %v14190_v20  ;;  %v7637_v18 = vpack.c.bf16 %v7603_v38, %v7602_v25  ;;  %v8209_v45 = vld [vmem:[#allocation5 + $0x31] sm:$0xff] }
 0x625   : > { %v14338_v27 = vadd.f32 %v7743_v62, %v14163_v15  ;;  %9987 = vmatmul.msk.bf16.gmra.mxu1 %vm650_vm0, %v6487_v59  ;;  %v8524_v62 = vld [vmem:[#allocation5 + $0x42] sm:$0xff] }
 0x626   : > { %10014 = vmatmul.msk.bf16.gmra.mxu2 %vm650_vm0, %v7023_v35  ;;  %v7895_v35 = vld [vmem:[#allocation5 + $0x19] sm:$0xff] }
 0x627   : > { %10127 = vmatmul.msk.bf16.vlgmr.msrb.gmra.mxu3 %vm650_vm0, %v8566_v42 }
 0x629   : > { %v7180_v0 = vpop.f32.mrf.mxu2 }
 0x62a   : > { %v7498_v28 = vpop.f32.mrf.mxu3  ;;  %v7252_v37 = vadd.f32 %v7180_v0, %v6913_v6  ;;  %v8208_v6 = vld [vmem:[#allocation5 + $0x29] sm:$0xff] }
 0x62b   : > { %v6914_v1 = vpop.f32.mrf.mxu1  ;;  %v8253_v38 = vpack.c.bf16 %v8209_v45, %v8208_v6 }
 0x62c   : > { %v7746_v15 = vpop.f32.mrf.mxu0  ;;  %v14349_v47 = vadd.f32 %v7493_v23, %v7252_v37  ;;  %v6915_v50 = vadd.f32 %v6914_v1, %v14196_v33  ;;  %v8523_v23 = vld [vmem:[#allocation5 + $0x3a] sm:$0xff] }
 0x62d   : > { %v14347_v58 = vadd.f32 %v7746_v15, %v14174_v16  ;;  %v7940_v16 = vpack.c.bf16 %v7896_v22, %v7895_v35  ;;  %v8567_v0 = vpack.c.bf16 %v8524_v62, %v8523_v23  ;;  %v7605_v15 = vld [vmem:[#allocation5 + $0xd0] sm:$0xff]  ;;  %v7604_v22 = vld [vmem:[#allocation5 + $0xc8] sm:$0xff] }
 0x62f   : > { %10056 = vmatmul.msk.bf16.gmra.mxu0 %vm650_vm0, %v7637_v18 }
 0x631   : > { %v7182_v24 = vpop.f32.mrf.mxu2 }
 0x632   : > { %v7500_v20 = vpop.f32.mrf.mxu3  ;;  %v7253_v46 = vadd.f32 %v7182_v24, %v6915_v50 }
 0x633   : > { %v6917_v39 = vpop.f32.mrf.mxu1 }
 0x634   : > { %v7748_v59 = vpop.f32.mrf.mxu0  ;;  %v14356_v37 = vadd.f32 %v7495_v14, %v7253_v46  ;;  %v6918_v33 = vadd.f32 %v6917_v39, %v14204_v5  ;;  %v7638_v14 = vpack.c.bf16 %v7605_v15, %v7604_v22  ;;  %v8211_v5 = vld [vmem:[#allocation5 + $0x41] sm:$0xff]  ;;  %v8526_v39 = vld [vmem:[#allocation5 + $0x52] sm:$0xff] }
 0x635   : > { %v14354_v42 = vadd.f32 %v7748_v59, %v14183_v13  ;;  %10073 = vmatmul.msk.bf16.vlgmr.msrb.gmra.mxu1 %vm650_vm0, %v7940_v16 }
 0x636   : > { %10100 = vmatmul.msk.bf16.vlgmr.msrb.gmra.mxu2 %vm650_vm0, %v8253_v38 }
 0x637   : > { %10128 = vmatmul.msk.bf16.gmra.mxu3 %vm650_vm0, %v8567_v0  ;;  %v8210_v0 = vld [vmem:[#allocation5 + $0x39] sm:$0xff] }
 0x639   : > { %v7185_v1 = vpop.f32.mrf.mxu2 }
 0x63a   : > { %v7503_v25 = vpop.f32.mrf.mxu3  ;;  %v7254_v13 = vadd.f32 %v7185_v1, %v6918_v33  ;;  %v8254_v33 = vpack.c.bf16 %v8211_v5, %v8210_v0  ;;  %v7607_v1 = vld [vmem:[#allocation5 + $0xe0] sm:$0xff] }
 0x63b   : > { %v6919_v50 = vpop.f32.mrf.mxu1 }
 0x63c   : > { %v7751_v18 = vpop.f32.mrf.mxu0  ;;  %v14365_v45 = vadd.f32 %v7498_v28, %v7254_v13  ;;  %v6920_v62 = vadd.f32 %v6919_v50, %v14210_v3 }
 0x63d   : > { %v14363_v24 = vadd.f32 %v7751_v18, %v14192_v53  ;;  %v8525_v53 = vld [vmem:[#allocation5 + $0x4a] sm:$0xff] }
 0x63e   : > { %v8568_v15 = vpack.c.bf16 %v8526_v39, %v8525_v53 }
 0x63f   : > { %10057 = vmatmul.msk.bf16.gmra.mxu0 %vm650_vm0, %v7638_v14  ;;  %v7606_v14 = vld [vmem:[#allocation5 + $0xd8] sm:$0xff] }
 0x641   : > { %v7187_v46 = vpop.f32.mrf.mxu2 }
 0x642   : > { %v7505_v59 = vpop.f32.mrf.mxu3  ;;  %v7255_v35 = vadd.f32 %v7187_v46, %v6920_v62 }
 0x643   : > { %v6922_v6 = vpop.f32.mrf.mxu1 }
 0x644   : > { %v7753_v16 = vpop.f32.mrf.mxu0  ;;  %v14372_v28 = vadd.f32 %v7500_v20, %v7255_v35  ;;  %v6923_v3 = vadd.f32 %v6922_v6, %v14218_v54  ;;  %v7639_v20 = vpack.c.bf16 %v7607_v1, %v7606_v14  ;;  %v8213_v54 = vld [vmem:[#allocation5 + $0x51] sm:$0xff]  ;;  %v8528_v35 = vld [vmem:[#allocation5 + $0x62] sm:$0xff] }
 0x645   : > { %v14370_v23 = vadd.f32 %v7753_v16, %v14198_v49  ;;  %10074 = vmatmul.msk.bf16.gmra.mxu1 %vm650_vm0, %v8253_v38 }
 0x646   : > { %10101 = vmatmul.msk.bf16.gmra.mxu2 %vm650_vm0, %v8254_v33 }
 0x647   : > { %10129 = vmatmul.msk.bf16.gmra.mxu3 %vm650_vm0, %v8568_v15  ;;  %v8212_v15 = vld [vmem:[#allocation5 + $0x49] sm:$0xff] }
 0x649   : > { %v7190_v13 = vpop.f32.mrf.mxu2 }
 0x64a   : > { %v7508_v18 = vpop.f32.mrf.mxu3  ;;  %v7256_v50 = vadd.f32 %v7190_v13, %v6923_v3  ;;  %v8255_v3 = vpack.c.bf16 %v8213_v54, %v8212_v15  ;;  %v7609_v13 = vld [vmem:[#allocation5 + $0xf0] sm:$0xff] }
 0x64b   : > { %v6924_v22 = vpop.f32.mrf.mxu1 }
 0x64c   : > { %v7756_v49 = vpop.f32.mrf.mxu0  ;;  %v14381_v46 = vadd.f32 %v7503_v25, %v7256_v50  ;;  %v6925_v38 = vadd.f32 %v6924_v22, %v14224_v29 }
 0x64d   : > { %v14379_v62 = vadd.f32 %v7756_v49, %v14206_v9  ;;  %v8527_v9 = vld [vmem:[#allocation5 + $0x5a] sm:$0xff] }
 0x64e   : > { %v8569_v1 = vpack.c.bf16 %v8528_v35, %v8527_v9 }
 0x64f   : > { %10058 = vmatmul.msk.bf16.gmra.mxu0 %vm650_vm0, %v7639_v20  ;;  %v7608_v20 = vld [vmem:[#allocation5 + $0xe8] sm:$0xff] }
 0x651   : > { %v7192_v5 = vpop.f32.mrf.mxu2 }
 0x652   : > { %v7510_v39 = vpop.f32.mrf.mxu3  ;;  %v7257_v16 = vadd.f32 %v7192_v5, %v6925_v38 }
 0x653   : > { %v6927_v0 = vpop.f32.mrf.mxu1 }
 0x654   : > { %v7758_v6 = vpop.f32.mrf.mxu0  ;;  %v14388_v25 = vadd.f32 %v7505_v59, %v7257_v16  ;;  %v6928_v29 = vadd.f32 %v6927_v0, %v14232_v36  ;;  %v7640_v59 = vpack.c.bf16 %v7609_v13, %v7608_v20  ;;  %v8215_v36 = vld [vmem:[#allocation5 + $0x61] sm:$0xff]  ;;  %v8530_v16 = vld [vmem:[#allocation5 + $0x72] sm:$0xff] }
 0x655   : > { %v14386_v53 = vadd.f32 %v7758_v6, %v14212_v17  ;;  %10075 = vmatmul.msk.bf16.gmra.mxu1 %vm650_vm0, %v8254_v33 }
 0x656   : > { %10102 = vmatmul.msk.bf16.gmra.mxu2 %vm650_vm0, %v8255_v3 }
 0x657   : > { %10130 = vmatmul.msk.bf16.gmra.mxu3 %vm650_vm0, %v8569_v1  ;;  %v8214_v1 = vld [vmem:[#allocation5 + $0x59] sm:$0xff] }
 0x659   : > { %v7195_v50 = vpop.f32.mrf.mxu2 }
 0x65a   : > { %v7513_v49 = vpop.f32.mrf.mxu3  ;;  %v7258_v22 = vadd.f32 %v7195_v50, %v6928_v29  ;;  %v8256_v29 = vpack.c.bf16 %v8215_v36, %v8214_v1  ;;  %v7611_v50 = vld [vmem:[#allocation5 + $0x100] sm:$0xff] }
 0x65b   : > { %v6929_v14 = vpop.f32.mrf.mxu1 }
 0x65c   : > { %v7761_v17 = vpop.f32.mrf.mxu0  ;;  %v14397_v5 = vadd.f32 %v7508_v18, %v7258_v22  ;;  %v6930_v33 = vadd.f32 %v6929_v14, %v14238_v41 }
 0x65d   : > { %v14395_v38 = vadd.f32 %v7761_v17, %v14220_v48  ;;  %v8529_v48 = vld [vmem:[#allocation5 + $0x6a] sm:$0xff] }
 0x65e   : > { %v8570_v13 = vpack.c.bf16 %v8530_v16, %v8529_v48 }
 0x65f   : > { %10059 = vmatmul.msk.bf16.gmra.mxu0 %vm650_vm0, %v7640_v59  ;;  %v7610_v59 = vld [vmem:[#allocation5 + $0xf8] sm:$0xff] }
 0x661   : > { %v7197_v54 = vpop.f32.mrf.mxu2 }
 0x662   : > { %v7515_v35 = vpop.f32.mrf.mxu3  ;;  %v7259_v6 = vadd.f32 %v7197_v54, %v6930_v33 }
 0x663   : > { %v6932_v15 = vpop.f32.mrf.mxu1 }
 0x664   : > { %v7763_v0 = vpop.f32.mrf.mxu0  ;;  %v14404_v18 = vadd.f32 %v7510_v39, %v7259_v6  ;;  %v6933_v41 = vadd.f32 %v6932_v15, %v14246_v7  ;;  %v7641_v39 = vpack.c.bf16 %v7611_v50, %v7610_v59  ;;  %v8217_v7 = vld [vmem:[#allocation5 + $0x71] sm:$0xff]  ;;  %v8532_v6 = vld [vmem:[#allocation5 + $0x82] sm:$0xff] }
 0x665   : > { %v14402_v9 = vadd.f32 %v7763_v0, %v14226_v2  ;;  %10076 = vmatmul.msk.bf16.gmra.mxu1 %vm650_vm0, %v8255_v3 }
 0x666   : > { %10103 = vmatmul.msk.bf16.gmra.mxu2 %vm650_vm0, %v8256_v29 }
 0x667   : > { %10131 = vmatmul.msk.bf16.gmra.mxu3 %vm650_vm0, %v8570_v13  ;;  %v8216_v13 = vld [vmem:[#allocation5 + $0x69] sm:$0xff] }
 0x669   : > { %v7200_v22 = vpop.f32.mrf.mxu2 }
 0x66a   : > { %v7518_v17 = vpop.f32.mrf.mxu3  ;;  %v7260_v14 = vadd.f32 %v7200_v22, %v6933_v41  ;;  %v8257_v41 = vpack.c.bf16 %v8217_v7, %v8216_v13  ;;  %v7613_v22 = vld [vmem:[#allocation5 + $0x110] sm:$0xff] }
 0x66b   : > { %v6934_v20 = vpop.f32.mrf.mxu1 }
 0x66c   : > { %v7766_v2 = vpop.f32.mrf.mxu0  ;;  %v14413_v54 = vadd.f32 %v7513_v49, %v7260_v14  ;;  %v6935_v3 = vadd.f32 %v6934_v20, %v14252_v32 }
 0x66d   : > { %v14411_v33 = vadd.f32 %v7766_v2, %v14234_v52  ;;  %v8531_v52 = vld [vmem:[#allocation5 + $0x7a] sm:$0xff] }
 0x66e   : > { %v8571_v50 = vpack.c.bf16 %v8532_v6, %v8531_v52 }
 0x66f   : > { %10060 = vmatmul.msk.bf16.gmra.mxu0 %vm650_vm0, %v7641_v39  ;;  %v7612_v39 = vld [vmem:[#allocation5 + $0x108] sm:$0xff] }
 0x671   : > { %v7202_v36 = vpop.f32.mrf.mxu2 }
 0x672   : > { %v7520_v16 = vpop.f32.mrf.mxu3  ;;  %v7261_v0 = vadd.f32 %v7202_v36, %v6935_v3 }
 0x673   : > { %v6937_v1 = vpop.f32.mrf.mxu1 }
 0x674   : > { %v7768_v15 = vpop.f32.mrf.mxu0  ;;  %v14420_v49 = vadd.f32 %v7515_v35, %v7261_v0  ;;  %v6938_v32 = vadd.f32 %v6937_v1, %v14260_v60  ;;  %v7642_v35 = vpack.c.bf16 %v7613_v22, %v7612_v39  ;;  %v8219_v60 = vld [vmem:[#allocation5 + $0x81] sm:$0xff]  ;;  %v8534_v0 = vld [vmem:[#allocation5 + $0x92] sm:$0xff] }
 0x675   : > { %v14418_v48 = vadd.f32 %v7768_v15, %v14240_v40  ;;  %10077 = vmatmul.msk.bf16.gmra.mxu1 %vm650_vm0, %v8256_v29 }
 0x676   : > { %10104 = vmatmul.msk.bf16.gmra.mxu2 %vm650_vm0, %v8257_v41 }
 0x677   : > { %10132 = vmatmul.msk.bf16.gmra.mxu3 %vm650_vm0, %v8571_v50  ;;  %v8218_v50 = vld [vmem:[#allocation5 + $0x79] sm:$0xff] }
 0x679   : > { %v7205_v14 = vpop.f32.mrf.mxu2 }
 0x67a   : > { %v7523_v2 = vpop.f32.mrf.mxu3  ;;  %v7262_v20 = vadd.f32 %v7205_v14, %v6938_v32  ;;  %v8258_v32 = vpack.c.bf16 %v8219_v60, %v8218_v50  ;;  %v7615_v14 = vld [vmem:[#allocation5 + $0x120] sm:$0xff] }
 0x67b   : > { %v6939_v59 = vpop.f32.mrf.mxu1 }
 0x67c   : > { %v7771_v40 = vpop.f32.mrf.mxu0  ;;  %v14429_v36 = vadd.f32 %v7518_v17, %v7262_v20  ;;  %v6940_v29 = vadd.f32 %v6939_v59, %v14266_v56 }
 0x67d   : > { %v14427_v3 = vadd.f32 %v7771_v40, %v14248_v11  ;;  %v8533_v11 = vld [vmem:[#allocation5 + $0x8a] sm:$0xff] }
 0x67e   : > { %v8572_v22 = vpack.c.bf16 %v8534_v0, %v8533_v11 }
 0x67f   : > { %10061 = vmatmul.msk.bf16.gmra.mxu0 %vm650_vm0, %v7642_v35  ;;  %v7614_v35 = vld [vmem:[#allocation5 + $0x118] sm:$0xff] }
 0x681   : > { %v7207_v7 = vpop.f32.mrf.mxu2 }
 0x682   : > { %v7525_v6 = vpop.f32.mrf.mxu3  ;;  %v7263_v15 = vadd.f32 %v7207_v7, %v6940_v29 }
 0x683   : > { %v6942_v13 = vpop.f32.mrf.mxu1 }
 0x684   : > { %v7773_v1 = vpop.f32.mrf.mxu0  ;;  %v14436_v17 = vadd.f32 %v7520_v16, %v7263_v15  ;;  %v6943_v56 = vadd.f32 %v6942_v13, %v14274_v21  ;;  %v7643_v16 = vpack.c.bf16 %v7615_v14, %v7614_v35  ;;  %v8221_v21 = vld [vmem:[#allocation5 + $0x91] sm:$0xff]  ;;  %v8536_v15 = vld [vmem:[#allocation5 + $0xa2] sm:$0xff] }
 0x685   : > { %v14434_v52 = vadd.f32 %v7773_v1, %v14254_v57  ;;  %10078 = vmatmul.msk.bf16.gmra.mxu1 %vm650_vm0, %v8257_v41 }
 0x686   : > { %10105 = vmatmul.msk.bf16.gmra.mxu2 %vm650_vm0, %v8258_v32 }
 0x687   : > { %10133 = vmatmul.msk.bf16.gmra.mxu3 %vm650_vm0, %v8572_v22  ;;  %v8220_v22 = vld [vmem:[#allocation5 + $0x89] sm:$0xff] }
 0x689   : > { %v7210_v20 = vpop.f32.mrf.mxu2 }
 0x68a   : > { %v7528_v40 = vpop.f32.mrf.mxu3  ;;  %v7264_v59 = vadd.f32 %v7210_v20, %v6943_v56  ;;  %v8259_v56 = vpack.c.bf16 %v8221_v21, %v8220_v22  ;;  %v7617_v20 = vld [vmem:[#allocation5 + $0x130] sm:$0xff] }
 0x68b   : > { %v6944_v39 = vpop.f32.mrf.mxu1 }
 0x68c   : > { %v7776_v57 = vpop.f32.mrf.mxu0  ;;  %v14445_v7 = vadd.f32 %v7523_v2, %v7264_v59  ;;  %v6945_v41 = vadd.f32 %v6944_v39, %v14280_v8 }
 0x68d   : > { %v14443_v29 = vadd.f32 %v7776_v57, %v14262_v19  ;;  %v8535_v19 = vld [vmem:[#allocation5 + $0x9a] sm:$0xff] }
 0x68e   : > { %v8573_v14 = vpack.c.bf16 %v8536_v15, %v8535_v19 }
 0x68f   : > { %10062 = vmatmul.msk.bf16.gmra.mxu0 %vm650_vm0, %v7643_v16  ;;  %v7616_v16 = vld [vmem:[#allocation5 + $0x128] sm:$0xff] }
 0x691   : > { %v7212_v60 = vpop.f32.mrf.mxu2 }
 0x692   : > { %v7530_v0 = vpop.f32.mrf.mxu3  ;;  %v7265_v1 = vadd.f32 %v7212_v60, %v6945_v41  ;;  %v15432_v41 = vld [vmem:[#allocation55_spill] sm:$0xff] }
 0x693   : > { %v6947_v50 = vpop.f32.mrf.mxu1 }
 0x694   : > { %v7778_v13 = vpop.f32.mrf.mxu0  ;;  %v14452_v2 = vadd.f32 %v7525_v6, %v7265_v1  ;;  %v6948_v8 = vadd.f32 %v6947_v50, %v14288_v43  ;;  %v7644_v6 = vpack.c.bf16 %v7617_v20, %v7616_v16  ;;  %v8223_v43 = vld [vmem:[#allocation5 + $0xa1] sm:$0xff] }
 0x695   : > { %v14450_v11 = vadd.f32 %v7778_v13, %v14268_v10  ;;  %10079 = vmatmul.msk.bf16.gmra.mxu1 %vm650_vm0, %v8258_v32  ;;  %v8538_v13 = vld [vmem:[#allocation5 + $0xb2] sm:$0xff] }
 0x696   : > { %10106 = vmatmul.msk.bf16.gmra.mxu2 %vm650_vm0, %v8259_v56 }
 0x697   : > { %10134 = vmatmul.msk.bf16.gmra.mxu3 %vm650_vm0, %v8573_v14  ;;  %v15433_v14 = vld [vmem:[#allocation50_spill] sm:$0xff] }
 0x699   : > { %v7215_v59 = vpop.f32.mrf.mxu2 }
 0x69a   : > { %v7533_v57 = vpop.f32.mrf.mxu3  ;;  %v7266_v39 = vadd.f32 %v7215_v59, %v6948_v8  ;;  %v8222_v59 = vld [vmem:[#allocation5 + $0x99] sm:$0xff] }
 0x69b   : > { %v6949_v35 = vpop.f32.mrf.mxu1 }
 0x69c   : > { %v7781_v10 = vpop.f32.mrf.mxu0  ;;  %v14461_v21 = vadd.f32 %v7528_v40, %v7266_v39  ;;  %v6950_v32 = vadd.f32 %v6949_v35, %v14294_v55  ;;  %v7619_v39 = vld [vmem:[#allocation5 + $0x140] sm:$0xff] }
 0x69d   : > { %v14459_v60 = vadd.f32 %v7781_v10, %v15432_v41  ;;  %v8537_v10 = vld [vmem:[#allocation5 + $0xaa] sm:$0xff]  ;;  %v8260_v41 = vpack.c.bf16 %v8223_v43, %v8222_v59  ;;  %v8540_v59 = vld [vmem:[#allocation5 + $0xc2] sm:$0xff] }
 0x69e   : > { %v8574_v20 = vpack.c.bf16 %v8538_v13, %v8537_v10  ;;  %v15437_v10 = vld [vmem:[#allocation34_spill] sm:$0xff] }
 0x69f   : > { %10063 = vmatmul.msk.bf16.gmra.mxu0 %vm650_vm0, %v7644_v6 }
 0x6a1   : > { %v7217_v15 = vpop.f32.mrf.mxu2 }
 0x6a2   : > { %v7535_v1 = vpop.f32.mrf.mxu3  ;;  %v7267_v50 = vadd.f32 %v7217_v15, %v6950_v32 }
 0x6a3   : > { %v6952_v19 = vpop.f32.mrf.mxu1  ;;  %v7618_v1 = vld [vmem:[#allocation5 + $0x138] sm:$0xff] }
 0x6a4   : > { %v7783_v22 = vpop.f32.mrf.mxu0  ;;  %v14468_v40 = vadd.f32 %v7530_v0, %v7267_v50  ;;  %v6953_v55 = vadd.f32 %v6952_v19, %v14302_v61  ;;  %v7645_v0 = vpack.c.bf16 %v7619_v39, %v7618_v1 }
 0x6a5   : > { %v14466_v8 = vadd.f32 %v7783_v22, %v15433_v14  ;;  %10080 = vmatmul.msk.bf16.gmra.mxu1 %vm650_vm0, %v8259_v56  ;;  %v15435_v22 = vld [vmem:[#allocation58_spill] sm:$0xff] }
 0x6a6   : > { %15434 = vst [vmem:[#allocation52_spill] sm:$0xff] %v14468_v40  ;;  %10107 = vmatmul.msk.bf16.gmra.mxu2 %vm650_vm0, %v8260_v41  ;;  %v8225_v14 = vld [vmem:[#allocation5 + $0xb1] sm:$0xff] }
 0x6a7   : > { %10135 = vmatmul.msk.bf16.gmra.mxu3 %vm650_vm0, %v8574_v20 }
 0x6a9   : > { %v7220_v35 = vpop.f32.mrf.mxu2 }
 0x6aa   : > { %v8675_v16 = vpop.f32.mrf.mxu3  ;;  %v7268_v6 = vadd.f32 %v7220_v35, %v6953_v55  ;;  %v8224_v35 = vld [vmem:[#allocation5 + $0xa9] sm:$0xff] }
 0x6ab   : > { %v6954_v15 = vpop.f32.mrf.mxu1 }
 0x6ac   : > { %v7786_v32 = vpop.f32.mrf.mxu0  ;;  %v14477_v13 = vadd.f32 %v7533_v57, %v7268_v6  ;;  %v8539_v15 = vld [vmem:[#allocation5 + $0xba] sm:$0xff]  ;;  %v7621_v57 = vld [vmem:[#allocation5 + $0x150] sm:$0xff] }
 0x6ad   : > { %v14475_v43 = vadd.f32 %v7786_v32, %v15435_v22  ;;  %v8261_v32 = vpack.c.bf16 %v8225_v14, %v8224_v35  ;;  %v8575_v22 = vpack.c.bf16 %v8540_v59, %v8539_v15  ;;  %v8227_v35 = vld [vmem:[#allocation5 + $0xc1] sm:$0xff]  ;;  %v8542_v15 = vld [vmem:[#allocation5 + $0xd2] sm:$0xff] }
 0x6ae   : > { %15436 = vst [vmem:[#allocation54_spill] sm:$0xff] %v14477_v13 }
 0x6af   : > { %10064 = vmatmul.msk.bf16.gmra.mxu0 %vm650_vm0, %v7645_v0 }
 0x6b1   : > { %v7222_v56 = vpop.f32.mrf.mxu2 }
 0x6b2   : > { %v8677_v50 = vpop.f32.mrf.mxu3 }
 0x6b3   : > { %v8049_v19 = vpop.f32.mrf.mxu1 }
 0x6b4   : > { %v7788_v61 = vpop.f32.mrf.mxu0  ;;  %v8163_v55 = vadd.f32 %v8049_v19, %v14315_v26 }
 0x6b5   : > { %v14481_v20 = vadd.f32 %v7788_v61, %v15437_v10  ;;  %10081 = vmatmul.msk.bf16.gmra.mxu1 %vm650_vm0, %v8260_v41  ;;  %v7620_v61 = vld [vmem:[#allocation5 + $0x148] sm:$0xff] }
 0x6b6   : > { %10108 = vmatmul.msk.bf16.gmra.mxu2 %vm650_vm0, %v8261_v32  ;;  %v7646_v14 = vpack.c.bf16 %v7621_v57, %v7620_v61 }
 0x6b7   : > { %10136 = vmatmul.msk.bf16.gmra.mxu3 %vm650_vm0, %v8575_v22 }
 0x6b9   : > { %v8362_v39 = vpop.f32.mrf.mxu2 }
 0x6ba   : > { %v8680_v6 = vpop.f32.mrf.mxu3  ;;  %v8476_v0 = vadd.f32 %v8362_v39, %v8163_v55  ;;  %v8226_v39 = vld [vmem:[#allocation5 + $0xb9] sm:$0xff] }
 0x6bb   : > { %v8051_v56 = vpop.f32.mrf.mxu1 }
 0x6bc   : > { %v7791_v1 = vpop.f32.mrf.mxu0  ;;  %v8164_v26 = vadd.f32 %v8051_v56, %v14322_v34  ;;  %v14491_v59 = vadd.f32 %v8675_v16, %v8476_v0  ;;  %v8262_v34 = vpack.c.bf16 %v8227_v35, %v8226_v39  ;;  %v7623_v0 = vld [vmem:[#allocation5 + $0x160] sm:$0xff] }
 0x6bd   : > { %v14488_v10 = vadd.f32 %v7791_v1, %v14304_v44  ;;  %v8541_v1 = vld [vmem:[#allocation5 + $0xca] sm:$0xff] }
 0x6be   : > { %v8576_v57 = vpack.c.bf16 %v8542_v15, %v8541_v1  ;;  %v8229_v15 = vld [vmem:[#allocation5 + $0xd1] sm:$0xff] }
 0x6bf   : > { %10065 = vmatmul.msk.bf16.gmra.mxu0 %vm650_vm0, %v7646_v14 }
 0x6c1   : > { %v8364_v41 = vpop.f32.mrf.mxu2 }
 0x6c2   : > { %v8682_v19 = vpop.f32.mrf.mxu3  ;;  %v8477_v13 = vadd.f32 %v8364_v41, %v8164_v26  ;;  %v7622_v41 = vld [vmem:[#allocation5 + $0x158] sm:$0xff] }
 0x6c3   : > { %v8054_v40 = vpop.f32.mrf.mxu1 }
 0x6c4   : > { %v7793_v22 = vpop.f32.mrf.mxu0  ;;  %v8165_v44 = vadd.f32 %v8054_v40, %v14331_v31  ;;  %v14498_v16 = vadd.f32 %v8677_v50, %v8477_v13  ;;  %v7647_v13 = vpack.c.bf16 %v7623_v0, %v7622_v41 }
 0x6c5   : > { %v14495_v55 = vadd.f32 %v7793_v22, %v14308_v12  ;;  %10082 = vmatmul.msk.bf16.gmra.mxu1 %vm650_vm0, %v8261_v32  ;;  %v8544_v22 = vld [vmem:[#allocation5 + $0xe2] sm:$0xff] }
 0x6c6   : > { %10109 = vmatmul.msk.bf16.gmra.mxu2 %vm650_vm0, %v8262_v34 }
 0x6c7   : > { %10137 = vmatmul.msk.bf16.gmra.mxu3 %vm650_vm0, %v8576_v57 }
 0x6c9   : > { %v8367_v56 = vpop.f32.mrf.mxu2 }
 0x6ca   : > { %v8685_v61 = vpop.f32.mrf.mxu3  ;;  %v8478_v12 = vadd.f32 %v8367_v56, %v8165_v44  ;;  %v8228_v56 = vld [vmem:[#allocation5 + $0xc9] sm:$0xff] }
 0x6cb   : > { %v8056_v14 = vpop.f32.mrf.mxu1 }
 0x6cc   : > { %v7796_v26 = vpop.f32.mrf.mxu0  ;;  %v8166_v40 = vadd.f32 %v8056_v14, %v14338_v27  ;;  %v14507_v50 = vadd.f32 %v8680_v6, %v8478_v12  ;;  %v8263_v27 = vpack.c.bf16 %v8229_v15, %v8228_v56  ;;  %v7625_v12 = vld [vmem:[#allocation5 + $0x170] sm:$0xff] }
 0x6cd   : > { %v14504_v31 = vadd.f32 %v7796_v26, %v14317_v51  ;;  %v8543_v26 = vld [vmem:[#allocation5 + $0xda] sm:$0xff] }
 0x6ce   : > { %v8577_v0 = vpack.c.bf16 %v8544_v22, %v8543_v26 }
 0x6cf   : > { %10066 = vmatmul.msk.bf16.gmra.mxu0 %vm650_vm0, %v7647_v13 }
 0x6d1   : > { %v8369_v32 = vpop.f32.mrf.mxu2 }
 0x6d2   : > { %v8687_v35 = vpop.f32.mrf.mxu3  ;;  %v8479_v1 = vadd.f32 %v8369_v32, %v8166_v40  ;;  %v7624_v32 = vld [vmem:[#allocation5 + $0x168] sm:$0xff] }
 0x6d3   : > { %v8059_v57 = vpop.f32.mrf.mxu1 }
 0x6d4   : > { %v7798_v39 = vpop.f32.mrf.mxu0  ;;  %v8167_v51 = vadd.f32 %v8059_v57, %v14347_v58  ;;  %v14514_v6 = vadd.f32 %v8682_v19, %v8479_v1  ;;  %v7648_v19 = vpack.c.bf16 %v7625_v12, %v7624_v32  ;;  %v8231_v1 = vld [vmem:[#allocation5 + $0xe1] sm:$0xff]  ;;  %v8546_v57 = vld [vmem:[#allocation5 + $0xf2] sm:$0xff] }
 0x6d5   : > { %v14511_v44 = vadd.f32 %v7798_v39, %v14324_v4  ;;  %10083 = vmatmul.msk.bf16.gmra.mxu1 %vm650_vm0, %v8262_v34 }
 0x6d6   : > { %10110 = vmatmul.msk.bf16.gmra.mxu2 %vm650_vm0, %v8263_v27 }
 0x6d7   : > { %10138 = vmatmul.msk.bf16.gmra.mxu3 %vm650_vm0, %v8577_v0 }
 0x6d9   : > { %v8372_v14 = vpop.f32.mrf.mxu2 }
 0x6da   : > { %v8690_v41 = vpop.f32.mrf.mxu3  ;;  %v8480_v4 = vadd.f32 %v8372_v14, %v8167_v51  ;;  %v8230_v14 = vld [vmem:[#allocation5 + $0xd9] sm:$0xff] }
 0x6db   : > { %v8061_v13 = vpop.f32.mrf.mxu1 }
 0x6dc   : > { %v7801_v40 = vpop.f32.mrf.mxu0  ;;  %v8168_v15 = vadd.f32 %v8061_v13, %v14354_v42  ;;  %v14523_v22 = vadd.f32 %v8685_v61, %v8480_v4  ;;  %v8264_v42 = vpack.c.bf16 %v8231_v1, %v8230_v14  ;;  %v7626_v4 = vld [vmem:[#allocation5 + $0x178] sm:$0xff] }
 0x6dd   : > { %v14520_v58 = vadd.f32 %v7801_v40, %v14333_v30  ;;  %v8545_v40 = vld [vmem:[#allocation5 + $0xea] sm:$0xff]  ;;  %v7649_v1 = vpack.c.bf16 %v7626_v4, %v7626_v4 }
 0x6de   : > { %v8578_v12 = vpack.c.bf16 %v8546_v57, %v8545_v40 }
 0x6df   : > { %10067 = vmatmul.msk.bf16.gmra.mxu0 %vm650_vm0, %v7648_v19 }
 0x6e1   : > { %v8374_v34 = vpop.f32.mrf.mxu2 }
 0x6e2   : > { %v8692_v39 = vpop.f32.mrf.mxu3  ;;  %v8481_v26 = vadd.f32 %v8374_v34, %v8168_v15 }
 0x6e3   : > { %v8064_v0 = vpop.f32.mrf.mxu1 }
 0x6e4   : > { %v7803_v56 = vpop.f32.mrf.mxu0  ;;  %v8169_v30 = vadd.f32 %v8064_v0, %v14363_v24  ;;  %v14530_v61 = vadd.f32 %v8687_v35, %v8481_v26  ;;  %v8548_v26 = vld [vmem:[#allocation5 + $0x102] sm:$0xff] }
 0x6e5   : > { %v14527_v51 = vadd.f32 %v7803_v56, %v14340_v63  ;;  %10084 = vmatmul.msk.bf16.gmra.mxu1 %vm650_vm0, %v8263_v27  ;;  %v8233_v56 = vld [vmem:[#allocation5 + $0xf1] sm:$0xff] }
 0x6e6   : > { %10111 = vmatmul.msk.bf16.gmra.mxu2 %vm650_vm0, %v8264_v42 }
 0x6e7   : > { %10139 = vmatmul.msk.bf16.gmra.mxu3 %vm650_vm0, %v8578_v12  ;;  %v8232_v12 = vld [vmem:[#allocation5 + $0xe9] sm:$0xff] }
 0x6e9   : > { %v8377_v13 = vpop.f32.mrf.mxu2 }
 0x6ea   : > { %v8695_v32 = vpop.f32.mrf.mxu3  ;;  %v8482_v63 = vadd.f32 %v8377_v13, %v8169_v30  ;;  %v8547_v13 = vld [vmem:[#allocation5 + $0xfa] sm:$0xff] }
 0x6eb   : > { %v8066_v19 = vpop.f32.mrf.mxu1  ;;  %v8579_v4 = vpack.c.bf16 %v8548_v26, %v8547_v13 }
 0x6ec   : > { %v7806_v15 = vpop.f32.mrf.mxu0  ;;  %v8170_v34 = vadd.f32 %v8066_v19, %v14370_v23  ;;  %v14539_v35 = vadd.f32 %v8690_v41, %v8482_v63  ;;  %v8265_v23 = vpack.c.bf16 %v8233_v56, %v8232_v12 }
 0x6ed   : > { %v14536_v24 = vadd.f32 %v7806_v15, %v14349_v47  ;;  %v8835_v15 = vld [vmem:[#allocation5 + $0x33] sm:$0xff] }
 0x6ef   : > { %10068 = vmatmul.msk.bf16.gmra.mxu0 %vm650_vm0, %v7649_v1 }
 0x6f1   : > { %v8379_v27 = vpop.f32.mrf.mxu2 }
 0x6f2   : > { %v8697_v57 = vpop.f32.mrf.mxu3  ;;  %v8483_v14 = vadd.f32 %v8379_v27, %v8170_v34  ;;  %v8834_v27 = vld [vmem:[#allocation5 + $0x2b] sm:$0xff] }
 0x6f3   : > { %v8069_v40 = vpop.f32.mrf.mxu1 }
 0x6f4   : > { %v7808_v0 = vpop.f32.mrf.mxu0  ;;  %v8171_v47 = vadd.f32 %v8069_v40, %v14379_v62  ;;  %v14546_v41 = vadd.f32 %v8692_v39, %v8483_v14  ;;  %v8879_v39 = vpack.c.bf16 %v8835_v15, %v8834_v27  ;;  %v8235_v14 = vld [vmem:[#allocation5 + $0x101] sm:$0xff]  ;;  %v8550_v40 = vld [vmem:[#allocation5 + $0x112] sm:$0xff] }
 0x6f5   : > { %v14543_v30 = vadd.f32 %v7808_v0, %v14356_v37  ;;  %10085 = vmatmul.msk.bf16.gmra.mxu1 %vm650_vm0, %v8264_v42 }
 0x6f6   : > { %10112 = vmatmul.msk.bf16.gmra.mxu2 %vm650_vm0, %v8265_v23 }
 0x6f7   : > { %10140 = vmatmul.msk.bf16.gmra.mxu3 %vm650_vm0, %v8579_v4 }
 0x6f9   : > { %v8382_v63 = vpop.f32.mrf.mxu2 }
 0x6fa   : > { %v8700_v19 = vpop.f32.mrf.mxu3  ;;  %v8484_v37 = vadd.f32 %v8382_v63, %v8171_v47  ;;  %v8234_v63 = vld [vmem:[#allocation5 + $0xf9] sm:$0xff] }
 0x6fb   : > { %v8071_v1 = vpop.f32.mrf.mxu1 }
 0x6fc   : > { %v7811_v34 = vpop.f32.mrf.mxu0  ;;  %v8172_v56 = vadd.f32 %v8071_v1, %v14386_v53  ;;  %v14555_v26 = vadd.f32 %v8695_v32, %v8484_v37  ;;  %v8266_v53 = vpack.c.bf16 %v8235_v14, %v8234_v63  ;;  %v8837_v37 = vld [vmem:[#allocation5 + $0x43] sm:$0xff] }
 0x6fd   : > { %v14552_v62 = vadd.f32 %v7811_v34, %v14365_v45  ;;  %v8549_v34 = vld [vmem:[#allocation5 + $0x10a] sm:$0xff] }
 0x6fe   : > { %v8580_v15 = vpack.c.bf16 %v8550_v40, %v8549_v34 }
 0x6ff   : > { %10154 = vmatmul.msk.bf16.vlgmr.msrb.gmra.mxu0 %vm650_vm0, %v8879_v39 }
 0x701   : > { %v8384_v42 = vpop.f32.mrf.mxu2 }
 0x702   : > { %v8702_v0 = vpop.f32.mrf.mxu3  ;;  %v8485_v13 = vadd.f32 %v8384_v42, %v8172_v56  ;;  %v8836_v42 = vld [vmem:[#allocation5 + $0x3b] sm:$0xff] }
 0x703   : > { %v8074_v4 = vpop.f32.mrf.mxu1 }
 0x704   : > { %v7813_v12 = vpop.f32.mrf.mxu0  ;;  %v8173_v45 = vadd.f32 %v8074_v4, %v14395_v38  ;;  %v14562_v32 = vadd.f32 %v8697_v57, %v8485_v13  ;;  %v8880_v57 = vpack.c.bf16 %v8837_v37, %v8836_v42  ;;  %v8237_v13 = vld [vmem:[#allocation5 + $0x111] sm:$0xff]  ;;  %v8552_v4 = vld [vmem:[#allocation5 + $0x122] sm:$0xff] }
 0x705   : > { %v14559_v47 = vadd.f32 %v7813_v12, %v14372_v28  ;;  %10086 = vmatmul.msk.bf16.gmra.mxu1 %vm650_vm0, %v8265_v23 }
 0x706   : > { %10113 = vmatmul.msk.bf16.gmra.mxu2 %vm650_vm0, %v8266_v53 }
 0x707   : > { %10141 = vmatmul.msk.bf16.gmra.mxu3 %vm650_vm0, %v8580_v15 }
 0x709   : > { %v8387_v1 = vpop.f32.mrf.mxu2 }
 0x70a   : > { %v8705_v27 = vpop.f32.mrf.mxu3  ;;  %v8486_v28 = vadd.f32 %v8387_v1, %v8173_v45  ;;  %v8236_v1 = vld [vmem:[#allocation5 + $0x109] sm:$0xff] }
 0x70b   : > { %v8076_v39 = vpop.f32.mrf.mxu1 }
 0x70c   : > { %v7816_v56 = vpop.f32.mrf.mxu0  ;;  %v8174_v14 = vadd.f32 %v8076_v39, %v14402_v9  ;;  %v14571_v40 = vadd.f32 %v8700_v19, %v8486_v28  ;;  %v8267_v9 = vpack.c.bf16 %v8237_v13, %v8236_v1  ;;  %v8839_v28 = vld [vmem:[#allocation5 + $0x53] sm:$0xff] }
 0x70d   : > { %v14568_v38 = vadd.f32 %v7816_v56, %v14381_v46  ;;  %v8551_v56 = vld [vmem:[#allocation5 + $0x11a] sm:$0xff] }
 0x70e   : > { %v8581_v37 = vpack.c.bf16 %v8552_v4, %v8551_v56 }
 0x70f   : > { %10155 = vmatmul.msk.bf16.gmra.mxu0 %vm650_vm0, %v8880_v57 }
 0x711   : > { %v8389_v23 = vpop.f32.mrf.mxu2 }
 0x712   : > { %v8707_v12 = vpop.f32.mrf.mxu3  ;;  %v8487_v34 = vadd.f32 %v8389_v23, %v8174_v14  ;;  %v8838_v23 = vld [vmem:[#allocation5 + $0x4b] sm:$0xff] }
 0x713   : > { %v8079_v15 = vpop.f32.mrf.mxu1 }
 0x714   : > { %v7818_v63 = vpop.f32.mrf.mxu0  ;;  %v8175_v46 = vadd.f32 %v8079_v15, %v14411_v33  ;;  %v14578_v19 = vadd.f32 %v8702_v0, %v8487_v34  ;;  %v8881_v0 = vpack.c.bf16 %v8839_v28, %v8838_v23  ;;  %v8239_v34 = vld [vmem:[#allocation5 + $0x121] sm:$0xff]  ;;  %v8554_v15 = vld [vmem:[#allocation5 + $0x132] sm:$0xff] }
 0x715   : > { %v14575_v45 = vadd.f32 %v7818_v63, %v14388_v25  ;;  %10087 = vmatmul.msk.bf16.gmra.mxu1 %vm650_vm0, %v8266_v53 }
 0x716   : > { %10114 = vmatmul.msk.bf16.gmra.mxu2 %vm650_vm0, %v8267_v9 }
 0x717   : > { %10142 = vmatmul.msk.bf16.gmra.mxu3 %vm650_vm0, %v8581_v37 }
 0x719   : > { %v8392_v39 = vpop.f32.mrf.mxu2 }
 0x71a   : > { %v8710_v42 = vpop.f32.mrf.mxu3  ;;  %v8488_v25 = vadd.f32 %v8392_v39, %v8175_v46  ;;  %v8238_v39 = vld [vmem:[#allocation5 + $0x119] sm:$0xff] }
 0x71b   : > { %v8081_v57 = vpop.f32.mrf.mxu1 }
 0x71c   : > { %v7821_v14 = vpop.f32.mrf.mxu0  ;;  %v8176_v13 = vadd.f32 %v8081_v57, %v14418_v48  ;;  %v14587_v4 = vadd.f32 %v8705_v27, %v8488_v25  ;;  %v8268_v48 = vpack.c.bf16 %v8239_v34, %v8238_v39  ;;  %v8841_v25 = vld [vmem:[#allocation5 + $0x63] sm:$0xff] }
 0x71d   : > { %v14584_v33 = vadd.f32 %v7821_v14, %v14397_v5  ;;  %v8553_v14 = vld [vmem:[#allocation5 + $0x12a] sm:$0xff] }
 0x71e   : > { %v8582_v28 = vpack.c.bf16 %v8554_v15, %v8553_v14 }
 0x71f   : > { %10156 = vmatmul.msk.bf16.gmra.mxu0 %vm650_vm0, %v8881_v0 }
 0x721   : > { %v8394_v53 = vpop.f32.mrf.mxu2 }
 0x722   : > { %v8712_v63 = vpop.f32.mrf.mxu3  ;;  %v8489_v56 = vadd.f32 %v8394_v53, %v8176_v13  ;;  %v8840_v53 = vld [vmem:[#allocation5 + $0x5b] sm:$0xff] }
 0x723   : > { %v8084_v37 = vpop.f32.mrf.mxu1 }
 0x724   : > { %v7823_v1 = vpop.f32.mrf.mxu0  ;;  %v8177_v5 = vadd.f32 %v8084_v37, %v14427_v3  ;;  %v14594_v27 = vadd.f32 %v8707_v12, %v8489_v56  ;;  %v8882_v12 = vpack.c.bf16 %v8841_v25, %v8840_v53  ;;  %v8241_v56 = vld [vmem:[#allocation5 + $0x131] sm:$0xff]  ;;  %v8556_v37 = vld [vmem:[#allocation5 + $0x142] sm:$0xff] }
 0x725   : > { %v14591_v46 = vadd.f32 %v7823_v1, %v14404_v18  ;;  %10088 = vmatmul.msk.bf16.gmra.mxu1 %vm650_vm0, %v8267_v9 }
 0x726   : > { %10115 = vmatmul.msk.bf16.gmra.mxu2 %vm650_vm0, %v8268_v48 }
 0x727   : > { %10143 = vmatmul.msk.bf16.gmra.mxu3 %vm650_vm0, %v8582_v28 }
 0x729   : > { %v8397_v57 = vpop.f32.mrf.mxu2 }
 0x72a   : > { %v8715_v23 = vpop.f32.mrf.mxu3  ;;  %v8490_v18 = vadd.f32 %v8397_v57, %v8177_v5  ;;  %v8240_v57 = vld [vmem:[#allocation5 + $0x129] sm:$0xff] }
 0x72b   : > { %v8086_v0 = vpop.f32.mrf.mxu1 }
 0x72c   : > { %v7826_v13 = vpop.f32.mrf.mxu0  ;;  %v8178_v34 = vadd.f32 %v8086_v0, %v14434_v52  ;;  %v14603_v15 = vadd.f32 %v8710_v42, %v8490_v18  ;;  %v8269_v52 = vpack.c.bf16 %v8241_v56, %v8240_v57  ;;  %v8843_v18 = vld [vmem:[#allocation5 + $0x73] sm:$0xff] }
 0x72d   : > { %v14600_v3 = vadd.f32 %v7826_v13, %v14413_v54  ;;  %v8555_v13 = vld [vmem:[#allocation5 + $0x13a] sm:$0xff] }
 0x72e   : > { %v8583_v25 = vpack.c.bf16 %v8556_v37, %v8555_v13 }
 0x72f   : > { %10157 = vmatmul.msk.bf16.gmra.mxu0 %vm650_vm0, %v8882_v12 }
 0x731   : > { %v8399_v9 = vpop.f32.mrf.mxu2 }
 0x732   : > { %v8717_v1 = vpop.f32.mrf.mxu3  ;;  %v8491_v14 = vadd.f32 %v8399_v9, %v8178_v34  ;;  %v8842_v9 = vld [vmem:[#allocation5 + $0x6b] sm:$0xff] }
 0x733   : > { %v8089_v28 = vpop.f32.mrf.mxu1 }
 0x734   : > { %v7828_v39 = vpop.f32.mrf.mxu0  ;;  %v8179_v54 = vadd.f32 %v8089_v28, %v14443_v29  ;;  %v14610_v42 = vadd.f32 %v8712_v63, %v8491_v14  ;;  %v8883_v63 = vpack.c.bf16 %v8843_v18, %v8842_v9  ;;  %v8243_v14 = vld [vmem:[#allocation5 + $0x141] sm:$0xff]  ;;  %v8558_v28 = vld [vmem:[#allocation5 + $0x152] sm:$0xff] }
 0x735   : > { %v14607_v5 = vadd.f32 %v7828_v39, %v14420_v49  ;;  %10089 = vmatmul.msk.bf16.gmra.mxu1 %vm650_vm0, %v8268_v48 }
 0x736   : > { %10116 = vmatmul.msk.bf16.gmra.mxu2 %vm650_vm0, %v8269_v52 }
 0x737   : > { %10144 = vmatmul.msk.bf16.gmra.mxu3 %vm650_vm0, %v8583_v25 }
 0x739   : > { %v8402_v0 = vpop.f32.mrf.mxu2 }
 0x73a   : > { %v8720_v53 = vpop.f32.mrf.mxu3  ;;  %v8492_v49 = vadd.f32 %v8402_v0, %v8179_v54  ;;  %v8242_v0 = vld [vmem:[#allocation5 + $0x139] sm:$0xff] }
 0x73b   : > { %v8091_v12 = vpop.f32.mrf.mxu1 }
 0x73c   : > { %v7831_v34 = vpop.f32.mrf.mxu0  ;;  %v8180_v56 = vadd.f32 %v8091_v12, %v14450_v11  ;;  %v14619_v37 = vadd.f32 %v8715_v23, %v8492_v49  ;;  %v8270_v11 = vpack.c.bf16 %v8243_v14, %v8242_v0  ;;  %v8845_v49 = vld [vmem:[#allocation5 + $0x83] sm:$0xff] }
 0x73d   : > { %v14616_v29 = vadd.f32 %v7831_v34, %v14429_v36  ;;  %v8557_v34 = vld [vmem:[#allocation5 + $0x14a] sm:$0xff] }
 0x73e   : > { %v8584_v18 = vpack.c.bf16 %v8558_v28, %v8557_v34 }
 0x73f   : > { %10158 = vmatmul.msk.bf16.gmra.mxu0 %vm650_vm0, %v8883_v63 }
 0x741   : > { %v8404_v48 = vpop.f32.mrf.mxu2 }
 0x742   : > { %v8722_v39 = vpop.f32.mrf.mxu3  ;;  %v8493_v13 = vadd.f32 %v8404_v48, %v8180_v56  ;;  %v8844_v48 = vld [vmem:[#allocation5 + $0x7b] sm:$0xff] }
 0x743   : > { %v8094_v25 = vpop.f32.mrf.mxu1 }
 0x744   : > { %v7833_v57 = vpop.f32.mrf.mxu0  ;;  %v8181_v36 = vadd.f32 %v8094_v25, %v14459_v60  ;;  %v14626_v23 = vadd.f32 %v8717_v1, %v8493_v13  ;;  %v8884_v1 = vpack.c.bf16 %v8845_v49, %v8844_v48  ;;  %v8245_v13 = vld [vmem:[#allocation5 + $0x151] sm:$0xff]  ;;  %v8560_v25 = vld [vmem:[#allocation5 + $0x162] sm:$0xff] }
 0x745   : > { %v14623_v54 = vadd.f32 %v7833_v57, %v14436_v17  ;;  %10090 = vmatmul.msk.bf16.gmra.mxu1 %vm650_vm0, %v8269_v52 }
 0x746   : > { %10117 = vmatmul.msk.bf16.gmra.mxu2 %vm650_vm0, %v8270_v11 }
 0x747   : > { %10145 = vmatmul.msk.bf16.gmra.mxu3 %vm650_vm0, %v8584_v18 }
 0x749   : > { %v8407_v12 = vpop.f32.mrf.mxu2 }
 0x74a   : > { %v8725_v9 = vpop.f32.mrf.mxu3  ;;  %v8494_v17 = vadd.f32 %v8407_v12, %v8181_v36  ;;  %v8244_v12 = vld [vmem:[#allocation5 + $0x149] sm:$0xff] }
 0x74b   : > { %v8096_v63 = vpop.f32.mrf.mxu1 }
 0x74c   : > { %v7836_v56 = vpop.f32.mrf.mxu0  ;;  %v8182_v14 = vadd.f32 %v8096_v63, %v14466_v8  ;;  %v14635_v28 = vadd.f32 %v8720_v53, %v8494_v17  ;;  %v8271_v8 = vpack.c.bf16 %v8245_v13, %v8244_v12  ;;  %v8847_v17 = vld [vmem:[#allocation5 + $0x93] sm:$0xff] }
 0x74d   : > { %v14632_v60 = vadd.f32 %v7836_v56, %v14445_v7  ;;  %v8559_v56 = vld [vmem:[#allocation5 + $0x15a] sm:$0xff] }
 0x74e   : > { %v8585_v49 = vpack.c.bf16 %v8560_v25, %v8559_v56 }
 0x74f   : > { %10159 = vmatmul.msk.bf16.gmra.mxu0 %vm650_vm0, %v8884_v1 }
 0x751   : > { %v8409_v52 = vpop.f32.mrf.mxu2 }
 0x752   : > { %v8727_v57 = vpop.f32.mrf.mxu3  ;;  %v8495_v34 = vadd.f32 %v8409_v52, %v8182_v14  ;;  %v8846_v52 = vld [vmem:[#allocation5 + $0x8b] sm:$0xff] }
 0x753   : > { %v8099_v18 = vpop.f32.mrf.mxu1 }
 0x754   : > { %v7838_v0 = vpop.f32.mrf.mxu0  ;;  %v8183_v7 = vadd.f32 %v8099_v18, %v14475_v43  ;;  %v14642_v53 = vadd.f32 %v8722_v39, %v8495_v34  ;;  %v8885_v39 = vpack.c.bf16 %v8847_v17, %v8846_v52  ;;  %v8247_v34 = vld [vmem:[#allocation5 + $0x161] sm:$0xff]  ;;  %v8562_v18 = vld [vmem:[#allocation5 + $0x172] sm:$0xff] }
 0x755   : > { %v14639_v36 = vadd.f32 %v7838_v0, %v14452_v2  ;;  %10091 = vmatmul.msk.bf16.gmra.mxu1 %vm650_vm0, %v8270_v11 }
 0x756   : > { %15438 = vst [vmem:[#allocation60_spill] sm:$0xff] %v14642_v53  ;;  %10118 = vmatmul.msk.bf16.gmra.mxu2 %vm650_vm0, %v8271_v8  ;;  %v8561_v53 = vld [vmem:[#allocation5 + $0x16a] sm:$0xff] }
 0x757   : > { %10146 = vmatmul.msk.bf16.gmra.mxu3 %vm650_vm0, %v8585_v49  ;;  %v8586_v17 = vpack.c.bf16 %v8562_v18, %v8561_v53 }
 0x759   : > { %v8412_v63 = vpop.f32.mrf.mxu2 }
 0x75a   : > { %v8730_v48 = vpop.f32.mrf.mxu3  ;;  %v8496_v2 = vadd.f32 %v8412_v63, %v8183_v7  ;;  %v15440_v7 = vld [vmem:[#allocation52_spill] sm:$0xff] }
 0x75b   : > { %v8101_v1 = vpop.f32.mrf.mxu1 }
 0x75c   : > { %v7841_v14 = vpop.f32.mrf.mxu0  ;;  %v8184_v13 = vadd.f32 %v8101_v1, %v14481_v20  ;;  %v14651_v25 = vadd.f32 %v8725_v9, %v8496_v2  ;;  %v8849_v2 = vld [vmem:[#allocation5 + $0xa3] sm:$0xff] }
 0x75d   : > { %v14648_v43 = vadd.f32 %v7841_v14, %v14461_v21  ;;  %v8246_v14 = vld [vmem:[#allocation5 + $0x159] sm:$0xff] }
 0x75e   : > { %15439 = vst [vmem:[#allocation12_spill] sm:$0xff] %v14651_v25  ;;  %v8272_v20 = vpack.c.bf16 %v8247_v34, %v8246_v14  ;;  %v8564_v14 = vld [vmem:[#allocation5 + $0x182] sm:$0xff] }
 0x75f   : > { %10160 = vmatmul.msk.bf16.gmra.mxu0 %vm650_vm0, %v8885_v39  ;;  %v8248_v25 = vld [vmem:[#allocation5 + $0x169] sm:$0xff] }
 0x761   : > { %v8414_v11 = vpop.f32.mrf.mxu2 }
 0x762   : > { %v8732_v0 = vpop.f32.mrf.mxu3  ;;  %v8497_v56 = vadd.f32 %v8414_v11, %v8184_v13 }
 0x763   : > { %v8104_v49 = vpop.f32.mrf.mxu1 }
 0x764   : > { %v7843_v12 = vpop.f32.mrf.mxu0  ;;  %v8185_v21 = vadd.f32 %v8104_v49, %v14488_v10  ;;  %v14658_v9 = vadd.f32 %v8727_v57, %v8497_v56  ;;  %v15442_v10 = vld [vmem:[#allocation54_spill] sm:$0xff] }
 0x765   : > { %v14655_v63 = vadd.f32 %v7843_v12, %v15440_v7  ;;  %10092 = vmatmul.msk.bf16.gmra.mxu1 %vm650_vm0, %v8271_v8  ;;  %v8848_v12 = vld [vmem:[#allocation5 + $0x9b] sm:$0xff]  ;;  %v8249_v56 = vld [vmem:[#allocation5 + $0x171] sm:$0xff] }
 0x766   : > { %15441 = vst [vmem:[#allocation59_spill] sm:$0xff] %v14658_v9  ;;  %10119 = vmatmul.msk.bf16.gmra.mxu2 %vm650_vm0, %v8272_v20  ;;  %v8886_v57 = vpack.c.bf16 %v8849_v2, %v8848_v12  ;;  %v8563_v7 = vld [vmem:[#allocation5 + $0x17a] sm:$0xff]  ;;  %v8850_v12 = vld [vmem:[#allocation5 + $0xab] sm:$0xff] }
 0x767   : > { %10147 = vmatmul.msk.bf16.gmra.mxu3 %vm650_vm0, %v8586_v17 }
 0x769   : > { %v8417_v1 = vpop.f32.mrf.mxu2 }
 0x76a   : > { %v8735_v52 = vpop.f32.mrf.mxu3  ;;  %v8498_v39 = vadd.f32 %v8417_v1, %v8185_v21 }
 0x76b   : > { %v8106_v11 = vpop.f32.mrf.mxu1 }
 0x76c   : > { %v7846_v13 = vpop.f32.mrf.mxu0  ;;  %v8186_v53 = vadd.f32 %v8106_v11, %v14495_v55  ;;  %v14667_v34 = vadd.f32 %v8730_v48, %v8498_v39  ;;  %v8851_v55 = vld [vmem:[#allocation5 + $0xb3] sm:$0xff] }
 0x76d   : > { %v14664_v49 = vadd.f32 %v7846_v13, %v15442_v10  ;;  %v8273_v13 = vpack.c.bf16 %v8249_v56, %v8248_v25  ;;  %v8587_v10 = vpack.c.bf16 %v8564_v14, %v8563_v7  ;;  %v14679_v39 = vld [vmem:[%s14969_s11] ss:$0 sm:$0xff]  ;;  %v8565_v56 = vld [vmem:[#allocation5 + $0x18a] sm:$0xff] }
 0x76f   : > { %15443 = vst [vmem:[#allocation57_spill] sm:$0xff] %v14664_v49  ;;  %10161 = vmatmul.msk.bf16.gmra.mxu0 %vm650_vm0, %v8886_v57 }
 0x771   : > { %v8419_v8 = vpop.f32.mrf.mxu2 }
 0x772   : > { %v8737_v18 = vpop.f32.mrf.mxu3  ;;  %v8499_v9 = vadd.f32 %v8419_v8, %v8186_v53 }
 0x773   : > { %v8109_v21 = vpop.f32.mrf.mxu1 }
 0x774   : > { %v7848_v17 = vpop.f32.mrf.mxu0  ;;  %v8187_v1 = vadd.f32 %v8109_v21, %v14504_v31  ;;  %v14671_v49 = vadd.f32 %v8732_v0, %v8499_v9  ;;  %v8887_v9 = vpack.c.bf16 %v8851_v55, %v8850_v12  ;;  %v8250_v21 = vld [vmem:[#allocation5 + $0x179] sm:$0xff]  ;;  %v8853_v12 = vld [vmem:[#allocation5 + $0xc3] sm:$0xff] }
 0x775   : > { %10093 = vmatmul.msk.bf16.gmra.mxu1 %vm650_vm0, %v8272_v20 }
 0x776   : > { %15444 = vst [vmem:[#allocation64_spill] sm:$0xff] %v14671_v49  ;;  %10120 = vmatmul.msk.bf16.gmra.mxu2 %vm650_vm0, %v8273_v13 }
 0x777   : > { %10148 = vmatmul.msk.bf16.gmra.mxu3 %vm650_vm0, %v8587_v10 }
 0x779   : > { %v8422_v48 = vpop.f32.mrf.mxu2 }
 0x77a   : > { %v8740_v2 = vpop.f32.mrf.mxu3  ;;  %v8500_v31 = vadd.f32 %v8422_v48, %v8187_v1  ;;  %v8251_v1 = vld [vmem:[#allocation5 + $0x181] sm:$0xff] }
 0x77b   : > { %v8111_v25 = vpop.f32.mrf.mxu1  ;;  %v8274_v55 = vpack.c.bf16 %v8251_v1, %v8250_v21 }
 0x77c   : > { %v8988_v11 = vpop.f32.mrf.mxu0  ;;  %v8188_v20 = vadd.f32 %v8111_v25, %v14511_v44  ;;  %v14683_v53 = vadd.f32 %v8735_v52, %v8500_v31 }
 0x77d   : > { %v9102_v0 = vadd.f32 %v8988_v11, %v14491_v59  ;;  %v8588_v59 = vpack.c.bf16 %v8565_v56, %v8565_v56 }
 0x77f   : > { %v9151_v57 = vadd.f32 %v14679_v39, %v9102_v0  ;;  %10162 = vmatmul.msk.bf16.gmra.mxu0 %vm650_vm0, %v8887_v9 }
 0x781   : > { %v9196_v8 = vsub.f32 0.0, %v9151_v57  ;;  %v8424_v14 = vpop.f32.mrf.mxu2 }
 0x782   : > { %v8742_v17 = vpop.f32.mrf.mxu3  ;;  %v8501_v10 = vadd.f32 %v8424_v14, %v8188_v20 }
 0x783   : > { %v9241_v7 = vmul.f32 1.442695, %v9196_v8  ;;  %v8114_v49 = vpop.f32.mrf.mxu1 }
 0x784   : > { %v8990_v48 = vpop.f32.mrf.mxu0  ;;  %v8189_v52 = vadd.f32 %v8114_v49, %v14520_v58  ;;  %v14689_v31 = vadd.f32 %v8737_v18, %v8501_v10  ;;  %v8852_v18 = vld [vmem:[#allocation5 + $0xbb] sm:$0xff] }
 0x785   : > { %10396 = vpow2.f32 %v9241_v7  ;;  %v9103_v44 = vadd.f32 %v8990_v48, %v14498_v16  ;;  %10094 = vmatmul.msk.bf16.gmra.mxu1 %vm650_vm0, %v8273_v13  ;;  %v8888_v7 = vpack.c.bf16 %v8853_v12, %v8852_v18  ;;  %v8252_v48 = vld [vmem:[#allocation5 + $0x189] sm:$0xff] }
 0x786   : > { %10121 = vmatmul.msk.bf16.gmra.mxu2 %vm650_vm0, %v8274_v55 }
 0x787   : > { %v9152_v11 = vadd.f32 %v14679_v39, %v9103_v44  ;;  %10149 = vmatmul.msk.bf16.gmra.mxu3 %vm650_vm0, %v8588_v59 }
 0x789   : > { %v9197_v25 = vsub.f32 0.0, %v9152_v11  ;;  %v8427_v9 = vpop.f32.mrf.mxu2  ;;  %v7962_v11 = vpack.c.bf16 %v8250_v21, %v8250_v21 }
 0x78a   : > { %v8745_v57 = vpop.f32.mrf.mxu3  ;;  %v8502_v8 = vadd.f32 %v8427_v9, %v8189_v52 }
 0x78b   : > { %v10397_v0 = vpop.eup %10396  ;;  %v9243_v20 = vmul.f32 1.442695, %v9197_v25  ;;  %v8116_v49 = vpop.f32.mrf.mxu1 }
 0x78c   : > { %v9331_v16 = vadd.f32 1.0, %v10397_v0  ;;  %v8993_v58 = vpop.f32.mrf.mxu0  ;;  %v8190_v13 = vadd.f32 %v8116_v49, %v14527_v51  ;;  %v14697_v14 = vadd.f32 %v8740_v2, %v8502_v8  ;;  %v8275_v0 = vpack.c.bf16 %v8252_v48, %v8252_v48  ;;  %v8855_v49 = vld [vmem:[#allocation5 + $0xd3] sm:$0xff] }
 0x78d   : > { %10398 = vpow2.f32 %v9243_v20  ;;  %v9104_v56 = vadd.f32 %v8993_v58, %v14507_v50 }
 0x78e   : > { %10400 = vrcp.f32 %v9331_v16 }
 0x78f   : > { %v9153_v1 = vadd.f32 %v14679_v39, %v9104_v56  ;;  %10163 = vmatmul.msk.bf16.gmra.mxu0 %vm650_vm0, %v8888_v7  ;;  %v8854_v7 = vld [vmem:[#allocation5 + $0xcb] sm:$0xff] }
 0x791   : > { %v9198_v10 = vsub.f32 0.0, %v9153_v1  ;;  %v8429_v52 = vpop.f32.mrf.mxu2 }
 0x792   : > { %v8747_v55 = vpop.f32.mrf.mxu3  ;;  %v8503_v51 = vadd.f32 %v8429_v52, %v8190_v13 }
 0x793   : > { %v10399_v59 = vpop.eup %10398  ;;  %v9245_v44 = vmul.f32 1.442695, %v9198_v10  ;;  %v8119_v12 = vpop.f32.mrf.mxu1 }
 0x794   : > { %v10401_v25 = vpop.eup %10400  ;;  %v9332_v50 = vadd.f32 1.0, %v10399_v59  ;;  %v8995_v2 = vpop.f32.mrf.mxu0  ;;  %v8191_v21 = vadd.f32 %v8119_v12, %v14536_v24  ;;  %v14710_v16 = vadd.f32 %v8742_v17, %v8503_v51  ;;  %v8889_v59 = vpack.c.bf16 %v8855_v49, %v8854_v7  ;;  %v8857_v7 = vld [vmem:[#allocation5 + $0xe3] sm:$0xff] }
 0x795   : > { %v9421_v20 = vmin.f32 %v10401_v25, 1.0  ;;  %10402 = vpow2.f32 %v9245_v44  ;;  %v9105_v9 = vadd.f32 %v8995_v2, %v14514_v6  ;;  %10095 = vmatmul.msk.bf16.gmra.mxu1 %vm650_vm0, %v7962_v11 }
 0x796   : > { %10404 = vrcp.f32 %v9332_v50  ;;  %10122 = vmatmul.msk.bf16.gmra.mxu2 %vm650_vm0, %v8275_v0 }
 0x797   : > { %9467 = vst.msk [vmem:[%s14706_s24] sm:$0xff] %vm9466_vm1, %v9421_v20  ;;  %v9154_v8 = vadd.f32 %v14679_v39, %v9105_v9 }
 0x799   : > { %v9199_v58 = vsub.f32 0.0, %v9154_v8  ;;  %v8432_v13 = vpop.f32.mrf.mxu2 }
 0x79a   : > { %v8750_v6 = vpop.f32.mrf.mxu3  ;;  %v8504_v17 = vadd.f32 %v8432_v13, %v8191_v21 }
 0x79b   : > { %v10403_v18 = vpop.eup %10402  ;;  %v9247_v56 = vmul.f32 1.442695, %v9199_v58  ;;  %v8121_v48 = vpop.f32.mrf.mxu1 }
 0x79c   : > { %v10405_v24 = vpop.eup %10404  ;;  %v9333_v1 = vadd.f32 1.0, %v10403_v18  ;;  %v8998_v10 = vpop.f32.mrf.mxu0  ;;  %v8192_v11 = vadd.f32 %v8121_v48, %v14543_v30  ;;  %v14719_v25 = vadd.f32 %v8745_v57, %v8504_v17  ;;  %v8856_v48 = vld [vmem:[#allocation5 + $0xdb] sm:$0xff] }
 0x79d   : > { %v9422_v44 = vmin.f32 %v10405_v24, 1.0  ;;  %10406 = vpow2.f32 %v9247_v56  ;;  %v9106_v52 = vadd.f32 %v8998_v10, %v14523_v22 }
 0x79e   : > { %10408 = vrcp.f32 %v9333_v1 }
 0x79f   : > { %9468 = vst.msk [vmem:[%s14706_s24 + $0x8] sm:$0xff] %vm9466_vm1, %v9422_v44  ;;  %v9155_v50 = vadd.f32 %v14679_v39, %v9106_v52  ;;  %10164 = vmatmul.msk.bf16.gmra.mxu0 %vm650_vm0, %v8889_v59 }
 0x7a1   : > { %v9200_v51 = vsub.f32 0.0, %v9155_v50  ;;  %v8434_v0 = vpop.f32.mrf.mxu2 }
 0x7a2   : > { %v8752_v20 = vpop.f32.mrf.mxu3  ;;  %v8505_v22 = vadd.f32 %v8434_v0, %v8192_v11  ;;  %v8890_v11 = vpack.c.bf16 %v8857_v7, %v8856_v48 }
 0x7a3   : > { %v10407_v2 = vpop.eup %10406  ;;  %v9249_v12 = vmul.f32 1.442695, %v9200_v51  ;;  %v8124_v30 = vpop.f32.mrf.mxu1 }
 0x7a4   : > { %v10409_v9 = vpop.eup %10408  ;;  %v9334_v21 = vadd.f32 1.0, %v10407_v2  ;;  %v9000_v8 = vpop.f32.mrf.mxu0  ;;  %v8193_v49 = vadd.f32 %v8124_v30, %v14552_v62  ;;  %v14727_v18 = vadd.f32 %v8747_v55, %v8505_v22 }
 0x7a5   : > { %v9423_v58 = vmin.f32 %v10409_v9, 1.0  ;;  %10410 = vpow2.f32 %v9249_v12  ;;  %v9107_v57 = vadd.f32 %v9000_v8, %v14530_v61 }
 0x7a6   : > { %10412 = vrcp.f32 %v9334_v21 }
 0x7a7   : > { %9469 = vst.msk [vmem:[%s14706_s24 + $0x10] sm:$0xff] %vm9466_vm1, %v9423_v58  ;;  %v9156_v56 = vadd.f32 %v14679_v39, %v9107_v57 }
 0x7a9   : > { %v9201_v13 = vsub.f32 0.0, %v9156_v56  ;;  %v8437_v17 = vpop.f32.mrf.mxu2 }
 0x7aa   : > { %v8755_v10 = vpop.f32.mrf.mxu3  ;;  %v8506_v61 = vadd.f32 %v8437_v17, %v8193_v49 }
 0x7ab   : > { %v10411_v24 = vpop.eup %10410  ;;  %v9251_v1 = vmul.f32 1.442695, %v9201_v13  ;;  %v8126_v62 = vpop.f32.mrf.mxu1 }
 0x7ac   : > { %v10413_v59 = vpop.eup %10412  ;;  %v9335_v44 = vadd.f32 1.0, %v10411_v24  ;;  %v9003_v52 = vpop.f32.mrf.mxu0  ;;  %v8194_v51 = vadd.f32 %v8126_v62, %v14559_v47  ;;  %v14734_v2 = vadd.f32 %v8750_v6, %v8506_v61  ;;  %v8858_v61 = vld [vmem:[#allocation5 + $0xeb] sm:$0xff] }
 0x7ad   : > { %v9424_v55 = vmin.f32 %v10413_v59, 1.0  ;;  %10414 = vpow2.f32 %v9251_v1  ;;  %v9108_v50 = vadd.f32 %v9003_v52, %v14539_v35  ;;  %v8859_v1 = vld [vmem:[#allocation5 + $0xf3] sm:$0xff] }
 0x7ae   : > { %10416 = vrcp.f32 %v9335_v44 }
 0x7af   : > { %9470 = vst.msk [vmem:[%s14706_s24 + $0x18] sm:$0xff] %vm9466_vm1, %v9424_v55  ;;  %v9157_v12 = vadd.f32 %v14679_v39, %v9108_v50  ;;  %10165 = vmatmul.msk.bf16.gmra.mxu0 %vm650_vm0, %v8890_v11  ;;  %v8891_v55 = vpack.c.bf16 %v8859_v1, %v8858_v61  ;;  %v8861_v1 = vld [vmem:[#allocation5 + $0x103] sm:$0xff] }
 0x7b1   : > { %v9202_v0 = vsub.f32 0.0, %v9157_v12  ;;  %v8439_v22 = vpop.f32.mrf.mxu2 }
 0x7b2   : > { %v8757_v8 = vpop.f32.mrf.mxu3  ;;  %v8507_v35 = vadd.f32 %v8439_v22, %v8194_v51 }
 0x7b3   : > { %v10415_v9 = vpop.eup %10414  ;;  %v9253_v21 = vmul.f32 1.442695, %v9202_v0  ;;  %v8129_v47 = vpop.f32.mrf.mxu1 }
 0x7b4   : > { %v10417_v30 = vpop.eup %10416  ;;  %v9336_v58 = vadd.f32 1.0, %v10415_v9  ;;  %v9005_v57 = vpop.f32.mrf.mxu0  ;;  %v8195_v56 = vadd.f32 %v8129_v47, %v14568_v38  ;;  %v14742_v13 = vadd.f32 %v8752_v20, %v8507_v35 }
 0x7b5   : > { %v9425_v49 = vmin.f32 %v10417_v30, 1.0  ;;  %10418 = vpow2.f32 %v9253_v21  ;;  %v9109_v6 = vadd.f32 %v9005_v57, %v14546_v41 }
 0x7b6   : > { %10420 = vrcp.f32 %v9336_v58 }
 0x7b7   : > { %9471 = vst.msk [vmem:[%s14706_s24 + $0x20] sm:$0xff] %vm9466_vm1, %v9425_v49  ;;  %v9158_v7 = vadd.f32 %v14679_v39, %v9109_v6 }
 0x7b9   : > { %v9203_v24 = vsub.f32 0.0, %v9158_v7  ;;  %v8442_v59 = vpop.f32.mrf.mxu2 }
 0x7ba   : > { %v8760_v44 = vpop.f32.mrf.mxu3  ;;  %v8508_v41 = vadd.f32 %v8442_v59, %v8195_v56 }
 0x7bb   : > { %v10419_v17 = vpop.eup %10418  ;;  %v9255_v48 = vmul.f32 1.442695, %v9203_v24  ;;  %v8131_v38 = vpop.f32.mrf.mxu1 }
 0x7bc   : > { %v10421_v52 = vpop.eup %10420  ;;  %v9337_v62 = vadd.f32 1.0, %v10419_v17  ;;  %v9008_v11 = vpop.f32.mrf.mxu0  ;;  %v8196_v51 = vadd.f32 %v8131_v38, %v14575_v45  ;;  %v14749_v12 = vadd.f32 %v8755_v10, %v8508_v41 }
 0x7bd   : > { %v9426_v20 = vmin.f32 %v10421_v52, 1.0  ;;  %10422 = vpow2.f32 %v9255_v48  ;;  %v9110_v50 = vadd.f32 %v9008_v11, %v14555_v26  ;;  %v8860_v52 = vld [vmem:[#allocation5 + $0xfb] sm:$0xff] }
 0x7be   : > { %10424 = vrcp.f32 %v9337_v62  ;;  %v8892_v38 = vpack.c.bf16 %v8861_v1, %v8860_v52 }
 0x7bf   : > { %9472 = vst.msk [vmem:[%s14706_s24 + $0x28] sm:$0xff] %vm9466_vm1, %v9426_v20  ;;  %v9159_v0 = vadd.f32 %v14679_v39, %v9110_v50  ;;  %10166 = vmatmul.msk.bf16.gmra.mxu0 %vm650_vm0, %v8891_v55 }
 0x7c1   : > { %v9204_v9 = vsub.f32 0.0, %v9159_v0  ;;  %v8444_v30 = vpop.f32.mrf.mxu2 }
 0x7c2   : > { %v8762_v58 = vpop.f32.mrf.mxu3  ;;  %v8509_v26 = vadd.f32 %v8444_v30, %v8196_v51 }
 0x7c3   : > { %v10423_v21 = vpop.eup %10422  ;;  %v9257_v22 = vmul.f32 1.442695, %v9204_v9  ;;  %v8134_v45 = vpop.f32.mrf.mxu1 }
 0x7c4   : > { %v10425_v35 = vpop.eup %10424  ;;  %v9338_v57 = vadd.f32 1.0, %v10423_v21  ;;  %v9010_v47 = vpop.f32.mrf.mxu0  ;;  %v8197_v6 = vadd.f32 %v8134_v45, %v14584_v33  ;;  %v14757_v56 = vadd.f32 %v8757_v8, %v8509_v26 }
 0x7c5   : > { %v9427_v49 = vmin.f32 %v10425_v35, 1.0  ;;  %10426 = vpow2.f32 %v9257_v22  ;;  %v9111_v10 = vadd.f32 %v9010_v47, %v14562_v32 }
 0x7c6   : > { %10428 = vrcp.f32 %v9338_v57 }
 0x7c7   : > { %9473 = vst.msk [vmem:[%s14706_s24 + $0x30] sm:$0xff] %vm9466_vm1, %v9427_v49  ;;  %v9160_v7 = vadd.f32 %v14679_v39, %v9111_v10 }
 0x7c9   : > { %v9205_v24 = vsub.f32 0.0, %v9160_v7  ;;  %v8447_v59 = vpop.f32.mrf.mxu2  ;;  %v8863_v7 = vld [vmem:[#allocation5 + $0x113] sm:$0xff] }
 0x7ca   : > { %v8765_v61 = vpop.f32.mrf.mxu3  ;;  %v8510_v32 = vadd.f32 %v8447_v59, %v8197_v6  ;;  %v8862_v59 = vld [vmem:[#allocation5 + $0x10b] sm:$0xff] }
 0x7cb   : > { %v10427_v17 = vpop.eup %10426  ;;  %v9259_v48 = vmul.f32 1.442695, %v9205_v24  ;;  %v8136_v33 = vpop.f32.mrf.mxu1 }
 0x7cc   : > { %v10429_v62 = vpop.eup %10428  ;;  %v9339_v41 = vadd.f32 1.0, %v10427_v17  ;;  %v9013_v11 = vpop.f32.mrf.mxu0  ;;  %v8198_v20 = vadd.f32 %v8136_v33, %v14591_v46  ;;  %v14764_v50 = vadd.f32 %v8760_v44, %v8510_v32  ;;  %v8893_v32 = vpack.c.bf16 %v8863_v7, %v8862_v59 }
 0x7cd   : > { %v9428_v8 = vmin.f32 %v10429_v62, 1.0  ;;  %10430 = vpow2.f32 %v9259_v48  ;;  %v9112_v55 = vadd.f32 %v9013_v11, %v14571_v40 }
 0x7ce   : > { %10432 = vrcp.f32 %v9339_v41 }
 0x7cf   : > { %9474 = vst.msk [vmem:[%s14706_s24 + $0x38] sm:$0xff] %vm9466_vm1, %v9428_v8  ;;  %v9161_v51 = vadd.f32 %v14679_v39, %v9112_v55  ;;  %10167 = vmatmul.msk.bf16.gmra.mxu0 %vm650_vm0, %v8892_v38 }
 0x7d1   : > { %v9206_v0 = vsub.f32 0.0, %v9161_v51  ;;  %v8449_v22 = vpop.f32.mrf.mxu2 }
 0x7d2   : > { %v8767_v30 = vpop.f32.mrf.mxu3  ;;  %v8511_v40 = vadd.f32 %v8449_v22, %v8198_v20 }
 0x7d3   : > { %v10431_v9 = vpop.eup %10430  ;;  %v9261_v21 = vmul.f32 1.442695, %v9206_v0  ;;  %v8139_v46 = vpop.f32.mrf.mxu1 }
 0x7d4   : > { %v10433_v35 = vpop.eup %10432  ;;  %v9340_v57 = vadd.f32 1.0, %v10431_v9  ;;  %v9015_v26 = vpop.f32.mrf.mxu0  ;;  %v8199_v45 = vadd.f32 %v8139_v46, %v14600_v3  ;;  %v14772_v49 = vadd.f32 %v8762_v58, %v8511_v40 }
 0x7d5   : > { %v9429_v47 = vmin.f32 %v10433_v35, 1.0  ;;  %10434 = vpow2.f32 %v9261_v21  ;;  %v9113_v44 = vadd.f32 %v9015_v26, %v14578_v19 }
 0x7d6   : > { %10436 = vrcp.f32 %v9340_v57 }
 0x7d7   : > { %9475 = vst.msk [vmem:[%s14706_s24 + $0x40] sm:$0xff] %vm9466_vm1, %v9429_v47  ;;  %v9162_v10 = vadd.f32 %v14679_v39, %v9113_v44  ;;  %v8865_v44 = vld [vmem:[#allocation5 + $0x123] sm:$0xff] }
 0x7d9   : > { %v9207_v6 = vsub.f32 0.0, %v9162_v10  ;;  %v8452_v17 = vpop.f32.mrf.mxu2 }
 0x7da   : > { %v8770_v48 = vpop.f32.mrf.mxu3  ;;  %v8512_v19 = vadd.f32 %v8452_v17, %v8199_v45 }
 0x7db   : > { %v10435_v24 = vpop.eup %10434  ;;  %v9263_v1 = vmul.f32 1.442695, %v9207_v6  ;;  %v8141_v3 = vpop.f32.mrf.mxu1 }
 0x7dc   : > { %v10437_v52 = vpop.eup %10436  ;;  %v9341_v62 = vadd.f32 1.0, %v10435_v24  ;;  %v9018_v41 = vpop.f32.mrf.mxu0  ;;  %v8200_v33 = vadd.f32 %v8141_v3, %v14607_v5  ;;  %v14779_v38 = vadd.f32 %v8765_v61, %v8512_v19  ;;  %v8864_v24 = vld [vmem:[#allocation5 + $0x11b] sm:$0xff] }
 0x7dd   : > { %v9430_v58 = vmin.f32 %v10437_v52, 1.0  ;;  %10438 = vpow2.f32 %v9263_v1  ;;  %v9114_v11 = vadd.f32 %v9018_v41, %v14587_v4  ;;  %v8894_v52 = vpack.c.bf16 %v8865_v44, %v8864_v24 }
 0x7de   : > { %10440 = vrcp.f32 %v9341_v62 }
 0x7df   : > { %9476 = vst.msk [vmem:[%s14706_s24 + $0x48] sm:$0xff] %vm9466_vm1, %v9430_v58  ;;  %v9163_v8 = vadd.f32 %v14679_v39, %v9114_v11  ;;  %10168 = vmatmul.msk.bf16.gmra.mxu0 %vm650_vm0, %v8893_v32 }
 0x7e1   : > { %v9208_v55 = vsub.f32 0.0, %v9163_v8  ;;  %v8454_v0 = vpop.f32.mrf.mxu2 }
 0x7e2   : > { %v8772_v9 = vpop.f32.mrf.mxu3  ;;  %v8513_v4 = vadd.f32 %v8454_v0, %v8200_v33 }
 0x7e3   : > { %v10439_v20 = vpop.eup %10438  ;;  %v9265_v51 = vmul.f32 1.442695, %v9208_v55  ;;  %v8144_v5 = vpop.f32.mrf.mxu1 }
 0x7e4   : > { %v10441_v21 = vpop.eup %10440  ;;  %v9342_v22 = vadd.f32 1.0, %v10439_v20  ;;  %v9020_v35 = vpop.f32.mrf.mxu0  ;;  %v8201_v40 = vadd.f32 %v8144_v5, %v14616_v29  ;;  %v14787_v26 = vadd.f32 %v8767_v30, %v8513_v4  ;;  %v8867_v5 = vld [vmem:[#allocation5 + $0x133] sm:$0xff] }
 0x7e5   : > { %v9431_v57 = vmin.f32 %v10441_v21, 1.0  ;;  %10442 = vpow2.f32 %v9265_v51  ;;  %v9115_v61 = vadd.f32 %v9020_v35, %v14594_v27 }
 0x7e6   : > { %10444 = vrcp.f32 %v9342_v22 }
 0x7e7   : > { %9477 = vst.msk [vmem:[%s14706_s24 + $0x50] sm:$0xff] %vm9466_vm1, %v9431_v57  ;;  %v9164_v46 = vadd.f32 %v14679_v39, %v9115_v61 }
 0x7e9   : > { %v9209_v47 = vsub.f32 0.0, %v9164_v46  ;;  %v8457_v6 = vpop.f32.mrf.mxu2 }
 0x7ea   : > { %v8775_v7 = vpop.f32.mrf.mxu3  ;;  %v8514_v27 = vadd.f32 %v8457_v6, %v8201_v40 }
 0x7eb   : > { %v10443_v45 = vpop.eup %10442  ;;  %v9267_v10 = vmul.f32 1.442695, %v9209_v47  ;;  %v8146_v29 = vpop.f32.mrf.mxu1  ;;  %v8866_v47 = vld [vmem:[#allocation5 + $0x12b] sm:$0xff] }
 0x7ec   : > { %v10445_v1 = vpop.eup %10444  ;;  %v9343_v17 = vadd.f32 1.0, %v10443_v45  ;;  %v9023_v59 = vpop.f32.mrf.mxu0  ;;  %v8202_v19 = vadd.f32 %v8146_v29, %v14623_v54  ;;  %v14794_v41 = vadd.f32 %v8770_v48, %v8514_v27  ;;  %v8895_v6 = vpack.c.bf16 %v8867_v5, %v8866_v47 }
 0x7ed   : > { %v9432_v30 = vmin.f32 %v10445_v1, 1.0  ;;  %10446 = vpow2.f32 %v9267_v10  ;;  %v9116_v62 = vadd.f32 %v9023_v59, %v14603_v15 }
 0x7ee   : > { %10448 = vrcp.f32 %v9343_v17 }
 0x7ef   : > { %9478 = vst.msk [vmem:[%s14706_s24 + $0x58] sm:$0xff] %vm9466_vm1, %v9432_v30  ;;  %v9165_v3 = vadd.f32 %v14679_v39, %v9116_v62  ;;  %10169 = vmatmul.msk.bf16.gmra.mxu0 %vm650_vm0, %v8894_v52 }
 0x7f1   : > { %v9210_v32 = vsub.f32 0.0, %v9165_v3  ;;  %v8459_v33 = vpop.f32.mrf.mxu2 }
 0x7f2   : > { %v8777_v8 = vpop.f32.mrf.mxu3  ;;  %v8515_v15 = vadd.f32 %v8459_v33, %v8202_v19 }
 0x7f3   : > { %v10447_v58 = vpop.eup %10446  ;;  %v9269_v11 = vmul.f32 1.442695, %v9210_v32  ;;  %v8149_v54 = vpop.f32.mrf.mxu1 }
 0x7f4   : > { %v10449_v55 = vpop.eup %10448  ;;  %v9344_v20 = vadd.f32 1.0, %v10447_v58  ;;  %v9025_v51 = vpop.f32.mrf.mxu0  ;;  %v8203_v21 = vadd.f32 %v8149_v54, %v14632_v60  ;;  %v14802_v22 = vadd.f32 %v8772_v9, %v8515_v15  ;;  %v8869_v15 = vld [vmem:[#allocation5 + $0x143] sm:$0xff] }
 0x7f5   : > { %v9433_v0 = vmin.f32 %v10449_v55, 1.0  ;;  %10450 = vpow2.f32 %v9269_v11  ;;  %v9117_v48 = vadd.f32 %v9025_v51, %v14610_v42 }
 0x7f6   : > { %10452 = vrcp.f32 %v9344_v20 }
 0x7f7   : > { %9479 = vst.msk [vmem:[%s14706_s24 + $0x60] sm:$0xff] %vm9466_vm1, %v9433_v0  ;;  %v9166_v4 = vadd.f32 %v14679_v39, %v9117_v48  ;;  %v8868_v48 = vld [vmem:[#allocation5 + $0x13b] sm:$0xff] }
 0x7f9   : > { %v9211_v35 = vsub.f32 0.0, %v9166_v4  ;;  %v8462_v40 = vpop.f32.mrf.mxu2 }
 0x7fa   : > { %v8780_v46 = vpop.f32.mrf.mxu3  ;;  %v8516_v42 = vadd.f32 %v8462_v40, %v8203_v21 }
 0x7fb   : > { %v10451_v57 = vpop.eup %10450  ;;  %v9271_v61 = vmul.f32 1.442695, %v9211_v35  ;;  %v8151_v60 = vpop.f32.mrf.mxu1 }
 0x7fc   : > { %v10453_v44 = vpop.eup %10452  ;;  %v9345_v45 = vadd.f32 1.0, %v10451_v57  ;;  %v9028_v10 = vpop.f32.mrf.mxu0  ;;  %v8204_v1 = vadd.f32 %v8151_v60, %v14639_v36  ;;  %v14809_v17 = vadd.f32 %v8775_v7, %v8516_v42  ;;  %v8896_v57 = vpack.c.bf16 %v8869_v15, %v8868_v48 }
 0x7fd   : > { %v9434_v9 = vmin.f32 %v10453_v44, 1.0  ;;  %10454 = vpow2.f32 %v9271_v61  ;;  %v9118_v24 = vadd.f32 %v9028_v10, %v14619_v37 }
 0x7fe   : > { %10456 = vrcp.f32 %v9345_v45 }
 0x7ff   : > { %9480 = vst.msk [vmem:[%s14706_s24 + $0x68] sm:$0xff] %vm9466_vm1, %v9434_v9  ;;  %v9167_v27 = vadd.f32 %v14679_v39, %v9118_v24  ;;  %10170 = vmatmul.msk.bf16.gmra.mxu0 %vm650_vm0, %v8895_v6 }
 0x801   : > { %v9212_v59 = vsub.f32 0.0, %v9167_v27  ;;  %v8464_v30 = vpop.f32.mrf.mxu2 }
 0x802   : > { %v8782_v62 = vpop.f32.mrf.mxu3  ;;  %v8517_v37 = vadd.f32 %v8464_v30, %v8204_v1 }
 0x803   : > { %v10455_v29 = vpop.eup %10454  ;;  %v9273_v52 = vmul.f32 1.442695, %v9212_v59  ;;  %v8154_v36 = vpop.f32.mrf.mxu1 }
 0x804   : > { %v10457_v19 = vpop.eup %10456  ;;  %v9346_v3 = vadd.f32 1.0, %v10455_v29  ;;  %v9030_v32 = vpop.f32.mrf.mxu0  ;;  %v8205_v11 = vadd.f32 %v8154_v36, %v14648_v43  ;;  %v14817_v33 = vadd.f32 %v8777_v8, %v8517_v37  ;;  %v15446_v29 = vld [vmem:[#allocation57_spill] sm:$0xff] }
 0x805   : > { %v9435_v58 = vmin.f32 %v10457_v19, 1.0  ;;  %10458 = vpow2.f32 %v9273_v52  ;;  %v9119_v7 = vadd.f32 %v9030_v32, %v14626_v23  ;;  %v8871_v37 = vld [vmem:[#allocation5 + $0x153] sm:$0xff] }
 0x806   : > { %10460 = vrcp.f32 %v9346_v3 }
 0x807   : > { %9481 = vst.msk [vmem:[%s14706_s24 + $0x70] sm:$0xff] %vm9466_vm1, %v9435_v58  ;;  %v9168_v55 = vadd.f32 %v14679_v39, %v9119_v7 }
 0x809   : > { %v9213_v20 = vsub.f32 0.0, %v9168_v55  ;;  %v8467_v0 = vpop.f32.mrf.mxu2 }
 0x80a   : > { %v8785_v21 = vpop.f32.mrf.mxu3  ;;  %v8518_v23 = vadd.f32 %v8467_v0, %v8205_v11 }
 0x80b   : > { %v10459_v51 = vpop.eup %10458  ;;  %v9275_v54 = vmul.f32 1.442695, %v9213_v20  ;;  %v8156_v43 = vpop.f32.mrf.mxu1 }
 0x80c   : > { %v10461_v4 = vpop.eup %10460  ;;  %v9347_v35 = vadd.f32 1.0, %v10459_v51  ;;  %v9033_v5 = vpop.f32.mrf.mxu0  ;;  %v8206_v40 = vadd.f32 %v8156_v43, %v14655_v63  ;;  %v14824_v47 = vadd.f32 %v8780_v46, %v8518_v23  ;;  %v15445_v46 = vld [vmem:[#allocation60_spill] sm:$0xff] }
 0x80d   : > { %v9436_v8 = vmin.f32 %v10461_v4, 1.0  ;;  %10462 = vpow2.f32 %v9275_v54  ;;  %v9120_v61 = vadd.f32 %v9033_v5, %v14635_v28  ;;  %v8870_v51 = vld [vmem:[#allocation5 + $0x14b] sm:$0xff] }
 0x80e   : > { %10464 = vrcp.f32 %v9347_v35  ;;  %v8897_v48 = vpack.c.bf16 %v8871_v37, %v8870_v51 }
 0x80f   : > { %9482 = vst.msk [vmem:[%s14706_s24 + $0x78] sm:$0xff] %vm9466_vm1, %v9436_v8  ;;  %v9169_v44 = vadd.f32 %v14679_v39, %v9120_v61  ;;  %10171 = vmatmul.msk.bf16.gmra.mxu0 %vm650_vm0, %v8896_v57 }
 0x811   : > { %v9214_v45 = vsub.f32 0.0, %v9169_v44  ;;  %v8469_v60 = vpop.f32.mrf.mxu2 }
 0x812   : > { %v8787_v6 = vpop.f32.mrf.mxu3  ;;  %v8519_v28 = vadd.f32 %v8469_v60, %v8206_v40  ;;  %v8873_v60 = vld [vmem:[#allocation5 + $0x163] sm:$0xff] }
 0x813   : > { %v10463_v42 = vpop.eup %10462  ;;  %v9277_v10 = vmul.f32 1.442695, %v9214_v45  ;;  %v8159_v63 = vpop.f32.mrf.mxu1  ;;  %v15448_v45 = vld [vmem:[#allocation59_spill] sm:$0xff] }
 0x814   : > { %v10465_v9 = vpop.eup %10464  ;;  %v9348_v24 = vadd.f32 1.0, %v10463_v42  ;;  %v9035_v1 = vpop.f32.mrf.mxu0  ;;  %v8207_v52 = vadd.f32 %v8159_v63, %v15446_v29  ;;  %v14832_v30 = vadd.f32 %v8782_v62, %v8519_v28  ;;  %v15447_v62 = vld [vmem:[#allocation12_spill] sm:$0xff]  ;;  %v8872_v63 = vld [vmem:[#allocation5 + $0x15b] sm:$0xff] }
 0x815   : > { %v9437_v27 = vmin.f32 %v10465_v9, 1.0  ;;  %10466 = vpow2.f32 %v9277_v10  ;;  %v9121_v59 = vadd.f32 %v9035_v1, %v15445_v46 }
 0x816   : > { %10468 = vrcp.f32 %v9348_v24 }
 0x817   : > { %9483 = vst.msk [vmem:[%s14706_s24 + $0x80] sm:$0xff] %vm9466_vm1, %v9437_v27  ;;  %v9170_v19 = vadd.f32 %v14679_v39, %v9121_v59  ;;  %v8898_v59 = vpack.c.bf16 %v8873_v60, %v8872_v63  ;;  %v8876_v60 = vld [vmem:[#allocation5 + $0x17b] sm:$0xff] }
 0x819   : > { %v9215_v3 = vsub.f32 0.0, %v9170_v19  ;;  %v8472_v58 = vpop.f32.mrf.mxu2 }
 0x81a   : > { %v8520_v55 = vadd.f32 %v8472_v58, %v8207_v52 }
 0x81b   : > { %v10467_v32 = vpop.eup %10466  ;;  %v9279_v36 = vmul.f32 1.442695, %v9215_v3  ;;  %v8161_v15 = vpop.f32.mrf.mxu1 }
 0x81c   : > { %v10469_v7 = vpop.eup %10468  ;;  %v9349_v11 = vadd.f32 1.0, %v10467_v32  ;;  %v9038_v20 = vpop.f32.mrf.mxu0  ;;  %v14838_v4 = vadd.f32 %v8785_v21, %v8520_v55 }
 0x81d   : > { %v9438_v54 = vmin.f32 %v10469_v7, 1.0  ;;  %10470 = vpow2.f32 %v9279_v36  ;;  %v9122_v0 = vadd.f32 %v9038_v20, %v15447_v62  ;;  %v15449_v7 = vld [vmem:[#allocation64_spill] sm:$0xff]  ;;  %v8875_v20 = vld [vmem:[#allocation5 + $0x173] sm:$0xff] }
 0x81e   : > { %10472 = vrcp.f32 %v9349_v11 }
 0x81f   : > { %9484 = vst.msk [vmem:[%s14706_s24 + $0x88] sm:$0xff] %vm9466_vm1, %v9438_v54  ;;  %v9171_v35 = vadd.f32 %v14679_v39, %v9122_v0  ;;  %10172 = vmatmul.msk.bf16.gmra.mxu0 %vm650_vm0, %v8897_v48  ;;  %v8874_v48 = vld [vmem:[#allocation5 + $0x16b] sm:$0xff] }
 0x821   : > { %v9216_v23 = vsub.f32 0.0, %v9171_v35  ;;  %v8474_v57 = vpop.f32.mrf.mxu2 }
 0x823   : > { %v10471_v5 = vpop.eup %10470  ;;  %v9281_v43 = vmul.f32 1.442695, %v9216_v23 }
 0x824   : > { %v10473_v8 = vpop.eup %10472  ;;  %v9350_v61 = vadd.f32 1.0, %v10471_v5  ;;  %v9040_v40 = vpop.f32.mrf.mxu0  ;;  %v8899_v5 = vpack.c.bf16 %v8875_v20, %v8874_v48 }
 0x825   : > { %v9439_v44 = vmin.f32 %v10473_v8, 1.0  ;;  %10474 = vpow2.f32 %v9281_v43  ;;  %v9123_v42 = vadd.f32 %v9040_v40, %v15448_v45 }
 0x826   : > { %10476 = vrcp.f32 %v9350_v61 }
 0x827   : > { %9485 = vst.msk [vmem:[%s14706_s24 + $0x90] sm:$0xff] %vm9466_vm1, %v9439_v44  ;;  %v9172_v21 = vadd.f32 %v14679_v39, %v9123_v42 }
 0x829   : > { %v9217_v10 = vsub.f32 0.0, %v9172_v21 }
 0x82b   : > { %v10475_v6 = vpop.eup %10474  ;;  %v9283_v9 = vmul.f32 1.442695, %v9217_v10 }
 0x82c   : > { %v10477_v24 = vpop.eup %10476  ;;  %v9351_v28 = vadd.f32 1.0, %v10475_v6  ;;  %v9043_v1 = vpop.f32.mrf.mxu0  ;;  %v8877_v6 = vld [vmem:[#allocation5 + $0x183] sm:$0xff] }
 0x82d   : > { %v9440_v27 = vmin.f32 %v10477_v24, 1.0  ;;  %10478 = vpow2.f32 %v9283_v9  ;;  %v9124_v46 = vadd.f32 %v9043_v1, %v14667_v34 }
 0x82e   : > { %10480 = vrcp.f32 %v9351_v28 }
 0x82f   : > { %9486 = vst.msk [vmem:[%s14706_s24 + $0x98] sm:$0xff] %vm9466_vm1, %v9440_v27  ;;  %v9173_v29 = vadd.f32 %v14679_v39, %v9124_v46  ;;  %10173 = vmatmul.msk.bf16.gmra.mxu0 %vm650_vm0, %v8898_v59 }
 0x831   : > { %v9218_v52 = vsub.f32 0.0, %v9173_v29 }
 0x833   : > { %v10479_v19 = vpop.eup %10478  ;;  %v9285_v3 = vmul.f32 1.442695, %v9218_v52 }
 0x834   : > { %v10481_v37 = vpop.eup %10480  ;;  %v9352_v32 = vadd.f32 1.0, %v10479_v19  ;;  %v9045_v36 = vpop.f32.mrf.mxu0 }
 0x835   : > { %v9441_v58 = vmin.f32 %v10481_v37, 1.0  ;;  %10482 = vpow2.f32 %v9285_v3  ;;  %v9125_v11 = vadd.f32 %v9045_v36, %v15449_v7  ;;  %v8878_v7 = vld [vmem:[#allocation5 + $0x18b] sm:$0xff] }
 0x836   : > { %10484 = vrcp.f32 %v9352_v32  ;;  %v8901_v20 = vpack.c.bf16 %v8878_v7, %v8878_v7 }
 0x837   : > { %9487 = vst.msk [vmem:[%s14706_s24 + $0xa0] sm:$0xff] %vm9466_vm1, %v9441_v58  ;;  %v9174_v34 = vadd.f32 %v14679_v39, %v9125_v11 }
 0x839   : > { %v9219_v55 = vsub.f32 0.0, %v9174_v34 }
 0x83b   : > { %v10483_v15 = vpop.eup %10482  ;;  %v9287_v51 = vmul.f32 1.442695, %v9219_v55 }
 0x83c   : > { %v10485_v54 = vpop.eup %10484  ;;  %v9353_v62 = vadd.f32 1.0, %v10483_v15  ;;  %v9048_v0 = vpop.f32.mrf.mxu0 }
 0x83d   : > { %v9442_v35 = vmin.f32 %v10485_v54, 1.0  ;;  %10486 = vpow2.f32 %v9287_v51  ;;  %v9126_v23 = vadd.f32 %v9048_v0, %v14683_v53 }
 0x83e   : > { %10488 = vrcp.f32 %v9353_v62 }
 0x83f   : > { %9488 = vst.msk [vmem:[%s14706_s24 + $0xa8] sm:$0xff] %vm9466_vm1, %v9442_v35  ;;  %v9175_v43 = vadd.f32 %v14679_v39, %v9126_v23  ;;  %10174 = vmatmul.msk.bf16.gmra.mxu0 %vm650_vm0, %v8899_v5 }
 0x841   : > { %v9220_v57 = vsub.f32 0.0, %v9175_v43 }
 0x843   : > { %v10487_v8 = vpop.eup %10486  ;;  %v9289_v61 = vmul.f32 1.442695, %v9220_v57 }
 0x844   : > { %v10489_v40 = vpop.eup %10488  ;;  %v9354_v44 = vadd.f32 1.0, %v10487_v8  ;;  %v9050_v45 = vpop.f32.mrf.mxu0 }
 0x845   : > { %v9443_v42 = vmin.f32 %v10489_v40, 1.0  ;;  %10490 = vpow2.f32 %v9289_v61  ;;  %v9127_v21 = vadd.f32 %v9050_v45, %v14689_v31  ;;  %v8900_v31 = vpack.c.bf16 %v8877_v6, %v8876_v60 }
 0x846   : > { %10492 = vrcp.f32 %v9354_v44 }
 0x847   : > { %9489 = vst.msk [vmem:[%s14706_s24 + $0xb0] sm:$0xff] %vm9466_vm1, %v9443_v42  ;;  %v9176_v53 = vadd.f32 %v14679_v39, %v9127_v21 }
 0x849   : > { %v9221_v10 = vsub.f32 0.0, %v9176_v53 }
 0x84b   : > { %v10491_v9 = vpop.eup %10490  ;;  %v9291_v24 = vmul.f32 1.442695, %v9221_v10 }
 0x84c   : > { %v10493_v28 = vpop.eup %10492  ;;  %v9355_v1 = vadd.f32 1.0, %v10491_v9  ;;  %v9053_v63 = vpop.f32.mrf.mxu0 }
 0x84d   : > { %v9444_v27 = vmin.f32 %v10493_v28, 1.0  ;;  %10494 = vpow2.f32 %v9291_v24  ;;  %v9128_v46 = vadd.f32 %v9053_v63, %v14697_v14 }
 0x84e   : > { %10496 = vrcp.f32 %v9355_v1 }
 0x84f   : > { %9490 = vst.msk [vmem:[%s14706_s24 + $0xb8] sm:$0xff] %vm9466_vm1, %v9444_v27  ;;  %v9177_v59 = vadd.f32 %v14679_v39, %v9128_v46  ;;  %10175 = vmatmul.msk.bf16.gmra.mxu0 %vm650_vm0, %v8900_v31 }
 0x851   : > { %v9222_v29 = vsub.f32 0.0, %v9177_v59 }
 0x853   : > { %v10495_v52 = vpop.eup %10494  ;;  %v9293_v19 = vmul.f32 1.442695, %v9222_v29 }
 0x854   : > { %v10497_v3 = vpop.eup %10496  ;;  %v9356_v37 = vadd.f32 1.0, %v10495_v52  ;;  %v9055_v32 = vpop.f32.mrf.mxu0 }
 0x855   : > { %v9445_v36 = vmin.f32 %v10497_v3, 1.0  ;;  %10498 = vpow2.f32 %v9293_v19  ;;  %v9129_v58 = vadd.f32 %v9055_v32, %v14710_v16 }
 0x856   : > { %10500 = vrcp.f32 %v9356_v37 }
 0x857   : > { %9491 = vst.msk [vmem:[%s14706_s24 + $0xc0] sm:$0xff] %vm9466_vm1, %v9445_v36  ;;  %v9178_v14 = vadd.f32 %v14679_v39, %v9129_v58  ;;  %v14881_v39 = vld [vmem:[%s14969_s11] ss:$0 sm:$0xff] }
 0x859   : > { %v9223_v11 = vsub.f32 0.0, %v9178_v14 }
 0x85b   : > { %v10499_v34 = vpop.eup %10498  ;;  %v9295_v55 = vmul.f32 1.442695, %v9223_v11 }
 0x85c   : > { %v10501_v15 = vpop.eup %10500  ;;  %v9357_v51 = vadd.f32 1.0, %v10499_v34  ;;  %v9058_v54 = vpop.f32.mrf.mxu0 }
 0x85d   : > { %v9446_v62 = vmin.f32 %v10501_v15, 1.0  ;;  %10502 = vpow2.f32 %v9295_v55  ;;  %v9130_v0 = vadd.f32 %v9058_v54, %v14719_v25 }
 0x85e   : > { %10504 = vrcp.f32 %v9357_v51 }
 0x85f   : > { %9492 = vst.msk [vmem:[%s14706_s24 + $0xc8] sm:$0xff] %vm9466_vm1, %v9446_v62  ;;  %v9179_v16 = vadd.f32 %v14881_v39, %v9130_v0  ;;  %10176 = vmatmul.msk.bf16.gmra.mxu0 %vm650_vm0, %v8901_v20 }
 0x861   : > { %v9224_v48 = vsub.f32 0.0, %v9179_v16 }
 0x863   : > { %v10503_v35 = vpop.eup %10502  ;;  %v9297_v23 = vmul.f32 1.442695, %v9224_v48 }
 0x864   : > { %v10505_v5 = vpop.eup %10504  ;;  %v9358_v43 = vadd.f32 1.0, %v10503_v35  ;;  %v9060_v57 = vpop.f32.mrf.mxu0 }
 0x865   : > { %v9447_v25 = vmin.f32 %v10505_v5, 1.0  ;;  %10506 = vpow2.f32 %v9297_v23  ;;  %v9131_v8 = vadd.f32 %v9060_v57, %v14727_v18 }
 0x866   : > { %10508 = vrcp.f32 %v9358_v43 }
 0x867   : > { %9493 = vst.msk [vmem:[%s14706_s24 + $0xd0] sm:$0xff] %vm9466_vm1, %v9447_v25  ;;  %v9180_v61 = vadd.f32 %v14881_v39, %v9131_v8 }
 0x869   : > { %v9225_v40 = vsub.f32 0.0, %v9180_v61 }
 0x86b   : > { %v10507_v44 = vpop.eup %10506  ;;  %v9299_v45 = vmul.f32 1.442695, %v9225_v40 }
 0x86c   : > { %v10509_v42 = vpop.eup %10508  ;;  %v9359_v21 = vadd.f32 1.0, %v10507_v44  ;;  %v9063_v53 = vpop.f32.mrf.mxu0 }
 0x86d   : > { %v9448_v10 = vmin.f32 %v10509_v42, 1.0  ;;  %10510 = vpow2.f32 %v9299_v45  ;;  %v9132_v60 = vadd.f32 %v9063_v53, %v14734_v2 }
 0x86e   : > { %10512 = vrcp.f32 %v9359_v21 }
 0x86f   : > { %9494 = vst.msk [vmem:[%s14706_s24 + $0xd8] sm:$0xff] %vm9466_vm1, %v9448_v10  ;;  %v9181_v18 = vadd.f32 %v14881_v39, %v9132_v60 }
 0x871   : > { %v9226_v6 = vsub.f32 0.0, %v9181_v18 }
 0x873   : > { %v10511_v9 = vpop.eup %10510  ;;  %v9301_v24 = vmul.f32 1.442695, %v9226_v6 }
 0x874   : > { %v10513_v28 = vpop.eup %10512  ;;  %v9360_v1 = vadd.f32 1.0, %v10511_v9  ;;  %v9065_v63 = vpop.f32.mrf.mxu0 }
 0x875   : > { %v9449_v27 = vmin.f32 %v10513_v28, 1.0  ;;  %10514 = vpow2.f32 %v9301_v24  ;;  %v9133_v46 = vadd.f32 %v9065_v63, %v14742_v13 }
 0x876   : > { %10516 = vrcp.f32 %v9360_v1 }
 0x877   : > { %9495 = vst.msk [vmem:[%s14706_s24 + $0xe0] sm:$0xff] %vm9466_vm1, %v9449_v27  ;;  %v9182_v2 = vadd.f32 %v14881_v39, %v9133_v46 }
 0x879   : > { %v9227_v31 = vsub.f32 0.0, %v9182_v2 }
 0x87b   : > { %v10515_v59 = vpop.eup %10514  ;;  %v9303_v29 = vmul.f32 1.442695, %v9227_v31 }
 0x87c   : > { %v10517_v52 = vpop.eup %10516  ;;  %v9361_v19 = vadd.f32 1.0, %v10515_v59  ;;  %v9068_v3 = vpop.f32.mrf.mxu0 }
 0x87d   : > { %v9450_v37 = vmin.f32 %v10517_v52, 1.0  ;;  %10518 = vpow2.f32 %v9303_v29  ;;  %v9134_v32 = vadd.f32 %v9068_v3, %v14749_v12 }
 0x87e   : > { %10520 = vrcp.f32 %v9361_v19 }
 0x87f   : > { %9496 = vst.msk [vmem:[%s14706_s24 + $0xe8] sm:$0xff] %vm9466_vm1, %v9450_v37  ;;  %v9183_v13 = vadd.f32 %v14881_v39, %v9134_v32 }
 0x881   : > { %v9228_v36 = vsub.f32 0.0, %v9183_v13 }
 0x883   : > { %v10519_v58 = vpop.eup %10518  ;;  %v9305_v14 = vmul.f32 1.442695, %v9228_v36 }
 0x884   : > { %v10521_v7 = vpop.eup %10520  ;;  %v9362_v11 = vadd.f32 1.0, %v10519_v58  ;;  %v9070_v34 = vpop.f32.mrf.mxu0 }
 0x885   : > { %v9451_v55 = vmin.f32 %v10521_v7, 1.0  ;;  %10522 = vpow2.f32 %v9305_v14  ;;  %v9135_v20 = vadd.f32 %v9070_v34, %v14757_v56 }
 0x886   : > { %10524 = vrcp.f32 %v9362_v11 }
 0x887   : > { %9497 = vst.msk [vmem:[%s14706_s24 + $0xf0] sm:$0xff] %vm9466_vm1, %v9451_v55  ;;  %v9184_v12 = vadd.f32 %v14881_v39, %v9135_v20 }
 0x889   : > { %v9229_v15 = vsub.f32 0.0, %v9184_v12 }
 0x88b   : > { %v10523_v51 = vpop.eup %10522  ;;  %v9307_v54 = vmul.f32 1.442695, %v9229_v15 }
 0x88c   : > { %v10525_v62 = vpop.eup %10524  ;;  %v9363_v0 = vadd.f32 1.0, %v10523_v51  ;;  %v9073_v16 = vpop.f32.mrf.mxu0 }
 0x88d   : > { %v9452_v48 = vmin.f32 %v10525_v62, 1.0  ;;  %10526 = vpow2.f32 %v9307_v54  ;;  %v9136_v35 = vadd.f32 %v9073_v16, %v14764_v50 }
 0x88e   : > { %10528 = vrcp.f32 %v9363_v0 }
 0x88f   : > { %9498 = vst.msk [vmem:[%s14706_s24 + $0xf8] sm:$0xff] %vm9466_vm1, %v9452_v48  ;;  %v9185_v56 = vadd.f32 %v14881_v39, %v9136_v35 }
 0x891   : > { %v9230_v23 = vsub.f32 0.0, %v9185_v56 }
 0x893   : > { %v10527_v5 = vpop.eup %10526  ;;  %v9309_v43 = vmul.f32 1.442695, %v9230_v23 }
 0x894   : > { %v10529_v57 = vpop.eup %10528  ;;  %v9364_v25 = vadd.f32 1.0, %v10527_v5  ;;  %v9075_v8 = vpop.f32.mrf.mxu0 }
 0x895   : > { %v9453_v61 = vmin.f32 %v10529_v57, 1.0  ;;  %10530 = vpow2.f32 %v9309_v43  ;;  %v9137_v40 = vadd.f32 %v9075_v8, %v14772_v49 }
 0x896   : > { %10532 = vrcp.f32 %v9364_v25 }
 0x897   : > { %9499 = vst.msk [vmem:[%s14706_s24 + $0x100] sm:$0xff] %vm9466_vm1, %v9453_v61  ;;  %v9186_v50 = vadd.f32 %v14881_v39, %v9137_v40 }
 0x899   : > { %v9231_v44 = vsub.f32 0.0, %v9186_v50 }
 0x89b   : > { %v10531_v45 = vpop.eup %10530  ;;  %v9311_v42 = vmul.f32 1.442695, %v9231_v44 }
 0x89c   : > { %v10533_v21 = vpop.eup %10532  ;;  %v9365_v53 = vadd.f32 1.0, %v10531_v45  ;;  %v9078_v10 = vpop.f32.mrf.mxu0 }
 0x89d   : > { %v9454_v60 = vmin.f32 %v10533_v21, 1.0  ;;  %10534 = vpow2.f32 %v9311_v42  ;;  %v9138_v18 = vadd.f32 %v9078_v10, %v14779_v38 }
 0x89e   : > { %10536 = vrcp.f32 %v9365_v53 }
 0x89f   : > { %9500 = vst.msk [vmem:[%s14706_s24 + $0x108] sm:$0xff] %vm9466_vm1, %v9454_v60  ;;  %v9187_v49 = vadd.f32 %v14881_v39, %v9138_v18 }
 0x8a1   : > { %v9232_v6 = vsub.f32 0.0, %v9187_v49 }
 0x8a3   : > { %v10535_v9 = vpop.eup %10534  ;;  %v9313_v24 = vmul.f32 1.442695, %v9232_v6 }
 0x8a4   : > { %v10537_v28 = vpop.eup %10536  ;;  %v9366_v1 = vadd.f32 1.0, %v10535_v9  ;;  %v9080_v63 = vpop.f32.mrf.mxu0 }
 0x8a5   : > { %v9455_v27 = vmin.f32 %v10537_v28, 1.0  ;;  %10538 = vpow2.f32 %v9313_v24  ;;  %v9139_v46 = vadd.f32 %v9080_v63, %v14787_v26 }
 0x8a6   : > { %10540 = vrcp.f32 %v9366_v1 }
 0x8a7   : > { %9501 = vst.msk [vmem:[%s14706_s24 + $0x110] sm:$0xff] %vm9466_vm1, %v9455_v27  ;;  %v9188_v38 = vadd.f32 %v14881_v39, %v9139_v46 }
 0x8a9   : > { %v9233_v2 = vsub.f32 0.0, %v9188_v38 }
 0x8ab   : > { %v10539_v31 = vpop.eup %10538  ;;  %v9315_v59 = vmul.f32 1.442695, %v9233_v2 }
 0x8ac   : > { %v10541_v29 = vpop.eup %10540  ;;  %v9367_v52 = vadd.f32 1.0, %v10539_v31  ;;  %v9083_v19 = vpop.f32.mrf.mxu0 }
 0x8ad   : > { %v9456_v3 = vmin.f32 %v10541_v29, 1.0  ;;  %10542 = vpow2.f32 %v9315_v59  ;;  %v9140_v37 = vadd.f32 %v9083_v19, %v14794_v41 }
 0x8ae   : > { %10544 = vrcp.f32 %v9367_v52 }
 0x8af   : > { %9502 = vst.msk [vmem:[%s14706_s24 + $0x118] sm:$0xff] %vm9466_vm1, %v9456_v3  ;;  %v9189_v26 = vadd.f32 %v14881_v39, %v9140_v37 }
 0x8b1   : > { %v9234_v32 = vsub.f32 0.0, %v9189_v26 }
 0x8b3   : > { %v10543_v13 = vpop.eup %10542  ;;  %v9317_v36 = vmul.f32 1.442695, %v9234_v32 }
 0x8b4   : > { %v10545_v58 = vpop.eup %10544  ;;  %v9368_v14 = vadd.f32 1.0, %v10543_v13  ;;  %v9085_v7 = vpop.f32.mrf.mxu0 }
 0x8b5   : > { %v9457_v11 = vmin.f32 %v10545_v58, 1.0  ;;  %10546 = vpow2.f32 %v9317_v36  ;;  %v9141_v34 = vadd.f32 %v9085_v7, %v14802_v22 }
 0x8b6   : > { %10548 = vrcp.f32 %v9368_v14 }
 0x8b7   : > { %9503 = vst.msk [vmem:[%s14706_s24 + $0x120] sm:$0xff] %vm9466_vm1, %v9457_v11  ;;  %v9190_v41 = vadd.f32 %v14881_v39, %v9141_v34 }
 0x8b9   : > { %v9235_v55 = vsub.f32 0.0, %v9190_v41 }
 0x8bb   : > { %v10547_v20 = vpop.eup %10546  ;;  %v9319_v12 = vmul.f32 1.442695, %v9235_v55 }
 0x8bc   : > { %v10549_v15 = vpop.eup %10548  ;;  %v9369_v51 = vadd.f32 1.0, %v10547_v20  ;;  %v9088_v54 = vpop.f32.mrf.mxu0 }
 0x8bd   : > { %v9458_v62 = vmin.f32 %v10549_v15, 1.0  ;;  %10550 = vpow2.f32 %v9319_v12  ;;  %v9142_v0 = vadd.f32 %v9088_v54, %v14809_v17 }
 0x8be   : > { %10552 = vrcp.f32 %v9369_v51 }
 0x8bf   : > { %9504 = vst.msk [vmem:[%s14706_s24 + $0x128] sm:$0xff] %vm9466_vm1, %v9458_v62  ;;  %v9191_v22 = vadd.f32 %v14881_v39, %v9142_v0 }
 0x8c1   : > { %v9236_v16 = vsub.f32 0.0, %v9191_v22 }
 0x8c3   : > { %v10551_v48 = vpop.eup %10550  ;;  %v9321_v35 = vmul.f32 1.442695, %v9236_v16 }
 0x8c4   : > { %v10553_v56 = vpop.eup %10552  ;;  %v9370_v23 = vadd.f32 1.0, %v10551_v48  ;;  %v9090_v5 = vpop.f32.mrf.mxu0 }
 0x8c5   : > { %v9459_v43 = vmin.f32 %v10553_v56, 1.0  ;;  %10554 = vpow2.f32 %v9321_v35  ;;  %v9143_v57 = vadd.f32 %v9090_v5, %v14817_v33 }
 0x8c6   : > { %10556 = vrcp.f32 %v9370_v23 }
 0x8c7   : > { %9505 = vst.msk [vmem:[%s14706_s24 + $0x130] sm:$0xff] %vm9466_vm1, %v9459_v43  ;;  %v9192_v17 = vadd.f32 %v14881_v39, %v9143_v57 }
 0x8c9   : > { %v9237_v25 = vsub.f32 0.0, %v9192_v17 }
 0x8cb   : > { %v10555_v8 = vpop.eup %10554  ;;  %v9323_v61 = vmul.f32 1.442695, %v9237_v25 }
 0x8cc   : > { %v10557_v40 = vpop.eup %10556  ;;  %v9371_v50 = vadd.f32 1.0, %v10555_v8  ;;  %v9093_v44 = vpop.f32.mrf.mxu0 }
 0x8cd   : > { %v9460_v45 = vmin.f32 %v10557_v40, 1.0  ;;  %10558 = vpow2.f32 %v9323_v61  ;;  %v9144_v42 = vadd.f32 %v9093_v44, %v14824_v47 }
 0x8ce   : > { %10560 = vrcp.f32 %v9371_v50 }
 0x8cf   : > { %9506 = vst.msk [vmem:[%s14706_s24 + $0x138] sm:$0xff] %vm9466_vm1, %v9460_v45  ;;  %v9193_v33 = vadd.f32 %v14881_v39, %v9144_v42 }
 0x8d1   : > { %v9238_v21 = vsub.f32 0.0, %v9193_v33 }
 0x8d3   : > { %v10559_v53 = vpop.eup %10558  ;;  %v9325_v10 = vmul.f32 1.442695, %v9238_v21 }
 0x8d4   : > { %v10561_v60 = vpop.eup %10560  ;;  %v9372_v18 = vadd.f32 1.0, %v10559_v53  ;;  %v9095_v49 = vpop.f32.mrf.mxu0 }
 0x8d5   : > { %v9461_v6 = vmin.f32 %v10561_v60, 1.0  ;;  %10562 = vpow2.f32 %v9325_v10  ;;  %v9145_v9 = vadd.f32 %v9095_v49, %v14832_v30 }
 0x8d6   : > { %10564 = vrcp.f32 %v9372_v18 }
 0x8d7   : > { %9507 = vst.msk [vmem:[%s14706_s24 + $0x140] sm:$0xff] %vm9466_vm1, %v9461_v6  ;;  %v9194_v47 = vadd.f32 %v14881_v39, %v9145_v9 }
 0x8d9   : > { %v9239_v24 = vsub.f32 0.0, %v9194_v47 }
 0x8db   : > { %v10563_v28 = vpop.eup %10562  ;;  %v9327_v1 = vmul.f32 1.442695, %v9239_v24 }
 0x8dc   : > { %v10565_v63 = vpop.eup %10564  ;;  %v9373_v27 = vadd.f32 1.0, %v10563_v28  ;;  %v9098_v46 = vpop.f32.mrf.mxu0 }
 0x8dd   : > { %v9462_v38 = vmin.f32 %v10565_v63, 1.0  ;;  %10566 = vpow2.f32 %v9327_v1  ;;  %v9146_v2 = vadd.f32 %v9098_v46, %v14838_v4 }
 0x8de   : > { %10568 = vrcp.f32 %v9373_v27 }
 0x8df   : > { %9508 = vst.msk [vmem:[%s14706_s24 + $0x148] sm:$0xff] %vm9466_vm1, %v9462_v38  ;;  %v9195_v30 = vadd.f32 %v14881_v39, %v9146_v2 }
 0x8e1   : > { %v9240_v31 = vsub.f32 0.0, %v9195_v30 }
 0x8e3   : > { %v10567_v59 = vpop.eup %10566  ;;  %v9329_v29 = vmul.f32 1.442695, %v9240_v31 }
 0x8e4   : > { %v10569_v52 = vpop.eup %10568  ;;  %v9374_v19 = vadd.f32 1.0, %v10567_v59  ;;  %v9100_v3 = vpop.f32.mrf.mxu0 }
 0x8e5   : > { %v9463_v37 = vmin.f32 %v10569_v52, 1.0  ;;  %10570 = vpow2.f32 %v9329_v29 }
 0x8e6   : > { %10572 = vrcp.f32 %v9374_v19 }
 0x8e7   : > { %9509 = vst.msk [vmem:[%s14706_s24 + $0x150] sm:$0xff] %vm9466_vm1, %v9463_v37 }
 0x8eb   : > { %v10571_v26 = vpop.eup %10570 }
 0x8ec   : > { %v10573_v4 = vpop.eup %10572  ;;  %v9375_v32 = vadd.f32 1.0, %v10571_v26 }
 0x8ed   : > { %v9464_v13 = vmin.f32 %v10573_v4, 1.0 }
 0x8ee   : > { %10574 = vrcp.f32 %v9375_v32 }
 0x8ef   : > { %9510 = vst.msk [vmem:[%s14706_s24 + $0x158] sm:$0xff] %vm9466_vm1, %v9464_v13 }
 0x8f4   : > { %v10575_v39 = vpop.eup %10574 }
 0x8f5   : > { %v9465_v36 = vmin.f32 %v10575_v39, 1.0 }
 0x8f7   : > { %9511 = vst.msk [vmem:[%s14706_s24 + $0x160] sm:$0xff] %vm9466_vm1, %v9465_v36 }
 0x8f8 PF: > { %s24_s25 = sadd.s32 1, %s10667_s25  }
 0x8f9   : > { %p21_p5 = scmp.ge.s32.totalorder %s24_s25, 4  }
 0x8fb   :  { %23 = sbr.rel (!%p21_p5) target bundleno = 1 (0x1), region = 110 }

</bundles_post_ra>
